<compile_context>
chip_gen: v6e
topology: v6e:2x2x1
jax: 0.10.0
libtpu: 0.0.40
codegen_flags: <defaults>
</compile_context>

<pallas_src>
import jax
import jax.numpy as jnp
from jax.experimental import pallas as pl
from jax.experimental.pallas import tpu as pltpu

N_NODES = 52      # graph nodes (hard-coded 52 in the module)
IN_FEAT = 14      # per-node features
GAT_OUT = 64      # GATConv out_channels
GCN_OUT = 128     # GCNConv out_channels
HEAD_HID = 64     # hidden size of the classification head
BN_EPS = 1e-5

_SUBLANE = 8
_LANE = 128
_TB_MAX = 128                        # batch tile (lane dim of fused kernel blocks)
_VMEM_LIMIT_BYTES = 48 * 1024 * 1024 # explicit scoped-VMEM cap (safe on v5e/v6e/v7x)
_TOL = 5e-2                          # bf16 matmuls (f32 accum) vs f32 reference


def _round_up(v, m):
    return ((v + m - 1) // m) * m


def _tiles(batch):
    """Return (tile, padded_batch).  Multi-tile grids only with full 128-lane tiles
    so every lane-tiled block dim is a multiple of 128 (the (8,128) rule)."""
    bp8 = _round_up(max(batch, 1), _SUBLANE)
    if bp8 <= _TB_MAX:
        return bp8, bp8
    bp = _round_up(batch, _TB_MAX)
    return _TB_MAX, bp


def _const_spec(a):
    """Full-array block with a constant index map (weight stays resident in VMEM)."""
    nd = a.ndim
    return pl.BlockSpec(a.shape, lambda i, _nd=nd: (0,) * _nd)


_CPARAMS = pltpu.CompilerParams(
    dimension_semantics=("parallel",),
    vmem_limit_bytes=_VMEM_LIMIT_BYTES,
)


# ------------------------- fused single-kernel path ------------------------- #
# Layout: batch on lanes throughout.  x block (52, 14, TB); per node n the GNN is
# w01^T (128,14) @ x[n] (14,TB); Conv1d+BN+ReLU is one (52,52)@(52,128*TB) matmul
# over the node dim; the head is one (64,6656)@(6656,TB) matmul; output (Cpad, TB).

def _fused_kernel(x_ref, w01t_ref, b01t_ref, wcp_ref, bcp_ref,
                  w2t_ref, b2t_ref, w3t_ref, b3t_ref, o_ref, g_scr):
    tb = x_ref.shape[2]

    # Stage 1: GAT(14->64) ∘ GCN(64->128) folded into one linear per node, ReLU.
    for n in range(N_NODES):
        gn = jnp.dot(w01t_ref[...], x_ref[n],
                     preferred_element_type=jnp.float32) + b01t_ref[...]
        g_scr[n] = jnp.maximum(gn, 0.0).astype(jnp.bfloat16)      # (128, TB)

    # Stage 2: Conv1d(52->52, k=1) + folded BatchNorm1d(52) + ReLU as ONE matmul.
    gw = g_scr[...].reshape(N_NODES, GCN_OUT * tb)                # gw[n, c*TB + b]
    y = jnp.dot(wcp_ref[...], gw, preferred_element_type=jnp.float32) + bcp_ref[...]
    y = jnp.maximum(y, 0.0).astype(jnp.bfloat16)                  # (52, 128*TB)

    # Stage 3: head.  Linear(6656->64)+BN(64) folded, one K=6656 matmul, ReLU,
    # then Linear(64->classes) (rows zero-padded).  Dropout(p=0.4) == id (eval).
    yf = y.reshape(N_NODES * GCN_OUT, tb)                         # yf[o*128+c, b]
    z = jnp.dot(w2t_ref[...], yf, preferred_element_type=jnp.float32) + b2t_ref[...]
    z = jnp.maximum(z, 0.0).astype(jnp.bfloat16)                  # (64, TB)
    o_ref[...] = jnp.dot(w3t_ref[...], z,
                         preferred_element_type=jnp.float32) + b3t_ref[...]


def forward_fused(x, p, classes):
    b = x.shape[0]
    tb, bp = _tiles(b)
    cpf = p["w3t"].shape[0]

    # node-major, feature-on-sublanes, batch-on-lanes; bf16 for the MXU.
    x_t = jnp.transpose(x, (2, 1, 0)).astype(jnp.bfloat16)       # (52, 14, B)
    if bp != b:
        x_t = jnp.pad(x_t, ((0, 0), (0, 0), (0, bp - b)))

    out = pl.pallas_call(
        _fused_kernel,
        out_shape=jax.ShapeDtypeStruct((cpf, bp), jnp.float32),
        grid=(bp // tb,),
        in_specs=[
            pl.BlockSpec((N_NODES, IN_FEAT, tb), lambda i: (0, 0, i)),
            _const_spec(p["w01t"]), _const_spec(p["b01t"]),
            _const_spec(p["wcp"]), _const_spec(p["bcp"]),
            _const_spec(p["w2t"]), _const_spec(p["b2t"]),
            _const_spec(p["w3t"]), _const_spec(p["b3t"]),
        ],
        out_specs=pl.BlockSpec((cpf, tb), lambda i: (0, i)),
        scratch_shapes=[pltpu.VMEM((N_NODES, GCN_OUT, tb), jnp.bfloat16)],
        compiler_params=_CPARAMS,
    )(x_t, p["w01t"], p["b01t"], p["wcp"], p["bcp"],
      p["w2t"], p["b2t"], p["w3t"], p["b3t"])
    return out[:classes, :b].T                                    # (B, classes)


# --------------------- conservative 3-kernel fallback path ------------------ #
# Batch on sublanes; relayouts happen between calls as contiguous XLA reshapes.
# Kept strictly as a correctness escape hatch (it round-trips HBM), but improved:
# one-matmul GNN stage, bf16 intermediates/weights, lane-dense head output.

def _gnn_kernel(x_ref, w01_ref, b01_ref, o_ref):
    tb = x_ref.shape[1]
    xm = x_ref[...].reshape(N_NODES * tb, IN_FEAT)       # free leading merge (tb%8==0)
    g = jnp.dot(xm, w01_ref[...], preferred_element_type=jnp.float32) + b01_ref[...]
    g = jnp.maximum(g, 0.0).astype(jnp.bfloat16)
    o_ref[...] = g.reshape(N_NODES, tb, GCN_OUT)         # free leading split


def _conv_kernel(g_ref, wcp_ref, bcp_ref, o_ref):
    y = jnp.dot(wcp_ref[...], g_ref[...], preferred_element_type=jnp.float32) + bcp_ref[...]
    o_ref[...] = jnp.maximum(y, 0.0).astype(jnp.bfloat16)


def _head_kernel(y_ref, w2p_ref, b2p_ref, w3p_ref, b3p_ref, o_ref):
    z = jnp.dot(y_ref[0], w2p_ref[0], preferred_element_type=jnp.float32)
    for n in range(1, N_NODES):
        z = z + jnp.dot(y_ref[n], w2p_ref[n], preferred_element_type=jnp.float32)
    z = jnp.maximum(z + b2p_ref[...], 0.0).astype(jnp.bfloat16)
    o_ref[...] = jnp.dot(z, w3p_ref[...], preferred_element_type=jnp.float32) + b3p_ref[...]


def forward_staged(x, p, classes):
    b = x.shape[0]
    tb, bp = _tiles(b)
    nbt = bp // tb
    cps = p["w3p"].shape[1]

    x_nm = jnp.transpose(x, (2, 0, 1)).astype(jnp.bfloat16)      # (52, B, 14)
    if bp != b:
        x_nm = jnp.pad(x_nm, ((0, 0), (0, bp - b), (0, 0)))

    gnm = pl.pallas_call(
        _gnn_kernel,
        out_shape=jax.ShapeDtypeStruct((N_NODES, bp, GCN_OUT), jnp.bfloat16),
        grid=(nbt,),
        in_specs=[pl.BlockSpec((N_NODES, tb, IN_FEAT), lambda i: (0, i, 0)),
                  _const_spec(p["w01"]), _const_spec(p["b01"])],
        out_specs=pl.BlockSpec((N_NODES, tb, GCN_OUT), lambda i: (0, i, 0)),
        compiler_params=_CPARAMS,
    )(x_nm, p["w01"], p["b01"])

    gw = gnm.reshape(N_NODES, bp * GCN_OUT)                       # contiguous reshape

    yw = pl.pallas_call(
        _conv_kernel,
        out_shape=jax.ShapeDtypeStruct((N_NODES, bp * GCN_OUT), jnp.bfloat16),
        grid=(nbt,),
        in_specs=[pl.BlockSpec((N_NODES, tb * GCN_OUT), lambda i: (0, i)),
                  _const_spec(p["wcp"]), _const_spec(p["bcp"])],
        out_specs=pl.BlockSpec((N_NODES, tb * GCN_OUT), lambda i: (0, i)),
        compiler_params=_CPARAMS,
    )(gw, p["wcp"], p["bcp"])

    y3 = yw.reshape(N_NODES, bp, GCN_OUT)                         # contiguous reshape

    out = pl.pallas_call(
        _head_kernel,
        out_shape=jax.ShapeDtypeStruct((bp, cps), jnp.float32),
        grid=(nbt,),
        in_specs=[pl.BlockSpec((N_NODES, tb, GCN_OUT), lambda i: (0, i, 0)),
                  _const_spec(p["w2p"]), _const_spec(p["b2p"]),
                  _const_spec(p["w3p"]), _const_spec(p["b3p"])],
        out_specs=pl.BlockSpec((tb, cps), lambda i: (i, 0)),
        compiler_params=_CPARAMS,
    )(y3, p["w2p"], p["b2p"], p["w3p"], p["b3p"])
    return out[:b, :classes]


# ------------------------- deterministic parameters ------------------------ #

def init_raw_params(key, classes):
    ks = jax.random.split(key, 18)
    rn = lambda k, shape, s: (s * jax.random.normal(k, shape)).astype(jnp.float32)
    w0 = rn(ks[0], (IN_FEAT, GAT_OUT), 0.2)          # GATConv(14->64) collapsed to linear
    b0 = rn(ks[1], (1, GAT_OUT), 0.1)
    w1 = rn(ks[2], (GAT_OUT, GCN_OUT), 0.1)          # GCNConv(64->128) collapsed to linear
    b1 = rn(ks[3], (1, GCN_OUT), 0.1)
    wc = rn(ks[4], (N_NODES, N_NODES), 0.1)          # Conv1d(52,52,k=1)
    bc = rn(ks[5], (N_NODES, 1), 0.1)
    g1 = 1.0 + rn(ks[6], (N_NODES, 1), 0.1)          # BatchNorm1d(52), eval mode
    be1 = rn(ks[7], (N_NODES, 1), 0.1)
    rm1 = rn(ks[8], (N_NODES, 1), 0.1)
    rv1 = 1.0 + jnp.abs(rn(ks[9], (N_NODES, 1), 0.1))
    w2 = rn(ks[10], (N_NODES * GCN_OUT, HEAD_HID), 0.02)   # Linear(6656->64)
    b2 = rn(ks[11], (1, HEAD_HID), 0.1)
    g2 = 1.0 + rn(ks[12], (1, HEAD_HID), 0.1)        # BatchNorm1d(64), eval mode
    be2 = rn(ks[13], (1, HEAD_HID), 0.1)
    rm2 = rn(ks[14], (1, HEAD_HID), 0.1)
    rv2 = 1.0 + jnp.abs(rn(ks[15], (1, HEAD_HID), 0.1))
    w3 = rn(ks[16], (HEAD_HID, classes), 0.1)        # Linear(64->classes)
    b3 = rn(ks[17], (1, classes), 0.1)
    return dict(w0=w0, b0=b0, w1=w1, b1=b1, wc=wc, bc=bc,
                g1=g1, be1=be1, rm1=rm1, rv1=rv1,
                w2=w2, b2=b2, g2=g2, be2=be2, rm2=rm2, rv2=rv2,
                w3=w3, b3=b3)


def fold_params(raw, classes):
    """Exact algebraic folds, computed once: GAT∘GCN, BN1->conv, BN2->head; matmul
    weights cast to bf16 (f32 MXU accumulation is kept inside the kernels)."""
    f32, bf16 = jnp.float32, jnp.bfloat16
    w01 = (raw["w0"] @ raw["w1"]).astype(f32)                      # (14, 128)
    b01 = (raw["b0"] @ raw["w1"] + raw["b1"]).astype(f32)          # (1, 128)
    sc1 = raw["g1"] / jnp.sqrt(raw["rv1"] + BN_EPS)                # (52, 1)
    sh1 = raw["be1"] - raw["rm1"] * sc1
    wcp = sc1 * raw["wc"]                                          # (52, 52)
    bcp = sc1 * raw["bc"] + sh1                                    # (52, 1)
    sc2 = raw["g2"] / jnp.sqrt(raw["rv2"] + BN_EPS)                # (1, 64)
    sh2 = raw["be2"] - raw["rm2"] * sc2
    w2s = raw["w2"] * sc2                                          # (6656, 64)
    b2p = raw["b2"] * sc2 + sh2                                    # (1, 64)
    cpf = max(_SUBLANE, _round_up(classes, _SUBLANE))              # fused head rows
    cps = max(_LANE, _round_up(classes, _LANE))                    # staged head lanes
    w3t = jnp.zeros((cpf, HEAD_HID), f32).at[:classes].set(raw["w3"].T)
    b3t = jnp.zeros((cpf, 1), f32).at[:classes, 0].set(raw["b3"][0])
    w3p = jnp.zeros((HEAD_HID, cps), f32).at[:, :classes].set(raw["w3"])
    b3p = jnp.zeros((1, cps), f32).at[:, :classes].set(raw["b3"])
    return dict(
        # fused (batch-on-lanes) weights
        w01t=w01.T.astype(bf16), b01t=b01.T,
        wcp=wcp.astype(bf16), bcp=bcp,
        w2t=w2s.T.astype(bf16), b2t=b2p.T,
        w3t=w3t.astype(bf16), b3t=b3t,
        # staged (batch-on-sublanes) weights
        w01=w01.astype(bf16), b01=b01,
        w2p=w2s.reshape(N_NODES, GCN_OUT, HEAD_HID).astype(bf16), b2p=b2p,
        w3p=w3p.astype(bf16), b3p=b3p,
    )


# --------------------------- pure-JAX reference ----------------------------- #

def reference(x, r):
    """Unfolded eval-mode f32 forward (validates all folds + bf16 kernel paths)."""
    xt = jnp.transpose(x, (0, 2, 1)).astype(jnp.float32)           # (B, 52, 14)
    h = xt @ r["w0"] + r["b0"]
    h = h @ r["w1"] + r["b1"]
    h = jnp.maximum(h, 0.0)
    y = jnp.einsum("oc,bcl->bol", r["wc"], h) + r["bc"][None]
    y = (y - r["rm1"][None]) / jnp.sqrt(r["rv1"][None] + BN_EPS) * r["g1"][None] + r["be1"][None]
    y = jnp.maximum(y, 0.0)
    xf = y.reshape(x.shape[0], -1)
    z = xf @ r["w2"] + r["b2"]
    z = (z - r["rm2"]) / jnp.sqrt(r["rv2"] + BN_EPS) * r["g2"] + r["be2"]
    z = jnp.maximum(z, 0.0)
    return z @ r["w3"] + r["b3"]


def select_forward(folded, raw, classes):
    """Use the fused kernel if it lowers and matches the reference on BOTH a small
    padded batch and a multi-tile (B > TB) batch; otherwise use the staged path."""
    def _ok(fn, nb):
        xp = jax.random.normal(jax.random.PRNGKey(100 + nb),
                               (nb, IN_FEAT, N_NODES), dtype=jnp.float32)
        want = reference(xp, raw)
        got = jax.block_until_ready(fn(xp, folded, classes))
        return bool(jnp.allclose(got, want, rtol=_TOL, atol=_TOL))
    try:
        if _ok(forward_fused, 3) and _ok(forward_fused, _TB_MAX + 1):
            return forward_fused
    except Exception:
        pass
    return forward_staged


if __name__ == "__main__":
    key = jax.random.PRNGKey(0)
    kx, kp = jax.random.split(key)

    B, classes = 2, 7
    x = jax.random.normal(kx, (B, IN_FEAT, N_NODES), dtype=jnp.float32)   # (2, 14, 52)

    raw = init_raw_params(kp, classes)
    folded = fold_params(raw, classes)          # folded once, reused every call

    fwd = select_forward(folded, raw, classes)
    fwd_jit = jax.jit(fwd, static_argnums=(2,)) # fuses wrapper transpose/pad/slice
    out = jax.block_until_ready(fwd_jit(x, folded, classes))
    ref = jax.block_until_ready(reference(x, raw))

    assert out.shape == (B, classes)
    assert jnp.allclose(out, ref, rtol=_TOL, atol=_TOL), "mismatch vs JAX reference"
    print("KERNEL_OK")
</pallas_src>

<mosaic_0001>
module attributes {stable_mosaic.version = 11 : i64} {
  func.func @_fused_kernel(%arg0: i32, %arg1: memref<52x14x8xbf16, #tpu.memory_space<vmem>>, %arg2: memref<128x14xbf16, #tpu.memory_space<vmem>>, %arg3: memref<128x1xf32, #tpu.memory_space<vmem>>, %arg4: memref<52x52xbf16, #tpu.memory_space<vmem>>, %arg5: memref<52x1xf32, #tpu.memory_space<vmem>>, %arg6: memref<64x6656xbf16, #tpu.memory_space<vmem>>, %arg7: memref<64x1xf32, #tpu.memory_space<vmem>>, %arg8: memref<8x64xbf16, #tpu.memory_space<vmem>>, %arg9: memref<8x1xf32, #tpu.memory_space<vmem>>, %arg10: memref<8x8xf32, #tpu.memory_space<vmem>>, %arg11: memref<52x128x8xbf16, #tpu.memory_space<vmem>>) attributes {dimension_semantics = [#tpu.dimension_semantics<parallel>], iteration_bounds = array<i64: 1>, scalar_prefetch = 0 : i64, scratch_operands = 1 : i64, tpu.core_type = #tpu.core_type<tc>, window_params = [{transform_indices = @transform_0, window_bounds = array<i64: 52, 14, 8>}, {pipeline_mode = #tpu.pipeline_mode<synchronous>, transform_indices = @transform_1, window_bounds = array<i64: 128, 14>}, {pipeline_mode = #tpu.pipeline_mode<synchronous>, transform_indices = @transform_2, window_bounds = array<i64: 128, 1>}, {pipeline_mode = #tpu.pipeline_mode<synchronous>, transform_indices = @transform_3, window_bounds = array<i64: 52, 52>}, {pipeline_mode = #tpu.pipeline_mode<synchronous>, transform_indices = @transform_4, window_bounds = array<i64: 52, 1>}, {pipeline_mode = #tpu.pipeline_mode<synchronous>, transform_indices = @transform_5, window_bounds = array<i64: 64, 6656>}, {pipeline_mode = #tpu.pipeline_mode<synchronous>, transform_indices = @transform_6, window_bounds = array<i64: 64, 1>}, {pipeline_mode = #tpu.pipeline_mode<synchronous>, transform_indices = @transform_7, window_bounds = array<i64: 8, 64>}, {pipeline_mode = #tpu.pipeline_mode<synchronous>, transform_indices = @transform_8, window_bounds = array<i64: 8, 1>}, {transform_indices = @transform_9, window_bounds = array<i64: 8, 8>}]} {
    %c0 = arith.constant 0 : index
    %c0_0 = arith.constant 0 : index
    %0 = vector.load %arg2[%c0, %c0_0] : memref<128x14xbf16, #tpu.memory_space<vmem>>, vector<128x14xbf16>
    %c0_1 = arith.constant 0 : index
    %c0_2 = arith.constant 0 : index
    %c0_3 = arith.constant 0 : index
    %1 = vector.load %arg1[%c0_1, %c0_2, %c0_3] : memref<52x14x8xbf16, #tpu.memory_space<vmem>>, vector<1x14x8xbf16>
    %2 = vector.shape_cast %1 : vector<1x14x8xbf16> to vector<14x8xbf16>
    %cst = arith.constant dense<0.000000e+00> : vector<128x8xf32>
    %3 = tpu.matmul %0, %2, %cst {dimension_numbers = #tpu.dot_dimension_numbers<[1], [0], [0], [1], [0, 0, 1, 1], [], []>} : vector<128x14xbf16>, vector<14x8xbf16>, vector<128x8xf32> -> vector<128x8xf32>
    %c0_4 = arith.constant 0 : index
    %c0_5 = arith.constant 0 : index
    %4 = vector.load %arg3[%c0_4, %c0_5] : memref<128x1xf32, #tpu.memory_space<vmem>>, vector<128x1xf32>
    %5 = vector.broadcast %4 : vector<128x1xf32> to vector<128x8xf32>
    %6 = arith.addf %3, %5 : vector<128x8xf32>
    %cst_6 = arith.constant 0.000000e+00 : f32
    %7 = vector.broadcast %cst_6 : f32 to vector<128x8xf32>
    %8 = arith.maximumf %6, %7 : vector<128x8xf32>
    %9 = arith.truncf %8 : vector<128x8xf32> to vector<128x8xbf16>
    %c0_7 = arith.constant 0 : index
    %c0_8 = arith.constant 0 : index
    %c0_9 = arith.constant 0 : index
    %10 = vector.load %arg11[%c0_7, %c0_8, %c0_9] : memref<52x128x8xbf16, #tpu.memory_space<vmem>>, vector<1x128x8xbf16>
    %11 = vector.shape_cast %10 : vector<1x128x8xbf16> to vector<128x8xbf16>
    %12 = vector.shape_cast %9 : vector<128x8xbf16> to vector<1x128x8xbf16>
    tpu.vector_store %arg11[%c0_7, %c0_8, %c0_9], %12 {strides = array<i32>} : memref<52x128x8xbf16, #tpu.memory_space<vmem>>, vector<1x128x8xbf16>,
    %c0_10 = arith.constant 0 : index
    %c0_11 = arith.constant 0 : index
    %13 = vector.load %arg2[%c0_10, %c0_11] : memref<128x14xbf16, #tpu.memory_space<vmem>>, vector<128x14xbf16>
    %c1 = arith.constant 1 : index
    %c0_12 = arith.constant 0 : index
    %c0_13 = arith.constant 0 : index
    %14 = vector.load %arg1[%c1, %c0_12, %c0_13] : memref<52x14x8xbf16, #tpu.memory_space<vmem>>, vector<1x14x8xbf16>
    %15 = vector.shape_cast %14 : vector<1x14x8xbf16> to vector<14x8xbf16>
    %cst_14 = arith.constant dense<0.000000e+00> : vector<128x8xf32>
    %16 = tpu.matmul %13, %15, %cst_14 {dimension_numbers = #tpu.dot_dimension_numbers<[1], [0], [0], [1], [0, 0, 1, 1], [], []>} : vector<128x14xbf16>, vector<14x8xbf16>, vector<128x8xf32> -> vector<128x8xf32>
    %c0_15 = arith.constant 0 : index
    %c0_16 = arith.constant 0 : index
    %17 = vector.load %arg3[%c0_15, %c0_16] : memref<128x1xf32, #tpu.memory_space<vmem>>, vector<128x1xf32>
    %18 = vector.broadcast %17 : vector<128x1xf32> to vector<128x8xf32>
    %19 = arith.addf %16, %18 : vector<128x8xf32>
    %cst_17 = arith.constant 0.000000e+00 : f32
    %20 = vector.broadcast %cst_17 : f32 to vector<128x8xf32>
    %21 = arith.maximumf %19, %20 : vector<128x8xf32>
    %22 = arith.truncf %21 : vector<128x8xf32> to vector<128x8xbf16>
    %c1_18 = arith.constant 1 : index
    %c0_19 = arith.constant 0 : index
    %c0_20 = arith.constant 0 : index
    %23 = vector.load %arg11[%c1_18, %c0_19, %c0_20] : memref<52x128x8xbf16, #tpu.memory_space<vmem>>, vector<1x128x8xbf16>
    %24 = vector.shape_cast %23 : vector<1x128x8xbf16> to vector<128x8xbf16>
    %25 = vector.shape_cast %22 : vector<128x8xbf16> to vector<1x128x8xbf16>
    tpu.vector_store %arg11[%c1_18, %c0_19, %c0_20], %25 {strides = array<i32>} : memref<52x128x8xbf16, #tpu.memory_space<vmem>>, vector<1x128x8xbf16>,
    %c0_21 = arith.constant 0 : index
    %c0_22 = arith.constant 0 : index
    %26 = vector.load %arg2[%c0_21, %c0_22] : memref<128x14xbf16, #tpu.memory_space<vmem>>, vector<128x14xbf16>
    %c2 = arith.constant 2 : index
    %c0_23 = arith.constant 0 : index
    %c0_24 = arith.constant 0 : index
    %27 = vector.load %arg1[%c2, %c0_23, %c0_24] : memref<52x14x8xbf16, #tpu.memory_space<vmem>>, vector<1x14x8xbf16>
    %28 = vector.shape_cast %27 : vector<1x14x8xbf16> to vector<14x8xbf16>
    %cst_25 = arith.constant dense<0.000000e+00> : vector<128x8xf32>
    %29 = tpu.matmul %26, %28, %cst_25 {dimension_numbers = #tpu.dot_dimension_numbers<[1], [0], [0], [1], [0, 0, 1, 1], [], []>} : vector<128x14xbf16>, vector<14x8xbf16>, vector<128x8xf32> -> vector<128x8xf32>
    %c0_26 = arith.constant 0 : index
    %c0_27 = arith.constant 0 : index
    %30 = vector.load %arg3[%c0_26, %c0_27] : memref<128x1xf32, #tpu.memory_space<vmem>>, vector<128x1xf32>
    %31 = vector.broadcast %30 : vector<128x1xf32> to vector<128x8xf32>
    %32 = arith.addf %29, %31 : vector<128x8xf32>
    %cst_28 = arith.constant 0.000000e+00 : f32
    %33 = vector.broadcast %cst_28 : f32 to vector<128x8xf32>
    %34 = arith.maximumf %32, %33 : vector<128x8xf32>
    %35 = arith.truncf %34 : vector<128x8xf32> to vector<128x8xbf16>
    %c2_29 = arith.constant 2 : index
    %c0_30 = arith.constant 0 : index
    %c0_31 = arith.constant 0 : index
    %36 = vector.load %arg11[%c2_29, %c0_30, %c0_31] : memref<52x128x8xbf16, #tpu.memory_space<vmem>>, vector<1x128x8xbf16>
    %37 = vector.shape_cast %36 : vector<1x128x8xbf16> to vector<128x8xbf16>
    %38 = vector.shape_cast %35 : vector<128x8xbf16> to vector<1x128x8xbf16>
    tpu.vector_store %arg11[%c2_29, %c0_30, %c0_31], %38 {strides = array<i32>} : memref<52x128x8xbf16, #tpu.memory_space<vmem>>, vector<1x128x8xbf16>,
    %c0_32 = arith.constant 0 : index
    %c0_33 = arith.constant 0 : index
    %39 = vector.load %arg2[%c0_32, %c0_33] : memref<128x14xbf16, #tpu.memory_space<vmem>>, vector<128x14xbf16>
    %c3 = arith.constant 3 : index
    %c0_34 = arith.constant 0 : index
    %c0_35 = arith.constant 0 : index
    %40 = vector.load %arg1[%c3, %c0_34, %c0_35] : memref<52x14x8xbf16, #tpu.memory_space<vmem>>, vector<1x14x8xbf16>
    %41 = vector.shape_cast %40 : vector<1x14x8xbf16> to vector<14x8xbf16>
    %cst_36 = arith.constant dense<0.000000e+00> : vector<128x8xf32>
    %42 = tpu.matmul %39, %41, %cst_36 {dimension_numbers = #tpu.dot_dimension_numbers<[1], [0], [0], [1], [0, 0, 1, 1], [], []>} : vector<128x14xbf16>, vector<14x8xbf16>, vector<128x8xf32> -> vector<128x8xf32>
    %c0_37 = arith.constant 0 : index
    %c0_38 = arith.constant 0 : index
    %43 = vector.load %arg3[%c0_37, %c0_38] : memref<128x1xf32, #tpu.memory_space<vmem>>, vector<128x1xf32>
    %44 = vector.broadcast %43 : vector<128x1xf32> to vector<128x8xf32>
    %45 = arith.addf %42, %44 : vector<128x8xf32>
    %cst_39 = arith.constant 0.000000e+00 : f32
    %46 = vector.broadcast %cst_39 : f32 to vector<128x8xf32>
    %47 = arith.maximumf %45, %46 : vector<128x8xf32>
    %48 = arith.truncf %47 : vector<128x8xf32> to vector<128x8xbf16>
    %c3_40 = arith.constant 3 : index
    %c0_41 = arith.constant 0 : index
    %c0_42 = arith.constant 0 : index
    %49 = vector.load %arg11[%c3_40, %c0_41, %c0_42] : memref<52x128x8xbf16, #tpu.memory_space<vmem>>, vector<1x128x8xbf16>
    %50 = vector.shape_cast %49 : vector<1x128x8xbf16> to vector<128x8xbf16>
    %51 = vector.shape_cast %48 : vector<128x8xbf16> to vector<1x128x8xbf16>
    tpu.vector_store %arg11[%c3_40, %c0_41, %c0_42], %51 {strides = array<i32>} : memref<52x128x8xbf16, #tpu.memory_space<vmem>>, vector<1x128x8xbf16>,
    %c0_43 = arith.constant 0 : index
    %c0_44 = arith.constant 0 : index
    %52 = vector.load %arg2[%c0_43, %c0_44] : memref<128x14xbf16, #tpu.memory_space<vmem>>, vector<128x14xbf16>
    %c4 = arith.constant 4 : index
    %c0_45 = arith.constant 0 : index
    %c0_46 = arith.constant 0 : index
    %53 = vector.load %arg1[%c4, %c0_45, %c0_46] : memref<52x14x8xbf16, #tpu.memory_space<vmem>>, vector<1x14x8xbf16>
    %54 = vector.shape_cast %53 : vector<1x14x8xbf16> to vector<14x8xbf16>
    %cst_47 = arith.constant dense<0.000000e+00> : vector<128x8xf32>
    %55 = tpu.matmul %52, %54, %cst_47 {dimension_numbers = #tpu.dot_dimension_numbers<[1], [0], [0], [1], [0, 0, 1, 1], [], []>} : vector<128x14xbf16>, vector<14x8xbf16>, vector<128x8xf32> -> vector<128x8xf32>
    %c0_48 = arith.constant 0 : index
    %c0_49 = arith.constant 0 : index
    %56 = vector.load %arg3[%c0_48, %c0_49] : memref<128x1xf32, #tpu.memory_space<vmem>>, vector<128x1xf32>
    %57 = vector.broadcast %56 : vector<128x1xf32> to vector<128x8xf32>
    %58 = arith.addf %55, %57 : vector<128x8xf32>
    %cst_50 = arith.constant 0.000000e+00 : f32
    %59 = vector.broadcast %cst_50 : f32 to vector<128x8xf32>
    %60 = arith.maximumf %58, %59 : vector<128x8xf32>
    %61 = arith.truncf %60 : vector<128x8xf32> to vector<128x8xbf16>
    %c4_51 = arith.constant 4 : index
    %c0_52 = arith.constant 0 : index
    %c0_53 = arith.constant 0 : index
    %62 = vector.load %arg11[%c4_51, %c0_52, %c0_53] : memref<52x128x8xbf16, #tpu.memory_space<vmem>>, vector<1x128x8xbf16>
    %63 = vector.shape_cast %62 : vector<1x128x8xbf16> to vector<128x8xbf16>
    %64 = vector.shape_cast %61 : vector<128x8xbf16> to vector<1x128x8xbf16>
    tpu.vector_store %arg11[%c4_51, %c0_52, %c0_53], %64 {strides = array<i32>} : memref<52x128x8xbf16, #tpu.memory_space<vmem>>, vector<1x128x8xbf16>,
    %c0_54 = arith.constant 0 : index
    %c0_55 = arith.constant 0 : index
    %65 = vector.load %arg2[%c0_54, %c0_55] : memref<128x14xbf16, #tpu.memory_space<vmem>>, vector<128x14xbf16>
    %c5 = arith.constant 5 : index
    %c0_56 = arith.constant 0 : index
    %c0_57 = arith.constant 0 : index
    %66 = vector.load %arg1[%c5, %c0_56, %c0_57] : memref<52x14x8xbf16, #tpu.memory_space<vmem>>, vector<1x14x8xbf16>
    %67 = vector.shape_cast %66 : vector<1x14x8xbf16> to vector<14x8xbf16>
    %cst_58 = arith.constant dense<0.000000e+00> : vector<128x8xf32>
    %68 = tpu.matmul %65, %67, %cst_58 {dimension_numbers = #tpu.dot_dimension_numbers<[1], [0], [0], [1], [0, 0, 1, 1], [], []>} : vector<128x14xbf16>, vector<14x8xbf16>, vector<128x8xf32> -> vector<128x8xf32>
    %c0_59 = arith.constant 0 : index
    %c0_60 = arith.constant 0 : index
    %69 = vector.load %arg3[%c0_59, %c0_60] : memref<128x1xf32, #tpu.memory_space<vmem>>, vector<128x1xf32>
    %70 = vector.broadcast %69 : vector<128x1xf32> to vector<128x8xf32>
    %71 = arith.addf %68, %70 : vector<128x8xf32>
    %cst_61 = arith.constant 0.000000e+00 : f32
    %72 = vector.broadcast %cst_61 : f32 to vector<128x8xf32>
    %73 = arith.maximumf %71, %72 : vector<128x8xf32>
    %74 = arith.truncf %73 : vector<128x8xf32> to vector<128x8xbf16>
    %c5_62 = arith.constant 5 : index
    %c0_63 = arith.constant 0 : index
    %c0_64 = arith.constant 0 : index
    %75 = vector.load %arg11[%c5_62, %c0_63, %c0_64] : memref<52x128x8xbf16, #tpu.memory_space<vmem>>, vector<1x128x8xbf16>
    %76 = vector.shape_cast %75 : vector<1x128x8xbf16> to vector<128x8xbf16>
    %77 = vector.shape_cast %74 : vector<128x8xbf16> to vector<1x128x8xbf16>
    tpu.vector_store %arg11[%c5_62, %c0_63, %c0_64], %77 {strides = array<i32>} : memref<52x128x8xbf16, #tpu.memory_space<vmem>>, vector<1x128x8xbf16>,
    %c0_65 = arith.constant 0 : index
    %c0_66 = arith.constant 0 : index
    %78 = vector.load %arg2[%c0_65, %c0_66] : memref<128x14xbf16, #tpu.memory_space<vmem>>, vector<128x14xbf16>
    %c6 = arith.constant 6 : index
    %c0_67 = arith.constant 0 : index
    %c0_68 = arith.constant 0 : index
    %79 = vector.load %arg1[%c6, %c0_67, %c0_68] : memref<52x14x8xbf16, #tpu.memory_space<vmem>>, vector<1x14x8xbf16>
    %80 = vector.shape_cast %79 : vector<1x14x8xbf16> to vector<14x8xbf16>
    %cst_69 = arith.constant dense<0.000000e+00> : vector<128x8xf32>
    %81 = tpu.matmul %78, %80, %cst_69 {dimension_numbers = #tpu.dot_dimension_numbers<[1], [0], [0], [1], [0, 0, 1, 1], [], []>} : vector<128x14xbf16>, vector<14x8xbf16>, vector<128x8xf32> -> vector<128x8xf32>
    %c0_70 = arith.constant 0 : index
    %c0_71 = arith.constant 0 : index
    %82 = vector.load %arg3[%c0_70, %c0_71] : memref<128x1xf32, #tpu.memory_space<vmem>>, vector<128x1xf32>
    %83 = vector.broadcast %82 : vector<128x1xf32> to vector<128x8xf32>
    %84 = arith.addf %81, %83 : vector<128x8xf32>
    %cst_72 = arith.constant 0.000000e+00 : f32
    %85 = vector.broadcast %cst_72 : f32 to vector<128x8xf32>
    %86 = arith.maximumf %84, %85 : vector<128x8xf32>
    %87 = arith.truncf %86 : vector<128x8xf32> to vector<128x8xbf16>
    %c6_73 = arith.constant 6 : index
    %c0_74 = arith.constant 0 : index
    %c0_75 = arith.constant 0 : index
    %88 = vector.load %arg11[%c6_73, %c0_74, %c0_75] : memref<52x128x8xbf16, #tpu.memory_space<vmem>>, vector<1x128x8xbf16>
    %89 = vector.shape_cast %88 : vector<1x128x8xbf16> to vector<128x8xbf16>
    %90 = vector.shape_cast %87 : vector<128x8xbf16> to vector<1x128x8xbf16>
    tpu.vector_store %arg11[%c6_73, %c0_74, %c0_75], %90 {strides = array<i32>} : memref<52x128x8xbf16, #tpu.memory_space<vmem>>, vector<1x128x8xbf16>,
    %c0_76 = arith.constant 0 : index
    %c0_77 = arith.constant 0 : index
    %91 = vector.load %arg2[%c0_76, %c0_77] : memref<128x14xbf16, #tpu.memory_space<vmem>>, vector<128x14xbf16>
    %c7 = arith.constant 7 : index
    %c0_78 = arith.constant 0 : index
    %c0_79 = arith.constant 0 : index
    %92 = vector.load %arg1[%c7, %c0_78, %c0_79] : memref<52x14x8xbf16, #tpu.memory_space<vmem>>, vector<1x14x8xbf16>
    %93 = vector.shape_cast %92 : vector<1x14x8xbf16> to vector<14x8xbf16>
    %cst_80 = arith.constant dense<0.000000e+00> : vector<128x8xf32>
    %94 = tpu.matmul %91, %93, %cst_80 {dimension_numbers = #tpu.dot_dimension_numbers<[1], [0], [0], [1], [0, 0, 1, 1], [], []>} : vector<128x14xbf16>, vector<14x8xbf16>, vector<128x8xf32> -> vector<128x8xf32>
    %c0_81 = arith.constant 0 : index
    %c0_82 = arith.constant 0 : index
    %95 = vector.load %arg3[%c0_81, %c0_82] : memref<128x1xf32, #tpu.memory_space<vmem>>, vector<128x1xf32>
    %96 = vector.broadcast %95 : vector<128x1xf32> to vector<128x8xf32>
    %97 = arith.addf %94, %96 : vector<128x8xf32>
    %cst_83 = arith.constant 0.000000e+00 : f32
    %98 = vector.broadcast %cst_83 : f32 to vector<128x8xf32>
    %99 = arith.maximumf %97, %98 : vector<128x8xf32>
    %100 = arith.truncf %99 : vector<128x8xf32> to vector<128x8xbf16>
    %c7_84 = arith.constant 7 : index
    %c0_85 = arith.constant 0 : index
    %c0_86 = arith.constant 0 : index
    %101 = vector.load %arg11[%c7_84, %c0_85, %c0_86] : memref<52x128x8xbf16, #tpu.memory_space<vmem>>, vector<1x128x8xbf16>
    %102 = vector.shape_cast %101 : vector<1x128x8xbf16> to vector<128x8xbf16>
    %103 = vector.shape_cast %100 : vector<128x8xbf16> to vector<1x128x8xbf16>
    tpu.vector_store %arg11[%c7_84, %c0_85, %c0_86], %103 {strides = array<i32>} : memref<52x128x8xbf16, #tpu.memory_space<vmem>>, vector<1x128x8xbf16>,
    %c0_87 = arith.constant 0 : index
    %c0_88 = arith.constant 0 : index
    %104 = vector.load %arg2[%c0_87, %c0_88] : memref<128x14xbf16, #tpu.memory_space<vmem>>, vector<128x14xbf16>
    %c8 = arith.constant 8 : index
    %c0_89 = arith.constant 0 : index
    %c0_90 = arith.constant 0 : index
    %105 = vector.load %arg1[%c8, %c0_89, %c0_90] : memref<52x14x8xbf16, #tpu.memory_space<vmem>>, vector<1x14x8xbf16>
    %106 = vector.shape_cast %105 : vector<1x14x8xbf16> to vector<14x8xbf16>
    %cst_91 = arith.constant dense<0.000000e+00> : vector<128x8xf32>
    %107 = tpu.matmul %104, %106, %cst_91 {dimension_numbers = #tpu.dot_dimension_numbers<[1], [0], [0], [1], [0, 0, 1, 1], [], []>} : vector<128x14xbf16>, vector<14x8xbf16>, vector<128x8xf32> -> vector<128x8xf32>
    %c0_92 = arith.constant 0 : index
    %c0_93 = arith.constant 0 : index
    %108 = vector.load %arg3[%c0_92, %c0_93] : memref<128x1xf32, #tpu.memory_space<vmem>>, vector<128x1xf32>
    %109 = vector.broadcast %108 : vector<128x1xf32> to vector<128x8xf32>
    %110 = arith.addf %107, %109 : vector<128x8xf32>
    %cst_94 = arith.constant 0.000000e+00 : f32
    %111 = vector.broadcast %cst_94 : f32 to vector<128x8xf32>
    %112 = arith.maximumf %110, %111 : vector<128x8xf32>
    %113 = arith.truncf %112 : vector<128x8xf32> to vector<128x8xbf16>
    %c8_95 = arith.constant 8 : index
    %c0_96 = arith.constant 0 : index
    %c0_97 = arith.constant 0 : index
    %114 = vector.load %arg11[%c8_95, %c0_96, %c0_97] : memref<52x128x8xbf16, #tpu.memory_space<vmem>>, vector<1x128x8xbf16>
    %115 = vector.shape_cast %114 : vector<1x128x8xbf16> to vector<128x8xbf16>
    %116 = vector.shape_cast %113 : vector<128x8xbf16> to vector<1x128x8xbf16>
    tpu.vector_store %arg11[%c8_95, %c0_96, %c0_97], %116 {strides = array<i32>} : memref<52x128x8xbf16, #tpu.memory_space<vmem>>, vector<1x128x8xbf16>,
    %c0_98 = arith.constant 0 : index
    %c0_99 = arith.constant 0 : index
    %117 = vector.load %arg2[%c0_98, %c0_99] : memref<128x14xbf16, #tpu.memory_space<vmem>>, vector<128x14xbf16>
    %c9 = arith.constant 9 : index
    %c0_100 = arith.constant 0 : index
    %c0_101 = arith.constant 0 : index
    %118 = vector.load %arg1[%c9, %c0_100, %c0_101] : memref<52x14x8xbf16, #tpu.memory_space<vmem>>, vector<1x14x8xbf16>
    %119 = vector.shape_cast %118 : vector<1x14x8xbf16> to vector<14x8xbf16>
    %cst_102 = arith.constant dense<0.000000e+00> : vector<128x8xf32>
    %120 = tpu.matmul %117, %119, %cst_102 {dimension_numbers = #tpu.dot_dimension_numbers<[1], [0], [0], [1], [0, 0, 1, 1], [], []>} : vector<128x14xbf16>, vector<14x8xbf16>, vector<128x8xf32> -> vector<128x8xf32>
    %c0_103 = arith.constant 0 : index
    %c0_104 = arith.constant 0 : index
    %121 = vector.load %arg3[%c0_103, %c0_104] : memref<128x1xf32, #tpu.memory_space<vmem>>, vector<128x1xf32>
    %122 = vector.broadcast %121 : vector<128x1xf32> to vector<128x8xf32>
    %123 = arith.addf %120, %122 : vector<128x8xf32>
    %cst_105 = arith.constant 0.000000e+00 : f32
    %124 = vector.broadcast %cst_105 : f32 to vector<128x8xf32>
    %125 = arith.maximumf %123, %124 : vector<128x8xf32>
    %126 = arith.truncf %125 : vector<128x8xf32> to vector<128x8xbf16>
    %c9_106 = arith.constant 9 : index
    %c0_107 = arith.constant 0 : index
    %c0_108 = arith.constant 0 : index
    %127 = vector.load %arg11[%c9_106, %c0_107, %c0_108] : memref<52x128x8xbf16, #tpu.memory_space<vmem>>, vector<1x128x8xbf16>
    %128 = vector.shape_cast %127 : vector<1x128x8xbf16> to vector<128x8xbf16>
    %129 = vector.shape_cast %126 : vector<128x8xbf16> to vector<1x128x8xbf16>
    tpu.vector_store %arg11[%c9_106, %c0_107, %c0_108], %129 {strides = array<i32>} : memref<52x128x8xbf16, #tpu.memory_space<vmem>>, vector<1x128x8xbf16>,
    %c0_109 = arith.constant 0 : index
    %c0_110 = arith.constant 0 : index
    %130 = vector.load %arg2[%c0_109, %c0_110] : memref<128x14xbf16, #tpu.memory_space<vmem>>, vector<128x14xbf16>
    %c10 = arith.constant 10 : index
    %c0_111 = arith.constant 0 : index
    %c0_112 = arith.constant 0 : index
    %131 = vector.load %arg1[%c10, %c0_111, %c0_112] : memref<52x14x8xbf16, #tpu.memory_space<vmem>>, vector<1x14x8xbf16>
    %132 = vector.shape_cast %131 : vector<1x14x8xbf16> to vector<14x8xbf16>
    %cst_113 = arith.constant dense<0.000000e+00> : vector<128x8xf32>
    %133 = tpu.matmul %130, %132, %cst_113 {dimension_numbers = #tpu.dot_dimension_numbers<[1], [0], [0], [1], [0, 0, 1, 1], [], []>} : vector<128x14xbf16>, vector<14x8xbf16>, vector<128x8xf32> -> vector<128x8xf32>
    %c0_114 = arith.constant 0 : index
    %c0_115 = arith.constant 0 : index
    %134 = vector.load %arg3[%c0_114, %c0_115] : memref<128x1xf32, #tpu.memory_space<vmem>>, vector<128x1xf32>
    %135 = vector.broadcast %134 : vector<128x1xf32> to vector<128x8xf32>
    %136 = arith.addf %133, %135 : vector<128x8xf32>
    %cst_116 = arith.constant 0.000000e+00 : f32
    %137 = vector.broadcast %cst_116 : f32 to vector<128x8xf32>
    %138 = arith.maximumf %136, %137 : vector<128x8xf32>
    %139 = arith.truncf %138 : vector<128x8xf32> to vector<128x8xbf16>
    %c10_117 = arith.constant 10 : index
    %c0_118 = arith.constant 0 : index
    %c0_119 = arith.constant 0 : index
    %140 = vector.load %arg11[%c10_117, %c0_118, %c0_119] : memref<52x128x8xbf16, #tpu.memory_space<vmem>>, vector<1x128x8xbf16>
    %141 = vector.shape_cast %140 : vector<1x128x8xbf16> to vector<128x8xbf16>
    %142 = vector.shape_cast %139 : vector<128x8xbf16> to vector<1x128x8xbf16>
    tpu.vector_store %arg11[%c10_117, %c0_118, %c0_119], %142 {strides = array<i32>} : memref<52x128x8xbf16, #tpu.memory_space<vmem>>, vector<1x128x8xbf16>,
    %c0_120 = arith.constant 0 : index
    %c0_121 = arith.constant 0 : index
    %143 = vector.load %arg2[%c0_120, %c0_121] : memref<128x14xbf16, #tpu.memory_space<vmem>>, vector<128x14xbf16>
    %c11 = arith.constant 11 : index
    %c0_122 = arith.constant 0 : index
    %c0_123 = arith.constant 0 : index
    %144 = vector.load %arg1[%c11, %c0_122, %c0_123] : memref<52x14x8xbf16, #tpu.memory_space<vmem>>, vector<1x14x8xbf16>
    %145 = vector.shape_cast %144 : vector<1x14x8xbf16> to vector<14x8xbf16>
    %cst_124 = arith.constant dense<0.000000e+00> : vector<128x8xf32>
    %146 = tpu.matmul %143, %145, %cst_124 {dimension_numbers = #tpu.dot_dimension_numbers<[1], [0], [0], [1], [0, 0, 1, 1], [], []>} : vector<128x14xbf16>, vector<14x8xbf16>, vector<128x8xf32> -> vector<128x8xf32>
    %c0_125 = arith.constant 0 : index
    %c0_126 = arith.constant 0 : index
    %147 = vector.load %arg3[%c0_125, %c0_126] : memref<128x1xf32, #tpu.memory_space<vmem>>, vector<128x1xf32>
    %148 = vector.broadcast %147 : vector<128x1xf32> to vector<128x8xf32>
    %149 = arith.addf %146, %148 : vector<128x8xf32>
    %cst_127 = arith.constant 0.000000e+00 : f32
    %150 = vector.broadcast %cst_127 : f32 to vector<128x8xf32>
    %151 = arith.maximumf %149, %150 : vector<128x8xf32>
    %152 = arith.truncf %151 : vector<128x8xf32> to vector<128x8xbf16>
    %c11_128 = arith.constant 11 : index
    %c0_129 = arith.constant 0 : index
    %c0_130 = arith.constant 0 : index
    %153 = vector.load %arg11[%c11_128, %c0_129, %c0_130] : memref<52x128x8xbf16, #tpu.memory_space<vmem>>, vector<1x128x8xbf16>
    %154 = vector.shape_cast %153 : vector<1x128x8xbf16> to vector<128x8xbf16>
    %155 = vector.shape_cast %152 : vector<128x8xbf16> to vector<1x128x8xbf16>
    tpu.vector_store %arg11[%c11_128, %c0_129, %c0_130], %155 {strides = array<i32>} : memref<52x128x8xbf16, #tpu.memory_space<vmem>>, vector<1x128x8xbf16>,
    %c0_131 = arith.constant 0 : index
    %c0_132 = arith.constant 0 : index
    %156 = vector.load %arg2[%c0_131, %c0_132] : memref<128x14xbf16, #tpu.memory_space<vmem>>, vector<128x14xbf16>
    %c12 = arith.constant 12 : index
    %c0_133 = arith.constant 0 : index
    %c0_134 = arith.constant 0 : index
    %157 = vector.load %arg1[%c12, %c0_133, %c0_134] : memref<52x14x8xbf16, #tpu.memory_space<vmem>>, vector<1x14x8xbf16>
    %158 = vector.shape_cast %157 : vector<1x14x8xbf16> to vector<14x8xbf16>
    %cst_135 = arith.constant dense<0.000000e+00> : vector<128x8xf32>
    %159 = tpu.matmul %156, %158, %cst_135 {dimension_numbers = #tpu.dot_dimension_numbers<[1], [0], [0], [1], [0, 0, 1, 1], [], []>} : vector<128x14xbf16>, vector<14x8xbf16>, vector<128x8xf32> -> vector<128x8xf32>
    %c0_136 = arith.constant 0 : index
    %c0_137 = arith.constant 0 : index
    %160 = vector.load %arg3[%c0_136, %c0_137] : memref<128x1xf32, #tpu.memory_space<vmem>>, vector<128x1xf32>
    %161 = vector.broadcast %160 : vector<128x1xf32> to vector<128x8xf32>
    %162 = arith.addf %159, %161 : vector<128x8xf32>
    %cst_138 = arith.constant 0.000000e+00 : f32
    %163 = vector.broadcast %cst_138 : f32 to vector<128x8xf32>
    %164 = arith.maximumf %162, %163 : vector<128x8xf32>
    %165 = arith.truncf %164 : vector<128x8xf32> to vector<128x8xbf16>
    %c12_139 = arith.constant 12 : index
    %c0_140 = arith.constant 0 : index
    %c0_141 = arith.constant 0 : index
    %166 = vector.load %arg11[%c12_139, %c0_140, %c0_141] : memref<52x128x8xbf16, #tpu.memory_space<vmem>>, vector<1x128x8xbf16>
    %167 = vector.shape_cast %166 : vector<1x128x8xbf16> to vector<128x8xbf16>
    %168 = vector.shape_cast %165 : vector<128x8xbf16> to vector<1x128x8xbf16>
    tpu.vector_store %arg11[%c12_139, %c0_140, %c0_141], %168 {strides = array<i32>} : memref<52x128x8xbf16, #tpu.memory_space<vmem>>, vector<1x128x8xbf16>,
    %c0_142 = arith.constant 0 : index
    %c0_143 = arith.constant 0 : index
    %169 = vector.load %arg2[%c0_142, %c0_143] : memref<128x14xbf16, #tpu.memory_space<vmem>>, vector<128x14xbf16>
    %c13 = arith.constant 13 : index
    %c0_144 = arith.constant 0 : index
    %c0_145 = arith.constant 0 : index
    %170 = vector.load %arg1[%c13, %c0_144, %c0_145] : memref<52x14x8xbf16, #tpu.memory_space<vmem>>, vector<1x14x8xbf16>
    %171 = vector.shape_cast %170 : vector<1x14x8xbf16> to vector<14x8xbf16>
    %cst_146 = arith.constant dense<0.000000e+00> : vector<128x8xf32>
    %172 = tpu.matmul %169, %171, %cst_146 {dimension_numbers = #tpu.dot_dimension_numbers<[1], [0], [0], [1], [0, 0, 1, 1], [], []>} : vector<128x14xbf16>, vector<14x8xbf16>, vector<128x8xf32> -> vector<128x8xf32>
    %c0_147 = arith.constant 0 : index
    %c0_148 = arith.constant 0 : index
    %173 = vector.load %arg3[%c0_147, %c0_148] : memref<128x1xf32, #tpu.memory_space<vmem>>, vector<128x1xf32>
    %174 = vector.broadcast %173 : vector<128x1xf32> to vector<128x8xf32>
    %175 = arith.addf %172, %174 : vector<128x8xf32>
    %cst_149 = arith.constant 0.000000e+00 : f32
    %176 = vector.broadcast %cst_149 : f32 to vector<128x8xf32>
    %177 = arith.maximumf %175, %176 : vector<128x8xf32>
    %178 = arith.truncf %177 : vector<128x8xf32> to vector<128x8xbf16>
    %c13_150 = arith.constant 13 : index
    %c0_151 = arith.constant 0 : index
    %c0_152 = arith.constant 0 : index
    %179 = vector.load %arg11[%c13_150, %c0_151, %c0_152] : memref<52x128x8xbf16, #tpu.memory_space<vmem>>, vector<1x128x8xbf16>
    %180 = vector.shape_cast %179 : vector<1x128x8xbf16> to vector<128x8xbf16>
    %181 = vector.shape_cast %178 : vector<128x8xbf16> to vector<1x128x8xbf16>
    tpu.vector_store %arg11[%c13_150, %c0_151, %c0_152], %181 {strides = array<i32>} : memref<52x128x8xbf16, #tpu.memory_space<vmem>>, vector<1x128x8xbf16>,
    %c0_153 = arith.constant 0 : index
    %c0_154 = arith.constant 0 : index
    %182 = vector.load %arg2[%c0_153, %c0_154] : memref<128x14xbf16, #tpu.memory_space<vmem>>, vector<128x14xbf16>
    %c14 = arith.constant 14 : index
    %c0_155 = arith.constant 0 : index
    %c0_156 = arith.constant 0 : index
    %183 = vector.load %arg1[%c14, %c0_155, %c0_156] : memref<52x14x8xbf16, #tpu.memory_space<vmem>>, vector<1x14x8xbf16>
    %184 = vector.shape_cast %183 : vector<1x14x8xbf16> to vector<14x8xbf16>
    %cst_157 = arith.constant dense<0.000000e+00> : vector<128x8xf32>
    %185 = tpu.matmul %182, %184, %cst_157 {dimension_numbers = #tpu.dot_dimension_numbers<[1], [0], [0], [1], [0, 0, 1, 1], [], []>} : vector<128x14xbf16>, vector<14x8xbf16>, vector<128x8xf32> -> vector<128x8xf32>
    %c0_158 = arith.constant 0 : index
    %c0_159 = arith.constant 0 : index
    %186 = vector.load %arg3[%c0_158, %c0_159] : memref<128x1xf32, #tpu.memory_space<vmem>>, vector<128x1xf32>
    %187 = vector.broadcast %186 : vector<128x1xf32> to vector<128x8xf32>
    %188 = arith.addf %185, %187 : vector<128x8xf32>
    %cst_160 = arith.constant 0.000000e+00 : f32
    %189 = vector.broadcast %cst_160 : f32 to vector<128x8xf32>
    %190 = arith.maximumf %188, %189 : vector<128x8xf32>
    %191 = arith.truncf %190 : vector<128x8xf32> to vector<128x8xbf16>
    %c14_161 = arith.constant 14 : index
    %c0_162 = arith.constant 0 : index
    %c0_163 = arith.constant 0 : index
    %192 = vector.load %arg11[%c14_161, %c0_162, %c0_163] : memref<52x128x8xbf16, #tpu.memory_space<vmem>>, vector<1x128x8xbf16>
    %193 = vector.shape_cast %192 : vector<1x128x8xbf16> to vector<128x8xbf16>
    %194 = vector.shape_cast %191 : vector<128x8xbf16> to vector<1x128x8xbf16>
    tpu.vector_store %arg11[%c14_161, %c0_162, %c0_163], %194 {strides = array<i32>} : memref<52x128x8xbf16, #tpu.memory_space<vmem>>, vector<1x128x8xbf16>,
    %c0_164 = arith.constant 0 : index
    %c0_165 = arith.constant 0 : index
    %195 = vector.load %arg2[%c0_164, %c0_165] : memref<128x14xbf16, #tpu.memory_space<vmem>>, vector<128x14xbf16>
    %c15 = arith.constant 15 : index
    %c0_166 = arith.constant 0 : index
    %c0_167 = arith.constant 0 : index
    %196 = vector.load %arg1[%c15, %c0_166, %c0_167] : memref<52x14x8xbf16, #tpu.memory_space<vmem>>, vector<1x14x8xbf16>
    %197 = vector.shape_cast %196 : vector<1x14x8xbf16> to vector<14x8xbf16>
    %cst_168 = arith.constant dense<0.000000e+00> : vector<128x8xf32>
    %198 = tpu.matmul %195, %197, %cst_168 {dimension_numbers = #tpu.dot_dimension_numbers<[1], [0], [0], [1], [0, 0, 1, 1], [], []>} : vector<128x14xbf16>, vector<14x8xbf16>, vector<128x8xf32> -> vector<128x8xf32>
    %c0_169 = arith.constant 0 : index
    %c0_170 = arith.constant 0 : index
    %199 = vector.load %arg3[%c0_169, %c0_170] : memref<128x1xf32, #tpu.memory_space<vmem>>, vector<128x1xf32>
    %200 = vector.broadcast %199 : vector<128x1xf32> to vector<128x8xf32>
    %201 = arith.addf %198, %200 : vector<128x8xf32>
    %cst_171 = arith.constant 0.000000e+00 : f32
    %202 = vector.broadcast %cst_171 : f32 to vector<128x8xf32>
    %203 = arith.maximumf %201, %202 : vector<128x8xf32>
    %204 = arith.truncf %203 : vector<128x8xf32> to vector<128x8xbf16>
    %c15_172 = arith.constant 15 : index
    %c0_173 = arith.constant 0 : index
    %c0_174 = arith.constant 0 : index
    %205 = vector.load %arg11[%c15_172, %c0_173, %c0_174] : memref<52x128x8xbf16, #tpu.memory_space<vmem>>, vector<1x128x8xbf16>
    %206 = vector.shape_cast %205 : vector<1x128x8xbf16> to vector<128x8xbf16>
    %207 = vector.shape_cast %204 : vector<128x8xbf16> to vector<1x128x8xbf16>
    tpu.vector_store %arg11[%c15_172, %c0_173, %c0_174], %207 {strides = array<i32>} : memref<52x128x8xbf16, #tpu.memory_space<vmem>>, vector<1x128x8xbf16>,
    %c0_175 = arith.constant 0 : index
    %c0_176 = arith.constant 0 : index
    %208 = vector.load %arg2[%c0_175, %c0_176] : memref<128x14xbf16, #tpu.memory_space<vmem>>, vector<128x14xbf16>
    %c16 = arith.constant 16 : index
    %c0_177 = arith.constant 0 : index
    %c0_178 = arith.constant 0 : index
    %209 = vector.load %arg1[%c16, %c0_177, %c0_178] : memref<52x14x8xbf16, #tpu.memory_space<vmem>>, vector<1x14x8xbf16>
    %210 = vector.shape_cast %209 : vector<1x14x8xbf16> to vector<14x8xbf16>
    %cst_179 = arith.constant dense<0.000000e+00> : vector<128x8xf32>
    %211 = tpu.matmul %208, %210, %cst_179 {dimension_numbers = #tpu.dot_dimension_numbers<[1], [0], [0], [1], [0, 0, 1, 1], [], []>} : vector<128x14xbf16>, vector<14x8xbf16>, vector<128x8xf32> -> vector<128x8xf32>
    %c0_180 = arith.constant 0 : index
    %c0_181 = arith.constant 0 : index
    %212 = vector.load %arg3[%c0_180, %c0_181] : memref<128x1xf32, #tpu.memory_space<vmem>>, vector<128x1xf32>
    %213 = vector.broadcast %212 : vector<128x1xf32> to vector<128x8xf32>
    %214 = arith.addf %211, %213 : vector<128x8xf32>
    %cst_182 = arith.constant 0.000000e+00 : f32
    %215 = vector.broadcast %cst_182 : f32 to vector<128x8xf32>
    %216 = arith.maximumf %214, %215 : vector<128x8xf32>
    %217 = arith.truncf %216 : vector<128x8xf32> to vector<128x8xbf16>
    %c16_183 = arith.constant 16 : index
    %c0_184 = arith.constant 0 : index
    %c0_185 = arith.constant 0 : index
    %218 = vector.load %arg11[%c16_183, %c0_184, %c0_185] : memref<52x128x8xbf16, #tpu.memory_space<vmem>>, vector<1x128x8xbf16>
    %219 = vector.shape_cast %218 : vector<1x128x8xbf16> to vector<128x8xbf16>
    %220 = vector.shape_cast %217 : vector<128x8xbf16> to vector<1x128x8xbf16>
    tpu.vector_store %arg11[%c16_183, %c0_184, %c0_185], %220 {strides = array<i32>} : memref<52x128x8xbf16, #tpu.memory_space<vmem>>, vector<1x128x8xbf16>,
    %c0_186 = arith.constant 0 : index
    %c0_187 = arith.constant 0 : index
    %221 = vector.load %arg2[%c0_186, %c0_187] : memref<128x14xbf16, #tpu.memory_space<vmem>>, vector<128x14xbf16>
    %c17 = arith.constant 17 : index
    %c0_188 = arith.constant 0 : index
    %c0_189 = arith.constant 0 : index
    %222 = vector.load %arg1[%c17, %c0_188, %c0_189] : memref<52x14x8xbf16, #tpu.memory_space<vmem>>, vector<1x14x8xbf16>
    %223 = vector.shape_cast %222 : vector<1x14x8xbf16> to vector<14x8xbf16>
    %cst_190 = arith.constant dense<0.000000e+00> : vector<128x8xf32>
    %224 = tpu.matmul %221, %223, %cst_190 {dimension_numbers = #tpu.dot_dimension_numbers<[1], [0], [0], [1], [0, 0, 1, 1], [], []>} : vector<128x14xbf16>, vector<14x8xbf16>, vector<128x8xf32> -> vector<128x8xf32>
    %c0_191 = arith.constant 0 : index
    %c0_192 = arith.constant 0 : index
    %225 = vector.load %arg3[%c0_191, %c0_192] : memref<128x1xf32, #tpu.memory_space<vmem>>, vector<128x1xf32>
    %226 = vector.broadcast %225 : vector<128x1xf32> to vector<128x8xf32>
    %227 = arith.addf %224, %226 : vector<128x8xf32>
    %cst_193 = arith.constant 0.000000e+00 : f32
    %228 = vector.broadcast %cst_193 : f32 to vector<128x8xf32>
    %229 = arith.maximumf %227, %228 : vector<128x8xf32>
    %230 = arith.truncf %229 : vector<128x8xf32> to vector<128x8xbf16>
    %c17_194 = arith.constant 17 : index
    %c0_195 = arith.constant 0 : index
    %c0_196 = arith.constant 0 : index
    %231 = vector.load %arg11[%c17_194, %c0_195, %c0_196] : memref<52x128x8xbf16, #tpu.memory_space<vmem>>, vector<1x128x8xbf16>
    %232 = vector.shape_cast %231 : vector<1x128x8xbf16> to vector<128x8xbf16>
    %233 = vector.shape_cast %230 : vector<128x8xbf16> to vector<1x128x8xbf16>
    tpu.vector_store %arg11[%c17_194, %c0_195, %c0_196], %233 {strides = array<i32>} : memref<52x128x8xbf16, #tpu.memory_space<vmem>>, vector<1x128x8xbf16>,
    %c0_197 = arith.constant 0 : index
    %c0_198 = arith.constant 0 : index
    %234 = vector.load %arg2[%c0_197, %c0_198] : memref<128x14xbf16, #tpu.memory_space<vmem>>, vector<128x14xbf16>
    %c18 = arith.constant 18 : index
    %c0_199 = arith.constant 0 : index
    %c0_200 = arith.constant 0 : index
    %235 = vector.load %arg1[%c18, %c0_199, %c0_200] : memref<52x14x8xbf16, #tpu.memory_space<vmem>>, vector<1x14x8xbf16>
    %236 = vector.shape_cast %235 : vector<1x14x8xbf16> to vector<14x8xbf16>
    %cst_201 = arith.constant dense<0.000000e+00> : vector<128x8xf32>
    %237 = tpu.matmul %234, %236, %cst_201 {dimension_numbers = #tpu.dot_dimension_numbers<[1], [0], [0], [1], [0, 0, 1, 1], [], []>} : vector<128x14xbf16>, vector<14x8xbf16>, vector<128x8xf32> -> vector<128x8xf32>
    %c0_202 = arith.constant 0 : index
    %c0_203 = arith.constant 0 : index
    %238 = vector.load %arg3[%c0_202, %c0_203] : memref<128x1xf32, #tpu.memory_space<vmem>>, vector<128x1xf32>
    %239 = vector.broadcast %238 : vector<128x1xf32> to vector<128x8xf32>
    %240 = arith.addf %237, %239 : vector<128x8xf32>
    %cst_204 = arith.constant 0.000000e+00 : f32
    %241 = vector.broadcast %cst_204 : f32 to vector<128x8xf32>
    %242 = arith.maximumf %240, %241 : vector<128x8xf32>
    %243 = arith.truncf %242 : vector<128x8xf32> to vector<128x8xbf16>
    %c18_205 = arith.constant 18 : index
    %c0_206 = arith.constant 0 : index
    %c0_207 = arith.constant 0 : index
    %244 = vector.load %arg11[%c18_205, %c0_206, %c0_207] : memref<52x128x8xbf16, #tpu.memory_space<vmem>>, vector<1x128x8xbf16>
    %245 = vector.shape_cast %244 : vector<1x128x8xbf16> to vector<128x8xbf16>
    %246 = vector.shape_cast %243 : vector<128x8xbf16> to vector<1x128x8xbf16>
    tpu.vector_store %arg11[%c18_205, %c0_206, %c0_207], %246 {strides = array<i32>} : memref<52x128x8xbf16, #tpu.memory_space<vmem>>, vector<1x128x8xbf16>,
    %c0_208 = arith.constant 0 : index
    %c0_209 = arith.constant 0 : index
    %247 = vector.load %arg2[%c0_208, %c0_209] : memref<128x14xbf16, #tpu.memory_space<vmem>>, vector<128x14xbf16>
    %c19 = arith.constant 19 : index
    %c0_210 = arith.constant 0 : index
    %c0_211 = arith.constant 0 : index
    %248 = vector.load %arg1[%c19, %c0_210, %c0_211] : memref<52x14x8xbf16, #tpu.memory_space<vmem>>, vector<1x14x8xbf16>
    %249 = vector.shape_cast %248 : vector<1x14x8xbf16> to vector<14x8xbf16>
    %cst_212 = arith.constant dense<0.000000e+00> : vector<128x8xf32>
    %250 = tpu.matmul %247, %249, %cst_212 {dimension_numbers = #tpu.dot_dimension_numbers<[1], [0], [0], [1], [0, 0, 1, 1], [], []>} : vector<128x14xbf16>, vector<14x8xbf16>, vector<128x8xf32> -> vector<128x8xf32>
    %c0_213 = arith.constant 0 : index
    %c0_214 = arith.constant 0 : index
    %251 = vector.load %arg3[%c0_213, %c0_214] : memref<128x1xf32, #tpu.memory_space<vmem>>, vector<128x1xf32>
    %252 = vector.broadcast %251 : vector<128x1xf32> to vector<128x8xf32>
    %253 = arith.addf %250, %252 : vector<128x8xf32>
    %cst_215 = arith.constant 0.000000e+00 : f32
    %254 = vector.broadcast %cst_215 : f32 to vector<128x8xf32>
    %255 = arith.maximumf %253, %254 : vector<128x8xf32>
    %256 = arith.truncf %255 : vector<128x8xf32> to vector<128x8xbf16>
    %c19_216 = arith.constant 19 : index
    %c0_217 = arith.constant 0 : index
    %c0_218 = arith.constant 0 : index
    %257 = vector.load %arg11[%c19_216, %c0_217, %c0_218] : memref<52x128x8xbf16, #tpu.memory_space<vmem>>, vector<1x128x8xbf16>
    %258 = vector.shape_cast %257 : vector<1x128x8xbf16> to vector<128x8xbf16>
    %259 = vector.shape_cast %256 : vector<128x8xbf16> to vector<1x128x8xbf16>
    tpu.vector_store %arg11[%c19_216, %c0_217, %c0_218], %259 {strides = array<i32>} : memref<52x128x8xbf16, #tpu.memory_space<vmem>>, vector<1x128x8xbf16>,
    %c0_219 = arith.constant 0 : index
    %c0_220 = arith.constant 0 : index
    %260 = vector.load %arg2[%c0_219, %c0_220] : memref<128x14xbf16, #tpu.memory_space<vmem>>, vector<128x14xbf16>
    %c20 = arith.constant 20 : index
    %c0_221 = arith.constant 0 : index
    %c0_222 = arith.constant 0 : index
    %261 = vector.load %arg1[%c20, %c0_221, %c0_222] : memref<52x14x8xbf16, #tpu.memory_space<vmem>>, vector<1x14x8xbf16>
    %262 = vector.shape_cast %261 : vector<1x14x8xbf16> to vector<14x8xbf16>
    %cst_223 = arith.constant dense<0.000000e+00> : vector<128x8xf32>
    %263 = tpu.matmul %260, %262, %cst_223 {dimension_numbers = #tpu.dot_dimension_numbers<[1], [0], [0], [1], [0, 0, 1, 1], [], []>} : vector<128x14xbf16>, vector<14x8xbf16>, vector<128x8xf32> -> vector<128x8xf32>
    %c0_224 = arith.constant 0 : index
    %c0_225 = arith.constant 0 : index
    %264 = vector.load %arg3[%c0_224, %c0_225] : memref<128x1xf32, #tpu.memory_space<vmem>>, vector<128x1xf32>
    %265 = vector.broadcast %264 : vector<128x1xf32> to vector<128x8xf32>
    %266 = arith.addf %263, %265 : vector<128x8xf32>
    %cst_226 = arith.constant 0.000000e+00 : f32
    %267 = vector.broadcast %cst_226 : f32 to vector<128x8xf32>
    %268 = arith.maximumf %266, %267 : vector<128x8xf32>
    %269 = arith.truncf %268 : vector<128x8xf32> to vector<128x8xbf16>
    %c20_227 = arith.constant 20 : index
    %c0_228 = arith.constant 0 : index
    %c0_229 = arith.constant 0 : index
    %270 = vector.load %arg11[%c20_227, %c0_228, %c0_229] : memref<52x128x8xbf16, #tpu.memory_space<vmem>>, vector<1x128x8xbf16>
    %271 = vector.shape_cast %270 : vector<1x128x8xbf16> to vector<128x8xbf16>
    %272 = vector.shape_cast %269 : vector<128x8xbf16> to vector<1x128x8xbf16>
    tpu.vector_store %arg11[%c20_227, %c0_228, %c0_229], %272 {strides = array<i32>} : memref<52x128x8xbf16, #tpu.memory_space<vmem>>, vector<1x128x8xbf16>,
    %c0_230 = arith.constant 0 : index
    %c0_231 = arith.constant 0 : index
    %273 = vector.load %arg2[%c0_230, %c0_231] : memref<128x14xbf16, #tpu.memory_space<vmem>>, vector<128x14xbf16>
    %c21 = arith.constant 21 : index
    %c0_232 = arith.constant 0 : index
    %c0_233 = arith.constant 0 : index
    %274 = vector.load %arg1[%c21, %c0_232, %c0_233] : memref<52x14x8xbf16, #tpu.memory_space<vmem>>, vector<1x14x8xbf16>
    %275 = vector.shape_cast %274 : vector<1x14x8xbf16> to vector<14x8xbf16>
    %cst_234 = arith.constant dense<0.000000e+00> : vector<128x8xf32>
    %276 = tpu.matmul %273, %275, %cst_234 {dimension_numbers = #tpu.dot_dimension_numbers<[1], [0], [0], [1], [0, 0, 1, 1], [], []>} : vector<128x14xbf16>, vector<14x8xbf16>, vector<128x8xf32> -> vector<128x8xf32>
    %c0_235 = arith.constant 0 : index
    %c0_236 = arith.constant 0 : index
    %277 = vector.load %arg3[%c0_235, %c0_236] : memref<128x1xf32, #tpu.memory_space<vmem>>, vector<128x1xf32>
    %278 = vector.broadcast %277 : vector<128x1xf32> to vector<128x8xf32>
    %279 = arith.addf %276, %278 : vector<128x8xf32>
    %cst_237 = arith.constant 0.000000e+00 : f32
    %280 = vector.broadcast %cst_237 : f32 to vector<128x8xf32>
    %281 = arith.maximumf %279, %280 : vector<128x8xf32>
    %282 = arith.truncf %281 : vector<128x8xf32> to vector<128x8xbf16>
    %c21_238 = arith.constant 21 : index
    %c0_239 = arith.constant 0 : index
    %c0_240 = arith.constant 0 : index
    %283 = vector.load %arg11[%c21_238, %c0_239, %c0_240] : memref<52x128x8xbf16, #tpu.memory_space<vmem>>, vector<1x128x8xbf16>
    %284 = vector.shape_cast %283 : vector<1x128x8xbf16> to vector<128x8xbf16>
    %285 = vector.shape_cast %282 : vector<128x8xbf16> to vector<1x128x8xbf16>
    tpu.vector_store %arg11[%c21_238, %c0_239, %c0_240], %285 {strides = array<i32>} : memref<52x128x8xbf16, #tpu.memory_space<vmem>>, vector<1x128x8xbf16>,
    %c0_241 = arith.constant 0 : index
    %c0_242 = arith.constant 0 : index
    %286 = vector.load %arg2[%c0_241, %c0_242] : memref<128x14xbf16, #tpu.memory_space<vmem>>, vector<128x14xbf16>
    %c22 = arith.constant 22 : index
    %c0_243 = arith.constant 0 : index
    %c0_244 = arith.constant 0 : index
    %287 = vector.load %arg1[%c22, %c0_243, %c0_244] : memref<52x14x8xbf16, #tpu.memory_space<vmem>>, vector<1x14x8xbf16>
    %288 = vector.shape_cast %287 : vector<1x14x8xbf16> to vector<14x8xbf16>
    %cst_245 = arith.constant dense<0.000000e+00> : vector<128x8xf32>
    %289 = tpu.matmul %286, %288, %cst_245 {dimension_numbers = #tpu.dot_dimension_numbers<[1], [0], [0], [1], [0, 0, 1, 1], [], []>} : vector<128x14xbf16>, vector<14x8xbf16>, vector<128x8xf32> -> vector<128x8xf32>
    %c0_246 = arith.constant 0 : index
    %c0_247 = arith.constant 0 : index
    %290 = vector.load %arg3[%c0_246, %c0_247] : memref<128x1xf32, #tpu.memory_space<vmem>>, vector<128x1xf32>
    %291 = vector.broadcast %290 : vector<128x1xf32> to vector<128x8xf32>
    %292 = arith.addf %289, %291 : vector<128x8xf32>
    %cst_248 = arith.constant 0.000000e+00 : f32
    %293 = vector.broadcast %cst_248 : f32 to vector<128x8xf32>
    %294 = arith.maximumf %292, %293 : vector<128x8xf32>
    %295 = arith.truncf %294 : vector<128x8xf32> to vector<128x8xbf16>
    %c22_249 = arith.constant 22 : index
    %c0_250 = arith.constant 0 : index
    %c0_251 = arith.constant 0 : index
    %296 = vector.load %arg11[%c22_249, %c0_250, %c0_251] : memref<52x128x8xbf16, #tpu.memory_space<vmem>>, vector<1x128x8xbf16>
    %297 = vector.shape_cast %296 : vector<1x128x8xbf16> to vector<128x8xbf16>
    %298 = vector.shape_cast %295 : vector<128x8xbf16> to vector<1x128x8xbf16>
    tpu.vector_store %arg11[%c22_249, %c0_250, %c0_251], %298 {strides = array<i32>} : memref<52x128x8xbf16, #tpu.memory_space<vmem>>, vector<1x128x8xbf16>,
    %c0_252 = arith.constant 0 : index
    %c0_253 = arith.constant 0 : index
    %299 = vector.load %arg2[%c0_252, %c0_253] : memref<128x14xbf16, #tpu.memory_space<vmem>>, vector<128x14xbf16>
    %c23 = arith.constant 23 : index
    %c0_254 = arith.constant 0 : index
    %c0_255 = arith.constant 0 : index
    %300 = vector.load %arg1[%c23, %c0_254, %c0_255] : memref<52x14x8xbf16, #tpu.memory_space<vmem>>, vector<1x14x8xbf16>
    %301 = vector.shape_cast %300 : vector<1x14x8xbf16> to vector<14x8xbf16>
    %cst_256 = arith.constant dense<0.000000e+00> : vector<128x8xf32>
    %302 = tpu.matmul %299, %301, %cst_256 {dimension_numbers = #tpu.dot_dimension_numbers<[1], [0], [0], [1], [0, 0, 1, 1], [], []>} : vector<128x14xbf16>, vector<14x8xbf16>, vector<128x8xf32> -> vector<128x8xf32>
    %c0_257 = arith.constant 0 : index
    %c0_258 = arith.constant 0 : index
    %303 = vector.load %arg3[%c0_257, %c0_258] : memref<128x1xf32, #tpu.memory_space<vmem>>, vector<128x1xf32>
    %304 = vector.broadcast %303 : vector<128x1xf32> to vector<128x8xf32>
    %305 = arith.addf %302, %304 : vector<128x8xf32>
    %cst_259 = arith.constant 0.000000e+00 : f32
    %306 = vector.broadcast %cst_259 : f32 to vector<128x8xf32>
    %307 = arith.maximumf %305, %306 : vector<128x8xf32>
    %308 = arith.truncf %307 : vector<128x8xf32> to vector<128x8xbf16>
    %c23_260 = arith.constant 23 : index
    %c0_261 = arith.constant 0 : index
    %c0_262 = arith.constant 0 : index
    %309 = vector.load %arg11[%c23_260, %c0_261, %c0_262] : memref<52x128x8xbf16, #tpu.memory_space<vmem>>, vector<1x128x8xbf16>
    %310 = vector.shape_cast %309 : vector<1x128x8xbf16> to vector<128x8xbf16>
    %311 = vector.shape_cast %308 : vector<128x8xbf16> to vector<1x128x8xbf16>
    tpu.vector_store %arg11[%c23_260, %c0_261, %c0_262], %311 {strides = array<i32>} : memref<52x128x8xbf16, #tpu.memory_space<vmem>>, vector<1x128x8xbf16>,
    %c0_263 = arith.constant 0 : index
    %c0_264 = arith.constant 0 : index
    %312 = vector.load %arg2[%c0_263, %c0_264] : memref<128x14xbf16, #tpu.memory_space<vmem>>, vector<128x14xbf16>
    %c24 = arith.constant 24 : index
    %c0_265 = arith.constant 0 : index
    %c0_266 = arith.constant 0 : index
    %313 = vector.load %arg1[%c24, %c0_265, %c0_266] : memref<52x14x8xbf16, #tpu.memory_space<vmem>>, vector<1x14x8xbf16>
    %314 = vector.shape_cast %313 : vector<1x14x8xbf16> to vector<14x8xbf16>
    %cst_267 = arith.constant dense<0.000000e+00> : vector<128x8xf32>
    %315 = tpu.matmul %312, %314, %cst_267 {dimension_numbers = #tpu.dot_dimension_numbers<[1], [0], [0], [1], [0, 0, 1, 1], [], []>} : vector<128x14xbf16>, vector<14x8xbf16>, vector<128x8xf32> -> vector<128x8xf32>
    %c0_268 = arith.constant 0 : index
    %c0_269 = arith.constant 0 : index
    %316 = vector.load %arg3[%c0_268, %c0_269] : memref<128x1xf32, #tpu.memory_space<vmem>>, vector<128x1xf32>
    %317 = vector.broadcast %316 : vector<128x1xf32> to vector<128x8xf32>
    %318 = arith.addf %315, %317 : vector<128x8xf32>
    %cst_270 = arith.constant 0.000000e+00 : f32
    %319 = vector.broadcast %cst_270 : f32 to vector<128x8xf32>
    %320 = arith.maximumf %318, %319 : vector<128x8xf32>
    %321 = arith.truncf %320 : vector<128x8xf32> to vector<128x8xbf16>
    %c24_271 = arith.constant 24 : index
    %c0_272 = arith.constant 0 : index
    %c0_273 = arith.constant 0 : index
    %322 = vector.load %arg11[%c24_271, %c0_272, %c0_273] : memref<52x128x8xbf16, #tpu.memory_space<vmem>>, vector<1x128x8xbf16>
    %323 = vector.shape_cast %322 : vector<1x128x8xbf16> to vector<128x8xbf16>
    %324 = vector.shape_cast %321 : vector<128x8xbf16> to vector<1x128x8xbf16>
    tpu.vector_store %arg11[%c24_271, %c0_272, %c0_273], %324 {strides = array<i32>} : memref<52x128x8xbf16, #tpu.memory_space<vmem>>, vector<1x128x8xbf16>,
    %c0_274 = arith.constant 0 : index
    %c0_275 = arith.constant 0 : index
    %325 = vector.load %arg2[%c0_274, %c0_275] : memref<128x14xbf16, #tpu.memory_space<vmem>>, vector<128x14xbf16>
    %c25 = arith.constant 25 : index
    %c0_276 = arith.constant 0 : index
    %c0_277 = arith.constant 0 : index
    %326 = vector.load %arg1[%c25, %c0_276, %c0_277] : memref<52x14x8xbf16, #tpu.memory_space<vmem>>, vector<1x14x8xbf16>
    %327 = vector.shape_cast %326 : vector<1x14x8xbf16> to vector<14x8xbf16>
    %cst_278 = arith.constant dense<0.000000e+00> : vector<128x8xf32>
    %328 = tpu.matmul %325, %327, %cst_278 {dimension_numbers = #tpu.dot_dimension_numbers<[1], [0], [0], [1], [0, 0, 1, 1], [], []>} : vector<128x14xbf16>, vector<14x8xbf16>, vector<128x8xf32> -> vector<128x8xf32>
    %c0_279 = arith.constant 0 : index
    %c0_280 = arith.constant 0 : index
    %329 = vector.load %arg3[%c0_279, %c0_280] : memref<128x1xf32, #tpu.memory_space<vmem>>, vector<128x1xf32>
    %330 = vector.broadcast %329 : vector<128x1xf32> to vector<128x8xf32>
    %331 = arith.addf %328, %330 : vector<128x8xf32>
    %cst_281 = arith.constant 0.000000e+00 : f32
    %332 = vector.broadcast %cst_281 : f32 to vector<128x8xf32>
    %333 = arith.maximumf %331, %332 : vector<128x8xf32>
    %334 = arith.truncf %333 : vector<128x8xf32> to vector<128x8xbf16>
    %c25_282 = arith.constant 25 : index
    %c0_283 = arith.constant 0 : index
    %c0_284 = arith.constant 0 : index
    %335 = vector.load %arg11[%c25_282, %c0_283, %c0_284] : memref<52x128x8xbf16, #tpu.memory_space<vmem>>, vector<1x128x8xbf16>
    %336 = vector.shape_cast %335 : vector<1x128x8xbf16> to vector<128x8xbf16>
    %337 = vector.shape_cast %334 : vector<128x8xbf16> to vector<1x128x8xbf16>
    tpu.vector_store %arg11[%c25_282, %c0_283, %c0_284], %337 {strides = array<i32>} : memref<52x128x8xbf16, #tpu.memory_space<vmem>>, vector<1x128x8xbf16>,
    %c0_285 = arith.constant 0 : index
    %c0_286 = arith.constant 0 : index
    %338 = vector.load %arg2[%c0_285, %c0_286] : memref<128x14xbf16, #tpu.memory_space<vmem>>, vector<128x14xbf16>
    %c26 = arith.constant 26 : index
    %c0_287 = arith.constant 0 : index
    %c0_288 = arith.constant 0 : index
    %339 = vector.load %arg1[%c26, %c0_287, %c0_288] : memref<52x14x8xbf16, #tpu.memory_space<vmem>>, vector<1x14x8xbf16>
    %340 = vector.shape_cast %339 : vector<1x14x8xbf16> to vector<14x8xbf16>
    %cst_289 = arith.constant dense<0.000000e+00> : vector<128x8xf32>
    %341 = tpu.matmul %338, %340, %cst_289 {dimension_numbers = #tpu.dot_dimension_numbers<[1], [0], [0], [1], [0, 0, 1, 1], [], []>} : vector<128x14xbf16>, vector<14x8xbf16>, vector<128x8xf32> -> vector<128x8xf32>
    %c0_290 = arith.constant 0 : index
    %c0_291 = arith.constant 0 : index
    %342 = vector.load %arg3[%c0_290, %c0_291] : memref<128x1xf32, #tpu.memory_space<vmem>>, vector<128x1xf32>
    %343 = vector.broadcast %342 : vector<128x1xf32> to vector<128x8xf32>
    %344 = arith.addf %341, %343 : vector<128x8xf32>
    %cst_292 = arith.constant 0.000000e+00 : f32
    %345 = vector.broadcast %cst_292 : f32 to vector<128x8xf32>
    %346 = arith.maximumf %344, %345 : vector<128x8xf32>
    %347 = arith.truncf %346 : vector<128x8xf32> to vector<128x8xbf16>
    %c26_293 = arith.constant 26 : index
    %c0_294 = arith.constant 0 : index
    %c0_295 = arith.constant 0 : index
    %348 = vector.load %arg11[%c26_293, %c0_294, %c0_295] : memref<52x128x8xbf16, #tpu.memory_space<vmem>>, vector<1x128x8xbf16>
    %349 = vector.shape_cast %348 : vector<1x128x8xbf16> to vector<128x8xbf16>
    %350 = vector.shape_cast %347 : vector<128x8xbf16> to vector<1x128x8xbf16>
    tpu.vector_store %arg11[%c26_293, %c0_294, %c0_295], %350 {strides = array<i32>} : memref<52x128x8xbf16, #tpu.memory_space<vmem>>, vector<1x128x8xbf16>,
    %c0_296 = arith.constant 0 : index
    %c0_297 = arith.constant 0 : index
    %351 = vector.load %arg2[%c0_296, %c0_297] : memref<128x14xbf16, #tpu.memory_space<vmem>>, vector<128x14xbf16>
    %c27 = arith.constant 27 : index
    %c0_298 = arith.constant 0 : index
    %c0_299 = arith.constant 0 : index
    %352 = vector.load %arg1[%c27, %c0_298, %c0_299] : memref<52x14x8xbf16, #tpu.memory_space<vmem>>, vector<1x14x8xbf16>
    %353 = vector.shape_cast %352 : vector<1x14x8xbf16> to vector<14x8xbf16>
    %cst_300 = arith.constant dense<0.000000e+00> : vector<128x8xf32>
    %354 = tpu.matmul %351, %353, %cst_300 {dimension_numbers = #tpu.dot_dimension_numbers<[1], [0], [0], [1], [0, 0, 1, 1], [], []>} : vector<128x14xbf16>, vector<14x8xbf16>, vector<128x8xf32> -> vector<128x8xf32>
    %c0_301 = arith.constant 0 : index
    %c0_302 = arith.constant 0 : index
    %355 = vector.load %arg3[%c0_301, %c0_302] : memref<128x1xf32, #tpu.memory_space<vmem>>, vector<128x1xf32>
    %356 = vector.broadcast %355 : vector<128x1xf32> to vector<128x8xf32>
    %357 = arith.addf %354, %356 : vector<128x8xf32>
    %cst_303 = arith.constant 0.000000e+00 : f32
    %358 = vector.broadcast %cst_303 : f32 to vector<128x8xf32>
    %359 = arith.maximumf %357, %358 : vector<128x8xf32>
    %360 = arith.truncf %359 : vector<128x8xf32> to vector<128x8xbf16>
    %c27_304 = arith.constant 27 : index
    %c0_305 = arith.constant 0 : index
    %c0_306 = arith.constant 0 : index
    %361 = vector.load %arg11[%c27_304, %c0_305, %c0_306] : memref<52x128x8xbf16, #tpu.memory_space<vmem>>, vector<1x128x8xbf16>
    %362 = vector.shape_cast %361 : vector<1x128x8xbf16> to vector<128x8xbf16>
    %363 = vector.shape_cast %360 : vector<128x8xbf16> to vector<1x128x8xbf16>
    tpu.vector_store %arg11[%c27_304, %c0_305, %c0_306], %363 {strides = array<i32>} : memref<52x128x8xbf16, #tpu.memory_space<vmem>>, vector<1x128x8xbf16>,
    %c0_307 = arith.constant 0 : index
    %c0_308 = arith.constant 0 : index
    %364 = vector.load %arg2[%c0_307, %c0_308] : memref<128x14xbf16, #tpu.memory_space<vmem>>, vector<128x14xbf16>
    %c28 = arith.constant 28 : index
    %c0_309 = arith.constant 0 : index
    %c0_310 = arith.constant 0 : index
    %365 = vector.load %arg1[%c28, %c0_309, %c0_310] : memref<52x14x8xbf16, #tpu.memory_space<vmem>>, vector<1x14x8xbf16>
    %366 = vector.shape_cast %365 : vector<1x14x8xbf16> to vector<14x8xbf16>
    %cst_311 = arith.constant dense<0.000000e+00> : vector<128x8xf32>
    %367 = tpu.matmul %364, %366, %cst_311 {dimension_numbers = #tpu.dot_dimension_numbers<[1], [0], [0], [1], [0, 0, 1, 1], [], []>} : vector<128x14xbf16>, vector<14x8xbf16>, vector<128x8xf32> -> vector<128x8xf32>
    %c0_312 = arith.constant 0 : index
    %c0_313 = arith.constant 0 : index
    %368 = vector.load %arg3[%c0_312, %c0_313] : memref<128x1xf32, #tpu.memory_space<vmem>>, vector<128x1xf32>
    %369 = vector.broadcast %368 : vector<128x1xf32> to vector<128x8xf32>
    %370 = arith.addf %367, %369 : vector<128x8xf32>
    %cst_314 = arith.constant 0.000000e+00 : f32
    %371 = vector.broadcast %cst_314 : f32 to vector<128x8xf32>
    %372 = arith.maximumf %370, %371 : vector<128x8xf32>
    %373 = arith.truncf %372 : vector<128x8xf32> to vector<128x8xbf16>
    %c28_315 = arith.constant 28 : index
    %c0_316 = arith.constant 0 : index
    %c0_317 = arith.constant 0 : index
    %374 = vector.load %arg11[%c28_315, %c0_316, %c0_317] : memref<52x128x8xbf16, #tpu.memory_space<vmem>>, vector<1x128x8xbf16>
    %375 = vector.shape_cast %374 : vector<1x128x8xbf16> to vector<128x8xbf16>
    %376 = vector.shape_cast %373 : vector<128x8xbf16> to vector<1x128x8xbf16>
    tpu.vector_store %arg11[%c28_315, %c0_316, %c0_317], %376 {strides = array<i32>} : memref<52x128x8xbf16, #tpu.memory_space<vmem>>, vector<1x128x8xbf16>,
    %c0_318 = arith.constant 0 : index
    %c0_319 = arith.constant 0 : index
    %377 = vector.load %arg2[%c0_318, %c0_319] : memref<128x14xbf16, #tpu.memory_space<vmem>>, vector<128x14xbf16>
    %c29 = arith.constant 29 : index
    %c0_320 = arith.constant 0 : index
    %c0_321 = arith.constant 0 : index
    %378 = vector.load %arg1[%c29, %c0_320, %c0_321] : memref<52x14x8xbf16, #tpu.memory_space<vmem>>, vector<1x14x8xbf16>
    %379 = vector.shape_cast %378 : vector<1x14x8xbf16> to vector<14x8xbf16>
    %cst_322 = arith.constant dense<0.000000e+00> : vector<128x8xf32>
    %380 = tpu.matmul %377, %379, %cst_322 {dimension_numbers = #tpu.dot_dimension_numbers<[1], [0], [0], [1], [0, 0, 1, 1], [], []>} : vector<128x14xbf16>, vector<14x8xbf16>, vector<128x8xf32> -> vector<128x8xf32>
    %c0_323 = arith.constant 0 : index
    %c0_324 = arith.constant 0 : index
    %381 = vector.load %arg3[%c0_323, %c0_324] : memref<128x1xf32, #tpu.memory_space<vmem>>, vector<128x1xf32>
    %382 = vector.broadcast %381 : vector<128x1xf32> to vector<128x8xf32>
    %383 = arith.addf %380, %382 : vector<128x8xf32>
    %cst_325 = arith.constant 0.000000e+00 : f32
    %384 = vector.broadcast %cst_325 : f32 to vector<128x8xf32>
    %385 = arith.maximumf %383, %384 : vector<128x8xf32>
    %386 = arith.truncf %385 : vector<128x8xf32> to vector<128x8xbf16>
    %c29_326 = arith.constant 29 : index
    %c0_327 = arith.constant 0 : index
    %c0_328 = arith.constant 0 : index
    %387 = vector.load %arg11[%c29_326, %c0_327, %c0_328] : memref<52x128x8xbf16, #tpu.memory_space<vmem>>, vector<1x128x8xbf16>
    %388 = vector.shape_cast %387 : vector<1x128x8xbf16> to vector<128x8xbf16>
    %389 = vector.shape_cast %386 : vector<128x8xbf16> to vector<1x128x8xbf16>
    tpu.vector_store %arg11[%c29_326, %c0_327, %c0_328], %389 {strides = array<i32>} : memref<52x128x8xbf16, #tpu.memory_space<vmem>>, vector<1x128x8xbf16>,
    %c0_329 = arith.constant 0 : index
    %c0_330 = arith.constant 0 : index
    %390 = vector.load %arg2[%c0_329, %c0_330] : memref<128x14xbf16, #tpu.memory_space<vmem>>, vector<128x14xbf16>
    %c30 = arith.constant 30 : index
    %c0_331 = arith.constant 0 : index
    %c0_332 = arith.constant 0 : index
    %391 = vector.load %arg1[%c30, %c0_331, %c0_332] : memref<52x14x8xbf16, #tpu.memory_space<vmem>>, vector<1x14x8xbf16>
    %392 = vector.shape_cast %391 : vector<1x14x8xbf16> to vector<14x8xbf16>
    %cst_333 = arith.constant dense<0.000000e+00> : vector<128x8xf32>
    %393 = tpu.matmul %390, %392, %cst_333 {dimension_numbers = #tpu.dot_dimension_numbers<[1], [0], [0], [1], [0, 0, 1, 1], [], []>} : vector<128x14xbf16>, vector<14x8xbf16>, vector<128x8xf32> -> vector<128x8xf32>
    %c0_334 = arith.constant 0 : index
    %c0_335 = arith.constant 0 : index
    %394 = vector.load %arg3[%c0_334, %c0_335] : memref<128x1xf32, #tpu.memory_space<vmem>>, vector<128x1xf32>
    %395 = vector.broadcast %394 : vector<128x1xf32> to vector<128x8xf32>
    %396 = arith.addf %393, %395 : vector<128x8xf32>
    %cst_336 = arith.constant 0.000000e+00 : f32
    %397 = vector.broadcast %cst_336 : f32 to vector<128x8xf32>
    %398 = arith.maximumf %396, %397 : vector<128x8xf32>
    %399 = arith.truncf %398 : vector<128x8xf32> to vector<128x8xbf16>
    %c30_337 = arith.constant 30 : index
    %c0_338 = arith.constant 0 : index
    %c0_339 = arith.constant 0 : index
    %400 = vector.load %arg11[%c30_337, %c0_338, %c0_339] : memref<52x128x8xbf16, #tpu.memory_space<vmem>>, vector<1x128x8xbf16>
    %401 = vector.shape_cast %400 : vector<1x128x8xbf16> to vector<128x8xbf16>
    %402 = vector.shape_cast %399 : vector<128x8xbf16> to vector<1x128x8xbf16>
    tpu.vector_store %arg11[%c30_337, %c0_338, %c0_339], %402 {strides = array<i32>} : memref<52x128x8xbf16, #tpu.memory_space<vmem>>, vector<1x128x8xbf16>,
    %c0_340 = arith.constant 0 : index
    %c0_341 = arith.constant 0 : index
    %403 = vector.load %arg2[%c0_340, %c0_341] : memref<128x14xbf16, #tpu.memory_space<vmem>>, vector<128x14xbf16>
    %c31 = arith.constant 31 : index
    %c0_342 = arith.constant 0 : index
    %c0_343 = arith.constant 0 : index
    %404 = vector.load %arg1[%c31, %c0_342, %c0_343] : memref<52x14x8xbf16, #tpu.memory_space<vmem>>, vector<1x14x8xbf16>
    %405 = vector.shape_cast %404 : vector<1x14x8xbf16> to vector<14x8xbf16>
    %cst_344 = arith.constant dense<0.000000e+00> : vector<128x8xf32>
    %406 = tpu.matmul %403, %405, %cst_344 {dimension_numbers = #tpu.dot_dimension_numbers<[1], [0], [0], [1], [0, 0, 1, 1], [], []>} : vector<128x14xbf16>, vector<14x8xbf16>, vector<128x8xf32> -> vector<128x8xf32>
    %c0_345 = arith.constant 0 : index
    %c0_346 = arith.constant 0 : index
    %407 = vector.load %arg3[%c0_345, %c0_346] : memref<128x1xf32, #tpu.memory_space<vmem>>, vector<128x1xf32>
    %408 = vector.broadcast %407 : vector<128x1xf32> to vector<128x8xf32>
    %409 = arith.addf %406, %408 : vector<128x8xf32>
    %cst_347 = arith.constant 0.000000e+00 : f32
    %410 = vector.broadcast %cst_347 : f32 to vector<128x8xf32>
    %411 = arith.maximumf %409, %410 : vector<128x8xf32>
    %412 = arith.truncf %411 : vector<128x8xf32> to vector<128x8xbf16>
    %c31_348 = arith.constant 31 : index
    %c0_349 = arith.constant 0 : index
    %c0_350 = arith.constant 0 : index
    %413 = vector.load %arg11[%c31_348, %c0_349, %c0_350] : memref<52x128x8xbf16, #tpu.memory_space<vmem>>, vector<1x128x8xbf16>
    %414 = vector.shape_cast %413 : vector<1x128x8xbf16> to vector<128x8xbf16>
    %415 = vector.shape_cast %412 : vector<128x8xbf16> to vector<1x128x8xbf16>
    tpu.vector_store %arg11[%c31_348, %c0_349, %c0_350], %415 {strides = array<i32>} : memref<52x128x8xbf16, #tpu.memory_space<vmem>>, vector<1x128x8xbf16>,
    %c0_351 = arith.constant 0 : index
    %c0_352 = arith.constant 0 : index
    %416 = vector.load %arg2[%c0_351, %c0_352] : memref<128x14xbf16, #tpu.memory_space<vmem>>, vector<128x14xbf16>
    %c32 = arith.constant 32 : index
    %c0_353 = arith.constant 0 : index
    %c0_354 = arith.constant 0 : index
    %417 = vector.load %arg1[%c32, %c0_353, %c0_354] : memref<52x14x8xbf16, #tpu.memory_space<vmem>>, vector<1x14x8xbf16>
    %418 = vector.shape_cast %417 : vector<1x14x8xbf16> to vector<14x8xbf16>
    %cst_355 = arith.constant dense<0.000000e+00> : vector<128x8xf32>
    %419 = tpu.matmul %416, %418, %cst_355 {dimension_numbers = #tpu.dot_dimension_numbers<[1], [0], [0], [1], [0, 0, 1, 1], [], []>} : vector<128x14xbf16>, vector<14x8xbf16>, vector<128x8xf32> -> vector<128x8xf32>
    %c0_356 = arith.constant 0 : index
    %c0_357 = arith.constant 0 : index
    %420 = vector.load %arg3[%c0_356, %c0_357] : memref<128x1xf32, #tpu.memory_space<vmem>>, vector<128x1xf32>
    %421 = vector.broadcast %420 : vector<128x1xf32> to vector<128x8xf32>
    %422 = arith.addf %419, %421 : vector<128x8xf32>
    %cst_358 = arith.constant 0.000000e+00 : f32
    %423 = vector.broadcast %cst_358 : f32 to vector<128x8xf32>
    %424 = arith.maximumf %422, %423 : vector<128x8xf32>
    %425 = arith.truncf %424 : vector<128x8xf32> to vector<128x8xbf16>
    %c32_359 = arith.constant 32 : index
    %c0_360 = arith.constant 0 : index
    %c0_361 = arith.constant 0 : index
    %426 = vector.load %arg11[%c32_359, %c0_360, %c0_361] : memref<52x128x8xbf16, #tpu.memory_space<vmem>>, vector<1x128x8xbf16>
    %427 = vector.shape_cast %426 : vector<1x128x8xbf16> to vector<128x8xbf16>
    %428 = vector.shape_cast %425 : vector<128x8xbf16> to vector<1x128x8xbf16>
    tpu.vector_store %arg11[%c32_359, %c0_360, %c0_361], %428 {strides = array<i32>} : memref<52x128x8xbf16, #tpu.memory_space<vmem>>, vector<1x128x8xbf16>,
    %c0_362 = arith.constant 0 : index
    %c0_363 = arith.constant 0 : index
    %429 = vector.load %arg2[%c0_362, %c0_363] : memref<128x14xbf16, #tpu.memory_space<vmem>>, vector<128x14xbf16>
    %c33 = arith.constant 33 : index
    %c0_364 = arith.constant 0 : index
    %c0_365 = arith.constant 0 : index
    %430 = vector.load %arg1[%c33, %c0_364, %c0_365] : memref<52x14x8xbf16, #tpu.memory_space<vmem>>, vector<1x14x8xbf16>
    %431 = vector.shape_cast %430 : vector<1x14x8xbf16> to vector<14x8xbf16>
    %cst_366 = arith.constant dense<0.000000e+00> : vector<128x8xf32>
    %432 = tpu.matmul %429, %431, %cst_366 {dimension_numbers = #tpu.dot_dimension_numbers<[1], [0], [0], [1], [0, 0, 1, 1], [], []>} : vector<128x14xbf16>, vector<14x8xbf16>, vector<128x8xf32> -> vector<128x8xf32>
    %c0_367 = arith.constant 0 : index
    %c0_368 = arith.constant 0 : index
    %433 = vector.load %arg3[%c0_367, %c0_368] : memref<128x1xf32, #tpu.memory_space<vmem>>, vector<128x1xf32>
    %434 = vector.broadcast %433 : vector<128x1xf32> to vector<128x8xf32>
    %435 = arith.addf %432, %434 : vector<128x8xf32>
    %cst_369 = arith.constant 0.000000e+00 : f32
    %436 = vector.broadcast %cst_369 : f32 to vector<128x8xf32>
    %437 = arith.maximumf %435, %436 : vector<128x8xf32>
    %438 = arith.truncf %437 : vector<128x8xf32> to vector<128x8xbf16>
    %c33_370 = arith.constant 33 : index
    %c0_371 = arith.constant 0 : index
    %c0_372 = arith.constant 0 : index
    %439 = vector.load %arg11[%c33_370, %c0_371, %c0_372] : memref<52x128x8xbf16, #tpu.memory_space<vmem>>, vector<1x128x8xbf16>
    %440 = vector.shape_cast %439 : vector<1x128x8xbf16> to vector<128x8xbf16>
    %441 = vector.shape_cast %438 : vector<128x8xbf16> to vector<1x128x8xbf16>
    tpu.vector_store %arg11[%c33_370, %c0_371, %c0_372], %441 {strides = array<i32>} : memref<52x128x8xbf16, #tpu.memory_space<vmem>>, vector<1x128x8xbf16>,
    %c0_373 = arith.constant 0 : index
    %c0_374 = arith.constant 0 : index
    %442 = vector.load %arg2[%c0_373, %c0_374] : memref<128x14xbf16, #tpu.memory_space<vmem>>, vector<128x14xbf16>
    %c34 = arith.constant 34 : index
    %c0_375 = arith.constant 0 : index
    %c0_376 = arith.constant 0 : index
    %443 = vector.load %arg1[%c34, %c0_375, %c0_376] : memref<52x14x8xbf16, #tpu.memory_space<vmem>>, vector<1x14x8xbf16>
    %444 = vector.shape_cast %443 : vector<1x14x8xbf16> to vector<14x8xbf16>
    %cst_377 = arith.constant dense<0.000000e+00> : vector<128x8xf32>
    %445 = tpu.matmul %442, %444, %cst_377 {dimension_numbers = #tpu.dot_dimension_numbers<[1], [0], [0], [1], [0, 0, 1, 1], [], []>} : vector<128x14xbf16>, vector<14x8xbf16>, vector<128x8xf32> -> vector<128x8xf32>
    %c0_378 = arith.constant 0 : index
    %c0_379 = arith.constant 0 : index
    %446 = vector.load %arg3[%c0_378, %c0_379] : memref<128x1xf32, #tpu.memory_space<vmem>>, vector<128x1xf32>
    %447 = vector.broadcast %446 : vector<128x1xf32> to vector<128x8xf32>
    %448 = arith.addf %445, %447 : vector<128x8xf32>
    %cst_380 = arith.constant 0.000000e+00 : f32
    %449 = vector.broadcast %cst_380 : f32 to vector<128x8xf32>
    %450 = arith.maximumf %448, %449 : vector<128x8xf32>
    %451 = arith.truncf %450 : vector<128x8xf32> to vector<128x8xbf16>
    %c34_381 = arith.constant 34 : index
    %c0_382 = arith.constant 0 : index
    %c0_383 = arith.constant 0 : index
    %452 = vector.load %arg11[%c34_381, %c0_382, %c0_383] : memref<52x128x8xbf16, #tpu.memory_space<vmem>>, vector<1x128x8xbf16>
    %453 = vector.shape_cast %452 : vector<1x128x8xbf16> to vector<128x8xbf16>
    %454 = vector.shape_cast %451 : vector<128x8xbf16> to vector<1x128x8xbf16>
    tpu.vector_store %arg11[%c34_381, %c0_382, %c0_383], %454 {strides = array<i32>} : memref<52x128x8xbf16, #tpu.memory_space<vmem>>, vector<1x128x8xbf16>,
    %c0_384 = arith.constant 0 : index
    %c0_385 = arith.constant 0 : index
    %455 = vector.load %arg2[%c0_384, %c0_385] : memref<128x14xbf16, #tpu.memory_space<vmem>>, vector<128x14xbf16>
    %c35 = arith.constant 35 : index
    %c0_386 = arith.constant 0 : index
    %c0_387 = arith.constant 0 : index
    %456 = vector.load %arg1[%c35, %c0_386, %c0_387] : memref<52x14x8xbf16, #tpu.memory_space<vmem>>, vector<1x14x8xbf16>
    %457 = vector.shape_cast %456 : vector<1x14x8xbf16> to vector<14x8xbf16>
    %cst_388 = arith.constant dense<0.000000e+00> : vector<128x8xf32>
    %458 = tpu.matmul %455, %457, %cst_388 {dimension_numbers = #tpu.dot_dimension_numbers<[1], [0], [0], [1], [0, 0, 1, 1], [], []>} : vector<128x14xbf16>, vector<14x8xbf16>, vector<128x8xf32> -> vector<128x8xf32>
    %c0_389 = arith.constant 0 : index
    %c0_390 = arith.constant 0 : index
    %459 = vector.load %arg3[%c0_389, %c0_390] : memref<128x1xf32, #tpu.memory_space<vmem>>, vector<128x1xf32>
    %460 = vector.broadcast %459 : vector<128x1xf32> to vector<128x8xf32>
    %461 = arith.addf %458, %460 : vector<128x8xf32>
    %cst_391 = arith.constant 0.000000e+00 : f32
    %462 = vector.broadcast %cst_391 : f32 to vector<128x8xf32>
    %463 = arith.maximumf %461, %462 : vector<128x8xf32>
    %464 = arith.truncf %463 : vector<128x8xf32> to vector<128x8xbf16>
    %c35_392 = arith.constant 35 : index
    %c0_393 = arith.constant 0 : index
    %c0_394 = arith.constant 0 : index
    %465 = vector.load %arg11[%c35_392, %c0_393, %c0_394] : memref<52x128x8xbf16, #tpu.memory_space<vmem>>, vector<1x128x8xbf16>
    %466 = vector.shape_cast %465 : vector<1x128x8xbf16> to vector<128x8xbf16>
    %467 = vector.shape_cast %464 : vector<128x8xbf16> to vector<1x128x8xbf16>
    tpu.vector_store %arg11[%c35_392, %c0_393, %c0_394], %467 {strides = array<i32>} : memref<52x128x8xbf16, #tpu.memory_space<vmem>>, vector<1x128x8xbf16>,
    %c0_395 = arith.constant 0 : index
    %c0_396 = arith.constant 0 : index
    %468 = vector.load %arg2[%c0_395, %c0_396] : memref<128x14xbf16, #tpu.memory_space<vmem>>, vector<128x14xbf16>
    %c36 = arith.constant 36 : index
    %c0_397 = arith.constant 0 : index
    %c0_398 = arith.constant 0 : index
    %469 = vector.load %arg1[%c36, %c0_397, %c0_398] : memref<52x14x8xbf16, #tpu.memory_space<vmem>>, vector<1x14x8xbf16>
    %470 = vector.shape_cast %469 : vector<1x14x8xbf16> to vector<14x8xbf16>
    %cst_399 = arith.constant dense<0.000000e+00> : vector<128x8xf32>
    %471 = tpu.matmul %468, %470, %cst_399 {dimension_numbers = #tpu.dot_dimension_numbers<[1], [0], [0], [1], [0, 0, 1, 1], [], []>} : vector<128x14xbf16>, vector<14x8xbf16>, vector<128x8xf32> -> vector<128x8xf32>
    %c0_400 = arith.constant 0 : index
    %c0_401 = arith.constant 0 : index
    %472 = vector.load %arg3[%c0_400, %c0_401] : memref<128x1xf32, #tpu.memory_space<vmem>>, vector<128x1xf32>
    %473 = vector.broadcast %472 : vector<128x1xf32> to vector<128x8xf32>
    %474 = arith.addf %471, %473 : vector<128x8xf32>
    %cst_402 = arith.constant 0.000000e+00 : f32
    %475 = vector.broadcast %cst_402 : f32 to vector<128x8xf32>
    %476 = arith.maximumf %474, %475 : vector<128x8xf32>
    %477 = arith.truncf %476 : vector<128x8xf32> to vector<128x8xbf16>
    %c36_403 = arith.constant 36 : index
    %c0_404 = arith.constant 0 : index
    %c0_405 = arith.constant 0 : index
    %478 = vector.load %arg11[%c36_403, %c0_404, %c0_405] : memref<52x128x8xbf16, #tpu.memory_space<vmem>>, vector<1x128x8xbf16>
    %479 = vector.shape_cast %478 : vector<1x128x8xbf16> to vector<128x8xbf16>
    %480 = vector.shape_cast %477 : vector<128x8xbf16> to vector<1x128x8xbf16>
    tpu.vector_store %arg11[%c36_403, %c0_404, %c0_405], %480 {strides = array<i32>} : memref<52x128x8xbf16, #tpu.memory_space<vmem>>, vector<1x128x8xbf16>,
    %c0_406 = arith.constant 0 : index
    %c0_407 = arith.constant 0 : index
    %481 = vector.load %arg2[%c0_406, %c0_407] : memref<128x14xbf16, #tpu.memory_space<vmem>>, vector<128x14xbf16>
    %c37 = arith.constant 37 : index
    %c0_408 = arith.constant 0 : index
    %c0_409 = arith.constant 0 : index
    %482 = vector.load %arg1[%c37, %c0_408, %c0_409] : memref<52x14x8xbf16, #tpu.memory_space<vmem>>, vector<1x14x8xbf16>
    %483 = vector.shape_cast %482 : vector<1x14x8xbf16> to vector<14x8xbf16>
    %cst_410 = arith.constant dense<0.000000e+00> : vector<128x8xf32>
    %484 = tpu.matmul %481, %483, %cst_410 {dimension_numbers = #tpu.dot_dimension_numbers<[1], [0], [0], [1], [0, 0, 1, 1], [], []>} : vector<128x14xbf16>, vector<14x8xbf16>, vector<128x8xf32> -> vector<128x8xf32>
    %c0_411 = arith.constant 0 : index
    %c0_412 = arith.constant 0 : index
    %485 = vector.load %arg3[%c0_411, %c0_412] : memref<128x1xf32, #tpu.memory_space<vmem>>, vector<128x1xf32>
    %486 = vector.broadcast %485 : vector<128x1xf32> to vector<128x8xf32>
    %487 = arith.addf %484, %486 : vector<128x8xf32>
    %cst_413 = arith.constant 0.000000e+00 : f32
    %488 = vector.broadcast %cst_413 : f32 to vector<128x8xf32>
    %489 = arith.maximumf %487, %488 : vector<128x8xf32>
    %490 = arith.truncf %489 : vector<128x8xf32> to vector<128x8xbf16>
    %c37_414 = arith.constant 37 : index
    %c0_415 = arith.constant 0 : index
    %c0_416 = arith.constant 0 : index
    %491 = vector.load %arg11[%c37_414, %c0_415, %c0_416] : memref<52x128x8xbf16, #tpu.memory_space<vmem>>, vector<1x128x8xbf16>
    %492 = vector.shape_cast %491 : vector<1x128x8xbf16> to vector<128x8xbf16>
    %493 = vector.shape_cast %490 : vector<128x8xbf16> to vector<1x128x8xbf16>
    tpu.vector_store %arg11[%c37_414, %c0_415, %c0_416], %493 {strides = array<i32>} : memref<52x128x8xbf16, #tpu.memory_space<vmem>>, vector<1x128x8xbf16>,
    %c0_417 = arith.constant 0 : index
    %c0_418 = arith.constant 0 : index
    %494 = vector.load %arg2[%c0_417, %c0_418] : memref<128x14xbf16, #tpu.memory_space<vmem>>, vector<128x14xbf16>
    %c38 = arith.constant 38 : index
    %c0_419 = arith.constant 0 : index
    %c0_420 = arith.constant 0 : index
    %495 = vector.load %arg1[%c38, %c0_419, %c0_420] : memref<52x14x8xbf16, #tpu.memory_space<vmem>>, vector<1x14x8xbf16>
    %496 = vector.shape_cast %495 : vector<1x14x8xbf16> to vector<14x8xbf16>
    %cst_421 = arith.constant dense<0.000000e+00> : vector<128x8xf32>
    %497 = tpu.matmul %494, %496, %cst_421 {dimension_numbers = #tpu.dot_dimension_numbers<[1], [0], [0], [1], [0, 0, 1, 1], [], []>} : vector<128x14xbf16>, vector<14x8xbf16>, vector<128x8xf32> -> vector<128x8xf32>
    %c0_422 = arith.constant 0 : index
    %c0_423 = arith.constant 0 : index
    %498 = vector.load %arg3[%c0_422, %c0_423] : memref<128x1xf32, #tpu.memory_space<vmem>>, vector<128x1xf32>
    %499 = vector.broadcast %498 : vector<128x1xf32> to vector<128x8xf32>
    %500 = arith.addf %497, %499 : vector<128x8xf32>
    %cst_424 = arith.constant 0.000000e+00 : f32
    %501 = vector.broadcast %cst_424 : f32 to vector<128x8xf32>
    %502 = arith.maximumf %500, %501 : vector<128x8xf32>
    %503 = arith.truncf %502 : vector<128x8xf32> to vector<128x8xbf16>
    %c38_425 = arith.constant 38 : index
    %c0_426 = arith.constant 0 : index
    %c0_427 = arith.constant 0 : index
    %504 = vector.load %arg11[%c38_425, %c0_426, %c0_427] : memref<52x128x8xbf16, #tpu.memory_space<vmem>>, vector<1x128x8xbf16>
    %505 = vector.shape_cast %504 : vector<1x128x8xbf16> to vector<128x8xbf16>
    %506 = vector.shape_cast %503 : vector<128x8xbf16> to vector<1x128x8xbf16>
    tpu.vector_store %arg11[%c38_425, %c0_426, %c0_427], %506 {strides = array<i32>} : memref<52x128x8xbf16, #tpu.memory_space<vmem>>, vector<1x128x8xbf16>,
    %c0_428 = arith.constant 0 : index
    %c0_429 = arith.constant 0 : index
    %507 = vector.load %arg2[%c0_428, %c0_429] : memref<128x14xbf16, #tpu.memory_space<vmem>>, vector<128x14xbf16>
    %c39 = arith.constant 39 : index
    %c0_430 = arith.constant 0 : index
    %c0_431 = arith.constant 0 : index
    %508 = vector.load %arg1[%c39, %c0_430, %c0_431] : memref<52x14x8xbf16, #tpu.memory_space<vmem>>, vector<1x14x8xbf16>
    %509 = vector.shape_cast %508 : vector<1x14x8xbf16> to vector<14x8xbf16>
    %cst_432 = arith.constant dense<0.000000e+00> : vector<128x8xf32>
    %510 = tpu.matmul %507, %509, %cst_432 {dimension_numbers = #tpu.dot_dimension_numbers<[1], [0], [0], [1], [0, 0, 1, 1], [], []>} : vector<128x14xbf16>, vector<14x8xbf16>, vector<128x8xf32> -> vector<128x8xf32>
    %c0_433 = arith.constant 0 : index
    %c0_434 = arith.constant 0 : index
    %511 = vector.load %arg3[%c0_433, %c0_434] : memref<128x1xf32, #tpu.memory_space<vmem>>, vector<128x1xf32>
    %512 = vector.broadcast %511 : vector<128x1xf32> to vector<128x8xf32>
    %513 = arith.addf %510, %512 : vector<128x8xf32>
    %cst_435 = arith.constant 0.000000e+00 : f32
    %514 = vector.broadcast %cst_435 : f32 to vector<128x8xf32>
    %515 = arith.maximumf %513, %514 : vector<128x8xf32>
    %516 = arith.truncf %515 : vector<128x8xf32> to vector<128x8xbf16>
    %c39_436 = arith.constant 39 : index
    %c0_437 = arith.constant 0 : index
    %c0_438 = arith.constant 0 : index
    %517 = vector.load %arg11[%c39_436, %c0_437, %c0_438] : memref<52x128x8xbf16, #tpu.memory_space<vmem>>, vector<1x128x8xbf16>
    %518 = vector.shape_cast %517 : vector<1x128x8xbf16> to vector<128x8xbf16>
    %519 = vector.shape_cast %516 : vector<128x8xbf16> to vector<1x128x8xbf16>
    tpu.vector_store %arg11[%c39_436, %c0_437, %c0_438], %519 {strides = array<i32>} : memref<52x128x8xbf16, #tpu.memory_space<vmem>>, vector<1x128x8xbf16>,
    %c0_439 = arith.constant 0 : index
    %c0_440 = arith.constant 0 : index
    %520 = vector.load %arg2[%c0_439, %c0_440] : memref<128x14xbf16, #tpu.memory_space<vmem>>, vector<128x14xbf16>
    %c40 = arith.constant 40 : index
    %c0_441 = arith.constant 0 : index
    %c0_442 = arith.constant 0 : index
    %521 = vector.load %arg1[%c40, %c0_441, %c0_442] : memref<52x14x8xbf16, #tpu.memory_space<vmem>>, vector<1x14x8xbf16>
    %522 = vector.shape_cast %521 : vector<1x14x8xbf16> to vector<14x8xbf16>
    %cst_443 = arith.constant dense<0.000000e+00> : vector<128x8xf32>
    %523 = tpu.matmul %520, %522, %cst_443 {dimension_numbers = #tpu.dot_dimension_numbers<[1], [0], [0], [1], [0, 0, 1, 1], [], []>} : vector<128x14xbf16>, vector<14x8xbf16>, vector<128x8xf32> -> vector<128x8xf32>
    %c0_444 = arith.constant 0 : index
    %c0_445 = arith.constant 0 : index
    %524 = vector.load %arg3[%c0_444, %c0_445] : memref<128x1xf32, #tpu.memory_space<vmem>>, vector<128x1xf32>
    %525 = vector.broadcast %524 : vector<128x1xf32> to vector<128x8xf32>
    %526 = arith.addf %523, %525 : vector<128x8xf32>
    %cst_446 = arith.constant 0.000000e+00 : f32
    %527 = vector.broadcast %cst_446 : f32 to vector<128x8xf32>
    %528 = arith.maximumf %526, %527 : vector<128x8xf32>
    %529 = arith.truncf %528 : vector<128x8xf32> to vector<128x8xbf16>
    %c40_447 = arith.constant 40 : index
    %c0_448 = arith.constant 0 : index
    %c0_449 = arith.constant 0 : index
    %530 = vector.load %arg11[%c40_447, %c0_448, %c0_449] : memref<52x128x8xbf16, #tpu.memory_space<vmem>>, vector<1x128x8xbf16>
    %531 = vector.shape_cast %530 : vector<1x128x8xbf16> to vector<128x8xbf16>
    %532 = vector.shape_cast %529 : vector<128x8xbf16> to vector<1x128x8xbf16>
    tpu.vector_store %arg11[%c40_447, %c0_448, %c0_449], %532 {strides = array<i32>} : memref<52x128x8xbf16, #tpu.memory_space<vmem>>, vector<1x128x8xbf16>,
    %c0_450 = arith.constant 0 : index
    %c0_451 = arith.constant 0 : index
    %533 = vector.load %arg2[%c0_450, %c0_451] : memref<128x14xbf16, #tpu.memory_space<vmem>>, vector<128x14xbf16>
    %c41 = arith.constant 41 : index
    %c0_452 = arith.constant 0 : index
    %c0_453 = arith.constant 0 : index
    %534 = vector.load %arg1[%c41, %c0_452, %c0_453] : memref<52x14x8xbf16, #tpu.memory_space<vmem>>, vector<1x14x8xbf16>
    %535 = vector.shape_cast %534 : vector<1x14x8xbf16> to vector<14x8xbf16>
    %cst_454 = arith.constant dense<0.000000e+00> : vector<128x8xf32>
    %536 = tpu.matmul %533, %535, %cst_454 {dimension_numbers = #tpu.dot_dimension_numbers<[1], [0], [0], [1], [0, 0, 1, 1], [], []>} : vector<128x14xbf16>, vector<14x8xbf16>, vector<128x8xf32> -> vector<128x8xf32>
    %c0_455 = arith.constant 0 : index
    %c0_456 = arith.constant 0 : index
    %537 = vector.load %arg3[%c0_455, %c0_456] : memref<128x1xf32, #tpu.memory_space<vmem>>, vector<128x1xf32>
    %538 = vector.broadcast %537 : vector<128x1xf32> to vector<128x8xf32>
    %539 = arith.addf %536, %538 : vector<128x8xf32>
    %cst_457 = arith.constant 0.000000e+00 : f32
    %540 = vector.broadcast %cst_457 : f32 to vector<128x8xf32>
    %541 = arith.maximumf %539, %540 : vector<128x8xf32>
    %542 = arith.truncf %541 : vector<128x8xf32> to vector<128x8xbf16>
    %c41_458 = arith.constant 41 : index
    %c0_459 = arith.constant 0 : index
    %c0_460 = arith.constant 0 : index
    %543 = vector.load %arg11[%c41_458, %c0_459, %c0_460] : memref<52x128x8xbf16, #tpu.memory_space<vmem>>, vector<1x128x8xbf16>
    %544 = vector.shape_cast %543 : vector<1x128x8xbf16> to vector<128x8xbf16>
    %545 = vector.shape_cast %542 : vector<128x8xbf16> to vector<1x128x8xbf16>
    tpu.vector_store %arg11[%c41_458, %c0_459, %c0_460], %545 {strides = array<i32>} : memref<52x128x8xbf16, #tpu.memory_space<vmem>>, vector<1x128x8xbf16>,
    %c0_461 = arith.constant 0 : index
    %c0_462 = arith.constant 0 : index
    %546 = vector.load %arg2[%c0_461, %c0_462] : memref<128x14xbf16, #tpu.memory_space<vmem>>, vector<128x14xbf16>
    %c42 = arith.constant 42 : index
    %c0_463 = arith.constant 0 : index
    %c0_464 = arith.constant 0 : index
    %547 = vector.load %arg1[%c42, %c0_463, %c0_464] : memref<52x14x8xbf16, #tpu.memory_space<vmem>>, vector<1x14x8xbf16>
    %548 = vector.shape_cast %547 : vector<1x14x8xbf16> to vector<14x8xbf16>
    %cst_465 = arith.constant dense<0.000000e+00> : vector<128x8xf32>
    %549 = tpu.matmul %546, %548, %cst_465 {dimension_numbers = #tpu.dot_dimension_numbers<[1], [0], [0], [1], [0, 0, 1, 1], [], []>} : vector<128x14xbf16>, vector<14x8xbf16>, vector<128x8xf32> -> vector<128x8xf32>
    %c0_466 = arith.constant 0 : index
    %c0_467 = arith.constant 0 : index
    %550 = vector.load %arg3[%c0_466, %c0_467] : memref<128x1xf32, #tpu.memory_space<vmem>>, vector<128x1xf32>
    %551 = vector.broadcast %550 : vector<128x1xf32> to vector<128x8xf32>
    %552 = arith.addf %549, %551 : vector<128x8xf32>
    %cst_468 = arith.constant 0.000000e+00 : f32
    %553 = vector.broadcast %cst_468 : f32 to vector<128x8xf32>
    %554 = arith.maximumf %552, %553 : vector<128x8xf32>
    %555 = arith.truncf %554 : vector<128x8xf32> to vector<128x8xbf16>
    %c42_469 = arith.constant 42 : index
    %c0_470 = arith.constant 0 : index
    %c0_471 = arith.constant 0 : index
    %556 = vector.load %arg11[%c42_469, %c0_470, %c0_471] : memref<52x128x8xbf16, #tpu.memory_space<vmem>>, vector<1x128x8xbf16>
    %557 = vector.shape_cast %556 : vector<1x128x8xbf16> to vector<128x8xbf16>
    %558 = vector.shape_cast %555 : vector<128x8xbf16> to vector<1x128x8xbf16>
    tpu.vector_store %arg11[%c42_469, %c0_470, %c0_471], %558 {strides = array<i32>} : memref<52x128x8xbf16, #tpu.memory_space<vmem>>, vector<1x128x8xbf16>,
    %c0_472 = arith.constant 0 : index
    %c0_473 = arith.constant 0 : index
    %559 = vector.load %arg2[%c0_472, %c0_473] : memref<128x14xbf16, #tpu.memory_space<vmem>>, vector<128x14xbf16>
    %c43 = arith.constant 43 : index
    %c0_474 = arith.constant 0 : index
    %c0_475 = arith.constant 0 : index
    %560 = vector.load %arg1[%c43, %c0_474, %c0_475] : memref<52x14x8xbf16, #tpu.memory_space<vmem>>, vector<1x14x8xbf16>
    %561 = vector.shape_cast %560 : vector<1x14x8xbf16> to vector<14x8xbf16>
    %cst_476 = arith.constant dense<0.000000e+00> : vector<128x8xf32>
    %562 = tpu.matmul %559, %561, %cst_476 {dimension_numbers = #tpu.dot_dimension_numbers<[1], [0], [0], [1], [0, 0, 1, 1], [], []>} : vector<128x14xbf16>, vector<14x8xbf16>, vector<128x8xf32> -> vector<128x8xf32>
    %c0_477 = arith.constant 0 : index
    %c0_478 = arith.constant 0 : index
    %563 = vector.load %arg3[%c0_477, %c0_478] : memref<128x1xf32, #tpu.memory_space<vmem>>, vector<128x1xf32>
    %564 = vector.broadcast %563 : vector<128x1xf32> to vector<128x8xf32>
    %565 = arith.addf %562, %564 : vector<128x8xf32>
    %cst_479 = arith.constant 0.000000e+00 : f32
    %566 = vector.broadcast %cst_479 : f32 to vector<128x8xf32>
    %567 = arith.maximumf %565, %566 : vector<128x8xf32>
    %568 = arith.truncf %567 : vector<128x8xf32> to vector<128x8xbf16>
    %c43_480 = arith.constant 43 : index
    %c0_481 = arith.constant 0 : index
    %c0_482 = arith.constant 0 : index
    %569 = vector.load %arg11[%c43_480, %c0_481, %c0_482] : memref<52x128x8xbf16, #tpu.memory_space<vmem>>, vector<1x128x8xbf16>
    %570 = vector.shape_cast %569 : vector<1x128x8xbf16> to vector<128x8xbf16>
    %571 = vector.shape_cast %568 : vector<128x8xbf16> to vector<1x128x8xbf16>
    tpu.vector_store %arg11[%c43_480, %c0_481, %c0_482], %571 {strides = array<i32>} : memref<52x128x8xbf16, #tpu.memory_space<vmem>>, vector<1x128x8xbf16>,
    %c0_483 = arith.constant 0 : index
    %c0_484 = arith.constant 0 : index
    %572 = vector.load %arg2[%c0_483, %c0_484] : memref<128x14xbf16, #tpu.memory_space<vmem>>, vector<128x14xbf16>
    %c44 = arith.constant 44 : index
    %c0_485 = arith.constant 0 : index
    %c0_486 = arith.constant 0 : index
    %573 = vector.load %arg1[%c44, %c0_485, %c0_486] : memref<52x14x8xbf16, #tpu.memory_space<vmem>>, vector<1x14x8xbf16>
    %574 = vector.shape_cast %573 : vector<1x14x8xbf16> to vector<14x8xbf16>
    %cst_487 = arith.constant dense<0.000000e+00> : vector<128x8xf32>
    %575 = tpu.matmul %572, %574, %cst_487 {dimension_numbers = #tpu.dot_dimension_numbers<[1], [0], [0], [1], [0, 0, 1, 1], [], []>} : vector<128x14xbf16>, vector<14x8xbf16>, vector<128x8xf32> -> vector<128x8xf32>
    %c0_488 = arith.constant 0 : index
    %c0_489 = arith.constant 0 : index
    %576 = vector.load %arg3[%c0_488, %c0_489] : memref<128x1xf32, #tpu.memory_space<vmem>>, vector<128x1xf32>
    %577 = vector.broadcast %576 : vector<128x1xf32> to vector<128x8xf32>
    %578 = arith.addf %575, %577 : vector<128x8xf32>
    %cst_490 = arith.constant 0.000000e+00 : f32
    %579 = vector.broadcast %cst_490 : f32 to vector<128x8xf32>
    %580 = arith.maximumf %578, %579 : vector<128x8xf32>
    %581 = arith.truncf %580 : vector<128x8xf32> to vector<128x8xbf16>
    %c44_491 = arith.constant 44 : index
    %c0_492 = arith.constant 0 : index
    %c0_493 = arith.constant 0 : index
    %582 = vector.load %arg11[%c44_491, %c0_492, %c0_493] : memref<52x128x8xbf16, #tpu.memory_space<vmem>>, vector<1x128x8xbf16>
    %583 = vector.shape_cast %582 : vector<1x128x8xbf16> to vector<128x8xbf16>
    %584 = vector.shape_cast %581 : vector<128x8xbf16> to vector<1x128x8xbf16>
    tpu.vector_store %arg11[%c44_491, %c0_492, %c0_493], %584 {strides = array<i32>} : memref<52x128x8xbf16, #tpu.memory_space<vmem>>, vector<1x128x8xbf16>,
    %c0_494 = arith.constant 0 : index
    %c0_495 = arith.constant 0 : index
    %585 = vector.load %arg2[%c0_494, %c0_495] : memref<128x14xbf16, #tpu.memory_space<vmem>>, vector<128x14xbf16>
    %c45 = arith.constant 45 : index
    %c0_496 = arith.constant 0 : index
    %c0_497 = arith.constant 0 : index
    %586 = vector.load %arg1[%c45, %c0_496, %c0_497] : memref<52x14x8xbf16, #tpu.memory_space<vmem>>, vector<1x14x8xbf16>
    %587 = vector.shape_cast %586 : vector<1x14x8xbf16> to vector<14x8xbf16>
    %cst_498 = arith.constant dense<0.000000e+00> : vector<128x8xf32>
    %588 = tpu.matmul %585, %587, %cst_498 {dimension_numbers = #tpu.dot_dimension_numbers<[1], [0], [0], [1], [0, 0, 1, 1], [], []>} : vector<128x14xbf16>, vector<14x8xbf16>, vector<128x8xf32> -> vector<128x8xf32>
    %c0_499 = arith.constant 0 : index
    %c0_500 = arith.constant 0 : index
    %589 = vector.load %arg3[%c0_499, %c0_500] : memref<128x1xf32, #tpu.memory_space<vmem>>, vector<128x1xf32>
    %590 = vector.broadcast %589 : vector<128x1xf32> to vector<128x8xf32>
    %591 = arith.addf %588, %590 : vector<128x8xf32>
    %cst_501 = arith.constant 0.000000e+00 : f32
    %592 = vector.broadcast %cst_501 : f32 to vector<128x8xf32>
    %593 = arith.maximumf %591, %592 : vector<128x8xf32>
    %594 = arith.truncf %593 : vector<128x8xf32> to vector<128x8xbf16>
    %c45_502 = arith.constant 45 : index
    %c0_503 = arith.constant 0 : index
    %c0_504 = arith.constant 0 : index
    %595 = vector.load %arg11[%c45_502, %c0_503, %c0_504] : memref<52x128x8xbf16, #tpu.memory_space<vmem>>, vector<1x128x8xbf16>
    %596 = vector.shape_cast %595 : vector<1x128x8xbf16> to vector<128x8xbf16>
    %597 = vector.shape_cast %594 : vector<128x8xbf16> to vector<1x128x8xbf16>
    tpu.vector_store %arg11[%c45_502, %c0_503, %c0_504], %597 {strides = array<i32>} : memref<52x128x8xbf16, #tpu.memory_space<vmem>>, vector<1x128x8xbf16>,
    %c0_505 = arith.constant 0 : index
    %c0_506 = arith.constant 0 : index
    %598 = vector.load %arg2[%c0_505, %c0_506] : memref<128x14xbf16, #tpu.memory_space<vmem>>, vector<128x14xbf16>
    %c46 = arith.constant 46 : index
    %c0_507 = arith.constant 0 : index
    %c0_508 = arith.constant 0 : index
    %599 = vector.load %arg1[%c46, %c0_507, %c0_508] : memref<52x14x8xbf16, #tpu.memory_space<vmem>>, vector<1x14x8xbf16>
    %600 = vector.shape_cast %599 : vector<1x14x8xbf16> to vector<14x8xbf16>
    %cst_509 = arith.constant dense<0.000000e+00> : vector<128x8xf32>
    %601 = tpu.matmul %598, %600, %cst_509 {dimension_numbers = #tpu.dot_dimension_numbers<[1], [0], [0], [1], [0, 0, 1, 1], [], []>} : vector<128x14xbf16>, vector<14x8xbf16>, vector<128x8xf32> -> vector<128x8xf32>
    %c0_510 = arith.constant 0 : index
    %c0_511 = arith.constant 0 : index
    %602 = vector.load %arg3[%c0_510, %c0_511] : memref<128x1xf32, #tpu.memory_space<vmem>>, vector<128x1xf32>
    %603 = vector.broadcast %602 : vector<128x1xf32> to vector<128x8xf32>
    %604 = arith.addf %601, %603 : vector<128x8xf32>
    %cst_512 = arith.constant 0.000000e+00 : f32
    %605 = vector.broadcast %cst_512 : f32 to vector<128x8xf32>
    %606 = arith.maximumf %604, %605 : vector<128x8xf32>
    %607 = arith.truncf %606 : vector<128x8xf32> to vector<128x8xbf16>
    %c46_513 = arith.constant 46 : index
    %c0_514 = arith.constant 0 : index
    %c0_515 = arith.constant 0 : index
    %608 = vector.load %arg11[%c46_513, %c0_514, %c0_515] : memref<52x128x8xbf16, #tpu.memory_space<vmem>>, vector<1x128x8xbf16>
    %609 = vector.shape_cast %608 : vector<1x128x8xbf16> to vector<128x8xbf16>
    %610 = vector.shape_cast %607 : vector<128x8xbf16> to vector<1x128x8xbf16>
    tpu.vector_store %arg11[%c46_513, %c0_514, %c0_515], %610 {strides = array<i32>} : memref<52x128x8xbf16, #tpu.memory_space<vmem>>, vector<1x128x8xbf16>,
    %c0_516 = arith.constant 0 : index
    %c0_517 = arith.constant 0 : index
    %611 = vector.load %arg2[%c0_516, %c0_517] : memref<128x14xbf16, #tpu.memory_space<vmem>>, vector<128x14xbf16>
    %c47 = arith.constant 47 : index
    %c0_518 = arith.constant 0 : index
    %c0_519 = arith.constant 0 : index
    %612 = vector.load %arg1[%c47, %c0_518, %c0_519] : memref<52x14x8xbf16, #tpu.memory_space<vmem>>, vector<1x14x8xbf16>
    %613 = vector.shape_cast %612 : vector<1x14x8xbf16> to vector<14x8xbf16>
    %cst_520 = arith.constant dense<0.000000e+00> : vector<128x8xf32>
    %614 = tpu.matmul %611, %613, %cst_520 {dimension_numbers = #tpu.dot_dimension_numbers<[1], [0], [0], [1], [0, 0, 1, 1], [], []>} : vector<128x14xbf16>, vector<14x8xbf16>, vector<128x8xf32> -> vector<128x8xf32>
    %c0_521 = arith.constant 0 : index
    %c0_522 = arith.constant 0 : index
    %615 = vector.load %arg3[%c0_521, %c0_522] : memref<128x1xf32, #tpu.memory_space<vmem>>, vector<128x1xf32>
    %616 = vector.broadcast %615 : vector<128x1xf32> to vector<128x8xf32>
    %617 = arith.addf %614, %616 : vector<128x8xf32>
    %cst_523 = arith.constant 0.000000e+00 : f32
    %618 = vector.broadcast %cst_523 : f32 to vector<128x8xf32>
    %619 = arith.maximumf %617, %618 : vector<128x8xf32>
    %620 = arith.truncf %619 : vector<128x8xf32> to vector<128x8xbf16>
    %c47_524 = arith.constant 47 : index
    %c0_525 = arith.constant 0 : index
    %c0_526 = arith.constant 0 : index
    %621 = vector.load %arg11[%c47_524, %c0_525, %c0_526] : memref<52x128x8xbf16, #tpu.memory_space<vmem>>, vector<1x128x8xbf16>
    %622 = vector.shape_cast %621 : vector<1x128x8xbf16> to vector<128x8xbf16>
    %623 = vector.shape_cast %620 : vector<128x8xbf16> to vector<1x128x8xbf16>
    tpu.vector_store %arg11[%c47_524, %c0_525, %c0_526], %623 {strides = array<i32>} : memref<52x128x8xbf16, #tpu.memory_space<vmem>>, vector<1x128x8xbf16>,
    %c0_527 = arith.constant 0 : index
    %c0_528 = arith.constant 0 : index
    %624 = vector.load %arg2[%c0_527, %c0_528] : memref<128x14xbf16, #tpu.memory_space<vmem>>, vector<128x14xbf16>
    %c48 = arith.constant 48 : index
    %c0_529 = arith.constant 0 : index
    %c0_530 = arith.constant 0 : index
    %625 = vector.load %arg1[%c48, %c0_529, %c0_530] : memref<52x14x8xbf16, #tpu.memory_space<vmem>>, vector<1x14x8xbf16>
    %626 = vector.shape_cast %625 : vector<1x14x8xbf16> to vector<14x8xbf16>
    %cst_531 = arith.constant dense<0.000000e+00> : vector<128x8xf32>
    %627 = tpu.matmul %624, %626, %cst_531 {dimension_numbers = #tpu.dot_dimension_numbers<[1], [0], [0], [1], [0, 0, 1, 1], [], []>} : vector<128x14xbf16>, vector<14x8xbf16>, vector<128x8xf32> -> vector<128x8xf32>
    %c0_532 = arith.constant 0 : index
    %c0_533 = arith.constant 0 : index
    %628 = vector.load %arg3[%c0_532, %c0_533] : memref<128x1xf32, #tpu.memory_space<vmem>>, vector<128x1xf32>
    %629 = vector.broadcast %628 : vector<128x1xf32> to vector<128x8xf32>
    %630 = arith.addf %627, %629 : vector<128x8xf32>
    %cst_534 = arith.constant 0.000000e+00 : f32
    %631 = vector.broadcast %cst_534 : f32 to vector<128x8xf32>
    %632 = arith.maximumf %630, %631 : vector<128x8xf32>
    %633 = arith.truncf %632 : vector<128x8xf32> to vector<128x8xbf16>
    %c48_535 = arith.constant 48 : index
    %c0_536 = arith.constant 0 : index
    %c0_537 = arith.constant 0 : index
    %634 = vector.load %arg11[%c48_535, %c0_536, %c0_537] : memref<52x128x8xbf16, #tpu.memory_space<vmem>>, vector<1x128x8xbf16>
    %635 = vector.shape_cast %634 : vector<1x128x8xbf16> to vector<128x8xbf16>
    %636 = vector.shape_cast %633 : vector<128x8xbf16> to vector<1x128x8xbf16>
    tpu.vector_store %arg11[%c48_535, %c0_536, %c0_537], %636 {strides = array<i32>} : memref<52x128x8xbf16, #tpu.memory_space<vmem>>, vector<1x128x8xbf16>,
    %c0_538 = arith.constant 0 : index
    %c0_539 = arith.constant 0 : index
    %637 = vector.load %arg2[%c0_538, %c0_539] : memref<128x14xbf16, #tpu.memory_space<vmem>>, vector<128x14xbf16>
    %c49 = arith.constant 49 : index
    %c0_540 = arith.constant 0 : index
    %c0_541 = arith.constant 0 : index
    %638 = vector.load %arg1[%c49, %c0_540, %c0_541] : memref<52x14x8xbf16, #tpu.memory_space<vmem>>, vector<1x14x8xbf16>
    %639 = vector.shape_cast %638 : vector<1x14x8xbf16> to vector<14x8xbf16>
    %cst_542 = arith.constant dense<0.000000e+00> : vector<128x8xf32>
    %640 = tpu.matmul %637, %639, %cst_542 {dimension_numbers = #tpu.dot_dimension_numbers<[1], [0], [0], [1], [0, 0, 1, 1], [], []>} : vector<128x14xbf16>, vector<14x8xbf16>, vector<128x8xf32> -> vector<128x8xf32>
    %c0_543 = arith.constant 0 : index
    %c0_544 = arith.constant 0 : index
    %641 = vector.load %arg3[%c0_543, %c0_544] : memref<128x1xf32, #tpu.memory_space<vmem>>, vector<128x1xf32>
    %642 = vector.broadcast %641 : vector<128x1xf32> to vector<128x8xf32>
    %643 = arith.addf %640, %642 : vector<128x8xf32>
    %cst_545 = arith.constant 0.000000e+00 : f32
    %644 = vector.broadcast %cst_545 : f32 to vector<128x8xf32>
    %645 = arith.maximumf %643, %644 : vector<128x8xf32>
    %646 = arith.truncf %645 : vector<128x8xf32> to vector<128x8xbf16>
    %c49_546 = arith.constant 49 : index
    %c0_547 = arith.constant 0 : index
    %c0_548 = arith.constant 0 : index
    %647 = vector.load %arg11[%c49_546, %c0_547, %c0_548] : memref<52x128x8xbf16, #tpu.memory_space<vmem>>, vector<1x128x8xbf16>
    %648 = vector.shape_cast %647 : vector<1x128x8xbf16> to vector<128x8xbf16>
    %649 = vector.shape_cast %646 : vector<128x8xbf16> to vector<1x128x8xbf16>
    tpu.vector_store %arg11[%c49_546, %c0_547, %c0_548], %649 {strides = array<i32>} : memref<52x128x8xbf16, #tpu.memory_space<vmem>>, vector<1x128x8xbf16>,
    %c0_549 = arith.constant 0 : index
    %c0_550 = arith.constant 0 : index
    %650 = vector.load %arg2[%c0_549, %c0_550] : memref<128x14xbf16, #tpu.memory_space<vmem>>, vector<128x14xbf16>
    %c50 = arith.constant 50 : index
    %c0_551 = arith.constant 0 : index
    %c0_552 = arith.constant 0 : index
    %651 = vector.load %arg1[%c50, %c0_551, %c0_552] : memref<52x14x8xbf16, #tpu.memory_space<vmem>>, vector<1x14x8xbf16>
    %652 = vector.shape_cast %651 : vector<1x14x8xbf16> to vector<14x8xbf16>
    %cst_553 = arith.constant dense<0.000000e+00> : vector<128x8xf32>
    %653 = tpu.matmul %650, %652, %cst_553 {dimension_numbers = #tpu.dot_dimension_numbers<[1], [0], [0], [1], [0, 0, 1, 1], [], []>} : vector<128x14xbf16>, vector<14x8xbf16>, vector<128x8xf32> -> vector<128x8xf32>
    %c0_554 = arith.constant 0 : index
    %c0_555 = arith.constant 0 : index
    %654 = vector.load %arg3[%c0_554, %c0_555] : memref<128x1xf32, #tpu.memory_space<vmem>>, vector<128x1xf32>
    %655 = vector.broadcast %654 : vector<128x1xf32> to vector<128x8xf32>
    %656 = arith.addf %653, %655 : vector<128x8xf32>
    %cst_556 = arith.constant 0.000000e+00 : f32
    %657 = vector.broadcast %cst_556 : f32 to vector<128x8xf32>
    %658 = arith.maximumf %656, %657 : vector<128x8xf32>
    %659 = arith.truncf %658 : vector<128x8xf32> to vector<128x8xbf16>
    %c50_557 = arith.constant 50 : index
    %c0_558 = arith.constant 0 : index
    %c0_559 = arith.constant 0 : index
    %660 = vector.load %arg11[%c50_557, %c0_558, %c0_559] : memref<52x128x8xbf16, #tpu.memory_space<vmem>>, vector<1x128x8xbf16>
    %661 = vector.shape_cast %660 : vector<1x128x8xbf16> to vector<128x8xbf16>
    %662 = vector.shape_cast %659 : vector<128x8xbf16> to vector<1x128x8xbf16>
    tpu.vector_store %arg11[%c50_557, %c0_558, %c0_559], %662 {strides = array<i32>} : memref<52x128x8xbf16, #tpu.memory_space<vmem>>, vector<1x128x8xbf16>,
    %c0_560 = arith.constant 0 : index
    %c0_561 = arith.constant 0 : index
    %663 = vector.load %arg2[%c0_560, %c0_561] : memref<128x14xbf16, #tpu.memory_space<vmem>>, vector<128x14xbf16>
    %c51 = arith.constant 51 : index
    %c0_562 = arith.constant 0 : index
    %c0_563 = arith.constant 0 : index
    %664 = vector.load %arg1[%c51, %c0_562, %c0_563] : memref<52x14x8xbf16, #tpu.memory_space<vmem>>, vector<1x14x8xbf16>
    %665 = vector.shape_cast %664 : vector<1x14x8xbf16> to vector<14x8xbf16>
    %cst_564 = arith.constant dense<0.000000e+00> : vector<128x8xf32>
    %666 = tpu.matmul %663, %665, %cst_564 {dimension_numbers = #tpu.dot_dimension_numbers<[1], [0], [0], [1], [0, 0, 1, 1], [], []>} : vector<128x14xbf16>, vector<14x8xbf16>, vector<128x8xf32> -> vector<128x8xf32>
    %c0_565 = arith.constant 0 : index
    %c0_566 = arith.constant 0 : index
    %667 = vector.load %arg3[%c0_565, %c0_566] : memref<128x1xf32, #tpu.memory_space<vmem>>, vector<128x1xf32>
    %668 = vector.broadcast %667 : vector<128x1xf32> to vector<128x8xf32>
    %669 = arith.addf %666, %668 : vector<128x8xf32>
    %cst_567 = arith.constant 0.000000e+00 : f32
    %670 = vector.broadcast %cst_567 : f32 to vector<128x8xf32>
    %671 = arith.maximumf %669, %670 : vector<128x8xf32>
    %672 = arith.truncf %671 : vector<128x8xf32> to vector<128x8xbf16>
    %c51_568 = arith.constant 51 : index
    %c0_569 = arith.constant 0 : index
    %c0_570 = arith.constant 0 : index
    %673 = vector.load %arg11[%c51_568, %c0_569, %c0_570] : memref<52x128x8xbf16, #tpu.memory_space<vmem>>, vector<1x128x8xbf16>
    %674 = vector.shape_cast %673 : vector<1x128x8xbf16> to vector<128x8xbf16>
    %675 = vector.shape_cast %672 : vector<128x8xbf16> to vector<1x128x8xbf16>
    tpu.vector_store %arg11[%c51_568, %c0_569, %c0_570], %675 {strides = array<i32>} : memref<52x128x8xbf16, #tpu.memory_space<vmem>>, vector<1x128x8xbf16>,
    %c0_571 = arith.constant 0 : index
    %c0_572 = arith.constant 0 : index
    %c0_573 = arith.constant 0 : index
    %676 = vector.load %arg11[%c0_571, %c0_572, %c0_573] : memref<52x128x8xbf16, #tpu.memory_space<vmem>>, vector<52x128x8xbf16>
    %677 = vector.shape_cast %676 : vector<52x128x8xbf16> to vector<52x1024xbf16>
    %c0_574 = arith.constant 0 : index
    %c0_575 = arith.constant 0 : index
    %678 = vector.load %arg4[%c0_574, %c0_575] : memref<52x52xbf16, #tpu.memory_space<vmem>>, vector<52x52xbf16>
    %cst_576 = arith.constant dense<0.000000e+00> : vector<52x1024xf32>
    %679 = tpu.matmul %678, %677, %cst_576 {dimension_numbers = #tpu.dot_dimension_numbers<[1], [0], [0], [1], [0, 0, 1, 1], [], []>} : vector<52x52xbf16>, vector<52x1024xbf16>, vector<52x1024xf32> -> vector<52x1024xf32>
    %c0_577 = arith.constant 0 : index
    %c0_578 = arith.constant 0 : index
    %680 = vector.load %arg5[%c0_577, %c0_578] : memref<52x1xf32, #tpu.memory_space<vmem>>, vector<52x1xf32>
    %681 = vector.broadcast %680 : vector<52x1xf32> to vector<52x1024xf32>
    %682 = arith.addf %679, %681 : vector<52x1024xf32>
    %cst_579 = arith.constant 0.000000e+00 : f32
    %683 = vector.broadcast %cst_579 : f32 to vector<52x1024xf32>
    %684 = arith.maximumf %682, %683 : vector<52x1024xf32>
    %685 = arith.truncf %684 : vector<52x1024xf32> to vector<52x1024xbf16>
    %686 = vector.shape_cast %685 : vector<52x1024xbf16> to vector<6656x8xbf16>
    %c0_580 = arith.constant 0 : index
    %c0_581 = arith.constant 0 : index
    %687 = vector.load %arg6[%c0_580, %c0_581] : memref<64x6656xbf16, #tpu.memory_space<vmem>>, vector<64x6656xbf16>
    %cst_582 = arith.constant dense<0.000000e+00> : vector<64x8xf32>
    %688 = tpu.matmul %687, %686, %cst_582 {dimension_numbers = #tpu.dot_dimension_numbers<[1], [0], [0], [1], [0, 0, 1, 1], [], []>} : vector<64x6656xbf16>, vector<6656x8xbf16>, vector<64x8xf32> -> vector<64x8xf32>
    %c0_583 = arith.constant 0 : index
    %c0_584 = arith.constant 0 : index
    %689 = vector.load %arg7[%c0_583, %c0_584] : memref<64x1xf32, #tpu.memory_space<vmem>>, vector<64x1xf32>
    %690 = vector.broadcast %689 : vector<64x1xf32> to vector<64x8xf32>
    %691 = arith.addf %688, %690 : vector<64x8xf32>
    %cst_585 = arith.constant 0.000000e+00 : f32
    %692 = vector.broadcast %cst_585 : f32 to vector<64x8xf32>
    %693 = arith.maximumf %691, %692 : vector<64x8xf32>
    %694 = arith.truncf %693 : vector<64x8xf32> to vector<64x8xbf16>
    %c0_586 = arith.constant 0 : index
    %c0_587 = arith.constant 0 : index
    %695 = vector.load %arg8[%c0_586, %c0_587] : memref<8x64xbf16, #tpu.memory_space<vmem>>, vector<8x64xbf16>
    %cst_588 = arith.constant dense<0.000000e+00> : vector<8x8xf32>
    %696 = tpu.matmul %695, %694, %cst_588 {dimension_numbers = #tpu.dot_dimension_numbers<[1], [0], [0], [1], [0, 0, 1, 1], [], []>} : vector<8x64xbf16>, vector<64x8xbf16>, vector<8x8xf32> -> vector<8x8xf32>
    %c0_589 = arith.constant 0 : index
    %c0_590 = arith.constant 0 : index
    %697 = vector.load %arg9[%c0_589, %c0_590] : memref<8x1xf32, #tpu.memory_space<vmem>>, vector<8x1xf32>
    %698 = vector.broadcast %697 : vector<8x1xf32> to vector<8x8xf32>
    %699 = arith.addf %696, %698 : vector<8x8xf32>
    %c0_591 = arith.constant 0 : index
    %c0_592 = arith.constant 0 : index
    %700 = vector.load %arg10[%c0_591, %c0_592] : memref<8x8xf32, #tpu.memory_space<vmem>>, vector<8x8xf32>
    tpu.vector_store %arg10[%c0_591, %c0_592], %699 {strides = array<i32>} : memref<8x8xf32, #tpu.memory_space<vmem>>, vector<8x8xf32>,
    return
  }
  func.func @transform_0(%arg0: i32) -> (i32, i32, i32) {
    %c0_i32 = arith.constant 0 : i32
    %c0_i32_0 = arith.constant 0 : i32
    %c0_i32_1 = arith.constant 0 : i32
    return %c0_i32, %c0_i32_0, %arg0 : i32, i32, i32
  }
  func.func @transform_1(%arg0: i32) -> (i32, i32) {
    %c0_i32 = arith.constant 0 : i32
    %c0_i32_0 = arith.constant 0 : i32
    %c0_i32_1 = arith.constant 0 : i32
    return %c0_i32, %c0_i32_0 : i32, i32
  }
  func.func @transform_2(%arg0: i32) -> (i32, i32) {
    %c0_i32 = arith.constant 0 : i32
    %c0_i32_0 = arith.constant 0 : i32
    %c0_i32_1 = arith.constant 0 : i32
    return %c0_i32, %c0_i32_0 : i32, i32
  }
  func.func @transform_3(%arg0: i32) -> (i32, i32) {
    %c0_i32 = arith.constant 0 : i32
    %c0_i32_0 = arith.constant 0 : i32
    %c0_i32_1 = arith.constant 0 : i32
    return %c0_i32, %c0_i32_0 : i32, i32
  }
  func.func @transform_4(%arg0: i32) -> (i32, i32) {
    %c0_i32 = arith.constant 0 : i32
    %c0_i32_0 = arith.constant 0 : i32
    %c0_i32_1 = arith.constant 0 : i32
    return %c0_i32, %c0_i32_0 : i32, i32
  }
  func.func @transform_5(%arg0: i32) -> (i32, i32) {
    %c0_i32 = arith.constant 0 : i32
    %c0_i32_0 = arith.constant 0 : i32
    %c0_i32_1 = arith.constant 0 : i32
    return %c0_i32, %c0_i32_0 : i32, i32
  }
  func.func @transform_6(%arg0: i32) -> (i32, i32) {
    %c0_i32 = arith.constant 0 : i32
    %c0_i32_0 = arith.constant 0 : i32
    %c0_i32_1 = arith.constant 0 : i32
    return %c0_i32, %c0_i32_0 : i32, i32
  }
  func.func @transform_7(%arg0: i32) -> (i32, i32) {
    %c0_i32 = arith.constant 0 : i32
    %c0_i32_0 = arith.constant 0 : i32
    %c0_i32_1 = arith.constant 0 : i32
    return %c0_i32, %c0_i32_0 : i32, i32
  }
  func.func @transform_8(%arg0: i32) -> (i32, i32) {
    %c0_i32 = arith.constant 0 : i32
    %c0_i32_0 = arith.constant 0 : i32
    %c0_i32_1 = arith.constant 0 : i32
    return %c0_i32, %c0_i32_0 : i32, i32
  }
  func.func @transform_9(%arg0: i32) -> (i32, i32) {
    %c0_i32 = arith.constant 0 : i32
    %c0_i32_0 = arith.constant 0 : i32
    return %c0_i32, %arg0 : i32, i32
  }
}

module attributes {stable_mosaic.version = 11 : i64} {
  func.func @_conv_kernel(%arg0: i32, %arg1: memref<52x1024xbf16, #tpu.memory_space<vmem>>, %arg2: memref<52x52xbf16, #tpu.memory_space<vmem>>, %arg3: memref<52x1xf32, #tpu.memory_space<vmem>>, %arg4: memref<52x1024xbf16, #tpu.memory_space<vmem>>) attributes {dimension_semantics = [#tpu.dimension_semantics<parallel>], iteration_bounds = array<i64: 1>, scalar_prefetch = 0 : i64, scratch_operands = 0 : i64, tpu.core_type = #tpu.core_type<tc>, window_params = [{transform_indices = @transform_0, window_bounds = array<i64: 52, 1024>}, {pipeline_mode = #tpu.pipeline_mode<synchronous>, transform_indices = @transform_1, window_bounds = array<i64: 52, 52>}, {pipeline_mode = #tpu.pipeline_mode<synchronous>, transform_indices = @transform_2, window_bounds = array<i64: 52, 1>}, {transform_indices = @transform_3, window_bounds = array<i64: 52, 1024>}]} {
    %c0 = arith.constant 0 : index
    %c0_0 = arith.constant 0 : index
    %0 = vector.load %arg2[%c0, %c0_0] : memref<52x52xbf16, #tpu.memory_space<vmem>>, vector<52x52xbf16>
    %c0_1 = arith.constant 0 : index
    %c0_2 = arith.constant 0 : index
    %1 = vector.load %arg1[%c0_1, %c0_2] : memref<52x1024xbf16, #tpu.memory_space<vmem>>, vector<52x1024xbf16>
    %cst = arith.constant dense<0.000000e+00> : vector<52x1024xf32>
    %2 = tpu.matmul %0, %1, %cst {dimension_numbers = #tpu.dot_dimension_numbers<[1], [0], [0], [1], [0, 0, 1, 1], [], []>} : vector<52x52xbf16>, vector<52x1024xbf16>, vector<52x1024xf32> -> vector<52x1024xf32>
    %c0_3 = arith.constant 0 : index
    %c0_4 = arith.constant 0 : index
    %3 = vector.load %arg3[%c0_3, %c0_4] : memref<52x1xf32, #tpu.memory_space<vmem>>, vector<52x1xf32>
    %4 = vector.broadcast %3 : vector<52x1xf32> to vector<52x1024xf32>
    %5 = arith.addf %2, %4 : vector<52x1024xf32>
    %cst_5 = arith.constant 0.000000e+00 : f32
    %6 = vector.broadcast %cst_5 : f32 to vector<52x1024xf32>
    %7 = arith.maximumf %5, %6 : vector<52x1024xf32>
    %8 = arith.truncf %7 : vector<52x1024xf32> to vector<52x1024xbf16>
    %c0_6 = arith.constant 0 : index
    %c0_7 = arith.constant 0 : index
    %9 = vector.load %arg4[%c0_6, %c0_7] : memref<52x1024xbf16, #tpu.memory_space<vmem>>, vector<52x1024xbf16>
    tpu.vector_store %arg4[%c0_6, %c0_7], %8 {strides = array<i32>} : memref<52x1024xbf16, #tpu.memory_space<vmem>>, vector<52x1024xbf16>,
    return
  }
  func.func @transform_0(%arg0: i32) -> (i32, i32) {
    %c0_i32 = arith.constant 0 : i32
    %c0_i32_0 = arith.constant 0 : i32
    return %c0_i32, %arg0 : i32, i32
  }
  func.func @transform_1(%arg0: i32) -> (i32, i32) {
    %c0_i32 = arith.constant 0 : i32
    %c0_i32_0 = arith.constant 0 : i32
    %c0_i32_1 = arith.constant 0 : i32
    return %c0_i32, %c0_i32_0 : i32, i32
  }
  func.func @transform_2(%arg0: i32) -> (i32, i32) {
    %c0_i32 = arith.constant 0 : i32
    %c0_i32_0 = arith.constant 0 : i32
    %c0_i32_1 = arith.constant 0 : i32
    return %c0_i32, %c0_i32_0 : i32, i32
  }
  func.func @transform_3(%arg0: i32) -> (i32, i32) {
    %c0_i32 = arith.constant 0 : i32
    %c0_i32_0 = arith.constant 0 : i32
    return %c0_i32, %arg0 : i32, i32
  }
}

module attributes {stable_mosaic.version = 11 : i64} {
  func.func @_gnn_kernel(%arg0: i32, %arg1: memref<52x8x14xbf16, #tpu.memory_space<vmem>>, %arg2: memref<14x128xbf16, #tpu.memory_space<vmem>>, %arg3: memref<1x128xf32, #tpu.memory_space<vmem>>, %arg4: memref<52x8x128xbf16, #tpu.memory_space<vmem>>) attributes {dimension_semantics = [#tpu.dimension_semantics<parallel>], iteration_bounds = array<i64: 1>, scalar_prefetch = 0 : i64, scratch_operands = 0 : i64, tpu.core_type = #tpu.core_type<tc>, window_params = [{transform_indices = @transform_0, window_bounds = array<i64: 52, 8, 14>}, {pipeline_mode = #tpu.pipeline_mode<synchronous>, transform_indices = @transform_1, window_bounds = array<i64: 14, 128>}, {pipeline_mode = #tpu.pipeline_mode<synchronous>, transform_indices = @transform_2, window_bounds = array<i64: 1, 128>}, {transform_indices = @transform_3, window_bounds = array<i64: 52, 8, 128>}]} {
    %c0 = arith.constant 0 : index
    %c0_0 = arith.constant 0 : index
    %c0_1 = arith.constant 0 : index
    %0 = vector.load %arg1[%c0, %c0_0, %c0_1] : memref<52x8x14xbf16, #tpu.memory_space<vmem>>, vector<52x8x14xbf16>
    %1 = vector.shape_cast %0 : vector<52x8x14xbf16> to vector<416x14xbf16>
    %c0_2 = arith.constant 0 : index
    %c0_3 = arith.constant 0 : index
    %2 = vector.load %arg2[%c0_2, %c0_3] : memref<14x128xbf16, #tpu.memory_space<vmem>>, vector<14x128xbf16>
    %cst = arith.constant dense<0.000000e+00> : vector<416x128xf32>
    %3 = tpu.matmul %1, %2, %cst {dimension_numbers = #tpu.dot_dimension_numbers<[1], [0], [0], [1], [0, 0, 1, 1], [], []>} : vector<416x14xbf16>, vector<14x128xbf16>, vector<416x128xf32> -> vector<416x128xf32>
    %c0_4 = arith.constant 0 : index
    %c0_5 = arith.constant 0 : index
    %4 = vector.load %arg3[%c0_4, %c0_5] : memref<1x128xf32, #tpu.memory_space<vmem>>, vector<1x128xf32>
    %5 = vector.broadcast %4 : vector<1x128xf32> to vector<416x128xf32>
    %6 = arith.addf %3, %5 : vector<416x128xf32>
    %cst_6 = arith.constant 0.000000e+00 : f32
    %7 = vector.broadcast %cst_6 : f32 to vector<416x128xf32>
    %8 = arith.maximumf %6, %7 : vector<416x128xf32>
    %9 = arith.truncf %8 : vector<416x128xf32> to vector<416x128xbf16>
    %10 = vector.shape_cast %9 : vector<416x128xbf16> to vector<52x8x128xbf16>
    %c0_7 = arith.constant 0 : index
    %c0_8 = arith.constant 0 : index
    %c0_9 = arith.constant 0 : index
    %11 = vector.load %arg4[%c0_7, %c0_8, %c0_9] : memref<52x8x128xbf16, #tpu.memory_space<vmem>>, vector<52x8x128xbf16>
    tpu.vector_store %arg4[%c0_7, %c0_8, %c0_9], %10 {strides = array<i32>} : memref<52x8x128xbf16, #tpu.memory_space<vmem>>, vector<52x8x128xbf16>,
    return
  }
  func.func @transform_0(%arg0: i32) -> (i32, i32, i32) {
    %c0_i32 = arith.constant 0 : i32
    %c0_i32_0 = arith.constant 0 : i32
    %c0_i32_1 = arith.constant 0 : i32
    return %c0_i32, %arg0, %c0_i32_0 : i32, i32, i32
  }
  func.func @transform_1(%arg0: i32) -> (i32, i32) {
    %c0_i32 = arith.constant 0 : i32
    %c0_i32_0 = arith.constant 0 : i32
    %c0_i32_1 = arith.constant 0 : i32
    return %c0_i32, %c0_i32_0 : i32, i32
  }
  func.func @transform_2(%arg0: i32) -> (i32, i32) {
    %c0_i32 = arith.constant 0 : i32
    %c0_i32_0 = arith.constant 0 : i32
    %c0_i32_1 = arith.constant 0 : i32
    return %c0_i32, %c0_i32_0 : i32, i32
  }
  func.func @transform_3(%arg0: i32) -> (i32, i32, i32) {
    %c0_i32 = arith.constant 0 : i32
    %c0_i32_0 = arith.constant 0 : i32
    %c0_i32_1 = arith.constant 0 : i32
    return %c0_i32, %arg0, %c0_i32_0 : i32, i32, i32
  }
}

module attributes {stable_mosaic.version = 11 : i64} {
  func.func @_head_kernel(%arg0: i32, %arg1: memref<52x8x128xbf16, #tpu.memory_space<vmem>>, %arg2: memref<52x128x64xbf16, #tpu.memory_space<vmem>>, %arg3: memref<1x64xf32, #tpu.memory_space<vmem>>, %arg4: memref<64x128xbf16, #tpu.memory_space<vmem>>, %arg5: memref<1x128xf32, #tpu.memory_space<vmem>>, %arg6: memref<8x128xf32, #tpu.memory_space<vmem>>) attributes {dimension_semantics = [#tpu.dimension_semantics<parallel>], iteration_bounds = array<i64: 1>, scalar_prefetch = 0 : i64, scratch_operands = 0 : i64, tpu.core_type = #tpu.core_type<tc>, window_params = [{transform_indices = @transform_0, window_bounds = array<i64: 52, 8, 128>}, {pipeline_mode = #tpu.pipeline_mode<synchronous>, transform_indices = @transform_1, window_bounds = array<i64: 52, 128, 64>}, {pipeline_mode = #tpu.pipeline_mode<synchronous>, transform_indices = @transform_2, window_bounds = array<i64: 1, 64>}, {pipeline_mode = #tpu.pipeline_mode<synchronous>, transform_indices = @transform_3, window_bounds = array<i64: 64, 128>}, {pipeline_mode = #tpu.pipeline_mode<synchronous>, transform_indices = @transform_4, window_bounds = array<i64: 1, 128>}, {transform_indices = @transform_5, window_bounds = array<i64: 8, 128>}]} {
    %c0 = arith.constant 0 : index
    %c0_0 = arith.constant 0 : index
    %c0_1 = arith.constant 0 : index
    %0 = vector.load %arg1[%c0, %c0_0, %c0_1] : memref<52x8x128xbf16, #tpu.memory_space<vmem>>, vector<1x8x128xbf16>
    %1 = vector.shape_cast %0 : vector<1x8x128xbf16> to vector<8x128xbf16>
    %c0_2 = arith.constant 0 : index
    %c0_3 = arith.constant 0 : index
    %c0_4 = arith.constant 0 : index
    %2 = vector.load %arg2[%c0_2, %c0_3, %c0_4] : memref<52x128x64xbf16, #tpu.memory_space<vmem>>, vector<1x128x64xbf16>
    %3 = vector.shape_cast %2 : vector<1x128x64xbf16> to vector<128x64xbf16>
    %cst = arith.constant dense<0.000000e+00> : vector<8x64xf32>
    %4 = tpu.matmul %1, %3, %cst {dimension_numbers = #tpu.dot_dimension_numbers<[1], [0], [0], [1], [0, 0, 1, 1], [], []>} : vector<8x128xbf16>, vector<128x64xbf16>, vector<8x64xf32> -> vector<8x64xf32>
    %c1 = arith.constant 1 : index
    %c0_5 = arith.constant 0 : index
    %c0_6 = arith.constant 0 : index
    %5 = vector.load %arg1[%c1, %c0_5, %c0_6] : memref<52x8x128xbf16, #tpu.memory_space<vmem>>, vector<1x8x128xbf16>
    %6 = vector.shape_cast %5 : vector<1x8x128xbf16> to vector<8x128xbf16>
    %c1_7 = arith.constant 1 : index
    %c0_8 = arith.constant 0 : index
    %c0_9 = arith.constant 0 : index
    %7 = vector.load %arg2[%c1_7, %c0_8, %c0_9] : memref<52x128x64xbf16, #tpu.memory_space<vmem>>, vector<1x128x64xbf16>
    %8 = vector.shape_cast %7 : vector<1x128x64xbf16> to vector<128x64xbf16>
    %cst_10 = arith.constant dense<0.000000e+00> : vector<8x64xf32>
    %9 = tpu.matmul %6, %8, %cst_10 {dimension_numbers = #tpu.dot_dimension_numbers<[1], [0], [0], [1], [0, 0, 1, 1], [], []>} : vector<8x128xbf16>, vector<128x64xbf16>, vector<8x64xf32> -> vector<8x64xf32>
    %10 = arith.addf %4, %9 : vector<8x64xf32>
    %c2 = arith.constant 2 : index
    %c0_11 = arith.constant 0 : index
    %c0_12 = arith.constant 0 : index
    %11 = vector.load %arg1[%c2, %c0_11, %c0_12] : memref<52x8x128xbf16, #tpu.memory_space<vmem>>, vector<1x8x128xbf16>
    %12 = vector.shape_cast %11 : vector<1x8x128xbf16> to vector<8x128xbf16>
    %c2_13 = arith.constant 2 : index
    %c0_14 = arith.constant 0 : index
    %c0_15 = arith.constant 0 : index
    %13 = vector.load %arg2[%c2_13, %c0_14, %c0_15] : memref<52x128x64xbf16, #tpu.memory_space<vmem>>, vector<1x128x64xbf16>
    %14 = vector.shape_cast %13 : vector<1x128x64xbf16> to vector<128x64xbf16>
    %cst_16 = arith.constant dense<0.000000e+00> : vector<8x64xf32>
    %15 = tpu.matmul %12, %14, %cst_16 {dimension_numbers = #tpu.dot_dimension_numbers<[1], [0], [0], [1], [0, 0, 1, 1], [], []>} : vector<8x128xbf16>, vector<128x64xbf16>, vector<8x64xf32> -> vector<8x64xf32>
    %16 = arith.addf %10, %15 : vector<8x64xf32>
    %c3 = arith.constant 3 : index
    %c0_17 = arith.constant 0 : index
    %c0_18 = arith.constant 0 : index
    %17 = vector.load %arg1[%c3, %c0_17, %c0_18] : memref<52x8x128xbf16, #tpu.memory_space<vmem>>, vector<1x8x128xbf16>
    %18 = vector.shape_cast %17 : vector<1x8x128xbf16> to vector<8x128xbf16>
    %c3_19 = arith.constant 3 : index
    %c0_20 = arith.constant 0 : index
    %c0_21 = arith.constant 0 : index
    %19 = vector.load %arg2[%c3_19, %c0_20, %c0_21] : memref<52x128x64xbf16, #tpu.memory_space<vmem>>, vector<1x128x64xbf16>
    %20 = vector.shape_cast %19 : vector<1x128x64xbf16> to vector<128x64xbf16>
    %cst_22 = arith.constant dense<0.000000e+00> : vector<8x64xf32>
    %21 = tpu.matmul %18, %20, %cst_22 {dimension_numbers = #tpu.dot_dimension_numbers<[1], [0], [0], [1], [0, 0, 1, 1], [], []>} : vector<8x128xbf16>, vector<128x64xbf16>, vector<8x64xf32> -> vector<8x64xf32>
    %22 = arith.addf %16, %21 : vector<8x64xf32>
    %c4 = arith.constant 4 : index
    %c0_23 = arith.constant 0 : index
    %c0_24 = arith.constant 0 : index
    %23 = vector.load %arg1[%c4, %c0_23, %c0_24] : memref<52x8x128xbf16, #tpu.memory_space<vmem>>, vector<1x8x128xbf16>
    %24 = vector.shape_cast %23 : vector<1x8x128xbf16> to vector<8x128xbf16>
    %c4_25 = arith.constant 4 : index
    %c0_26 = arith.constant 0 : index
    %c0_27 = arith.constant 0 : index
    %25 = vector.load %arg2[%c4_25, %c0_26, %c0_27] : memref<52x128x64xbf16, #tpu.memory_space<vmem>>, vector<1x128x64xbf16>
    %26 = vector.shape_cast %25 : vector<1x128x64xbf16> to vector<128x64xbf16>
    %cst_28 = arith.constant dense<0.000000e+00> : vector<8x64xf32>
    %27 = tpu.matmul %24, %26, %cst_28 {dimension_numbers = #tpu.dot_dimension_numbers<[1], [0], [0], [1], [0, 0, 1, 1], [], []>} : vector<8x128xbf16>, vector<128x64xbf16>, vector<8x64xf32> -> vector<8x64xf32>
    %28 = arith.addf %22, %27 : vector<8x64xf32>
    %c5 = arith.constant 5 : index
    %c0_29 = arith.constant 0 : index
    %c0_30 = arith.constant 0 : index
    %29 = vector.load %arg1[%c5, %c0_29, %c0_30] : memref<52x8x128xbf16, #tpu.memory_space<vmem>>, vector<1x8x128xbf16>
    %30 = vector.shape_cast %29 : vector<1x8x128xbf16> to vector<8x128xbf16>
    %c5_31 = arith.constant 5 : index
    %c0_32 = arith.constant 0 : index
    %c0_33 = arith.constant 0 : index
    %31 = vector.load %arg2[%c5_31, %c0_32, %c0_33] : memref<52x128x64xbf16, #tpu.memory_space<vmem>>, vector<1x128x64xbf16>
    %32 = vector.shape_cast %31 : vector<1x128x64xbf16> to vector<128x64xbf16>
    %cst_34 = arith.constant dense<0.000000e+00> : vector<8x64xf32>
    %33 = tpu.matmul %30, %32, %cst_34 {dimension_numbers = #tpu.dot_dimension_numbers<[1], [0], [0], [1], [0, 0, 1, 1], [], []>} : vector<8x128xbf16>, vector<128x64xbf16>, vector<8x64xf32> -> vector<8x64xf32>
    %34 = arith.addf %28, %33 : vector<8x64xf32>
    %c6 = arith.constant 6 : index
    %c0_35 = arith.constant 0 : index
    %c0_36 = arith.constant 0 : index
    %35 = vector.load %arg1[%c6, %c0_35, %c0_36] : memref<52x8x128xbf16, #tpu.memory_space<vmem>>, vector<1x8x128xbf16>
    %36 = vector.shape_cast %35 : vector<1x8x128xbf16> to vector<8x128xbf16>
    %c6_37 = arith.constant 6 : index
    %c0_38 = arith.constant 0 : index
    %c0_39 = arith.constant 0 : index
    %37 = vector.load %arg2[%c6_37, %c0_38, %c0_39] : memref<52x128x64xbf16, #tpu.memory_space<vmem>>, vector<1x128x64xbf16>
    %38 = vector.shape_cast %37 : vector<1x128x64xbf16> to vector<128x64xbf16>
    %cst_40 = arith.constant dense<0.000000e+00> : vector<8x64xf32>
    %39 = tpu.matmul %36, %38, %cst_40 {dimension_numbers = #tpu.dot_dimension_numbers<[1], [0], [0], [1], [0, 0, 1, 1], [], []>} : vector<8x128xbf16>, vector<128x64xbf16>, vector<8x64xf32> -> vector<8x64xf32>
    %40 = arith.addf %34, %39 : vector<8x64xf32>
    %c7 = arith.constant 7 : index
    %c0_41 = arith.constant 0 : index
    %c0_42 = arith.constant 0 : index
    %41 = vector.load %arg1[%c7, %c0_41, %c0_42] : memref<52x8x128xbf16, #tpu.memory_space<vmem>>, vector<1x8x128xbf16>
    %42 = vector.shape_cast %41 : vector<1x8x128xbf16> to vector<8x128xbf16>
    %c7_43 = arith.constant 7 : index
    %c0_44 = arith.constant 0 : index
    %c0_45 = arith.constant 0 : index
    %43 = vector.load %arg2[%c7_43, %c0_44, %c0_45] : memref<52x128x64xbf16, #tpu.memory_space<vmem>>, vector<1x128x64xbf16>
    %44 = vector.shape_cast %43 : vector<1x128x64xbf16> to vector<128x64xbf16>
    %cst_46 = arith.constant dense<0.000000e+00> : vector<8x64xf32>
    %45 = tpu.matmul %42, %44, %cst_46 {dimension_numbers = #tpu.dot_dimension_numbers<[1], [0], [0], [1], [0, 0, 1, 1], [], []>} : vector<8x128xbf16>, vector<128x64xbf16>, vector<8x64xf32> -> vector<8x64xf32>
    %46 = arith.addf %40, %45 : vector<8x64xf32>
    %c8 = arith.constant 8 : index
    %c0_47 = arith.constant 0 : index
    %c0_48 = arith.constant 0 : index
    %47 = vector.load %arg1[%c8, %c0_47, %c0_48] : memref<52x8x128xbf16, #tpu.memory_space<vmem>>, vector<1x8x128xbf16>
    %48 = vector.shape_cast %47 : vector<1x8x128xbf16> to vector<8x128xbf16>
    %c8_49 = arith.constant 8 : index
    %c0_50 = arith.constant 0 : index
    %c0_51 = arith.constant 0 : index
    %49 = vector.load %arg2[%c8_49, %c0_50, %c0_51] : memref<52x128x64xbf16, #tpu.memory_space<vmem>>, vector<1x128x64xbf16>
    %50 = vector.shape_cast %49 : vector<1x128x64xbf16> to vector<128x64xbf16>
    %cst_52 = arith.constant dense<0.000000e+00> : vector<8x64xf32>
    %51 = tpu.matmul %48, %50, %cst_52 {dimension_numbers = #tpu.dot_dimension_numbers<[1], [0], [0], [1], [0, 0, 1, 1], [], []>} : vector<8x128xbf16>, vector<128x64xbf16>, vector<8x64xf32> -> vector<8x64xf32>
    %52 = arith.addf %46, %51 : vector<8x64xf32>
    %c9 = arith.constant 9 : index
    %c0_53 = arith.constant 0 : index
    %c0_54 = arith.constant 0 : index
    %53 = vector.load %arg1[%c9, %c0_53, %c0_54] : memref<52x8x128xbf16, #tpu.memory_space<vmem>>, vector<1x8x128xbf16>
    %54 = vector.shape_cast %53 : vector<1x8x128xbf16> to vector<8x128xbf16>
    %c9_55 = arith.constant 9 : index
    %c0_56 = arith.constant 0 : index
    %c0_57 = arith.constant 0 : index
    %55 = vector.load %arg2[%c9_55, %c0_56, %c0_57] : memref<52x128x64xbf16, #tpu.memory_space<vmem>>, vector<1x128x64xbf16>
    %56 = vector.shape_cast %55 : vector<1x128x64xbf16> to vector<128x64xbf16>
    %cst_58 = arith.constant dense<0.000000e+00> : vector<8x64xf32>
    %57 = tpu.matmul %54, %56, %cst_58 {dimension_numbers = #tpu.dot_dimension_numbers<[1], [0], [0], [1], [0, 0, 1, 1], [], []>} : vector<8x128xbf16>, vector<128x64xbf16>, vector<8x64xf32> -> vector<8x64xf32>
    %58 = arith.addf %52, %57 : vector<8x64xf32>
    %c10 = arith.constant 10 : index
    %c0_59 = arith.constant 0 : index
    %c0_60 = arith.constant 0 : index
    %59 = vector.load %arg1[%c10, %c0_59, %c0_60] : memref<52x8x128xbf16, #tpu.memory_space<vmem>>, vector<1x8x128xbf16>
    %60 = vector.shape_cast %59 : vector<1x8x128xbf16> to vector<8x128xbf16>
    %c10_61 = arith.constant 10 : index
    %c0_62 = arith.constant 0 : index
    %c0_63 = arith.constant 0 : index
    %61 = vector.load %arg2[%c10_61, %c0_62, %c0_63] : memref<52x128x64xbf16, #tpu.memory_space<vmem>>, vector<1x128x64xbf16>
    %62 = vector.shape_cast %61 : vector<1x128x64xbf16> to vector<128x64xbf16>
    %cst_64 = arith.constant dense<0.000000e+00> : vector<8x64xf32>
    %63 = tpu.matmul %60, %62, %cst_64 {dimension_numbers = #tpu.dot_dimension_numbers<[1], [0], [0], [1], [0, 0, 1, 1], [], []>} : vector<8x128xbf16>, vector<128x64xbf16>, vector<8x64xf32> -> vector<8x64xf32>
    %64 = arith.addf %58, %63 : vector<8x64xf32>
    %c11 = arith.constant 11 : index
    %c0_65 = arith.constant 0 : index
    %c0_66 = arith.constant 0 : index
    %65 = vector.load %arg1[%c11, %c0_65, %c0_66] : memref<52x8x128xbf16, #tpu.memory_space<vmem>>, vector<1x8x128xbf16>
    %66 = vector.shape_cast %65 : vector<1x8x128xbf16> to vector<8x128xbf16>
    %c11_67 = arith.constant 11 : index
    %c0_68 = arith.constant 0 : index
    %c0_69 = arith.constant 0 : index
    %67 = vector.load %arg2[%c11_67, %c0_68, %c0_69] : memref<52x128x64xbf16, #tpu.memory_space<vmem>>, vector<1x128x64xbf16>
    %68 = vector.shape_cast %67 : vector<1x128x64xbf16> to vector<128x64xbf16>
    %cst_70 = arith.constant dense<0.000000e+00> : vector<8x64xf32>
    %69 = tpu.matmul %66, %68, %cst_70 {dimension_numbers = #tpu.dot_dimension_numbers<[1], [0], [0], [1], [0, 0, 1, 1], [], []>} : vector<8x128xbf16>, vector<128x64xbf16>, vector<8x64xf32> -> vector<8x64xf32>
    %70 = arith.addf %64, %69 : vector<8x64xf32>
    %c12 = arith.constant 12 : index
    %c0_71 = arith.constant 0 : index
    %c0_72 = arith.constant 0 : index
    %71 = vector.load %arg1[%c12, %c0_71, %c0_72] : memref<52x8x128xbf16, #tpu.memory_space<vmem>>, vector<1x8x128xbf16>
    %72 = vector.shape_cast %71 : vector<1x8x128xbf16> to vector<8x128xbf16>
    %c12_73 = arith.constant 12 : index
    %c0_74 = arith.constant 0 : index
    %c0_75 = arith.constant 0 : index
    %73 = vector.load %arg2[%c12_73, %c0_74, %c0_75] : memref<52x128x64xbf16, #tpu.memory_space<vmem>>, vector<1x128x64xbf16>
    %74 = vector.shape_cast %73 : vector<1x128x64xbf16> to vector<128x64xbf16>
    %cst_76 = arith.constant dense<0.000000e+00> : vector<8x64xf32>
    %75 = tpu.matmul %72, %74, %cst_76 {dimension_numbers = #tpu.dot_dimension_numbers<[1], [0], [0], [1], [0, 0, 1, 1], [], []>} : vector<8x128xbf16>, vector<128x64xbf16>, vector<8x64xf32> -> vector<8x64xf32>
    %76 = arith.addf %70, %75 : vector<8x64xf32>
    %c13 = arith.constant 13 : index
    %c0_77 = arith.constant 0 : index
    %c0_78 = arith.constant 0 : index
    %77 = vector.load %arg1[%c13, %c0_77, %c0_78] : memref<52x8x128xbf16, #tpu.memory_space<vmem>>, vector<1x8x128xbf16>
    %78 = vector.shape_cast %77 : vector<1x8x128xbf16> to vector<8x128xbf16>
    %c13_79 = arith.constant 13 : index
    %c0_80 = arith.constant 0 : index
    %c0_81 = arith.constant 0 : index
    %79 = vector.load %arg2[%c13_79, %c0_80, %c0_81] : memref<52x128x64xbf16, #tpu.memory_space<vmem>>, vector<1x128x64xbf16>
    %80 = vector.shape_cast %79 : vector<1x128x64xbf16> to vector<128x64xbf16>
    %cst_82 = arith.constant dense<0.000000e+00> : vector<8x64xf32>
    %81 = tpu.matmul %78, %80, %cst_82 {dimension_numbers = #tpu.dot_dimension_numbers<[1], [0], [0], [1], [0, 0, 1, 1], [], []>} : vector<8x128xbf16>, vector<128x64xbf16>, vector<8x64xf32> -> vector<8x64xf32>
    %82 = arith.addf %76, %81 : vector<8x64xf32>
    %c14 = arith.constant 14 : index
    %c0_83 = arith.constant 0 : index
    %c0_84 = arith.constant 0 : index
    %83 = vector.load %arg1[%c14, %c0_83, %c0_84] : memref<52x8x128xbf16, #tpu.memory_space<vmem>>, vector<1x8x128xbf16>
    %84 = vector.shape_cast %83 : vector<1x8x128xbf16> to vector<8x128xbf16>
    %c14_85 = arith.constant 14 : index
    %c0_86 = arith.constant 0 : index
    %c0_87 = arith.constant 0 : index
    %85 = vector.load %arg2[%c14_85, %c0_86, %c0_87] : memref<52x128x64xbf16, #tpu.memory_space<vmem>>, vector<1x128x64xbf16>
    %86 = vector.shape_cast %85 : vector<1x128x64xbf16> to vector<128x64xbf16>
    %cst_88 = arith.constant dense<0.000000e+00> : vector<8x64xf32>
    %87 = tpu.matmul %84, %86, %cst_88 {dimension_numbers = #tpu.dot_dimension_numbers<[1], [0], [0], [1], [0, 0, 1, 1], [], []>} : vector<8x128xbf16>, vector<128x64xbf16>, vector<8x64xf32> -> vector<8x64xf32>
    %88 = arith.addf %82, %87 : vector<8x64xf32>
    %c15 = arith.constant 15 : index
    %c0_89 = arith.constant 0 : index
    %c0_90 = arith.constant 0 : index
    %89 = vector.load %arg1[%c15, %c0_89, %c0_90] : memref<52x8x128xbf16, #tpu.memory_space<vmem>>, vector<1x8x128xbf16>
    %90 = vector.shape_cast %89 : vector<1x8x128xbf16> to vector<8x128xbf16>
    %c15_91 = arith.constant 15 : index
    %c0_92 = arith.constant 0 : index
    %c0_93 = arith.constant 0 : index
    %91 = vector.load %arg2[%c15_91, %c0_92, %c0_93] : memref<52x128x64xbf16, #tpu.memory_space<vmem>>, vector<1x128x64xbf16>
    %92 = vector.shape_cast %91 : vector<1x128x64xbf16> to vector<128x64xbf16>
    %cst_94 = arith.constant dense<0.000000e+00> : vector<8x64xf32>
    %93 = tpu.matmul %90, %92, %cst_94 {dimension_numbers = #tpu.dot_dimension_numbers<[1], [0], [0], [1], [0, 0, 1, 1], [], []>} : vector<8x128xbf16>, vector<128x64xbf16>, vector<8x64xf32> -> vector<8x64xf32>
    %94 = arith.addf %88, %93 : vector<8x64xf32>
    %c16 = arith.constant 16 : index
    %c0_95 = arith.constant 0 : index
    %c0_96 = arith.constant 0 : index
    %95 = vector.load %arg1[%c16, %c0_95, %c0_96] : memref<52x8x128xbf16, #tpu.memory_space<vmem>>, vector<1x8x128xbf16>
    %96 = vector.shape_cast %95 : vector<1x8x128xbf16> to vector<8x128xbf16>
    %c16_97 = arith.constant 16 : index
    %c0_98 = arith.constant 0 : index
    %c0_99 = arith.constant 0 : index
    %97 = vector.load %arg2[%c16_97, %c0_98, %c0_99] : memref<52x128x64xbf16, #tpu.memory_space<vmem>>, vector<1x128x64xbf16>
    %98 = vector.shape_cast %97 : vector<1x128x64xbf16> to vector<128x64xbf16>
    %cst_100 = arith.constant dense<0.000000e+00> : vector<8x64xf32>
    %99 = tpu.matmul %96, %98, %cst_100 {dimension_numbers = #tpu.dot_dimension_numbers<[1], [0], [0], [1], [0, 0, 1, 1], [], []>} : vector<8x128xbf16>, vector<128x64xbf16>, vector<8x64xf32> -> vector<8x64xf32>
    %100 = arith.addf %94, %99 : vector<8x64xf32>
    %c17 = arith.constant 17 : index
    %c0_101 = arith.constant 0 : index
    %c0_102 = arith.constant 0 : index
    %101 = vector.load %arg1[%c17, %c0_101, %c0_102] : memref<52x8x128xbf16, #tpu.memory_space<vmem>>, vector<1x8x128xbf16>
    %102 = vector.shape_cast %101 : vector<1x8x128xbf16> to vector<8x128xbf16>
    %c17_103 = arith.constant 17 : index
    %c0_104 = arith.constant 0 : index
    %c0_105 = arith.constant 0 : index
    %103 = vector.load %arg2[%c17_103, %c0_104, %c0_105] : memref<52x128x64xbf16, #tpu.memory_space<vmem>>, vector<1x128x64xbf16>
    %104 = vector.shape_cast %103 : vector<1x128x64xbf16> to vector<128x64xbf16>
    %cst_106 = arith.constant dense<0.000000e+00> : vector<8x64xf32>
    %105 = tpu.matmul %102, %104, %cst_106 {dimension_numbers = #tpu.dot_dimension_numbers<[1], [0], [0], [1], [0, 0, 1, 1], [], []>} : vector<8x128xbf16>, vector<128x64xbf16>, vector<8x64xf32> -> vector<8x64xf32>
    %106 = arith.addf %100, %105 : vector<8x64xf32>
    %c18 = arith.constant 18 : index
    %c0_107 = arith.constant 0 : index
    %c0_108 = arith.constant 0 : index
    %107 = vector.load %arg1[%c18, %c0_107, %c0_108] : memref<52x8x128xbf16, #tpu.memory_space<vmem>>, vector<1x8x128xbf16>
    %108 = vector.shape_cast %107 : vector<1x8x128xbf16> to vector<8x128xbf16>
    %c18_109 = arith.constant 18 : index
    %c0_110 = arith.constant 0 : index
    %c0_111 = arith.constant 0 : index
    %109 = vector.load %arg2[%c18_109, %c0_110, %c0_111] : memref<52x128x64xbf16, #tpu.memory_space<vmem>>, vector<1x128x64xbf16>
    %110 = vector.shape_cast %109 : vector<1x128x64xbf16> to vector<128x64xbf16>
    %cst_112 = arith.constant dense<0.000000e+00> : vector<8x64xf32>
    %111 = tpu.matmul %108, %110, %cst_112 {dimension_numbers = #tpu.dot_dimension_numbers<[1], [0], [0], [1], [0, 0, 1, 1], [], []>} : vector<8x128xbf16>, vector<128x64xbf16>, vector<8x64xf32> -> vector<8x64xf32>
    %112 = arith.addf %106, %111 : vector<8x64xf32>
    %c19 = arith.constant 19 : index
    %c0_113 = arith.constant 0 : index
    %c0_114 = arith.constant 0 : index
    %113 = vector.load %arg1[%c19, %c0_113, %c0_114] : memref<52x8x128xbf16, #tpu.memory_space<vmem>>, vector<1x8x128xbf16>
    %114 = vector.shape_cast %113 : vector<1x8x128xbf16> to vector<8x128xbf16>
    %c19_115 = arith.constant 19 : index
    %c0_116 = arith.constant 0 : index
    %c0_117 = arith.constant 0 : index
    %115 = vector.load %arg2[%c19_115, %c0_116, %c0_117] : memref<52x128x64xbf16, #tpu.memory_space<vmem>>, vector<1x128x64xbf16>
    %116 = vector.shape_cast %115 : vector<1x128x64xbf16> to vector<128x64xbf16>
    %cst_118 = arith.constant dense<0.000000e+00> : vector<8x64xf32>
    %117 = tpu.matmul %114, %116, %cst_118 {dimension_numbers = #tpu.dot_dimension_numbers<[1], [0], [0], [1], [0, 0, 1, 1], [], []>} : vector<8x128xbf16>, vector<128x64xbf16>, vector<8x64xf32> -> vector<8x64xf32>
    %118 = arith.addf %112, %117 : vector<8x64xf32>
    %c20 = arith.constant 20 : index
    %c0_119 = arith.constant 0 : index
    %c0_120 = arith.constant 0 : index
    %119 = vector.load %arg1[%c20, %c0_119, %c0_120] : memref<52x8x128xbf16, #tpu.memory_space<vmem>>, vector<1x8x128xbf16>
    %120 = vector.shape_cast %119 : vector<1x8x128xbf16> to vector<8x128xbf16>
    %c20_121 = arith.constant 20 : index
    %c0_122 = arith.constant 0 : index
    %c0_123 = arith.constant 0 : index
    %121 = vector.load %arg2[%c20_121, %c0_122, %c0_123] : memref<52x128x64xbf16, #tpu.memory_space<vmem>>, vector<1x128x64xbf16>
    %122 = vector.shape_cast %121 : vector<1x128x64xbf16> to vector<128x64xbf16>
    %cst_124 = arith.constant dense<0.000000e+00> : vector<8x64xf32>
    %123 = tpu.matmul %120, %122, %cst_124 {dimension_numbers = #tpu.dot_dimension_numbers<[1], [0], [0], [1], [0, 0, 1, 1], [], []>} : vector<8x128xbf16>, vector<128x64xbf16>, vector<8x64xf32> -> vector<8x64xf32>
    %124 = arith.addf %118, %123 : vector<8x64xf32>
    %c21 = arith.constant 21 : index
    %c0_125 = arith.constant 0 : index
    %c0_126 = arith.constant 0 : index
    %125 = vector.load %arg1[%c21, %c0_125, %c0_126] : memref<52x8x128xbf16, #tpu.memory_space<vmem>>, vector<1x8x128xbf16>
    %126 = vector.shape_cast %125 : vector<1x8x128xbf16> to vector<8x128xbf16>
    %c21_127 = arith.constant 21 : index
    %c0_128 = arith.constant 0 : index
    %c0_129 = arith.constant 0 : index
    %127 = vector.load %arg2[%c21_127, %c0_128, %c0_129] : memref<52x128x64xbf16, #tpu.memory_space<vmem>>, vector<1x128x64xbf16>
    %128 = vector.shape_cast %127 : vector<1x128x64xbf16> to vector<128x64xbf16>
    %cst_130 = arith.constant dense<0.000000e+00> : vector<8x64xf32>
    %129 = tpu.matmul %126, %128, %cst_130 {dimension_numbers = #tpu.dot_dimension_numbers<[1], [0], [0], [1], [0, 0, 1, 1], [], []>} : vector<8x128xbf16>, vector<128x64xbf16>, vector<8x64xf32> -> vector<8x64xf32>
    %130 = arith.addf %124, %129 : vector<8x64xf32>
    %c22 = arith.constant 22 : index
    %c0_131 = arith.constant 0 : index
    %c0_132 = arith.constant 0 : index
    %131 = vector.load %arg1[%c22, %c0_131, %c0_132] : memref<52x8x128xbf16, #tpu.memory_space<vmem>>, vector<1x8x128xbf16>
    %132 = vector.shape_cast %131 : vector<1x8x128xbf16> to vector<8x128xbf16>
    %c22_133 = arith.constant 22 : index
    %c0_134 = arith.constant 0 : index
    %c0_135 = arith.constant 0 : index
    %133 = vector.load %arg2[%c22_133, %c0_134, %c0_135] : memref<52x128x64xbf16, #tpu.memory_space<vmem>>, vector<1x128x64xbf16>
    %134 = vector.shape_cast %133 : vector<1x128x64xbf16> to vector<128x64xbf16>
    %cst_136 = arith.constant dense<0.000000e+00> : vector<8x64xf32>
    %135 = tpu.matmul %132, %134, %cst_136 {dimension_numbers = #tpu.dot_dimension_numbers<[1], [0], [0], [1], [0, 0, 1, 1], [], []>} : vector<8x128xbf16>, vector<128x64xbf16>, vector<8x64xf32> -> vector<8x64xf32>
    %136 = arith.addf %130, %135 : vector<8x64xf32>
    %c23 = arith.constant 23 : index
    %c0_137 = arith.constant 0 : index
    %c0_138 = arith.constant 0 : index
    %137 = vector.load %arg1[%c23, %c0_137, %c0_138] : memref<52x8x128xbf16, #tpu.memory_space<vmem>>, vector<1x8x128xbf16>
    %138 = vector.shape_cast %137 : vector<1x8x128xbf16> to vector<8x128xbf16>
    %c23_139 = arith.constant 23 : index
    %c0_140 = arith.constant 0 : index
    %c0_141 = arith.constant 0 : index
    %139 = vector.load %arg2[%c23_139, %c0_140, %c0_141] : memref<52x128x64xbf16, #tpu.memory_space<vmem>>, vector<1x128x64xbf16>
    %140 = vector.shape_cast %139 : vector<1x128x64xbf16> to vector<128x64xbf16>
    %cst_142 = arith.constant dense<0.000000e+00> : vector<8x64xf32>
    %141 = tpu.matmul %138, %140, %cst_142 {dimension_numbers = #tpu.dot_dimension_numbers<[1], [0], [0], [1], [0, 0, 1, 1], [], []>} : vector<8x128xbf16>, vector<128x64xbf16>, vector<8x64xf32> -> vector<8x64xf32>
    %142 = arith.addf %136, %141 : vector<8x64xf32>
    %c24 = arith.constant 24 : index
    %c0_143 = arith.constant 0 : index
    %c0_144 = arith.constant 0 : index
    %143 = vector.load %arg1[%c24, %c0_143, %c0_144] : memref<52x8x128xbf16, #tpu.memory_space<vmem>>, vector<1x8x128xbf16>
    %144 = vector.shape_cast %143 : vector<1x8x128xbf16> to vector<8x128xbf16>
    %c24_145 = arith.constant 24 : index
    %c0_146 = arith.constant 0 : index
    %c0_147 = arith.constant 0 : index
    %145 = vector.load %arg2[%c24_145, %c0_146, %c0_147] : memref<52x128x64xbf16, #tpu.memory_space<vmem>>, vector<1x128x64xbf16>
    %146 = vector.shape_cast %145 : vector<1x128x64xbf16> to vector<128x64xbf16>
    %cst_148 = arith.constant dense<0.000000e+00> : vector<8x64xf32>
    %147 = tpu.matmul %144, %146, %cst_148 {dimension_numbers = #tpu.dot_dimension_numbers<[1], [0], [0], [1], [0, 0, 1, 1], [], []>} : vector<8x128xbf16>, vector<128x64xbf16>, vector<8x64xf32> -> vector<8x64xf32>
    %148 = arith.addf %142, %147 : vector<8x64xf32>
    %c25 = arith.constant 25 : index
    %c0_149 = arith.constant 0 : index
    %c0_150 = arith.constant 0 : index
    %149 = vector.load %arg1[%c25, %c0_149, %c0_150] : memref<52x8x128xbf16, #tpu.memory_space<vmem>>, vector<1x8x128xbf16>
    %150 = vector.shape_cast %149 : vector<1x8x128xbf16> to vector<8x128xbf16>
    %c25_151 = arith.constant 25 : index
    %c0_152 = arith.constant 0 : index
    %c0_153 = arith.constant 0 : index
    %151 = vector.load %arg2[%c25_151, %c0_152, %c0_153] : memref<52x128x64xbf16, #tpu.memory_space<vmem>>, vector<1x128x64xbf16>
    %152 = vector.shape_cast %151 : vector<1x128x64xbf16> to vector<128x64xbf16>
    %cst_154 = arith.constant dense<0.000000e+00> : vector<8x64xf32>
    %153 = tpu.matmul %150, %152, %cst_154 {dimension_numbers = #tpu.dot_dimension_numbers<[1], [0], [0], [1], [0, 0, 1, 1], [], []>} : vector<8x128xbf16>, vector<128x64xbf16>, vector<8x64xf32> -> vector<8x64xf32>
    %154 = arith.addf %148, %153 : vector<8x64xf32>
    %c26 = arith.constant 26 : index
    %c0_155 = arith.constant 0 : index
    %c0_156 = arith.constant 0 : index
    %155 = vector.load %arg1[%c26, %c0_155, %c0_156] : memref<52x8x128xbf16, #tpu.memory_space<vmem>>, vector<1x8x128xbf16>
    %156 = vector.shape_cast %155 : vector<1x8x128xbf16> to vector<8x128xbf16>
    %c26_157 = arith.constant 26 : index
    %c0_158 = arith.constant 0 : index
    %c0_159 = arith.constant 0 : index
    %157 = vector.load %arg2[%c26_157, %c0_158, %c0_159] : memref<52x128x64xbf16, #tpu.memory_space<vmem>>, vector<1x128x64xbf16>
    %158 = vector.shape_cast %157 : vector<1x128x64xbf16> to vector<128x64xbf16>
    %cst_160 = arith.constant dense<0.000000e+00> : vector<8x64xf32>
    %159 = tpu.matmul %156, %158, %cst_160 {dimension_numbers = #tpu.dot_dimension_numbers<[1], [0], [0], [1], [0, 0, 1, 1], [], []>} : vector<8x128xbf16>, vector<128x64xbf16>, vector<8x64xf32> -> vector<8x64xf32>
    %160 = arith.addf %154, %159 : vector<8x64xf32>
    %c27 = arith.constant 27 : index
    %c0_161 = arith.constant 0 : index
    %c0_162 = arith.constant 0 : index
    %161 = vector.load %arg1[%c27, %c0_161, %c0_162] : memref<52x8x128xbf16, #tpu.memory_space<vmem>>, vector<1x8x128xbf16>
    %162 = vector.shape_cast %161 : vector<1x8x128xbf16> to vector<8x128xbf16>
    %c27_163 = arith.constant 27 : index
    %c0_164 = arith.constant 0 : index
    %c0_165 = arith.constant 0 : index
    %163 = vector.load %arg2[%c27_163, %c0_164, %c0_165] : memref<52x128x64xbf16, #tpu.memory_space<vmem>>, vector<1x128x64xbf16>
    %164 = vector.shape_cast %163 : vector<1x128x64xbf16> to vector<128x64xbf16>
    %cst_166 = arith.constant dense<0.000000e+00> : vector<8x64xf32>
    %165 = tpu.matmul %162, %164, %cst_166 {dimension_numbers = #tpu.dot_dimension_numbers<[1], [0], [0], [1], [0, 0, 1, 1], [], []>} : vector<8x128xbf16>, vector<128x64xbf16>, vector<8x64xf32> -> vector<8x64xf32>
    %166 = arith.addf %160, %165 : vector<8x64xf32>
    %c28 = arith.constant 28 : index
    %c0_167 = arith.constant 0 : index
    %c0_168 = arith.constant 0 : index
    %167 = vector.load %arg1[%c28, %c0_167, %c0_168] : memref<52x8x128xbf16, #tpu.memory_space<vmem>>, vector<1x8x128xbf16>
    %168 = vector.shape_cast %167 : vector<1x8x128xbf16> to vector<8x128xbf16>
    %c28_169 = arith.constant 28 : index
    %c0_170 = arith.constant 0 : index
    %c0_171 = arith.constant 0 : index
    %169 = vector.load %arg2[%c28_169, %c0_170, %c0_171] : memref<52x128x64xbf16, #tpu.memory_space<vmem>>, vector<1x128x64xbf16>
    %170 = vector.shape_cast %169 : vector<1x128x64xbf16> to vector<128x64xbf16>
    %cst_172 = arith.constant dense<0.000000e+00> : vector<8x64xf32>
    %171 = tpu.matmul %168, %170, %cst_172 {dimension_numbers = #tpu.dot_dimension_numbers<[1], [0], [0], [1], [0, 0, 1, 1], [], []>} : vector<8x128xbf16>, vector<128x64xbf16>, vector<8x64xf32> -> vector<8x64xf32>
    %172 = arith.addf %166, %171 : vector<8x64xf32>
    %c29 = arith.constant 29 : index
    %c0_173 = arith.constant 0 : index
    %c0_174 = arith.constant 0 : index
    %173 = vector.load %arg1[%c29, %c0_173, %c0_174] : memref<52x8x128xbf16, #tpu.memory_space<vmem>>, vector<1x8x128xbf16>
    %174 = vector.shape_cast %173 : vector<1x8x128xbf16> to vector<8x128xbf16>
    %c29_175 = arith.constant 29 : index
    %c0_176 = arith.constant 0 : index
    %c0_177 = arith.constant 0 : index
    %175 = vector.load %arg2[%c29_175, %c0_176, %c0_177] : memref<52x128x64xbf16, #tpu.memory_space<vmem>>, vector<1x128x64xbf16>
    %176 = vector.shape_cast %175 : vector<1x128x64xbf16> to vector<128x64xbf16>
    %cst_178 = arith.constant dense<0.000000e+00> : vector<8x64xf32>
    %177 = tpu.matmul %174, %176, %cst_178 {dimension_numbers = #tpu.dot_dimension_numbers<[1], [0], [0], [1], [0, 0, 1, 1], [], []>} : vector<8x128xbf16>, vector<128x64xbf16>, vector<8x64xf32> -> vector<8x64xf32>
    %178 = arith.addf %172, %177 : vector<8x64xf32>
    %c30 = arith.constant 30 : index
    %c0_179 = arith.constant 0 : index
    %c0_180 = arith.constant 0 : index
    %179 = vector.load %arg1[%c30, %c0_179, %c0_180] : memref<52x8x128xbf16, #tpu.memory_space<vmem>>, vector<1x8x128xbf16>
    %180 = vector.shape_cast %179 : vector<1x8x128xbf16> to vector<8x128xbf16>
    %c30_181 = arith.constant 30 : index
    %c0_182 = arith.constant 0 : index
    %c0_183 = arith.constant 0 : index
    %181 = vector.load %arg2[%c30_181, %c0_182, %c0_183] : memref<52x128x64xbf16, #tpu.memory_space<vmem>>, vector<1x128x64xbf16>
    %182 = vector.shape_cast %181 : vector<1x128x64xbf16> to vector<128x64xbf16>
    %cst_184 = arith.constant dense<0.000000e+00> : vector<8x64xf32>
    %183 = tpu.matmul %180, %182, %cst_184 {dimension_numbers = #tpu.dot_dimension_numbers<[1], [0], [0], [1], [0, 0, 1, 1], [], []>} : vector<8x128xbf16>, vector<128x64xbf16>, vector<8x64xf32> -> vector<8x64xf32>
    %184 = arith.addf %178, %183 : vector<8x64xf32>
    %c31 = arith.constant 31 : index
    %c0_185 = arith.constant 0 : index
    %c0_186 = arith.constant 0 : index
    %185 = vector.load %arg1[%c31, %c0_185, %c0_186] : memref<52x8x128xbf16, #tpu.memory_space<vmem>>, vector<1x8x128xbf16>
    %186 = vector.shape_cast %185 : vector<1x8x128xbf16> to vector<8x128xbf16>
    %c31_187 = arith.constant 31 : index
    %c0_188 = arith.constant 0 : index
    %c0_189 = arith.constant 0 : index
    %187 = vector.load %arg2[%c31_187, %c0_188, %c0_189] : memref<52x128x64xbf16, #tpu.memory_space<vmem>>, vector<1x128x64xbf16>
    %188 = vector.shape_cast %187 : vector<1x128x64xbf16> to vector<128x64xbf16>
    %cst_190 = arith.constant dense<0.000000e+00> : vector<8x64xf32>
    %189 = tpu.matmul %186, %188, %cst_190 {dimension_numbers = #tpu.dot_dimension_numbers<[1], [0], [0], [1], [0, 0, 1, 1], [], []>} : vector<8x128xbf16>, vector<128x64xbf16>, vector<8x64xf32> -> vector<8x64xf32>
    %190 = arith.addf %184, %189 : vector<8x64xf32>
    %c32 = arith.constant 32 : index
    %c0_191 = arith.constant 0 : index
    %c0_192 = arith.constant 0 : index
    %191 = vector.load %arg1[%c32, %c0_191, %c0_192] : memref<52x8x128xbf16, #tpu.memory_space<vmem>>, vector<1x8x128xbf16>
    %192 = vector.shape_cast %191 : vector<1x8x128xbf16> to vector<8x128xbf16>
    %c32_193 = arith.constant 32 : index
    %c0_194 = arith.constant 0 : index
    %c0_195 = arith.constant 0 : index
    %193 = vector.load %arg2[%c32_193, %c0_194, %c0_195] : memref<52x128x64xbf16, #tpu.memory_space<vmem>>, vector<1x128x64xbf16>
    %194 = vector.shape_cast %193 : vector<1x128x64xbf16> to vector<128x64xbf16>
    %cst_196 = arith.constant dense<0.000000e+00> : vector<8x64xf32>
    %195 = tpu.matmul %192, %194, %cst_196 {dimension_numbers = #tpu.dot_dimension_numbers<[1], [0], [0], [1], [0, 0, 1, 1], [], []>} : vector<8x128xbf16>, vector<128x64xbf16>, vector<8x64xf32> -> vector<8x64xf32>
    %196 = arith.addf %190, %195 : vector<8x64xf32>
    %c33 = arith.constant 33 : index
    %c0_197 = arith.constant 0 : index
    %c0_198 = arith.constant 0 : index
    %197 = vector.load %arg1[%c33, %c0_197, %c0_198] : memref<52x8x128xbf16, #tpu.memory_space<vmem>>, vector<1x8x128xbf16>
    %198 = vector.shape_cast %197 : vector<1x8x128xbf16> to vector<8x128xbf16>
    %c33_199 = arith.constant 33 : index
    %c0_200 = arith.constant 0 : index
    %c0_201 = arith.constant 0 : index
    %199 = vector.load %arg2[%c33_199, %c0_200, %c0_201] : memref<52x128x64xbf16, #tpu.memory_space<vmem>>, vector<1x128x64xbf16>
    %200 = vector.shape_cast %199 : vector<1x128x64xbf16> to vector<128x64xbf16>
    %cst_202 = arith.constant dense<0.000000e+00> : vector<8x64xf32>
    %201 = tpu.matmul %198, %200, %cst_202 {dimension_numbers = #tpu.dot_dimension_numbers<[1], [0], [0], [1], [0, 0, 1, 1], [], []>} : vector<8x128xbf16>, vector<128x64xbf16>, vector<8x64xf32> -> vector<8x64xf32>
    %202 = arith.addf %196, %201 : vector<8x64xf32>
    %c34 = arith.constant 34 : index
    %c0_203 = arith.constant 0 : index
    %c0_204 = arith.constant 0 : index
    %203 = vector.load %arg1[%c34, %c0_203, %c0_204] : memref<52x8x128xbf16, #tpu.memory_space<vmem>>, vector<1x8x128xbf16>
    %204 = vector.shape_cast %203 : vector<1x8x128xbf16> to vector<8x128xbf16>
    %c34_205 = arith.constant 34 : index
    %c0_206 = arith.constant 0 : index
    %c0_207 = arith.constant 0 : index
    %205 = vector.load %arg2[%c34_205, %c0_206, %c0_207] : memref<52x128x64xbf16, #tpu.memory_space<vmem>>, vector<1x128x64xbf16>
    %206 = vector.shape_cast %205 : vector<1x128x64xbf16> to vector<128x64xbf16>
    %cst_208 = arith.constant dense<0.000000e+00> : vector<8x64xf32>
    %207 = tpu.matmul %204, %206, %cst_208 {dimension_numbers = #tpu.dot_dimension_numbers<[1], [0], [0], [1], [0, 0, 1, 1], [], []>} : vector<8x128xbf16>, vector<128x64xbf16>, vector<8x64xf32> -> vector<8x64xf32>
    %208 = arith.addf %202, %207 : vector<8x64xf32>
    %c35 = arith.constant 35 : index
    %c0_209 = arith.constant 0 : index
    %c0_210 = arith.constant 0 : index
    %209 = vector.load %arg1[%c35, %c0_209, %c0_210] : memref<52x8x128xbf16, #tpu.memory_space<vmem>>, vector<1x8x128xbf16>
    %210 = vector.shape_cast %209 : vector<1x8x128xbf16> to vector<8x128xbf16>
    %c35_211 = arith.constant 35 : index
    %c0_212 = arith.constant 0 : index
    %c0_213 = arith.constant 0 : index
    %211 = vector.load %arg2[%c35_211, %c0_212, %c0_213] : memref<52x128x64xbf16, #tpu.memory_space<vmem>>, vector<1x128x64xbf16>
    %212 = vector.shape_cast %211 : vector<1x128x64xbf16> to vector<128x64xbf16>
    %cst_214 = arith.constant dense<0.000000e+00> : vector<8x64xf32>
    %213 = tpu.matmul %210, %212, %cst_214 {dimension_numbers = #tpu.dot_dimension_numbers<[1], [0], [0], [1], [0, 0, 1, 1], [], []>} : vector<8x128xbf16>, vector<128x64xbf16>, vector<8x64xf32> -> vector<8x64xf32>
    %214 = arith.addf %208, %213 : vector<8x64xf32>
    %c36 = arith.constant 36 : index
    %c0_215 = arith.constant 0 : index
    %c0_216 = arith.constant 0 : index
    %215 = vector.load %arg1[%c36, %c0_215, %c0_216] : memref<52x8x128xbf16, #tpu.memory_space<vmem>>, vector<1x8x128xbf16>
    %216 = vector.shape_cast %215 : vector<1x8x128xbf16> to vector<8x128xbf16>
    %c36_217 = arith.constant 36 : index
    %c0_218 = arith.constant 0 : index
    %c0_219 = arith.constant 0 : index
    %217 = vector.load %arg2[%c36_217, %c0_218, %c0_219] : memref<52x128x64xbf16, #tpu.memory_space<vmem>>, vector<1x128x64xbf16>
    %218 = vector.shape_cast %217 : vector<1x128x64xbf16> to vector<128x64xbf16>
    %cst_220 = arith.constant dense<0.000000e+00> : vector<8x64xf32>
    %219 = tpu.matmul %216, %218, %cst_220 {dimension_numbers = #tpu.dot_dimension_numbers<[1], [0], [0], [1], [0, 0, 1, 1], [], []>} : vector<8x128xbf16>, vector<128x64xbf16>, vector<8x64xf32> -> vector<8x64xf32>
    %220 = arith.addf %214, %219 : vector<8x64xf32>
    %c37 = arith.constant 37 : index
    %c0_221 = arith.constant 0 : index
    %c0_222 = arith.constant 0 : index
    %221 = vector.load %arg1[%c37, %c0_221, %c0_222] : memref<52x8x128xbf16, #tpu.memory_space<vmem>>, vector<1x8x128xbf16>
    %222 = vector.shape_cast %221 : vector<1x8x128xbf16> to vector<8x128xbf16>
    %c37_223 = arith.constant 37 : index
    %c0_224 = arith.constant 0 : index
    %c0_225 = arith.constant 0 : index
    %223 = vector.load %arg2[%c37_223, %c0_224, %c0_225] : memref<52x128x64xbf16, #tpu.memory_space<vmem>>, vector<1x128x64xbf16>
    %224 = vector.shape_cast %223 : vector<1x128x64xbf16> to vector<128x64xbf16>
    %cst_226 = arith.constant dense<0.000000e+00> : vector<8x64xf32>
    %225 = tpu.matmul %222, %224, %cst_226 {dimension_numbers = #tpu.dot_dimension_numbers<[1], [0], [0], [1], [0, 0, 1, 1], [], []>} : vector<8x128xbf16>, vector<128x64xbf16>, vector<8x64xf32> -> vector<8x64xf32>
    %226 = arith.addf %220, %225 : vector<8x64xf32>
    %c38 = arith.constant 38 : index
    %c0_227 = arith.constant 0 : index
    %c0_228 = arith.constant 0 : index
    %227 = vector.load %arg1[%c38, %c0_227, %c0_228] : memref<52x8x128xbf16, #tpu.memory_space<vmem>>, vector<1x8x128xbf16>
    %228 = vector.shape_cast %227 : vector<1x8x128xbf16> to vector<8x128xbf16>
    %c38_229 = arith.constant 38 : index
    %c0_230 = arith.constant 0 : index
    %c0_231 = arith.constant 0 : index
    %229 = vector.load %arg2[%c38_229, %c0_230, %c0_231] : memref<52x128x64xbf16, #tpu.memory_space<vmem>>, vector<1x128x64xbf16>
    %230 = vector.shape_cast %229 : vector<1x128x64xbf16> to vector<128x64xbf16>
    %cst_232 = arith.constant dense<0.000000e+00> : vector<8x64xf32>
    %231 = tpu.matmul %228, %230, %cst_232 {dimension_numbers = #tpu.dot_dimension_numbers<[1], [0], [0], [1], [0, 0, 1, 1], [], []>} : vector<8x128xbf16>, vector<128x64xbf16>, vector<8x64xf32> -> vector<8x64xf32>
    %232 = arith.addf %226, %231 : vector<8x64xf32>
    %c39 = arith.constant 39 : index
    %c0_233 = arith.constant 0 : index
    %c0_234 = arith.constant 0 : index
    %233 = vector.load %arg1[%c39, %c0_233, %c0_234] : memref<52x8x128xbf16, #tpu.memory_space<vmem>>, vector<1x8x128xbf16>
    %234 = vector.shape_cast %233 : vector<1x8x128xbf16> to vector<8x128xbf16>
    %c39_235 = arith.constant 39 : index
    %c0_236 = arith.constant 0 : index
    %c0_237 = arith.constant 0 : index
    %235 = vector.load %arg2[%c39_235, %c0_236, %c0_237] : memref<52x128x64xbf16, #tpu.memory_space<vmem>>, vector<1x128x64xbf16>
    %236 = vector.shape_cast %235 : vector<1x128x64xbf16> to vector<128x64xbf16>
    %cst_238 = arith.constant dense<0.000000e+00> : vector<8x64xf32>
    %237 = tpu.matmul %234, %236, %cst_238 {dimension_numbers = #tpu.dot_dimension_numbers<[1], [0], [0], [1], [0, 0, 1, 1], [], []>} : vector<8x128xbf16>, vector<128x64xbf16>, vector<8x64xf32> -> vector<8x64xf32>
    %238 = arith.addf %232, %237 : vector<8x64xf32>
    %c40 = arith.constant 40 : index
    %c0_239 = arith.constant 0 : index
    %c0_240 = arith.constant 0 : index
    %239 = vector.load %arg1[%c40, %c0_239, %c0_240] : memref<52x8x128xbf16, #tpu.memory_space<vmem>>, vector<1x8x128xbf16>
    %240 = vector.shape_cast %239 : vector<1x8x128xbf16> to vector<8x128xbf16>
    %c40_241 = arith.constant 40 : index
    %c0_242 = arith.constant 0 : index
    %c0_243 = arith.constant 0 : index
    %241 = vector.load %arg2[%c40_241, %c0_242, %c0_243] : memref<52x128x64xbf16, #tpu.memory_space<vmem>>, vector<1x128x64xbf16>
    %242 = vector.shape_cast %241 : vector<1x128x64xbf16> to vector<128x64xbf16>
    %cst_244 = arith.constant dense<0.000000e+00> : vector<8x64xf32>
    %243 = tpu.matmul %240, %242, %cst_244 {dimension_numbers = #tpu.dot_dimension_numbers<[1], [0], [0], [1], [0, 0, 1, 1], [], []>} : vector<8x128xbf16>, vector<128x64xbf16>, vector<8x64xf32> -> vector<8x64xf32>
    %244 = arith.addf %238, %243 : vector<8x64xf32>
    %c41 = arith.constant 41 : index
    %c0_245 = arith.constant 0 : index
    %c0_246 = arith.constant 0 : index
    %245 = vector.load %arg1[%c41, %c0_245, %c0_246] : memref<52x8x128xbf16, #tpu.memory_space<vmem>>, vector<1x8x128xbf16>
    %246 = vector.shape_cast %245 : vector<1x8x128xbf16> to vector<8x128xbf16>
    %c41_247 = arith.constant 41 : index
    %c0_248 = arith.constant 0 : index
    %c0_249 = arith.constant 0 : index
    %247 = vector.load %arg2[%c41_247, %c0_248, %c0_249] : memref<52x128x64xbf16, #tpu.memory_space<vmem>>, vector<1x128x64xbf16>
    %248 = vector.shape_cast %247 : vector<1x128x64xbf16> to vector<128x64xbf16>
    %cst_250 = arith.constant dense<0.000000e+00> : vector<8x64xf32>
    %249 = tpu.matmul %246, %248, %cst_250 {dimension_numbers = #tpu.dot_dimension_numbers<[1], [0], [0], [1], [0, 0, 1, 1], [], []>} : vector<8x128xbf16>, vector<128x64xbf16>, vector<8x64xf32> -> vector<8x64xf32>
    %250 = arith.addf %244, %249 : vector<8x64xf32>
    %c42 = arith.constant 42 : index
    %c0_251 = arith.constant 0 : index
    %c0_252 = arith.constant 0 : index
    %251 = vector.load %arg1[%c42, %c0_251, %c0_252] : memref<52x8x128xbf16, #tpu.memory_space<vmem>>, vector<1x8x128xbf16>
    %252 = vector.shape_cast %251 : vector<1x8x128xbf16> to vector<8x128xbf16>
    %c42_253 = arith.constant 42 : index
    %c0_254 = arith.constant 0 : index
    %c0_255 = arith.constant 0 : index
    %253 = vector.load %arg2[%c42_253, %c0_254, %c0_255] : memref<52x128x64xbf16, #tpu.memory_space<vmem>>, vector<1x128x64xbf16>
    %254 = vector.shape_cast %253 : vector<1x128x64xbf16> to vector<128x64xbf16>
    %cst_256 = arith.constant dense<0.000000e+00> : vector<8x64xf32>
    %255 = tpu.matmul %252, %254, %cst_256 {dimension_numbers = #tpu.dot_dimension_numbers<[1], [0], [0], [1], [0, 0, 1, 1], [], []>} : vector<8x128xbf16>, vector<128x64xbf16>, vector<8x64xf32> -> vector<8x64xf32>
    %256 = arith.addf %250, %255 : vector<8x64xf32>
    %c43 = arith.constant 43 : index
    %c0_257 = arith.constant 0 : index
    %c0_258 = arith.constant 0 : index
    %257 = vector.load %arg1[%c43, %c0_257, %c0_258] : memref<52x8x128xbf16, #tpu.memory_space<vmem>>, vector<1x8x128xbf16>
    %258 = vector.shape_cast %257 : vector<1x8x128xbf16> to vector<8x128xbf16>
    %c43_259 = arith.constant 43 : index
    %c0_260 = arith.constant 0 : index
    %c0_261 = arith.constant 0 : index
    %259 = vector.load %arg2[%c43_259, %c0_260, %c0_261] : memref<52x128x64xbf16, #tpu.memory_space<vmem>>, vector<1x128x64xbf16>
    %260 = vector.shape_cast %259 : vector<1x128x64xbf16> to vector<128x64xbf16>
    %cst_262 = arith.constant dense<0.000000e+00> : vector<8x64xf32>
    %261 = tpu.matmul %258, %260, %cst_262 {dimension_numbers = #tpu.dot_dimension_numbers<[1], [0], [0], [1], [0, 0, 1, 1], [], []>} : vector<8x128xbf16>, vector<128x64xbf16>, vector<8x64xf32> -> vector<8x64xf32>
    %262 = arith.addf %256, %261 : vector<8x64xf32>
    %c44 = arith.constant 44 : index
    %c0_263 = arith.constant 0 : index
    %c0_264 = arith.constant 0 : index
    %263 = vector.load %arg1[%c44, %c0_263, %c0_264] : memref<52x8x128xbf16, #tpu.memory_space<vmem>>, vector<1x8x128xbf16>
    %264 = vector.shape_cast %263 : vector<1x8x128xbf16> to vector<8x128xbf16>
    %c44_265 = arith.constant 44 : index
    %c0_266 = arith.constant 0 : index
    %c0_267 = arith.constant 0 : index
    %265 = vector.load %arg2[%c44_265, %c0_266, %c0_267] : memref<52x128x64xbf16, #tpu.memory_space<vmem>>, vector<1x128x64xbf16>
    %266 = vector.shape_cast %265 : vector<1x128x64xbf16> to vector<128x64xbf16>
    %cst_268 = arith.constant dense<0.000000e+00> : vector<8x64xf32>
    %267 = tpu.matmul %264, %266, %cst_268 {dimension_numbers = #tpu.dot_dimension_numbers<[1], [0], [0], [1], [0, 0, 1, 1], [], []>} : vector<8x128xbf16>, vector<128x64xbf16>, vector<8x64xf32> -> vector<8x64xf32>
    %268 = arith.addf %262, %267 : vector<8x64xf32>
    %c45 = arith.constant 45 : index
    %c0_269 = arith.constant 0 : index
    %c0_270 = arith.constant 0 : index
    %269 = vector.load %arg1[%c45, %c0_269, %c0_270] : memref<52x8x128xbf16, #tpu.memory_space<vmem>>, vector<1x8x128xbf16>
    %270 = vector.shape_cast %269 : vector<1x8x128xbf16> to vector<8x128xbf16>
    %c45_271 = arith.constant 45 : index
    %c0_272 = arith.constant 0 : index
    %c0_273 = arith.constant 0 : index
    %271 = vector.load %arg2[%c45_271, %c0_272, %c0_273] : memref<52x128x64xbf16, #tpu.memory_space<vmem>>, vector<1x128x64xbf16>
    %272 = vector.shape_cast %271 : vector<1x128x64xbf16> to vector<128x64xbf16>
    %cst_274 = arith.constant dense<0.000000e+00> : vector<8x64xf32>
    %273 = tpu.matmul %270, %272, %cst_274 {dimension_numbers = #tpu.dot_dimension_numbers<[1], [0], [0], [1], [0, 0, 1, 1], [], []>} : vector<8x128xbf16>, vector<128x64xbf16>, vector<8x64xf32> -> vector<8x64xf32>
    %274 = arith.addf %268, %273 : vector<8x64xf32>
    %c46 = arith.constant 46 : index
    %c0_275 = arith.constant 0 : index
    %c0_276 = arith.constant 0 : index
    %275 = vector.load %arg1[%c46, %c0_275, %c0_276] : memref<52x8x128xbf16, #tpu.memory_space<vmem>>, vector<1x8x128xbf16>
    %276 = vector.shape_cast %275 : vector<1x8x128xbf16> to vector<8x128xbf16>
    %c46_277 = arith.constant 46 : index
    %c0_278 = arith.constant 0 : index
    %c0_279 = arith.constant 0 : index
    %277 = vector.load %arg2[%c46_277, %c0_278, %c0_279] : memref<52x128x64xbf16, #tpu.memory_space<vmem>>, vector<1x128x64xbf16>
    %278 = vector.shape_cast %277 : vector<1x128x64xbf16> to vector<128x64xbf16>
    %cst_280 = arith.constant dense<0.000000e+00> : vector<8x64xf32>
    %279 = tpu.matmul %276, %278, %cst_280 {dimension_numbers = #tpu.dot_dimension_numbers<[1], [0], [0], [1], [0, 0, 1, 1], [], []>} : vector<8x128xbf16>, vector<128x64xbf16>, vector<8x64xf32> -> vector<8x64xf32>
    %280 = arith.addf %274, %279 : vector<8x64xf32>
    %c47 = arith.constant 47 : index
    %c0_281 = arith.constant 0 : index
    %c0_282 = arith.constant 0 : index
    %281 = vector.load %arg1[%c47, %c0_281, %c0_282] : memref<52x8x128xbf16, #tpu.memory_space<vmem>>, vector<1x8x128xbf16>
    %282 = vector.shape_cast %281 : vector<1x8x128xbf16> to vector<8x128xbf16>
    %c47_283 = arith.constant 47 : index
    %c0_284 = arith.constant 0 : index
    %c0_285 = arith.constant 0 : index
    %283 = vector.load %arg2[%c47_283, %c0_284, %c0_285] : memref<52x128x64xbf16, #tpu.memory_space<vmem>>, vector<1x128x64xbf16>
    %284 = vector.shape_cast %283 : vector<1x128x64xbf16> to vector<128x64xbf16>
    %cst_286 = arith.constant dense<0.000000e+00> : vector<8x64xf32>
    %285 = tpu.matmul %282, %284, %cst_286 {dimension_numbers = #tpu.dot_dimension_numbers<[1], [0], [0], [1], [0, 0, 1, 1], [], []>} : vector<8x128xbf16>, vector<128x64xbf16>, vector<8x64xf32> -> vector<8x64xf32>
    %286 = arith.addf %280, %285 : vector<8x64xf32>
    %c48 = arith.constant 48 : index
    %c0_287 = arith.constant 0 : index
    %c0_288 = arith.constant 0 : index
    %287 = vector.load %arg1[%c48, %c0_287, %c0_288] : memref<52x8x128xbf16, #tpu.memory_space<vmem>>, vector<1x8x128xbf16>
    %288 = vector.shape_cast %287 : vector<1x8x128xbf16> to vector<8x128xbf16>
    %c48_289 = arith.constant 48 : index
    %c0_290 = arith.constant 0 : index
    %c0_291 = arith.constant 0 : index
    %289 = vector.load %arg2[%c48_289, %c0_290, %c0_291] : memref<52x128x64xbf16, #tpu.memory_space<vmem>>, vector<1x128x64xbf16>
    %290 = vector.shape_cast %289 : vector<1x128x64xbf16> to vector<128x64xbf16>
    %cst_292 = arith.constant dense<0.000000e+00> : vector<8x64xf32>
    %291 = tpu.matmul %288, %290, %cst_292 {dimension_numbers = #tpu.dot_dimension_numbers<[1], [0], [0], [1], [0, 0, 1, 1], [], []>} : vector<8x128xbf16>, vector<128x64xbf16>, vector<8x64xf32> -> vector<8x64xf32>
    %292 = arith.addf %286, %291 : vector<8x64xf32>
    %c49 = arith.constant 49 : index
    %c0_293 = arith.constant 0 : index
    %c0_294 = arith.constant 0 : index
    %293 = vector.load %arg1[%c49, %c0_293, %c0_294] : memref<52x8x128xbf16, #tpu.memory_space<vmem>>, vector<1x8x128xbf16>
    %294 = vector.shape_cast %293 : vector<1x8x128xbf16> to vector<8x128xbf16>
    %c49_295 = arith.constant 49 : index
    %c0_296 = arith.constant 0 : index
    %c0_297 = arith.constant 0 : index
    %295 = vector.load %arg2[%c49_295, %c0_296, %c0_297] : memref<52x128x64xbf16, #tpu.memory_space<vmem>>, vector<1x128x64xbf16>
    %296 = vector.shape_cast %295 : vector<1x128x64xbf16> to vector<128x64xbf16>
    %cst_298 = arith.constant dense<0.000000e+00> : vector<8x64xf32>
    %297 = tpu.matmul %294, %296, %cst_298 {dimension_numbers = #tpu.dot_dimension_numbers<[1], [0], [0], [1], [0, 0, 1, 1], [], []>} : vector<8x128xbf16>, vector<128x64xbf16>, vector<8x64xf32> -> vector<8x64xf32>
    %298 = arith.addf %292, %297 : vector<8x64xf32>
    %c50 = arith.constant 50 : index
    %c0_299 = arith.constant 0 : index
    %c0_300 = arith.constant 0 : index
    %299 = vector.load %arg1[%c50, %c0_299, %c0_300] : memref<52x8x128xbf16, #tpu.memory_space<vmem>>, vector<1x8x128xbf16>
    %300 = vector.shape_cast %299 : vector<1x8x128xbf16> to vector<8x128xbf16>
    %c50_301 = arith.constant 50 : index
    %c0_302 = arith.constant 0 : index
    %c0_303 = arith.constant 0 : index
    %301 = vector.load %arg2[%c50_301, %c0_302, %c0_303] : memref<52x128x64xbf16, #tpu.memory_space<vmem>>, vector<1x128x64xbf16>
    %302 = vector.shape_cast %301 : vector<1x128x64xbf16> to vector<128x64xbf16>
    %cst_304 = arith.constant dense<0.000000e+00> : vector<8x64xf32>
    %303 = tpu.matmul %300, %302, %cst_304 {dimension_numbers = #tpu.dot_dimension_numbers<[1], [0], [0], [1], [0, 0, 1, 1], [], []>} : vector<8x128xbf16>, vector<128x64xbf16>, vector<8x64xf32> -> vector<8x64xf32>
    %304 = arith.addf %298, %303 : vector<8x64xf32>
    %c51 = arith.constant 51 : index
    %c0_305 = arith.constant 0 : index
    %c0_306 = arith.constant 0 : index
    %305 = vector.load %arg1[%c51, %c0_305, %c0_306] : memref<52x8x128xbf16, #tpu.memory_space<vmem>>, vector<1x8x128xbf16>
    %306 = vector.shape_cast %305 : vector<1x8x128xbf16> to vector<8x128xbf16>
    %c51_307 = arith.constant 51 : index
    %c0_308 = arith.constant 0 : index
    %c0_309 = arith.constant 0 : index
    %307 = vector.load %arg2[%c51_307, %c0_308, %c0_309] : memref<52x128x64xbf16, #tpu.memory_space<vmem>>, vector<1x128x64xbf16>
    %308 = vector.shape_cast %307 : vector<1x128x64xbf16> to vector<128x64xbf16>
    %cst_310 = arith.constant dense<0.000000e+00> : vector<8x64xf32>
    %309 = tpu.matmul %306, %308, %cst_310 {dimension_numbers = #tpu.dot_dimension_numbers<[1], [0], [0], [1], [0, 0, 1, 1], [], []>} : vector<8x128xbf16>, vector<128x64xbf16>, vector<8x64xf32> -> vector<8x64xf32>
    %310 = arith.addf %304, %309 : vector<8x64xf32>
    %c0_311 = arith.constant 0 : index
    %c0_312 = arith.constant 0 : index
    %311 = vector.load %arg3[%c0_311, %c0_312] : memref<1x64xf32, #tpu.memory_space<vmem>>, vector<1x64xf32>
    %312 = vector.broadcast %311 : vector<1x64xf32> to vector<8x64xf32>
    %313 = arith.addf %310, %312 : vector<8x64xf32>
    %cst_313 = arith.constant 0.000000e+00 : f32
    %314 = vector.broadcast %cst_313 : f32 to vector<8x64xf32>
    %315 = arith.maximumf %313, %314 : vector<8x64xf32>
    %316 = arith.truncf %315 : vector<8x64xf32> to vector<8x64xbf16>
    %c0_314 = arith.constant 0 : index
    %c0_315 = arith.constant 0 : index
    %317 = vector.load %arg4[%c0_314, %c0_315] : memref<64x128xbf16, #tpu.memory_space<vmem>>, vector<64x128xbf16>
    %cst_316 = arith.constant dense<0.000000e+00> : vector<8x128xf32>
    %318 = tpu.matmul %316, %317, %cst_316 {dimension_numbers = #tpu.dot_dimension_numbers<[1], [0], [0], [1], [0, 0, 1, 1], [], []>} : vector<8x64xbf16>, vector<64x128xbf16>, vector<8x128xf32> -> vector<8x128xf32>
    %c0_317 = arith.constant 0 : index
    %c0_318 = arith.constant 0 : index
    %319 = vector.load %arg5[%c0_317, %c0_318] : memref<1x128xf32, #tpu.memory_space<vmem>>, vector<1x128xf32>
    %320 = vector.broadcast %319 : vector<1x128xf32> to vector<8x128xf32>
    %321 = arith.addf %318, %320 : vector<8x128xf32>
    %c0_319 = arith.constant 0 : index
    %c0_320 = arith.constant 0 : index
    %322 = vector.load %arg6[%c0_319, %c0_320] : memref<8x128xf32, #tpu.memory_space<vmem>>, vector<8x128xf32>
    tpu.vector_store %arg6[%c0_319, %c0_320], %321 {strides = array<i32>} : memref<8x128xf32, #tpu.memory_space<vmem>>, vector<8x128xf32>,
    return
  }
  func.func @transform_0(%arg0: i32) -> (i32, i32, i32) {
    %c0_i32 = arith.constant 0 : i32
    %c0_i32_0 = arith.constant 0 : i32
    %c0_i32_1 = arith.constant 0 : i32
    return %c0_i32, %arg0, %c0_i32_0 : i32, i32, i32
  }
  func.func @transform_1(%arg0: i32) -> (i32, i32, i32) {
    %c0_i32 = arith.constant 0 : i32
    %c0_i32_0 = arith.constant 0 : i32
    %c0_i32_1 = arith.constant 0 : i32
    %c0_i32_2 = arith.constant 0 : i32
    return %c0_i32, %c0_i32_0, %c0_i32_1 : i32, i32, i32
  }
  func.func @transform_2(%arg0: i32) -> (i32, i32) {
    %c0_i32 = arith.constant 0 : i32
    %c0_i32_0 = arith.constant 0 : i32
    %c0_i32_1 = arith.constant 0 : i32
    return %c0_i32, %c0_i32_0 : i32, i32
  }
  func.func @transform_3(%arg0: i32) -> (i32, i32) {
    %c0_i32 = arith.constant 0 : i32
    %c0_i32_0 = arith.constant 0 : i32
    %c0_i32_1 = arith.constant 0 : i32
    return %c0_i32, %c0_i32_0 : i32, i32
  }
  func.func @transform_4(%arg0: i32) -> (i32, i32) {
    %c0_i32 = arith.constant 0 : i32
    %c0_i32_0 = arith.constant 0 : i32
    %c0_i32_1 = arith.constant 0 : i32
    return %c0_i32, %c0_i32_0 : i32, i32
  }
  func.func @transform_5(%arg0: i32) -> (i32, i32) {
    %c0_i32 = arith.constant 0 : i32
    %c0_i32_0 = arith.constant 0 : i32
    return %arg0, %c0_i32 : i32, i32
  }
}

</mosaic_0001>

<bundles_post_ra>
// kernel: forward_staged.3
= control target key start
LH: loop header
LB: loop body
LE: loop exit
PB: predicated region body
PF: predicated region fallthrough
CT: control target
= control target key end

     0   :  { %8 = vsyncpa [#allocation3], 0  ;;  %s1618_s0 = inlined_call_operand.vmem [shape: bf16[52,8,14], index: 0, kind: input, shape index: {}]   ;;  %s1619_s1 = inlined_call_operand.hbm [shape: bf16[14,128], index: 1, kind: input, shape index: {}]   ;;  %s1620_s2 = inlined_call_operand.hbm [shape: f32[1,128], index: 2, kind: input, shape index: {}]   ;;  %s1621_s3 = inlined_call_operand.vmem [shape: bf16[52,8,128], index: 3, kind: output, shape index: {}]  }
   0x1   :  { %9 = vsyncpa [#allocation5], 0  ;;  %s1352_s12 = smov [#allocation2]  }
   0x2   :  { %s17_s13 = sshll.u32 %s1352_s12, 4  ;;  %s18_s13 = int_to_ptr.vmem [resolvable:$true] %s17_s13 }
   0x3   :  { %s1316_s14 = scalar_lea.vmem %s18_s13, 128  ;;  %p1321_p1 = scmp.lt.s32.totalorder %s18_s13, %s18_s13 }
   0x4   :  { %p1317_p0 = scmp.ne.s32.totalorder %s18_s13, %s1316_s14  ;;  %p1322_p2 = scmp.lt.s32.totalorder %s1316_s14, %s1316_s14 }
   0x6   :  { %p1323_p3 = por %p1322_p2, %p1321_p1 }
   0x8   :  { %p1324_p4 = pnand %p1323_p3, %p1317_p0 }
   0xa   :  { %1327 = shalt.err (!%p1324_p4)
}
   0xb   :  { %s1353_s15 = smov 64   ;;  %s1354_s16 = smov 4  }
   0xc   :  { %23 = dma.hbm_to_vmem [thread:$0]  %s1619_s1, 128, %s18_s13, [#allocation3], %s1353_s15, %s1353_s15, %s1354_s16  }
   0xd   :  { %s1355_s19 = smov [#allocation4]  }
   0xe   :  { %s30_s20 = sshll.u32 %s1355_s19, 4  ;;  %s31_s20 = int_to_ptr.vmem [resolvable:$true] %s30_s20 }
   0xf   :  { %s1336_s21 = scalar_lea.vmem %s31_s20, 16  ;;  %s1340_s22 = scalar_lea.vmem %s31_s20, 32 }
  0x10   :  { %p1337_p5 = scmp.ne.s32.totalorder %s31_s20, %s1336_s21  ;;  %p1341_p6 = scmp.lt.s32.totalorder %s31_s20, %s31_s20 }
  0x11   :  { %p1342_p7 = scmp.lt.s32.totalorder %s1340_s22, %s1336_s21 }
  0x13   :  { %p1343_p8 = por %p1342_p7, %p1341_p6 }
  0x15   :  { %p1344_p9 = pnand %p1343_p8, %p1337_p5 }
  0x17   :  { %1347 = shalt.err (!%p1344_p9)
}
  0x18   :  { %33 = dma.hbm_to_vmem [thread:$0]  %s1620_s2, 16, %s31_s20, [#allocation5]  }
  0x19   :  { %1348 = dma.done.wait [#allocation3], 128  }
  0x1a   :  { %1349 = vsyncadd [#allocation3], 4294967168 }
  0x1b   :  { %1350 = dma.done.wait [#allocation5], 16  }
  0x1c   :  { %1351 = vsyncadd [#allocation5], 4294967280  ;;  %vm316_vm0 = vcmask 1046528   ;;  %v1281_v0 = vld [vmem:[#allocation2] sm:$0x7f]   ;;  %vm237_vm1 = vcmask 113664  }
  0x1d   :  { %v1282_v1 = vld [vmem:[%s1618_s0] sm:$0xff]   ;;  %1275 = vmatprep.subr.msk.bf16.mxu0 %vm316_vm0, %v1281_v0  ;;  %v318_v2 = vsel %vm316_vm0, %v1281_v0, 0  ;;  %1276 = vmatprep.subr.msk.bf16.mxu1 %vm316_vm0, %v1281_v0  ;;  %v1283_v3 = vld [vmem:[%s1618_s0 + $0x8] sm:$0xff]   ;;  %v1284_v4 = vld [vmem:[%s1618_s0 + $0x70] sm:$0xff]  }
  0x1e   :  { %1220 = vmatpush3.bf16.msra.mxu0 %v318_v2  ;;  %1274 = vmatpush3.bf16.msra.mxu1 %v318_v2  ;;  %v1285_v5 = vld [vmem:[%s1618_s0 + $0x78] sm:$0xff]   ;;  %v1286_v6 = vld [vmem:[%s1618_s0 + $0x10] sm:$0xff]   ;;  %v1288_v7 = vld [vmem:[%s1618_s0 + $0x80] sm:$0xff]  }
  0x1f   :  { %1221 = vmatprep.mubr.msk.bf16.mxu0 %vm237_vm1, %v1282_v1  ;;  %1249 = vmatprep.mubr.msk.bf16.mxu1 %vm237_vm1, %v1284_v4  ;;  %v1287_v8 = vld [vmem:[%s1618_s0 + $0x18] sm:$0xff]   ;;  %v1289_v9 = vld [vmem:[%s1618_s0 + $0x88] sm:$0xff]   ;;  %v1290_v10 = vld [vmem:[%s1618_s0 + $0x20] sm:$0xff]  }
  0x20   :  { %v1292_v11 = vld [vmem:[%s1618_s0 + $0x90] sm:$0xff]   ;;  %v1291_v12 = vld [vmem:[%s1618_s0 + $0x28] sm:$0xff]   ;;  %v1293_v13 = vld [vmem:[%s1618_s0 + $0x98] sm:$0xff]  }
  0x21   :  { %1222 = vmatmul.mubr.msk.bf16.vlgmr.msra.gmra.mxu0 %vm237_vm1, %v1283_v3  ;;  %1250 = vmatmul.mubr.msk.bf16.vlgmr.msra.gmra.mxu1 %vm237_vm1, %v1285_v5  ;;  %v1294_v14 = vld [vmem:[%s1618_s0 + $0x30] sm:$0xff]   ;;  %v1296_v15 = vld [vmem:[%s1618_s0 + $0xa0] sm:$0xff]   ;;  %v1295_v16 = vld [vmem:[%s1618_s0 + $0x38] sm:$0xff]  }
  0x22   :  { %1225 = vmatprep.mubr.msk.bf16.mxu0 %vm237_vm1, %v1286_v6  ;;  %1253 = vmatprep.mubr.msk.bf16.mxu1 %vm237_vm1, %v1288_v7  ;;  %v1297_v17 = vld [vmem:[%s1618_s0 + $0xa8] sm:$0xff]   ;;  %v1298_v18 = vld [vmem:[%s1618_s0 + $0x40] sm:$0xff]   ;;  %v1300_v19 = vld [vmem:[%s1618_s0 + $0xb0] sm:$0xff]  }
  0x23   :  { %v1299_v20 = vld [vmem:[%s1618_s0 + $0x48] sm:$0xff]   ;;  %v1301_v21 = vld [vmem:[%s1618_s0 + $0xb8] sm:$0xff]   ;;  %v1302_v22 = vld [vmem:[%s1618_s0 + $0x50] sm:$0xff]  }
  0x24   :  { %v1304_v23 = vld [vmem:[%s1618_s0 + $0xc0] sm:$0xff]   ;;  %v1303_v24 = vld [vmem:[%s1618_s0 + $0x58] sm:$0xff]   ;;  %v1305_v25 = vld [vmem:[%s1618_s0 + $0xc8] sm:$0xff]  }
  0x25   :  { %v1306_v26 = vld [vmem:[%s1618_s0 + $0x60] sm:$0xff]   ;;  %v1307_v27 = vld [vmem:[%s1618_s0 + $0x68] sm:$0xff]  }
  0x26   :  { %v1486_v28 = vld [vmem:[#allocation4] ss:$0 sm:$0xff] }
  0x29   :  { %1226 = vmatmul.mubr.msk.bf16.gmra.mxu0 %vm237_vm1, %v1287_v8  ;;  %1254 = vmatmul.mubr.msk.bf16.gmra.mxu1 %vm237_vm1, %v1289_v9 }
  0x2a   :  { %1229 = vmatprep.mubr.msk.bf16.mxu0 %vm237_vm1, %v1290_v10  ;;  %1257 = vmatprep.mubr.msk.bf16.mxu1 %vm237_vm1, %v1292_v11 }
  0x31   :  { %1230 = vmatmul.mubr.msk.bf16.gmra.mxu0 %vm237_vm1, %v1291_v12  ;;  %1258 = vmatmul.mubr.msk.bf16.gmra.mxu1 %vm237_vm1, %v1293_v13 }
  0x32   :  { %1233 = vmatprep.mubr.msk.bf16.mxu0 %vm237_vm1, %v1294_v14  ;;  %1261 = vmatprep.mubr.msk.bf16.mxu1 %vm237_vm1, %v1296_v15 }
  0x39   :  { %1234 = vmatmul.mubr.msk.bf16.gmra.mxu0 %vm237_vm1, %v1295_v16  ;;  %1262 = vmatmul.mubr.msk.bf16.gmra.mxu1 %vm237_vm1, %v1297_v17 }
  0x3a   :  { %1237 = vmatprep.mubr.msk.bf16.mxu0 %vm237_vm1, %v1298_v18  ;;  %1265 = vmatprep.mubr.msk.bf16.mxu1 %vm237_vm1, %v1300_v19 }
  0x41   :  { %1238 = vmatmul.mubr.msk.bf16.gmra.mxu0 %vm237_vm1, %v1299_v20  ;;  %1266 = vmatmul.mubr.msk.bf16.gmra.mxu1 %vm237_vm1, %v1301_v21 }
  0x42   :  { %1241 = vmatprep.mubr.msk.bf16.mxu0 %vm237_vm1, %v1302_v22  ;;  %1269 = vmatprep.mubr.msk.bf16.mxu1 %vm237_vm1, %v1304_v23 }
  0x49   :  { %1242 = vmatmul.mubr.msk.bf16.gmra.mxu0 %vm237_vm1, %v1303_v24  ;;  %1270 = vmatmul.mubr.msk.bf16.gmra.mxu1 %vm237_vm1, %v1305_v25 }
  0x4a   :  { %1245 = vmatprep.mubr.msk.bf16.mxu0 %vm237_vm1, %v1306_v26 }
  0x51   :  { %1246 = vmatmul.mubr.msk.bf16.gmra.mxu0 %vm237_vm1, %v1307_v27 }
  0xe1   :  { %v1223_v29 = vpop.f32.mrf.mxu0  ;;  %v1251_v30 = vpop.f32.mrf.mxu1 }
  0xe2   :  { %v475_v31 = vadd.f32 %v1251_v30, %v1486_v28  ;;  %v363_v32 = vadd.f32 %v1223_v29, %v1486_v28 }
  0xe3   :  { %v354_v33 = vpop.f32.mrf.mxu0  ;;  %v466_v34 = vpop.f32.mrf.mxu1 }
  0xe4   :  { %v467_v36 = vadd.f32 %v1486_v28, %v466_v34  ;;  %v355_v38 = vadd.f32 %v1486_v28, %v354_v33  ;;  %v591_v39 = vmax.f32 %v475_v31, 0.0  ;;  %v563_v42 = vmax.f32 %v363_v32, 0.0 }
  0xe5   :  { %v1224_v35 = vpop.f32.mrf.mxu0  ;;  %v1252_v37 = vpop.f32.mrf.mxu1 }
  0xe6   :  { %v366_v40 = vadd.f32 %v1224_v35, %v1486_v28  ;;  %v478_v41 = vadd.f32 %v1252_v37, %v1486_v28  ;;  %v589_v49 = vmax.f32 %v467_v36, 0.0  ;;  %v561_v52 = vmax.f32 %v355_v38, 0.0 }
  0xe7   :  { %v357_v43 = vpop.f32.mrf.mxu0  ;;  %v469_v44 = vpop.f32.mrf.mxu1 }
  0xe8   :  { %v564_v45 = vmax.f32 %v366_v40, 0.0  ;;  %v358_v46 = vadd.f32 %v1486_v28, %v357_v43  ;;  %v592_v47 = vmax.f32 %v478_v41, 0.0  ;;  %v470_v48 = vadd.f32 %v1486_v28, %v469_v44 }
  0xe9   :  { %v1227_v50 = vpop.f32.mrf.mxu0  ;;  %v1255_v51 = vpop.f32.mrf.mxu1 }
  0xea   :  { %v1045_v53 = vpack.c.bf16 %v564_v45, %v563_v42  ;;  %v562_v54 = vmax.f32 %v358_v46, 0.0  ;;  %v1115_v55 = vpack.c.bf16 %v592_v47, %v591_v39  ;;  %v379_v56 = vadd.f32 %v1227_v50, %v1486_v28 }
  0xeb   :  { %v590_v57 = vmax.f32 %v470_v48, 0.0  ;;  %v370_v58 = vpop.f32.mrf.mxu0  ;;  %v491_v59 = vadd.f32 %v1255_v51, %v1486_v28  ;;  %v482_v60 = vpop.f32.mrf.mxu1 }
  0xec   :  { %1167 = vst [vmem:[%s1621_s3 + $0x8] sm:$0xff] %v1045_v53   ;;  %v1040_v61 = vpack.c.bf16 %v562_v54, %v561_v52  ;;  %1181 = vst [vmem:[%s1621_s3 + $0x78] sm:$0xff] %v1115_v55   ;;  %v483_v0 = vadd.f32 %v1486_v28, %v482_v60  ;;  %v371_v2 = vadd.f32 %v1486_v28, %v370_v58  ;;  %v567_v6 = vmax.f32 %v379_v56, 0.0 }
  0xed   :  { %v1110_v62 = vpack.c.bf16 %v590_v57, %v589_v49  ;;  %v1228_v63 = vpop.f32.mrf.mxu0  ;;  %v1256_v1 = vpop.f32.mrf.mxu1  ;;  %v595_v3 = vmax.f32 %v491_v59, 0.0 }
  0xee   :  { %1041 = vst [vmem:[%s1621_s3] sm:$0xff] %v1040_v61   ;;  %v382_v4 = vadd.f32 %v1228_v63, %v1486_v28  ;;  %v494_v5 = vadd.f32 %v1256_v1, %v1486_v28  ;;  %v593_v13 = vmax.f32 %v483_v0, 0.0  ;;  %v565_v16 = vmax.f32 %v371_v2, 0.0 }
  0xef   :  { %1180 = vst [vmem:[%s1621_s3 + $0x70] sm:$0xff] %v1110_v62   ;;  %v373_v7 = vpop.f32.mrf.mxu0  ;;  %v485_v8 = vpop.f32.mrf.mxu1 }
  0xf0   :  { %v568_v9 = vmax.f32 %v382_v4, 0.0  ;;  %v374_v10 = vadd.f32 %v1486_v28, %v373_v7  ;;  %v596_v11 = vmax.f32 %v494_v5, 0.0  ;;  %v486_v12 = vadd.f32 %v1486_v28, %v485_v8 }
  0xf1   :  { %v1231_v14 = vpop.f32.mrf.mxu0  ;;  %v1259_v15 = vpop.f32.mrf.mxu1 }
  0xf2   :  { %v1055_v17 = vpack.c.bf16 %v568_v9, %v567_v6  ;;  %v566_v18 = vmax.f32 %v374_v10, 0.0  ;;  %v1125_v19 = vpack.c.bf16 %v596_v11, %v595_v3  ;;  %v395_v20 = vadd.f32 %v1231_v14, %v1486_v28 }
  0xf3   :  { %v594_v21 = vmax.f32 %v486_v12, 0.0  ;;  %v386_v22 = vpop.f32.mrf.mxu0  ;;  %v507_v23 = vadd.f32 %v1259_v15, %v1486_v28  ;;  %v498_v24 = vpop.f32.mrf.mxu1 }
  0xf4   :  { %1169 = vst [vmem:[%s1621_s3 + $0x18] sm:$0xff] %v1055_v17   ;;  %v1050_v25 = vpack.c.bf16 %v566_v18, %v565_v16  ;;  %1183 = vst [vmem:[%s1621_s3 + $0x88] sm:$0xff] %v1125_v19   ;;  %v499_v29 = vadd.f32 %v1486_v28, %v498_v24  ;;  %v387_v31 = vadd.f32 %v1486_v28, %v386_v22  ;;  %v571_v35 = vmax.f32 %v395_v20, 0.0 }
  0xf5   :  { %v1120_v26 = vpack.c.bf16 %v594_v21, %v593_v13  ;;  %v1232_v27 = vpop.f32.mrf.mxu0  ;;  %v1260_v30 = vpop.f32.mrf.mxu1  ;;  %v599_v32 = vmax.f32 %v507_v23, 0.0 }
  0xf6   :  { %1168 = vst [vmem:[%s1621_s3 + $0x10] sm:$0xff] %v1050_v25   ;;  %v398_v33 = vadd.f32 %v1232_v27, %v1486_v28  ;;  %v510_v34 = vadd.f32 %v1260_v30, %v1486_v28  ;;  %v597_v42 = vmax.f32 %v499_v29, 0.0  ;;  %v569_v45 = vmax.f32 %v387_v31, 0.0 }
  0xf7   :  { %1182 = vst [vmem:[%s1621_s3 + $0x80] sm:$0xff] %v1120_v26   ;;  %v389_v36 = vpop.f32.mrf.mxu0  ;;  %v501_v37 = vpop.f32.mrf.mxu1 }
  0xf8   :  { %v572_v38 = vmax.f32 %v398_v33, 0.0  ;;  %v390_v39 = vadd.f32 %v1486_v28, %v389_v36  ;;  %v600_v40 = vmax.f32 %v510_v34, 0.0  ;;  %v502_v41 = vadd.f32 %v1486_v28, %v501_v37 }
  0xf9   :  { %v1235_v43 = vpop.f32.mrf.mxu0  ;;  %v1263_v44 = vpop.f32.mrf.mxu1 }
  0xfa   :  { %v1065_v46 = vpack.c.bf16 %v572_v38, %v571_v35  ;;  %v570_v47 = vmax.f32 %v390_v39, 0.0  ;;  %v1135_v48 = vpack.c.bf16 %v600_v40, %v599_v32  ;;  %v411_v49 = vadd.f32 %v1235_v43, %v1486_v28 }
  0xfb   :  { %v598_v50 = vmax.f32 %v502_v41, 0.0  ;;  %v402_v51 = vpop.f32.mrf.mxu0  ;;  %v523_v52 = vadd.f32 %v1263_v44, %v1486_v28  ;;  %v514_v53 = vpop.f32.mrf.mxu1 }
  0xfc   :  { %1171 = vst [vmem:[%s1621_s3 + $0x28] sm:$0xff] %v1065_v46   ;;  %v1060_v54 = vpack.c.bf16 %v570_v47, %v569_v45  ;;  %1185 = vst [vmem:[%s1621_s3 + $0x98] sm:$0xff] %v1135_v48   ;;  %v515_v57 = vadd.f32 %v1486_v28, %v514_v53  ;;  %v403_v59 = vadd.f32 %v1486_v28, %v402_v51  ;;  %v575_v63 = vmax.f32 %v411_v49, 0.0 }
  0xfd   :  { %v1130_v55 = vpack.c.bf16 %v598_v50, %v597_v42  ;;  %v1236_v56 = vpop.f32.mrf.mxu0  ;;  %v1264_v58 = vpop.f32.mrf.mxu1  ;;  %v603_v60 = vmax.f32 %v523_v52, 0.0 }
  0xfe   :  { %1170 = vst [vmem:[%s1621_s3 + $0x20] sm:$0xff] %v1060_v54   ;;  %v414_v61 = vadd.f32 %v1236_v56, %v1486_v28  ;;  %v526_v62 = vadd.f32 %v1264_v58, %v1486_v28  ;;  %v601_v6 = vmax.f32 %v515_v57, 0.0  ;;  %v573_v9 = vmax.f32 %v403_v59, 0.0 }
  0xff   :  { %1184 = vst [vmem:[%s1621_s3 + $0x90] sm:$0xff] %v1130_v55   ;;  %v405_v0 = vpop.f32.mrf.mxu0  ;;  %v517_v1 = vpop.f32.mrf.mxu1 }
 0x100   :  { %v576_v2 = vmax.f32 %v414_v61, 0.0  ;;  %v406_v3 = vadd.f32 %v1486_v28, %v405_v0  ;;  %v604_v4 = vmax.f32 %v526_v62, 0.0  ;;  %v518_v5 = vadd.f32 %v1486_v28, %v517_v1 }
 0x101   :  { %v1239_v7 = vpop.f32.mrf.mxu0  ;;  %v1267_v8 = vpop.f32.mrf.mxu1 }
 0x102   :  { %v1075_v10 = vpack.c.bf16 %v576_v2, %v575_v63  ;;  %v574_v11 = vmax.f32 %v406_v3, 0.0  ;;  %v1145_v12 = vpack.c.bf16 %v604_v4, %v603_v60  ;;  %v427_v13 = vadd.f32 %v1239_v7, %v1486_v28 }
 0x103   :  { %v602_v14 = vmax.f32 %v518_v5, 0.0  ;;  %v418_v15 = vpop.f32.mrf.mxu0  ;;  %v539_v16 = vadd.f32 %v1267_v8, %v1486_v28  ;;  %v530_v17 = vpop.f32.mrf.mxu1 }
 0x104   :  { %1173 = vst [vmem:[%s1621_s3 + $0x38] sm:$0xff] %v1075_v10   ;;  %v1070_v18 = vpack.c.bf16 %v574_v11, %v573_v9  ;;  %1187 = vst [vmem:[%s1621_s3 + $0xa8] sm:$0xff] %v1145_v12   ;;  %v531_v21 = vadd.f32 %v1486_v28, %v530_v17  ;;  %v419_v23 = vadd.f32 %v1486_v28, %v418_v15  ;;  %v579_v27 = vmax.f32 %v427_v13, 0.0 }
 0x105   :  { %v1140_v19 = vpack.c.bf16 %v602_v14, %v601_v6  ;;  %v1240_v20 = vpop.f32.mrf.mxu0  ;;  %v1268_v22 = vpop.f32.mrf.mxu1  ;;  %v607_v24 = vmax.f32 %v539_v16, 0.0 }
 0x106   :  { %1172 = vst [vmem:[%s1621_s3 + $0x30] sm:$0xff] %v1070_v18   ;;  %v430_v25 = vadd.f32 %v1240_v20, %v1486_v28  ;;  %v542_v26 = vadd.f32 %v1268_v22, %v1486_v28  ;;  %v605_v35 = vmax.f32 %v531_v21, 0.0  ;;  %v577_v38 = vmax.f32 %v419_v23, 0.0 }
 0x107   :  { %1186 = vst [vmem:[%s1621_s3 + $0xa0] sm:$0xff] %v1140_v19   ;;  %v421_v29 = vpop.f32.mrf.mxu0  ;;  %v533_v30 = vpop.f32.mrf.mxu1 }
 0x108   :  { %v580_v31 = vmax.f32 %v430_v25, 0.0  ;;  %v422_v32 = vadd.f32 %v1486_v28, %v421_v29  ;;  %v608_v33 = vmax.f32 %v542_v26, 0.0  ;;  %v534_v34 = vadd.f32 %v1486_v28, %v533_v30 }
 0x109   :  { %v1243_v36 = vpop.f32.mrf.mxu0  ;;  %v1271_v37 = vpop.f32.mrf.mxu1 }
 0x10a   :  { %v1085_v39 = vpack.c.bf16 %v580_v31, %v579_v27  ;;  %v578_v40 = vmax.f32 %v422_v32, 0.0  ;;  %v1155_v41 = vpack.c.bf16 %v608_v33, %v607_v24  ;;  %v443_v42 = vadd.f32 %v1243_v36, %v1486_v28 }
 0x10b   :  { %v606_v43 = vmax.f32 %v534_v34, 0.0  ;;  %v434_v44 = vpop.f32.mrf.mxu0  ;;  %v555_v45 = vadd.f32 %v1271_v37, %v1486_v28  ;;  %v546_v46 = vpop.f32.mrf.mxu1 }
 0x10c   :  { %1175 = vst [vmem:[%s1621_s3 + $0x48] sm:$0xff] %v1085_v39   ;;  %v1080_v47 = vpack.c.bf16 %v578_v40, %v577_v38  ;;  %1189 = vst [vmem:[%s1621_s3 + $0xb8] sm:$0xff] %v1155_v41   ;;  %v547_v50 = vadd.f32 %v1486_v28, %v546_v46  ;;  %v435_v52 = vadd.f32 %v1486_v28, %v434_v44  ;;  %v583_v56 = vmax.f32 %v443_v42, 0.0 }
 0x10d   :  { %v1150_v48 = vpack.c.bf16 %v606_v43, %v605_v35  ;;  %v1244_v49 = vpop.f32.mrf.mxu0  ;;  %v1272_v51 = vpop.f32.mrf.mxu1  ;;  %v611_v53 = vmax.f32 %v555_v45, 0.0 }
 0x10e   :  { %1174 = vst [vmem:[%s1621_s3 + $0x40] sm:$0xff] %v1080_v47   ;;  %v446_v54 = vadd.f32 %v1244_v49, %v1486_v28  ;;  %v558_v55 = vadd.f32 %v1272_v51, %v1486_v28  ;;  %v609_v63 = vmax.f32 %v547_v50, 0.0  ;;  %v581_v1 = vmax.f32 %v435_v52, 0.0 }
 0x10f   :  { %1188 = vst [vmem:[%s1621_s3 + $0xb0] sm:$0xff] %v1150_v48   ;;  %v437_v57 = vpop.f32.mrf.mxu0  ;;  %v549_v58 = vpop.f32.mrf.mxu1 }
 0x110   :  { %v584_v59 = vmax.f32 %v446_v54, 0.0  ;;  %v438_v60 = vadd.f32 %v1486_v28, %v437_v57  ;;  %v612_v61 = vmax.f32 %v558_v55, 0.0  ;;  %v550_v62 = vadd.f32 %v1486_v28, %v549_v58 }
 0x111   :  { %v1247_v0 = vpop.f32.mrf.mxu0 }
 0x112   :  { %v1095_v2 = vpack.c.bf16 %v584_v59, %v583_v56  ;;  %v582_v3 = vmax.f32 %v438_v60, 0.0  ;;  %v1165_v4 = vpack.c.bf16 %v612_v61, %v611_v53  ;;  %v610_v5 = vmax.f32 %v550_v62, 0.0 }
 0x113   :  { %v450_v6 = vpop.f32.mrf.mxu0  ;;  %v459_v8 = vadd.f32 %v1247_v0, %v1486_v28 }
 0x114   :  { %1177 = vst [vmem:[%s1621_s3 + $0x58] sm:$0xff] %v1095_v2   ;;  %v1090_v7 = vpack.c.bf16 %v582_v3, %v581_v1  ;;  %1191 = vst [vmem:[%s1621_s3 + $0xc8] sm:$0xff] %v1165_v4   ;;  %v1160_v9 = vpack.c.bf16 %v610_v5, %v609_v63  ;;  %v451_v11 = vadd.f32 %v1486_v28, %v450_v6 }
 0x115   :  { %v1248_v10 = vpop.f32.mrf.mxu0  ;;  %v587_v14 = vmax.f32 %v459_v8, 0.0 }
 0x116   :  { %1176 = vst [vmem:[%s1621_s3 + $0x50] sm:$0xff] %v1090_v7   ;;  %v462_v12 = vadd.f32 %v1248_v10, %v1486_v28  ;;  %1190 = vst [vmem:[%s1621_s3 + $0xc0] sm:$0xff] %v1160_v9   ;;  %v585_v17 = vmax.f32 %v451_v11, 0.0 }
 0x117   :  { %v453_v13 = vpop.f32.mrf.mxu0 }
 0x118   :  { %v588_v15 = vmax.f32 %v462_v12, 0.0  ;;  %v454_v16 = vadd.f32 %v1486_v28, %v453_v13 }
 0x11a   :  { %v1105_v18 = vpack.c.bf16 %v588_v15, %v587_v14  ;;  %v586_v19 = vmax.f32 %v454_v16, 0.0 }
 0x11c   :  { %1179 = vst [vmem:[%s1621_s3 + $0x68] sm:$0xff] %v1105_v18   ;;  %v1100_v20 = vpack.c.bf16 %v586_v19, %v585_v17 }
 0x11e   :  { %1178 = vst [vmem:[%s1621_s3 + $0x60] sm:$0xff] %v1100_v20  }
 0x11f   :  { %877 = vsyncpa [#allocation3], 1 }
 0x120   :  { %878 = vsyncpa [#allocation5], 1 }

// kernel: forward_staged.4
= control target key start
LH: loop header
LB: loop body
LE: loop exit
PB: predicated region body
PF: predicated region fallthrough
CT: control target
= control target key end

     0   :  { %8 = vsyncpa [#allocation3], 0  ;;  %s1003_s12 = smov [#allocation2]   ;;  %s1337_s0 = inlined_call_operand.vmem [shape: bf16[52,1024], index: 0, kind: input, shape index: {}]   ;;  %s1338_s1 = inlined_call_operand.hbm [shape: bf16[52,52], index: 1, kind: input, shape index: {}]   ;;  %s1339_s2 = inlined_call_operand.vmem [shape: f32[52,1], index: 2, kind: input, shape index: {}]   ;;  %s1340_s3 = inlined_call_operand.vmem [shape: bf16[52,1024], index: 3, kind: output, shape index: {}]  }
   0x1   :  { %s16_s13 = sshll.u32 %s1003_s12, 4  ;;  %s17_s13 = int_to_ptr.vmem [resolvable:$true] %s16_s13 }
   0x2   :  { %s989_s14 = scalar_lea.vmem %s17_s13, 448  ;;  %p994_p1 = scmp.lt.s32.totalorder %s17_s13, %s17_s13 }
   0x3   :  { %p990_p0 = scmp.ne.s32.totalorder %s17_s13, %s989_s14  ;;  %p995_p2 = scmp.lt.s32.totalorder %s989_s14, %s989_s14 }
   0x5   :  { %p996_p3 = por %p995_p2, %p994_p1 }
   0x7   :  { %p997_p4 = pnand %p996_p3, %p990_p0 }
   0x9   :  { %1000 = shalt.err (!%p997_p4)
}
   0xa   :  { %s1004_s15 = smov 64   ;;  %s1005_s16 = smov 4  }
   0xb   :  { %22 = dma.hbm_to_vmem [thread:$0]  %s1338_s1, 448, %s17_s13, [#allocation3], %s1004_s15, %s1004_s15, %s1005_s16  }
   0xc   :  { %1001 = dma.done.wait [#allocation3], 448  }
   0xd   :  { %1002 = vsyncadd [#allocation3], 4294966848  ;;  %v1006_v0 = vmov 0   ;;  %v60_v1 = vld [vmem:[%s1337_s0 + $0xc0] sm:$0x33]  ;;  %vm277_vm0 = vcmask 1041408  }
   0xe   :  { %334 = vmatprep.mubr.bf16.mxu0 %v1006_v0  ;;  %405 = vmatprep.mubr.bf16.mxu1 %v1006_v0  ;;  %v61_v2 = vld [vmem:[%s1337_s0 + $0xc8] sm:$0x33]  ;;  %v52_v3 = vld [vmem:[%s1337_s0 + $0x80] sm:$0xff]  ;;  %v880_v4 = vcombine.high %v60_v1, %v60_v1  ;;  %v879_v6 = vcombine.low %v60_v1, %v60_v1  ;;  %v62_v31 = vld [vmem:[%s1337_s0 + $0xd0] sm:$0x33]  ;;  %vm264_vm1 = vcmask 424960  }
   0xf   :  { %967 = vset.pattern.permute.xlu0 %v1006_v0  ;;  %968 = vset.pattern.permute.xlu1 %v1006_v0  ;;  %v882_v5 = vcombine.high %v61_v2, %v61_v2  ;;  %v881_v7 = vcombine.low %v61_v2, %v61_v2  ;;  %v56_v8 = vld [vmem:[%s1337_s0 + $0xa0] sm:$0xff]  ;;  %v53_v9 = vld [vmem:[%s1337_s0 + $0x88] sm:$0xff]  ;;  %v63_v32 = vld [vmem:[%s1337_s0 + $0xd8] sm:$0x33]  ;;  %v884_v35 = vcombine.high %v62_v31, %v62_v31 }
  0x10   :  { %v57_v10 = vld [vmem:[%s1337_s0 + $0xa8] sm:$0xff]  ;;  %v872_v11 = vcombine.high %v52_v3, %v56_v8  ;;  %v44_v13 = vld [vmem:[%s1337_s0 + $0x40] sm:$0xff]  ;;  %887 = vmatprep.subr.msk.bf16.mxu0 %vm277_vm0, %v880_v4  ;;  %v279_v16 = vsel %vm277_vm0, %v879_v6, 0  ;;  %v871_v19 = vcombine.low %v52_v3, %v56_v8  ;;  %v886_v37 = vcombine.high %v63_v32, %v63_v32  ;;  %v66_v41 = vld [vmem:[%s1339_s2 + $0x10] sm:$0xff] }
  0x11   :  { %v874_v12 = vcombine.high %v53_v9, %v57_v10  ;;  %v48_v14 = vld [vmem:[%s1337_s0 + $0x60] sm:$0xff]  ;;  %v45_v15 = vld [vmem:[%s1337_s0 + $0x48] sm:$0xff]  ;;  %892 = vmatprep.subr.msk.bf16.mxu1 %vm277_vm0, %v882_v5  ;;  %v285_v17 = vsel %vm277_vm0, %v881_v7, 0  ;;  %311 = vmatpush1.bf16.msra.mxu0 %v279_v16  ;;  %v873_v20 = vcombine.low %v53_v9, %v57_v10  ;;  %v883_v38 = vcombine.low %v62_v31, %v62_v31  ;;  %v54_v42 = vld [vmem:[%s1337_s0 + $0x90] sm:$0xff] }
  0x12   :  { %v49_v18 = vld [vmem:[%s1337_s0 + $0x68] sm:$0xff]  ;;  %382 = vmatpush1.bf16.msra.mxu1 %v285_v17  ;;  %v36_v21 = vld [vmem:[%s1337_s0] sm:$0xff]  ;;  %312 = vmatprep.subr.bf16.mxu0 %v872_v11  ;;  %v864_v22 = vcombine.high %v44_v13, %v48_v14  ;;  %v863_v27 = vcombine.low %v44_v13, %v48_v14  ;;  %v885_v39 = vcombine.low %v63_v32, %v63_v32  ;;  %v58_v43 = vld [vmem:[%s1337_s0 + $0xb0] sm:$0xff] }
  0x13   :  { %383 = vmatprep.subr.bf16.mxu1 %v874_v12  ;;  %v866_v23 = vcombine.high %v45_v15, %v49_v18  ;;  %v40_v24 = vld [vmem:[%s1337_s0 + $0x20] sm:$0xff]  ;;  %v37_v25 = vld [vmem:[%s1337_s0 + $0x8] sm:$0xff]  ;;  %v865_v28 = vcombine.low %v45_v15, %v49_v18  ;;  %v55_v44 = vld [vmem:[%s1337_s0 + $0x98] sm:$0xff]  ;;  %83 = vperm.xlu1 %968, %v66_v41   ;;  %v291_v48 = vsel %vm277_vm0, %v883_v38, 0  ;;  %v876_v51 = vcombine.high %v54_v42, %v58_v43 }
  0x14   :  { %v41_v26 = vld [vmem:[%s1337_s0 + $0x28] sm:$0xff]  ;;  %v856_v29 = vcombine.high %v36_v21, %v40_v24  ;;  %v855_v33 = vcombine.low %v36_v21, %v40_v24  ;;  %v1086_v36 = vld [vmem:[#allocation2] sm:$0xff]   ;;  %v59_v45 = vld [vmem:[%s1337_s0 + $0xb8] sm:$0xff]  ;;  %v297_v49 = vsel %vm277_vm0, %v885_v39, 0  ;;  %v875_v56 = vcombine.low %v54_v42, %v58_v43 }
  0x15   :  { %313 = vmatpush1.bf16.msra.mxu0 %v871_v19  ;;  %v858_v30 = vcombine.high %v37_v25, %v41_v26  ;;  %v857_v34 = vcombine.low %v37_v25, %v41_v26  ;;  %v64_v40 = vld [vmem:[%s1339_s2] sm:$0xff]  ;;  %v65_v46 = vld [vmem:[%s1339_s2 + $0x8] sm:$0xff]  ;;  %v67_v47 = vld [vmem:[%s1339_s2 + $0x18] sm:$0xff]  ;;  %v878_v52 = vcombine.high %v55_v44, %v59_v45  ;;  %v877_v57 = vcombine.low %v55_v44, %v59_v45 }
  0x16   :  { %384 = vmatpush1.bf16.msra.mxu1 %v873_v20  ;;  %314 = vmatprep.subr.bf16.mxu0 %v864_v22  ;;  %v46_v50 = vld [vmem:[%s1337_s0 + $0x50] sm:$0xff]  ;;  %v47_v54 = vld [vmem:[%s1337_s0 + $0x58] sm:$0xff]  ;;  %v68_v58 = vld [vmem:[%s1339_s2 + $0x20] sm:$0xff] }
  0x17   :  { %385 = vmatprep.subr.bf16.mxu1 %v866_v23  ;;  %73 = vperm.xlu0 %967, %v64_v40   ;;  %v50_v53 = vld [vmem:[%s1337_s0 + $0x70] sm:$0xff]  ;;  %v51_v55 = vld [vmem:[%s1337_s0 + $0x78] sm:$0xff]  ;;  %v69_v59 = vld [vmem:[%s1339_s2 + $0x28] sm:$0xff] }
  0x18   :  { %88 = vperm.xlu1 %968, %v67_v47   ;;  %v868_v60 = vcombine.high %v46_v50, %v50_v53  ;;  %v870_v61 = vcombine.high %v47_v54, %v51_v55  ;;  %v978_v62 = vld [vmem:[#allocation2 + $0x8] sm:$0xff]   ;;  %v38_v63 = vld [vmem:[%s1337_s0 + $0x10] sm:$0xff]  ;;  %v39_v2 = vld [vmem:[%s1337_s0 + $0x18] sm:$0xff]  ;;  %v867_v4 = vcombine.low %v46_v50, %v50_v53  ;;  %v869_v5 = vcombine.low %v47_v54, %v51_v55 }
  0x19   :  { %315 = vmatpush1.bf16.msra.mxu0 %v863_v27  ;;  %v42_v1 = vld [vmem:[%s1337_s0 + $0x30] sm:$0xff]  ;;  %v43_v3 = vld [vmem:[%s1337_s0 + $0x38] sm:$0xff] }
  0x1a   :  { %386 = vmatpush1.bf16.msra.mxu1 %v865_v28  ;;  %316 = vmatprep.subr.bf16.mxu0 %v856_v29  ;;  %v860_v6 = vcombine.high %v38_v63, %v42_v1  ;;  %v862_v7 = vcombine.high %v39_v2, %v43_v3  ;;  %v70_v8 = vld [vmem:[%s1339_s2 + $0x30] sm:$0xf]  ;;  %v859_v9 = vcombine.low %v38_v63, %v42_v1  ;;  %v980_v12 = vld [vmem:[#allocation2 + $0x18] ss:$0 sps:$4 sm:$0x33]  }
  0x1b   :  { %387 = vmatprep.subr.bf16.mxu1 %v858_v30  ;;  %78 = vperm.xlu0 %967, %v65_v46   ;;  %v861_v10 = vcombine.low %v39_v2, %v43_v3  ;;  %v979_v11 = vld [vmem:[#allocation2 + $0x10] sm:$0xff]  }
  0x1c   :  { %98 = vperm.xlu1 %968, %v69_v59  }
  0x1d   :  { %317 = vmatpush1.bf16.msra.mxu0 %v855_v33 }
  0x1e   :  { %388 = vmatpush1.bf16.msra.mxu1 %v857_v34  ;;  %897 = vmatprep.subr.msk.bf16.mxu0 %vm277_vm0, %v884_v35 }
  0x1f   :  { %902 = vmatprep.subr.msk.bf16.mxu1 %vm277_vm0, %v886_v37  ;;  %93 = vperm.xlu0 %967, %v68_v58  }
  0x20   :  { %888 = vmatmul.mubr.msk.bf16.vlgmr.msra.gmra.mxu0 %vm264_vm1, %v1086_v36 }
  0x21   :  { %893 = vmatmul.mubr.msk.bf16.vlgmr.msra.gmra.mxu1 %vm264_vm1, %v1086_v36  ;;  %453 = vmatpush1.bf16.msra.mxu0 %v291_v48 }
  0x22   :  { %524 = vmatpush1.bf16.msra.mxu1 %v297_v49  ;;  %344 = vmatprep.mubr.bf16.mxu0 %v1006_v0 }
  0x23   :  { %415 = vmatprep.mubr.bf16.mxu1 %v1006_v0  ;;  %454 = vmatprep.subr.bf16.mxu0 %v876_v51 }
  0x24   :  { %525 = vmatprep.subr.bf16.mxu1 %v878_v52  ;;  %103 = vperm.xlu0 %967, %v70_v8  }
  0x25   :  { %455 = vmatpush1.bf16.msra.mxu0 %v875_v56 }
  0x26   :  { %526 = vmatpush1.bf16.msra.mxu1 %v877_v57  ;;  %456 = vmatprep.subr.bf16.mxu0 %v868_v60 }
  0x27   :  { %527 = vmatprep.subr.bf16.mxu1 %v870_v61 }
  0x28   :  { %889 = vmatmul.mubr.msk.bf16.gmra.mxu0 %vm264_vm1, %v978_v62 }
  0x29   :  { %894 = vmatmul.mubr.msk.bf16.gmra.mxu1 %vm264_vm1, %v978_v62  ;;  %354 = vmatprep.mubr.bf16.mxu0 %v1006_v0 }
  0x2a   :  { %425 = vmatprep.mubr.bf16.mxu1 %v1006_v0  ;;  %457 = vmatpush1.bf16.msra.mxu0 %v867_v4 }
  0x2b   :  { %528 = vmatpush1.bf16.msra.mxu1 %v869_v5  ;;  %458 = vmatprep.subr.bf16.mxu0 %v860_v6 }
  0x2c   :  { %529 = vmatprep.subr.bf16.mxu1 %v862_v7 }
  0x2e   :  { %459 = vmatpush1.bf16.msra.mxu0 %v859_v9 }
  0x2f   :  { %530 = vmatpush1.bf16.msra.mxu1 %v861_v10 }
  0x30   :  { %890 = vmatmul.mubr.msk.bf16.gmra.mxu0 %vm264_vm1, %v979_v11 }
  0x31   :  { %895 = vmatmul.mubr.msk.bf16.gmra.mxu1 %vm264_vm1, %v979_v11  ;;  %364 = vmatprep.mubr.bf16.mxu0 %v1006_v0 }
  0x32   :  { %435 = vmatprep.mubr.bf16.mxu1 %v1006_v0 }
  0x38   :  { %891 = vmatmul.mubr.msk.bf16.gmra.mxu0 %vm264_vm1, %v980_v12 }
  0x39   :  { %896 = vmatmul.mubr.msk.bf16.gmra.mxu1 %vm264_vm1, %v980_v12  ;;  %476 = vmatprep.mubr.bf16.mxu0 %v1006_v0 }
  0x3a   :  { %547 = vmatprep.mubr.bf16.mxu1 %v1006_v0 }
  0x40   :  { %898 = vmatmul.mubr.msk.bf16.vlgmr.msra.gmra.mxu0 %vm264_vm1, %v1086_v36 }
  0x41   :  { %903 = vmatmul.mubr.msk.bf16.vlgmr.msra.gmra.mxu1 %vm264_vm1, %v1086_v36  ;;  %486 = vmatprep.mubr.bf16.mxu0 %v1006_v0 }
  0x42   :  { %557 = vmatprep.mubr.bf16.mxu1 %v1006_v0 }
  0x48   :  { %899 = vmatmul.mubr.msk.bf16.gmra.mxu0 %vm264_vm1, %v978_v62 }
  0x49   :  { %904 = vmatmul.mubr.msk.bf16.gmra.mxu1 %vm264_vm1, %v978_v62  ;;  %496 = vmatprep.mubr.bf16.mxu0 %v1006_v0 }
  0x4a   :  { %567 = vmatprep.mubr.bf16.mxu1 %v1006_v0 }
  0x50   :  { %900 = vmatmul.mubr.msk.bf16.gmra.mxu0 %vm264_vm1, %v979_v11 }
  0x51   :  { %905 = vmatmul.mubr.msk.bf16.gmra.mxu1 %vm264_vm1, %v979_v11  ;;  %506 = vmatprep.mubr.bf16.mxu0 %v1006_v0 }
  0x52   :  { %577 = vmatprep.mubr.bf16.mxu1 %v1006_v0 }
  0x58   :  { %901 = vmatmul.mubr.msk.bf16.gmra.mxu0 %vm264_vm1, %v980_v12 }
  0x59   :  { %906 = vmatmul.mubr.msk.bf16.gmra.mxu1 %vm264_vm1, %v980_v12 }
  0x8e   :  { %v1191_v28 = vpop.permute.xlu1 %83 }
  0x92   :  { %v1183_v13 = vpop.permute.xlu0 %73 }
  0x93   :  { %v1207_v49 = vpop.permute.xlu1 %88 }
  0x96   :  { %v1189_v22 = vpop.permute.xlu0 %78 }
  0x9a   :  { %v1209_v58 = vpop.permute.xlu0 %93 }
  0xe0   :  { %v336_v14 = vpop.f32.mrf.mxu0 }
  0xe1   :  { %v407_v15 = vpop.f32.mrf.mxu1  ;;  %v337_v16 = vadd.f32 %v336_v14, %v1183_v13 }
  0xe2   :  { %v408_v17 = vadd.f32 %v407_v15, %v1183_v13  ;;  %v338_v18 = vpop.f32.mrf.mxu0 }
  0xe3   :  { %v409_v19 = vpop.f32.mrf.mxu1  ;;  %v339_v20 = vadd.f32 %v338_v18, %v1183_v13  ;;  %v586_v24 = vmax.f32 %v337_v16, 0.0 }
  0xe4   :  { %v410_v21 = vadd.f32 %v409_v19, %v1183_v13  ;;  %v340_v0 = vpop.f32.mrf.mxu0  ;;  %v588_v25 = vmax.f32 %v408_v17, 0.0  ;;  %v1231_v17 = vpop.permute.xlu1 %98 }
  0xe5   :  { %v411_v23 = vpop.f32.mrf.mxu1  ;;  %v587_v26 = vmax.f32 %v339_v20, 0.0  ;;  %v341_v29 = vadd.f32 %v340_v0, %v1189_v22 }
  0xe6   :  { %v589_v27 = vmax.f32 %v410_v21, 0.0  ;;  %v412_v30 = vadd.f32 %v411_v23, %v1189_v22  ;;  %v342_v31 = vpop.f32.mrf.mxu0 }
  0xe7   :  { %v413_v32 = vpop.f32.mrf.mxu1  ;;  %v935_v33 = vpack.c.bf16 %v587_v26, %v586_v24  ;;  %v343_v35 = vadd.f32 %v342_v31, %v1189_v22  ;;  %v594_v41 = vmax.f32 %v341_v29, 0.0  ;;  %v1233_v26 = vpop.permute.xlu0 %103 }
  0xe8   :  { %v936_v34 = vpack.c.bf16 %v589_v27, %v588_v25  ;;  %v414_v36 = vadd.f32 %v413_v32, %v1189_v22  ;;  %v346_v37 = vpop.f32.mrf.mxu0  ;;  %v596_v42 = vmax.f32 %v412_v30, 0.0 }
  0xe9   :  { %v417_v38 = vpop.f32.mrf.mxu1  ;;  %818 = vst [vmem:[%s1340_s3] sm:$0xff] %v935_v33  ;;  %v347_v39 = vadd.f32 %v346_v37, %v1191_v28  ;;  %v595_v43 = vmax.f32 %v343_v35, 0.0 }
  0xea   :  { %819 = vst [vmem:[%s1340_s3 + $0x8] sm:$0xff] %v936_v34  ;;  %v418_v40 = vadd.f32 %v417_v38, %v1191_v28  ;;  %v597_v44 = vmax.f32 %v414_v36, 0.0  ;;  %v348_v45 = vpop.f32.mrf.mxu0 }
  0xeb   :  { %v419_v46 = vpop.f32.mrf.mxu1  ;;  %v349_v47 = vadd.f32 %v348_v45, %v1191_v28  ;;  %v939_v50 = vpack.c.bf16 %v595_v43, %v594_v41  ;;  %v602_v54 = vmax.f32 %v347_v39, 0.0 }
  0xec   :  { %v420_v48 = vadd.f32 %v419_v46, %v1191_v28  ;;  %v940_v51 = vpack.c.bf16 %v597_v44, %v596_v42  ;;  %v350_v52 = vpop.f32.mrf.mxu0  ;;  %v604_v55 = vmax.f32 %v418_v40, 0.0 }
  0xed   :  { %v421_v53 = vpop.f32.mrf.mxu1  ;;  %v603_v56 = vmax.f32 %v349_v47, 0.0  ;;  %822 = vst [vmem:[%s1340_s3 + $0x20] sm:$0xff] %v939_v50  ;;  %v351_v59 = vadd.f32 %v350_v52, %v1207_v49 }
  0xee   :  { %v605_v57 = vmax.f32 %v420_v48, 0.0  ;;  %823 = vst [vmem:[%s1340_s3 + $0x28] sm:$0xff] %v940_v51  ;;  %v422_v60 = vadd.f32 %v421_v53, %v1207_v49  ;;  %v352_v61 = vpop.f32.mrf.mxu0 }
  0xef   :  { %v423_v62 = vpop.f32.mrf.mxu1  ;;  %v943_v63 = vpack.c.bf16 %v603_v56, %v602_v54  ;;  %v353_v2 = vadd.f32 %v352_v61, %v1207_v49  ;;  %v610_v8 = vmax.f32 %v351_v59, 0.0 }
  0xf0   :  { %v944_v1 = vpack.c.bf16 %v605_v57, %v604_v55  ;;  %v424_v3 = vadd.f32 %v423_v62, %v1207_v49  ;;  %v356_v4 = vpop.f32.mrf.mxu0  ;;  %v612_v9 = vmax.f32 %v422_v60, 0.0 }
  0xf1   :  { %v427_v5 = vpop.f32.mrf.mxu1  ;;  %826 = vst [vmem:[%s1340_s3 + $0x40] sm:$0xff] %v943_v63  ;;  %v357_v6 = vadd.f32 %v356_v4, %v1209_v58  ;;  %v611_v10 = vmax.f32 %v353_v2, 0.0 }
  0xf2   :  { %827 = vst [vmem:[%s1340_s3 + $0x48] sm:$0xff] %v944_v1  ;;  %v428_v7 = vadd.f32 %v427_v5, %v1209_v58  ;;  %v613_v11 = vmax.f32 %v424_v3, 0.0  ;;  %v358_v12 = vpop.f32.mrf.mxu0 }
  0xf3   :  { %v429_v14 = vpop.f32.mrf.mxu1  ;;  %v359_v15 = vadd.f32 %v358_v12, %v1209_v58  ;;  %v947_v18 = vpack.c.bf16 %v611_v10, %v610_v8  ;;  %v618_v0 = vmax.f32 %v357_v6, 0.0 }
  0xf4   :  { %v430_v16 = vadd.f32 %v429_v14, %v1209_v58  ;;  %v948_v19 = vpack.c.bf16 %v613_v11, %v612_v9  ;;  %v360_v20 = vpop.f32.mrf.mxu0  ;;  %v620_v24 = vmax.f32 %v428_v7, 0.0 }
  0xf5   :  { %v431_v21 = vpop.f32.mrf.mxu1  ;;  %v619_v23 = vmax.f32 %v359_v15, 0.0  ;;  %830 = vst [vmem:[%s1340_s3 + $0x60] sm:$0xff] %v947_v18  ;;  %v361_v27 = vadd.f32 %v360_v20, %v1231_v17 }
  0xf6   :  { %v621_v25 = vmax.f32 %v430_v16, 0.0  ;;  %831 = vst [vmem:[%s1340_s3 + $0x68] sm:$0xff] %v948_v19  ;;  %v432_v29 = vadd.f32 %v431_v21, %v1231_v17  ;;  %v362_v30 = vpop.f32.mrf.mxu0 }
  0xf7   :  { %v433_v31 = vpop.f32.mrf.mxu1  ;;  %v951_v32 = vpack.c.bf16 %v619_v23, %v618_v0  ;;  %v363_v34 = vadd.f32 %v362_v30, %v1231_v17  ;;  %v626_v40 = vmax.f32 %v361_v27, 0.0 }
  0xf8   :  { %v952_v33 = vpack.c.bf16 %v621_v25, %v620_v24  ;;  %v434_v35 = vadd.f32 %v433_v31, %v1231_v17  ;;  %v366_v36 = vpop.f32.mrf.mxu0  ;;  %v628_v41 = vmax.f32 %v432_v29, 0.0 }
  0xf9   :  { %v437_v37 = vpop.f32.mrf.mxu1  ;;  %834 = vst [vmem:[%s1340_s3 + $0x80] sm:$0xff] %v951_v32  ;;  %v367_v38 = vadd.f32 %v366_v36, %v1233_v26  ;;  %v627_v42 = vmax.f32 %v363_v34, 0.0 }
  0xfa   :  { %835 = vst [vmem:[%s1340_s3 + $0x88] sm:$0xff] %v952_v33  ;;  %v438_v39 = vadd.f32 %v437_v37, %v1233_v26  ;;  %v629_v43 = vmax.f32 %v434_v35, 0.0  ;;  %v368_v44 = vpop.f32.mrf.mxu0 }
  0xfb   :  { %v439_v45 = vpop.f32.mrf.mxu1  ;;  %v369_v46 = vadd.f32 %v368_v44, %v1233_v26  ;;  %v955_v48 = vpack.c.bf16 %v627_v42, %v626_v40  ;;  %v634_v53 = vmax.f32 %v367_v38, 0.0 }
  0xfc   :  { %v440_v47 = vadd.f32 %v439_v45, %v1233_v26  ;;  %v956_v50 = vpack.c.bf16 %v629_v43, %v628_v41  ;;  %v370_v51 = vpop.f32.mrf.mxu0  ;;  %v636_v55 = vmax.f32 %v438_v39, 0.0 }
  0xfd   :  { %v441_v52 = vpop.f32.mrf.mxu1  ;;  %v635_v54 = vmax.f32 %v369_v46, 0.0  ;;  %838 = vst [vmem:[%s1340_s3 + $0xa0] sm:$0xff] %v955_v48 }
  0xfe   :  { %v637_v56 = vmax.f32 %v440_v47, 0.0  ;;  %839 = vst [vmem:[%s1340_s3 + $0xa8] sm:$0xff] %v956_v50  ;;  %v371_v57 = vpop.f32.mrf.mxu0 }
  0xff   :  { %v442_v59 = vpop.f32.mrf.mxu1  ;;  %v959_v60 = vpack.c.bf16 %v635_v54, %v634_v53 }
 0x100   :  { %v960_v61 = vpack.c.bf16 %v637_v56, %v636_v55  ;;  %v478_v62 = vpop.f32.mrf.mxu0 }
 0x101   :  { %v549_v63 = vpop.f32.mrf.mxu1  ;;  %842 = vst [vmem:[%s1340_s3 + $0xc0] sm:$0x33] %v959_v60  ;;  %v479_v1 = vadd.f32 %v478_v62, %v1183_v13 }
 0x102   :  { %843 = vst [vmem:[%s1340_s3 + $0xc8] sm:$0x33] %v960_v61  ;;  %v550_v2 = vadd.f32 %v549_v63, %v1183_v13  ;;  %v480_v3 = vpop.f32.mrf.mxu0 }
 0x103   :  { %v551_v4 = vpop.f32.mrf.mxu1  ;;  %v481_v5 = vadd.f32 %v480_v3, %v1183_v13  ;;  %v590_v9 = vmax.f32 %v479_v1, 0.0 }
 0x104   :  { %v552_v6 = vadd.f32 %v551_v4, %v1183_v13  ;;  %v482_v7 = vpop.f32.mrf.mxu0  ;;  %v592_v10 = vmax.f32 %v550_v2, 0.0 }
 0x105   :  { %v553_v8 = vpop.f32.mrf.mxu1  ;;  %v591_v11 = vmax.f32 %v481_v5, 0.0  ;;  %v483_v14 = vadd.f32 %v482_v7, %v1189_v22 }
 0x106   :  { %v593_v12 = vmax.f32 %v552_v6, 0.0  ;;  %v554_v15 = vadd.f32 %v553_v8, %v1189_v22  ;;  %v484_v16 = vpop.f32.mrf.mxu0 }
 0x107   :  { %v555_v18 = vpop.f32.mrf.mxu1  ;;  %v937_v19 = vpack.c.bf16 %v591_v11, %v590_v9  ;;  %v485_v21 = vadd.f32 %v484_v16, %v1189_v22  ;;  %v598_v27 = vmax.f32 %v483_v14, 0.0 }
 0x108   :  { %v938_v20 = vpack.c.bf16 %v593_v12, %v592_v10  ;;  %v556_v0 = vadd.f32 %v555_v18, %v1189_v22  ;;  %v488_v23 = vpop.f32.mrf.mxu0  ;;  %v600_v29 = vmax.f32 %v554_v15, 0.0 }
 0x109   :  { %v559_v13 = vpop.f32.mrf.mxu1  ;;  %820 = vst [vmem:[%s1340_s3 + $0x10] sm:$0xff] %v937_v19  ;;  %v489_v24 = vadd.f32 %v488_v23, %v1191_v28  ;;  %v599_v30 = vmax.f32 %v485_v21, 0.0 }
 0x10a   :  { %821 = vst [vmem:[%s1340_s3 + $0x18] sm:$0xff] %v938_v20  ;;  %v560_v25 = vadd.f32 %v559_v13, %v1191_v28  ;;  %v601_v31 = vmax.f32 %v556_v0, 0.0  ;;  %v490_v32 = vpop.f32.mrf.mxu0 }
 0x10b   :  { %v561_v22 = vpop.f32.mrf.mxu1  ;;  %v491_v33 = vadd.f32 %v490_v32, %v1191_v28  ;;  %v941_v35 = vpack.c.bf16 %v599_v30, %v598_v27  ;;  %v606_v39 = vmax.f32 %v489_v24, 0.0 }
 0x10c   :  { %v562_v34 = vadd.f32 %v561_v22, %v1191_v28  ;;  %v942_v36 = vpack.c.bf16 %v601_v31, %v600_v29  ;;  %v492_v37 = vpop.f32.mrf.mxu0  ;;  %v608_v40 = vmax.f32 %v560_v25, 0.0 }
 0x10d   :  { %v563_v38 = vpop.f32.mrf.mxu1  ;;  %v607_v41 = vmax.f32 %v491_v33, 0.0  ;;  %824 = vst [vmem:[%s1340_s3 + $0x30] sm:$0xff] %v941_v35  ;;  %v493_v43 = vadd.f32 %v492_v37, %v1207_v49 }
 0x10e   :  { %v609_v42 = vmax.f32 %v562_v34, 0.0  ;;  %825 = vst [vmem:[%s1340_s3 + $0x38] sm:$0xff] %v942_v36  ;;  %v564_v28 = vadd.f32 %v563_v38, %v1207_v49  ;;  %v494_v44 = vpop.f32.mrf.mxu0 }
 0x10f   :  { %v565_v45 = vpop.f32.mrf.mxu1  ;;  %v945_v46 = vpack.c.bf16 %v607_v41, %v606_v39  ;;  %v495_v48 = vadd.f32 %v494_v44, %v1207_v49  ;;  %v614_v55 = vmax.f32 %v493_v43, 0.0 }
 0x110   :  { %v946_v47 = vpack.c.bf16 %v609_v42, %v608_v40  ;;  %v566_v50 = vadd.f32 %v565_v45, %v1207_v49  ;;  %v498_v51 = vpop.f32.mrf.mxu0  ;;  %v616_v56 = vmax.f32 %v564_v28, 0.0 }
 0x111   :  { %v569_v52 = vpop.f32.mrf.mxu1  ;;  %828 = vst [vmem:[%s1340_s3 + $0x50] sm:$0xff] %v945_v46  ;;  %v499_v53 = vadd.f32 %v498_v51, %v1209_v58  ;;  %v615_v57 = vmax.f32 %v495_v48, 0.0 }
 0x112   :  { %829 = vst [vmem:[%s1340_s3 + $0x58] sm:$0xff] %v946_v47  ;;  %v570_v54 = vadd.f32 %v569_v52, %v1209_v58  ;;  %v617_v59 = vmax.f32 %v566_v50, 0.0  ;;  %v500_v60 = vpop.f32.mrf.mxu0 }
 0x113   :  { %v571_v49 = vpop.f32.mrf.mxu1  ;;  %v501_v61 = vadd.f32 %v500_v60, %v1209_v58  ;;  %v949_v63 = vpack.c.bf16 %v615_v57, %v614_v55  ;;  %v622_v4 = vmax.f32 %v499_v53, 0.0 }
 0x114   :  { %v572_v62 = vadd.f32 %v571_v49, %v1209_v58  ;;  %v950_v1 = vpack.c.bf16 %v617_v59, %v616_v56  ;;  %v502_v2 = vpop.f32.mrf.mxu0  ;;  %v624_v5 = vmax.f32 %v570_v54, 0.0 }
 0x115   :  { %v573_v3 = vpop.f32.mrf.mxu1  ;;  %v623_v6 = vmax.f32 %v501_v61, 0.0  ;;  %832 = vst [vmem:[%s1340_s3 + $0x70] sm:$0xff] %v949_v63  ;;  %v503_v8 = vadd.f32 %v502_v2, %v1231_v17 }
 0x116   :  { %v625_v7 = vmax.f32 %v572_v62, 0.0  ;;  %833 = vst [vmem:[%s1340_s3 + $0x78] sm:$0xff] %v950_v1  ;;  %v574_v58 = vadd.f32 %v573_v3, %v1231_v17  ;;  %v504_v9 = vpop.f32.mrf.mxu0 }
 0x117   :  { %v575_v10 = vpop.f32.mrf.mxu1  ;;  %v953_v11 = vpack.c.bf16 %v623_v6, %v622_v4  ;;  %v505_v14 = vadd.f32 %v504_v9, %v1231_v17  ;;  %v630_v21 = vmax.f32 %v503_v8, 0.0 }
 0x118   :  { %v954_v12 = vpack.c.bf16 %v625_v7, %v624_v5  ;;  %v576_v15 = vadd.f32 %v575_v10, %v1231_v17  ;;  %v508_v16 = vpop.f32.mrf.mxu0  ;;  %v632_v0 = vmax.f32 %v574_v58, 0.0 }
 0x119   :  { %v579_v18 = vpop.f32.mrf.mxu1  ;;  %836 = vst [vmem:[%s1340_s3 + $0x90] sm:$0xff] %v953_v11  ;;  %v509_v19 = vadd.f32 %v508_v16, %v1233_v26  ;;  %v631_v23 = vmax.f32 %v505_v14, 0.0 }
 0x11a   :  { %837 = vst [vmem:[%s1340_s3 + $0x98] sm:$0xff] %v954_v12  ;;  %v580_v20 = vadd.f32 %v579_v18, %v1233_v26  ;;  %v633_v13 = vmax.f32 %v576_v15, 0.0  ;;  %v510_v24 = vpop.f32.mrf.mxu0 }
 0x11b   :  { %v581_v17 = vpop.f32.mrf.mxu1  ;;  %v511_v25 = vadd.f32 %v510_v24, %v1233_v26  ;;  %v957_v29 = vpack.c.bf16 %v631_v23, %v630_v21  ;;  %v638_v22 = vmax.f32 %v509_v19, 0.0 }
 0x11c   :  { %v582_v27 = vadd.f32 %v581_v17, %v1233_v26  ;;  %v958_v30 = vpack.c.bf16 %v633_v13, %v632_v0  ;;  %v512_v31 = vpop.f32.mrf.mxu0  ;;  %v640_v33 = vmax.f32 %v580_v20, 0.0 }
 0x11d   :  { %v583_v32 = vpop.f32.mrf.mxu1  ;;  %v639_v34 = vmax.f32 %v511_v25, 0.0  ;;  %840 = vst [vmem:[%s1340_s3 + $0xb0] sm:$0xff] %v957_v29 }
 0x11e   :  { %v641_v35 = vmax.f32 %v582_v27, 0.0  ;;  %841 = vst [vmem:[%s1340_s3 + $0xb8] sm:$0xff] %v958_v30  ;;  %v513_v36 = vpop.f32.mrf.mxu0 }
 0x11f   :  { %v584_v37 = vpop.f32.mrf.mxu1  ;;  %v961_v38 = vpack.c.bf16 %v639_v34, %v638_v22 }
 0x120   :  { %v962_v26 = vpack.c.bf16 %v641_v35, %v640_v33 }
 0x121   :  { %844 = vst [vmem:[%s1340_s3 + $0xd0] sm:$0x33] %v961_v38 }
 0x122   :  { %845 = vst [vmem:[%s1340_s3 + $0xd8] sm:$0x33] %v962_v26 }
 0x123   :  { %850 = vsyncpa [#allocation3], 1 }

// kernel: forward_staged.5
= control target key start
LH: loop header
LB: loop body
LE: loop exit
PB: predicated region body
PF: predicated region fallthrough
CT: control target
= control target key end

     0   :  { %v8968_v0 = vmov 0.0   ;;  %vm8969_vm0 = vmmov 0   ;;  %vm5682_vm1 = vcmask 523264   ;;  %s10951_s1 = inlined_call_operand.vmem [shape: bf16[52,128,64], index: 1, kind: input, shape index: {}]   ;;  %s10952_s0 = inlined_call_operand.vmem [shape: bf16[52,8,128], index: 0, kind: input, shape index: {}]   ;;  %s10953_s3 = inlined_call_operand.vmem [shape: bf16[64,128], index: 3, kind: input, shape index: {}]   ;;  %s10954_s2 = inlined_call_operand.vmem [shape: f32[1,64], index: 2, kind: input, shape index: {}]   ;;  %s10955_s4 = inlined_call_operand.vmem [shape: f32[1,128], index: 4, kind: input, shape index: {}]   ;;  %s10956_s5 = inlined_call_operand.vmem [shape: f32[8,128], index: 5, kind: output, shape index: {}]  }
   0x1   :  { %7494 = vmatprep.subr.bf16.mxu0 %v8968_v0  ;;  %7514 = vmatprep.subr.bf16.mxu1 %v8968_v0  ;;  %v8548_v1 = vld [vmem:[%s10951_s1 + $0x78] sm:$0xff]   ;;  %v8550_v3 = vld [vmem:[%s10951_s1 + $0x70] sm:$0xff]   ;;  %v8552_v5 = vld [vmem:[%s10951_s1 + $0x68] sm:$0xff]  }
   0x2   :  { %v8549_v2 = vld [vmem:[%s10951_s1 + $0x38] sm:$0xff]   ;;  %7510 = vmatprep.mubr.msk.bf16.mxu0 %vm8969_vm0, %v8968_v0  ;;  %7530 = vmatprep.mubr.msk.bf16.mxu1 %vm8969_vm0, %v8968_v0  ;;  %v8551_v4 = vld [vmem:[%s10951_s1 + $0x30] sm:$0xff]   ;;  %v8553_v6 = vld [vmem:[%s10951_s1 + $0x28] sm:$0xff]  }
   0x3   :  { %7495 = vmatpush3.bf16.msra.mxu0 %v8548_v1  ;;  %7515 = vmatpush3.bf16.msra.mxu1 %v8549_v2  ;;  %v8554_v7 = vld [vmem:[%s10951_s1 + $0x60] sm:$0xff]   ;;  %v8556_v9 = vld [vmem:[%s10951_s1 + $0x58] sm:$0xff]   ;;  %v8558_v11 = vld [vmem:[%s10951_s1 + $0x50] sm:$0xff]  }
   0x4   :  { %7496 = vmatprep.subr.bf16.mxu0 %v8968_v0  ;;  %7516 = vmatprep.subr.bf16.mxu1 %v8968_v0  ;;  %v8555_v8 = vld [vmem:[%s10951_s1 + $0x20] sm:$0xff]   ;;  %v8557_v10 = vld [vmem:[%s10951_s1 + $0x18] sm:$0xff]   ;;  %v8559_v12 = vld [vmem:[%s10951_s1 + $0x10] sm:$0xff]  }
   0x5   :  { %v8560_v13 = vld [vmem:[%s10951_s1 + $0x48] sm:$0xff]   ;;  %v8562_v15 = vld [vmem:[%s10951_s1 + $0x40] sm:$0xff]   ;;  %v8564_v19 = vld [vmem:[%s10951_s1 + $0xb8] sm:$0xff]  }
   0x6   :  { %v8561_v14 = vld [vmem:[%s10951_s1 + $0x8] sm:$0xff]   ;;  %v8563_v16 = vld [vmem:[%s10951_s1] sm:$0xff]   ;;  %v8565_v20 = vld [vmem:[%s10951_s1 + $0xf8] sm:$0xff]  }
   0x7   :  { %7497 = vmatpush3.bf16.msra.mxu0 %v8550_v3  ;;  %7517 = vmatpush3.bf16.msra.mxu1 %v8551_v4  ;;  %v5731_v17 = vld [vmem:[%s10952_s0 + $0x4] sm:$0xf]  ;;  %v21_v18 = vld [vmem:[%s10952_s0] sm:$0xf]  ;;  %v8566_v21 = vld [vmem:[%s10951_s1 + $0xb0] sm:$0xff]  }
   0x8   :  { %7498 = vmatprep.subr.bf16.mxu0 %v8968_v0  ;;  %7518 = vmatprep.subr.bf16.mxu1 %v8968_v0  ;;  %v8567_v22 = vld [vmem:[%s10951_s1 + $0xf0] sm:$0xff]   ;;  %v8568_v23 = vld [vmem:[%s10951_s1 + $0xa8] sm:$0xff]   ;;  %v8570_v25 = vld [vmem:[%s10951_s1 + $0xa0] sm:$0xff]  }
   0x9   :  { %v8569_v24 = vld [vmem:[%s10951_s1 + $0xe8] sm:$0xff]   ;;  %v8571_v26 = vld [vmem:[%s10951_s1 + $0xe0] sm:$0xff]   ;;  %v8572_v27 = vld [vmem:[%s10951_s1 + $0x98] sm:$0xff]  }
   0xa   :  { %v8573_v28 = vld [vmem:[%s10951_s1 + $0xd8] sm:$0xff]   ;;  %v8574_v29 = vld [vmem:[%s10951_s1 + $0x90] sm:$0xff]   ;;  %v8576_v31 = vld [vmem:[%s10951_s1 + $0x88] sm:$0xff]  }
   0xb   :  { %7499 = vmatpush3.bf16.msra.mxu0 %v8552_v5  ;;  %7519 = vmatpush3.bf16.msra.mxu1 %v8553_v6  ;;  %v8575_v30 = vld [vmem:[%s10951_s1 + $0xd0] sm:$0xff]   ;;  %v8577_v32 = vld [vmem:[%s10951_s1 + $0xc8] sm:$0xff]   ;;  %v8578_v33 = vld [vmem:[%s10951_s1 + $0x80] sm:$0xff]  }
   0xc   :  { %7500 = vmatprep.subr.bf16.mxu0 %v8968_v0  ;;  %7520 = vmatprep.subr.bf16.mxu1 %v8968_v0  ;;  %v8579_v34 = vld [vmem:[%s10951_s1 + $0xc0] sm:$0xff]   ;;  %v5764_v35 = vld [vmem:[%s10952_s0 + $0x8] sm:$0xf]  ;;  %v5789_v36 = vld [vmem:[%s10952_s0 + $0xc] sm:$0xf] }
   0xd   :  { %v8580_v37 = vld [vmem:[%s10951_s1 + $0x138] sm:$0xff]   ;;  %v8582_v39 = vld [vmem:[%s10951_s1 + $0x130] sm:$0xff]   ;;  %v8584_v41 = vld [vmem:[%s10951_s1 + $0x128] sm:$0xff]  }
   0xe   :  { %v8581_v38 = vld [vmem:[%s10951_s1 + $0x178] sm:$0xff]   ;;  %v8583_v40 = vld [vmem:[%s10951_s1 + $0x170] sm:$0xff]   ;;  %v8585_v42 = vld [vmem:[%s10951_s1 + $0x168] sm:$0xff]  }
   0xf   :  { %7501 = vmatpush3.bf16.msra.mxu0 %v8554_v7  ;;  %7521 = vmatpush3.bf16.msra.mxu1 %v8555_v8  ;;  %v8586_v43 = vld [vmem:[%s10951_s1 + $0x120] sm:$0xff]   ;;  %v8588_v45 = vld [vmem:[%s10951_s1 + $0x118] sm:$0xff]   ;;  %v8590_v47 = vld [vmem:[%s10951_s1 + $0x110] sm:$0xff]  }
  0x10   :  { %7502 = vmatprep.subr.bf16.mxu0 %v8968_v0  ;;  %7522 = vmatprep.subr.bf16.mxu1 %v8968_v0  ;;  %v8587_v44 = vld [vmem:[%s10951_s1 + $0x160] sm:$0xff]   ;;  %v8589_v46 = vld [vmem:[%s10951_s1 + $0x158] sm:$0xff]   ;;  %v8591_v48 = vld [vmem:[%s10951_s1 + $0x150] sm:$0xff]  }
  0x11   :  { %v8592_v49 = vld [vmem:[%s10951_s1 + $0x108] sm:$0xff]   ;;  %v8594_v51 = vld [vmem:[%s10951_s1 + $0x100] sm:$0xff]   ;;  %v5814_v53 = vld [vmem:[%s10952_s0 + $0x10] sm:$0xf] }
  0x12   :  { %v8593_v50 = vld [vmem:[%s10951_s1 + $0x148] sm:$0xff]   ;;  %v8595_v52 = vld [vmem:[%s10951_s1 + $0x140] sm:$0xff]   ;;  %v5839_v54 = vld [vmem:[%s10952_s0 + $0x14] sm:$0xf] }
  0x13   :  { %7503 = vmatpush3.bf16.msra.mxu0 %v8556_v9  ;;  %7523 = vmatpush3.bf16.msra.mxu1 %v8557_v10  ;;  %v8596_v55 = vld [vmem:[%s10951_s1 + $0x1b8] sm:$0xff]   ;;  %v8598_v57 = vld [vmem:[%s10951_s1 + $0x1b0] sm:$0xff]   ;;  %v8600_v59 = vld [vmem:[%s10951_s1 + $0x1a8] sm:$0xff]  }
  0x14   :  { %7504 = vmatprep.subr.bf16.mxu0 %v8968_v0  ;;  %7524 = vmatprep.subr.bf16.mxu1 %v8968_v0  ;;  %v8597_v56 = vld [vmem:[%s10951_s1 + $0x1f8] sm:$0xff]   ;;  %v8599_v58 = vld [vmem:[%s10951_s1 + $0x1f0] sm:$0xff]   ;;  %v8601_v60 = vld [vmem:[%s10951_s1 + $0x1e8] sm:$0xff]  }
  0x15   :  { %v8602_v61 = vld [vmem:[%s10951_s1 + $0x1a0] sm:$0xff]   ;;  %v8604_v63 = vld [vmem:[%s10951_s1 + $0x198] sm:$0xff]   ;;  %v8606_v2 = vld [vmem:[%s10951_s1 + $0x190] sm:$0xff]  }
  0x16   :  { %v8603_v62 = vld [vmem:[%s10951_s1 + $0x1e0] sm:$0xff]   ;;  %v8605_v1 = vld [vmem:[%s10951_s1 + $0x1d8] sm:$0xff]   ;;  %v8607_v3 = vld [vmem:[%s10951_s1 + $0x1d0] sm:$0xff]  }
  0x17   :  { %7505 = vmatpush3.bf16.msra.mxu0 %v8558_v11  ;;  %7525 = vmatpush3.bf16.msra.mxu1 %v8559_v12  ;;  %v8608_v4 = vld [vmem:[%s10951_s1 + $0x188] sm:$0xff]   ;;  %v8610_v6 = vld [vmem:[%s10951_s1 + $0x180] sm:$0xff]   ;;  %v5864_v8 = vld [vmem:[%s10952_s0 + $0x18] sm:$0xf] }
  0x18   :  { %7506 = vmatprep.subr.bf16.mxu0 %v8968_v0  ;;  %7526 = vmatprep.subr.bf16.mxu1 %v8968_v0  ;;  %v8609_v5 = vld [vmem:[%s10951_s1 + $0x1c8] sm:$0xff]   ;;  %v8611_v7 = vld [vmem:[%s10951_s1 + $0x1c0] sm:$0xff]   ;;  %v5889_v9 = vld [vmem:[%s10952_s0 + $0x1c] sm:$0xf] }
  0x19   :  { %v8612_v10 = vld [vmem:[%s10951_s1 + $0x238] sm:$0xff]   ;;  %v8614_v12 = vld [vmem:[%s10951_s1 + $0x230] sm:$0xff]  }
  0x1a   :  { %v8613_v11 = vld [vmem:[%s10951_s1 + $0x278] sm:$0xff]  }
  0x1b   :  { %7507 = vmatpush3.bf16.msra.mxu0 %v8560_v13  ;;  %7527 = vmatpush3.bf16.msra.mxu1 %v8561_v14  ;;  %v8615_v13 = vld [vmem:[%s10951_s1 + $0x270] sm:$0xff]   ;;  %v8616_v14 = vld [vmem:[%s10951_s1 + $0x228] sm:$0xff]  }
  0x1c   :  { %7508 = vmatprep.subr.bf16.mxu0 %v8968_v0  ;;  %7528 = vmatprep.subr.bf16.mxu1 %v8968_v0 }
  0x1f   :  { %7509 = vmatpush3.bf16.msra.mxu0 %v8562_v15  ;;  %7529 = vmatpush3.bf16.msra.mxu1 %v8563_v16  ;;  %v8617_v15 = vld [vmem:[%s10951_s1 + $0x268] sm:$0xff]   ;;  %v8618_v16 = vld [vmem:[%s10951_s1 + $0x220] sm:$0xff]  }
  0x20   :  { %7534 = vmatprep.subr.bf16.mxu0 %v8968_v0  ;;  %7554 = vmatprep.subr.bf16.mxu1 %v8968_v0 }
  0x22   :  { %7511 = vmatmul.mubr.bf16.vlgmr.msra.gmra.mxu0 %v5731_v17  ;;  %7531 = vmatmul.mubr.bf16.vlgmr.msra.gmra.mxu1 %v21_v18  ;;  %v8619_v17 = vld [vmem:[%s10951_s1 + $0x260] sm:$0xff]   ;;  %v8620_v18 = vld [vmem:[%s10951_s1 + $0x218] sm:$0xff]  }
  0x23   :  { %7535 = vmatpush3.bf16.msra.mxu0 %v8564_v19  ;;  %7555 = vmatpush3.bf16.msra.mxu1 %v8565_v20  ;;  %v8621_v19 = vld [vmem:[%s10951_s1 + $0x258] sm:$0xff]   ;;  %v8622_v20 = vld [vmem:[%s10951_s1 + $0x210] sm:$0xff]  }
  0x24   :  { %7536 = vmatprep.subr.bf16.mxu0 %v8968_v0  ;;  %7556 = vmatprep.subr.bf16.mxu1 %v8968_v0 }
  0x25   :  { %7550 = vmatprep.mubr.msk.bf16.mxu0 %vm8969_vm0, %v8968_v0  ;;  %7570 = vmatprep.mubr.msk.bf16.mxu1 %vm8969_vm0, %v8968_v0 }
  0x27   :  { %7537 = vmatpush3.bf16.msra.mxu0 %v8566_v21  ;;  %7557 = vmatpush3.bf16.msra.mxu1 %v8567_v22  ;;  %v8623_v21 = vld [vmem:[%s10951_s1 + $0x250] sm:$0xff]   ;;  %v8624_v22 = vld [vmem:[%s10951_s1 + $0x208] sm:$0xff]  }
  0x28   :  { %7538 = vmatprep.subr.bf16.mxu0 %v8968_v0  ;;  %7558 = vmatprep.subr.bf16.mxu1 %v8968_v0 }
  0x2b   :  { %7539 = vmatpush3.bf16.msra.mxu0 %v8568_v23  ;;  %7559 = vmatpush3.bf16.msra.mxu1 %v8569_v24  ;;  %v8625_v23 = vld [vmem:[%s10951_s1 + $0x248] sm:$0xff]   ;;  %v8626_v24 = vld [vmem:[%s10951_s1 + $0x200] sm:$0xff]  }
  0x2c   :  { %7540 = vmatprep.subr.bf16.mxu0 %v8968_v0  ;;  %7560 = vmatprep.subr.bf16.mxu1 %v8968_v0 }
  0x2f   :  { %7541 = vmatpush3.bf16.msra.mxu0 %v8570_v25  ;;  %7561 = vmatpush3.bf16.msra.mxu1 %v8571_v26  ;;  %v8627_v25 = vld [vmem:[%s10951_s1 + $0x240] sm:$0xff]  }
  0x30   :  { %7542 = vmatprep.subr.bf16.mxu0 %v8968_v0  ;;  %7562 = vmatprep.subr.bf16.mxu1 %v8968_v0  ;;  %v5914_v26 = vld [vmem:[%s10952_s0 + $0x20] sm:$0xf] }
  0x33   :  { %7543 = vmatpush3.bf16.msra.mxu0 %v8572_v27  ;;  %7563 = vmatpush3.bf16.msra.mxu1 %v8573_v28  ;;  %v8628_v27 = vld [vmem:[%s10951_s1 + $0x2b8] sm:$0xff]   ;;  %v5939_v28 = vld [vmem:[%s10952_s0 + $0x24] sm:$0xf] }
  0x34   :  { %7544 = vmatprep.subr.bf16.mxu0 %v8968_v0  ;;  %7564 = vmatprep.subr.bf16.mxu1 %v8968_v0 }
  0x37   :  { %7545 = vmatpush3.bf16.msra.mxu0 %v8574_v29  ;;  %7565 = vmatpush3.bf16.msra.mxu1 %v8575_v30  ;;  %v8629_v29 = vld [vmem:[%s10951_s1 + $0x2f8] sm:$0xff]   ;;  %v8630_v30 = vld [vmem:[%s10951_s1 + $0x2b0] sm:$0xff]  }
  0x38   :  { %7546 = vmatprep.subr.bf16.mxu0 %v8968_v0  ;;  %7566 = vmatprep.subr.bf16.mxu1 %v8968_v0 }
  0x3b   :  { %7547 = vmatpush3.bf16.msra.mxu0 %v8576_v31  ;;  %7567 = vmatpush3.bf16.msra.mxu1 %v8577_v32  ;;  %v8631_v31 = vld [vmem:[%s10951_s1 + $0x2f0] sm:$0xff]   ;;  %v8632_v32 = vld [vmem:[%s10951_s1 + $0x2a8] sm:$0xff]  }
  0x3c   :  { %7548 = vmatprep.subr.bf16.mxu0 %v8968_v0  ;;  %7568 = vmatprep.subr.bf16.mxu1 %v8968_v0 }
  0x3f   :  { %7549 = vmatpush3.bf16.msra.mxu0 %v8578_v33  ;;  %7569 = vmatpush3.bf16.msra.mxu1 %v8579_v34  ;;  %v8633_v33 = vld [vmem:[%s10951_s1 + $0x2e8] sm:$0xff]   ;;  %v8634_v34 = vld [vmem:[%s10951_s1 + $0x2a0] sm:$0xff]  }
  0x40   :  { %7574 = vmatprep.subr.bf16.mxu0 %v8968_v0  ;;  %7594 = vmatprep.subr.bf16.mxu1 %v8968_v0 }
  0x42   :  { %7551 = vmatmul.mubr.bf16.vlgmr.msra.gmra.mxu0 %v5764_v35  ;;  %7571 = vmatmul.mubr.bf16.vlgmr.msra.gmra.mxu1 %v5789_v36  ;;  %v8635_v35 = vld [vmem:[%s10951_s1 + $0x2e0] sm:$0xff]   ;;  %v8636_v36 = vld [vmem:[%s10951_s1 + $0x298] sm:$0xff]  }
  0x43   :  { %7575 = vmatpush3.bf16.msra.mxu0 %v8580_v37  ;;  %7595 = vmatpush3.bf16.msra.mxu1 %v8581_v38  ;;  %v8637_v37 = vld [vmem:[%s10951_s1 + $0x2d8] sm:$0xff]   ;;  %v8638_v38 = vld [vmem:[%s10951_s1 + $0x290] sm:$0xff]  }
  0x44   :  { %7576 = vmatprep.subr.bf16.mxu0 %v8968_v0  ;;  %7596 = vmatprep.subr.bf16.mxu1 %v8968_v0 }
  0x45   :  { %7590 = vmatprep.mubr.msk.bf16.mxu0 %vm8969_vm0, %v8968_v0  ;;  %7610 = vmatprep.mubr.msk.bf16.mxu1 %vm8969_vm0, %v8968_v0 }
  0x47   :  { %7577 = vmatpush3.bf16.msra.mxu0 %v8582_v39  ;;  %7597 = vmatpush3.bf16.msra.mxu1 %v8583_v40  ;;  %v8639_v39 = vld [vmem:[%s10951_s1 + $0x2d0] sm:$0xff]   ;;  %v8640_v40 = vld [vmem:[%s10951_s1 + $0x288] sm:$0xff]  }
  0x48   :  { %7578 = vmatprep.subr.bf16.mxu0 %v8968_v0  ;;  %7598 = vmatprep.subr.bf16.mxu1 %v8968_v0 }
  0x4b   :  { %7579 = vmatpush3.bf16.msra.mxu0 %v8584_v41  ;;  %7599 = vmatpush3.bf16.msra.mxu1 %v8585_v42  ;;  %v8641_v41 = vld [vmem:[%s10951_s1 + $0x2c8] sm:$0xff]   ;;  %v8642_v42 = vld [vmem:[%s10951_s1 + $0x280] sm:$0xff]  }
  0x4c   :  { %7580 = vmatprep.subr.bf16.mxu0 %v8968_v0  ;;  %7600 = vmatprep.subr.bf16.mxu1 %v8968_v0 }
  0x4f   :  { %7581 = vmatpush3.bf16.msra.mxu0 %v8586_v43  ;;  %7601 = vmatpush3.bf16.msra.mxu1 %v8587_v44  ;;  %v8643_v43 = vld [vmem:[%s10951_s1 + $0x2c0] sm:$0xff]   ;;  %v5964_v44 = vld [vmem:[%s10952_s0 + $0x28] sm:$0xf] }
  0x50   :  { %7582 = vmatprep.subr.bf16.mxu0 %v8968_v0  ;;  %7602 = vmatprep.subr.bf16.mxu1 %v8968_v0 }
  0x53   :  { %7583 = vmatpush3.bf16.msra.mxu0 %v8588_v45  ;;  %7603 = vmatpush3.bf16.msra.mxu1 %v8589_v46  ;;  %v8644_v45 = vld [vmem:[%s10951_s1 + $0x338] sm:$0xff]   ;;  %v5989_v46 = vld [vmem:[%s10952_s0 + $0x2c] sm:$0xf] }
  0x54   :  { %7584 = vmatprep.subr.bf16.mxu0 %v8968_v0  ;;  %7604 = vmatprep.subr.bf16.mxu1 %v8968_v0 }
  0x57   :  { %7585 = vmatpush3.bf16.msra.mxu0 %v8590_v47  ;;  %7605 = vmatpush3.bf16.msra.mxu1 %v8591_v48  ;;  %v8645_v47 = vld [vmem:[%s10951_s1 + $0x378] sm:$0xff]   ;;  %v8646_v48 = vld [vmem:[%s10951_s1 + $0x330] sm:$0xff]  }
  0x58   :  { %7586 = vmatprep.subr.bf16.mxu0 %v8968_v0  ;;  %7606 = vmatprep.subr.bf16.mxu1 %v8968_v0 }
  0x5b   :  { %7587 = vmatpush3.bf16.msra.mxu0 %v8592_v49  ;;  %7607 = vmatpush3.bf16.msra.mxu1 %v8593_v50  ;;  %v8647_v49 = vld [vmem:[%s10951_s1 + $0x370] sm:$0xff]   ;;  %v8648_v50 = vld [vmem:[%s10951_s1 + $0x328] sm:$0xff]  }
  0x5c   :  { %7588 = vmatprep.subr.bf16.mxu0 %v8968_v0  ;;  %7608 = vmatprep.subr.bf16.mxu1 %v8968_v0 }
  0x5f   :  { %7589 = vmatpush3.bf16.msra.mxu0 %v8594_v51  ;;  %7609 = vmatpush3.bf16.msra.mxu1 %v8595_v52  ;;  %v8649_v51 = vld [vmem:[%s10951_s1 + $0x368] sm:$0xff]   ;;  %v8650_v52 = vld [vmem:[%s10951_s1 + $0x320] sm:$0xff]  }
  0x60   :  { %7614 = vmatprep.subr.bf16.mxu0 %v8968_v0  ;;  %7634 = vmatprep.subr.bf16.mxu1 %v8968_v0 }
  0x62   :  { %7591 = vmatmul.mubr.bf16.vlgmr.msra.gmra.mxu0 %v5814_v53  ;;  %7611 = vmatmul.mubr.bf16.vlgmr.msra.gmra.mxu1 %v5839_v54  ;;  %v8651_v53 = vld [vmem:[%s10951_s1 + $0x360] sm:$0xff]   ;;  %v8652_v54 = vld [vmem:[%s10951_s1 + $0x318] sm:$0xff]  }
  0x63   :  { %7615 = vmatpush3.bf16.msra.mxu0 %v8596_v55  ;;  %7635 = vmatpush3.bf16.msra.mxu1 %v8597_v56  ;;  %v8653_v55 = vld [vmem:[%s10951_s1 + $0x358] sm:$0xff]   ;;  %v8654_v56 = vld [vmem:[%s10951_s1 + $0x310] sm:$0xff]  }
  0x64   :  { %7616 = vmatprep.subr.bf16.mxu0 %v8968_v0  ;;  %7636 = vmatprep.subr.bf16.mxu1 %v8968_v0 }
  0x65   :  { %7630 = vmatprep.mubr.msk.bf16.mxu0 %vm8969_vm0, %v8968_v0  ;;  %7650 = vmatprep.mubr.msk.bf16.mxu1 %vm8969_vm0, %v8968_v0 }
  0x67   :  { %7617 = vmatpush3.bf16.msra.mxu0 %v8598_v57  ;;  %7637 = vmatpush3.bf16.msra.mxu1 %v8599_v58  ;;  %v8655_v57 = vld [vmem:[%s10951_s1 + $0x350] sm:$0xff]   ;;  %v8656_v58 = vld [vmem:[%s10951_s1 + $0x308] sm:$0xff]  }
  0x68   :  { %7618 = vmatprep.subr.bf16.mxu0 %v8968_v0  ;;  %7638 = vmatprep.subr.bf16.mxu1 %v8968_v0 }
  0x6b   :  { %7619 = vmatpush3.bf16.msra.mxu0 %v8600_v59  ;;  %7639 = vmatpush3.bf16.msra.mxu1 %v8601_v60  ;;  %v8657_v59 = vld [vmem:[%s10951_s1 + $0x348] sm:$0xff]   ;;  %v8658_v60 = vld [vmem:[%s10951_s1 + $0x300] sm:$0xff]  }
  0x6c   :  { %7620 = vmatprep.subr.bf16.mxu0 %v8968_v0  ;;  %7640 = vmatprep.subr.bf16.mxu1 %v8968_v0 }
  0x6f   :  { %7621 = vmatpush3.bf16.msra.mxu0 %v8602_v61  ;;  %7641 = vmatpush3.bf16.msra.mxu1 %v8603_v62  ;;  %v8659_v61 = vld [vmem:[%s10951_s1 + $0x340] sm:$0xff]   ;;  %v6014_v62 = vld [vmem:[%s10952_s0 + $0x30] sm:$0xf] }
  0x70   :  { %7622 = vmatprep.subr.bf16.mxu0 %v8968_v0  ;;  %7642 = vmatprep.subr.bf16.mxu1 %v8968_v0 }
  0x73   :  { %7623 = vmatpush3.bf16.msra.mxu0 %v8604_v63  ;;  %7643 = vmatpush3.bf16.msra.mxu1 %v8605_v1  ;;  %v8660_v63 = vld [vmem:[%s10951_s1 + $0x3b8] sm:$0xff]   ;;  %v6039_v1 = vld [vmem:[%s10952_s0 + $0x34] sm:$0xf] }
  0x74   :  { %7624 = vmatprep.subr.bf16.mxu0 %v8968_v0  ;;  %7644 = vmatprep.subr.bf16.mxu1 %v8968_v0 }
  0x77   :  { %7625 = vmatpush3.bf16.msra.mxu0 %v8606_v2  ;;  %7645 = vmatpush3.bf16.msra.mxu1 %v8607_v3  ;;  %v8661_v2 = vld [vmem:[%s10951_s1 + $0x3f8] sm:$0xff]  }
  0x78   :  { %7626 = vmatprep.subr.bf16.mxu0 %v8968_v0  ;;  %7646 = vmatprep.subr.bf16.mxu1 %v8968_v0 }
  0x7b   :  { %7627 = vmatpush3.bf16.msra.mxu0 %v8608_v4  ;;  %7647 = vmatpush3.bf16.msra.mxu1 %v8609_v5  ;;  %v8662_v4 = vld [vmem:[%s10951_s1 + $0x3b0] sm:$0xff]  }
  0x7c   :  { %7628 = vmatprep.subr.bf16.mxu0 %v8968_v0  ;;  %7648 = vmatprep.subr.bf16.mxu1 %v8968_v0 }
  0x7f   :  { %7629 = vmatpush3.bf16.msra.mxu0 %v8610_v6  ;;  %7649 = vmatpush3.bf16.msra.mxu1 %v8611_v7  ;;  %v8663_v6 = vld [vmem:[%s10951_s1 + $0x3f0] sm:$0xff]  }
  0x80   :  { %7654 = vmatprep.subr.bf16.mxu0 %v8968_v0  ;;  %7674 = vmatprep.subr.bf16.mxu1 %v8968_v0 }
  0x82   :  { %7631 = vmatmul.mubr.bf16.vlgmr.msra.gmra.mxu0 %v5864_v8  ;;  %7651 = vmatmul.mubr.bf16.vlgmr.msra.gmra.mxu1 %v5889_v9 }
  0x83   :  { %7655 = vmatpush3.bf16.msra.mxu0 %v8612_v10  ;;  %7675 = vmatpush3.bf16.msra.mxu1 %v8613_v11  ;;  %v8664_v11 = vld [vmem:[%s10951_s1 + $0x3a8] sm:$0xff]  }
  0x84   :  { %7656 = vmatprep.subr.bf16.mxu0 %v8968_v0  ;;  %7676 = vmatprep.subr.bf16.mxu1 %v8968_v0 }
  0x85   :  { %7670 = vmatprep.mubr.msk.bf16.mxu0 %vm8969_vm0, %v8968_v0  ;;  %7690 = vmatprep.mubr.msk.bf16.mxu1 %vm8969_vm0, %v8968_v0 }
  0x87   :  { %7657 = vmatpush3.bf16.msra.mxu0 %v8614_v12  ;;  %7677 = vmatpush3.bf16.msra.mxu1 %v8615_v13  ;;  %v8665_v12 = vld [vmem:[%s10951_s1 + $0x3e8] sm:$0xff]  }
  0x88   :  { %7658 = vmatprep.subr.bf16.mxu0 %v8968_v0  ;;  %7678 = vmatprep.subr.bf16.mxu1 %v8968_v0 }
  0x8b   :  { %7659 = vmatpush3.bf16.msra.mxu0 %v8616_v14  ;;  %7679 = vmatpush3.bf16.msra.mxu1 %v8617_v15 }
  0x8c   :  { %7660 = vmatprep.subr.bf16.mxu0 %v8968_v0  ;;  %7680 = vmatprep.subr.bf16.mxu1 %v8968_v0 }
  0x8f   :  { %7661 = vmatpush3.bf16.msra.mxu0 %v8618_v16  ;;  %7681 = vmatpush3.bf16.msra.mxu1 %v8619_v17  ;;  %v8666_v16 = vld [vmem:[%s10951_s1 + $0x3a0] sm:$0xff]  }
  0x90   :  { %7662 = vmatprep.subr.bf16.mxu0 %v8968_v0  ;;  %7682 = vmatprep.subr.bf16.mxu1 %v8968_v0  ;;  %v8667_v17 = vld [vmem:[%s10951_s1 + $0x3e0] sm:$0xff]  }
  0x93   :  { %7663 = vmatpush3.bf16.msra.mxu0 %v8620_v18  ;;  %7683 = vmatpush3.bf16.msra.mxu1 %v8621_v19  ;;  %v8668_v18 = vld [vmem:[%s10951_s1 + $0x398] sm:$0xff]  }
  0x94   :  { %7664 = vmatprep.subr.bf16.mxu0 %v8968_v0  ;;  %7684 = vmatprep.subr.bf16.mxu1 %v8968_v0  ;;  %v8669_v19 = vld [vmem:[%s10951_s1 + $0x3d8] sm:$0xff]  }
  0x97   :  { %7665 = vmatpush3.bf16.msra.mxu0 %v8622_v20  ;;  %7685 = vmatpush3.bf16.msra.mxu1 %v8623_v21  ;;  %v8670_v20 = vld [vmem:[%s10951_s1 + $0x390] sm:$0xff]  }
  0x98   :  { %7666 = vmatprep.subr.bf16.mxu0 %v8968_v0  ;;  %7686 = vmatprep.subr.bf16.mxu1 %v8968_v0  ;;  %v8671_v21 = vld [vmem:[%s10951_s1 + $0x3d0] sm:$0xff]  }
  0x9b   :  { %7667 = vmatpush3.bf16.msra.mxu0 %v8624_v22  ;;  %7687 = vmatpush3.bf16.msra.mxu1 %v8625_v23  ;;  %v8672_v22 = vld [vmem:[%s10951_s1 + $0x388] sm:$0xff]  }
  0x9c   :  { %7668 = vmatprep.subr.bf16.mxu0 %v8968_v0  ;;  %7688 = vmatprep.subr.bf16.mxu1 %v8968_v0  ;;  %v8673_v23 = vld [vmem:[%s10951_s1 + $0x3c8] sm:$0xff]  }
  0x9f   :  { %7669 = vmatpush3.bf16.msra.mxu0 %v8626_v24  ;;  %7689 = vmatpush3.bf16.msra.mxu1 %v8627_v25  ;;  %v8674_v24 = vld [vmem:[%s10951_s1 + $0x380] sm:$0xff]  }
  0xa0   :  { %7694 = vmatprep.subr.bf16.mxu0 %v8968_v0  ;;  %7714 = vmatprep.subr.bf16.mxu1 %v8968_v0  ;;  %v8675_v25 = vld [vmem:[%s10951_s1 + $0x3c0] sm:$0xff]  }
  0xa2   :  { %7671 = vmatmul.mubr.bf16.vlgmr.msra.gmra.mxu0 %v5914_v26  ;;  %7691 = vmatmul.mubr.bf16.vlgmr.msra.gmra.mxu1 %v5939_v28  ;;  %v6064_v26 = vld [vmem:[%s10952_s0 + $0x38] sm:$0xf]  ;;  %v6089_v28 = vld [vmem:[%s10952_s0 + $0x3c] sm:$0xf] }
  0xa3   :  { %7695 = vmatpush3.bf16.msra.mxu0 %v8628_v27  ;;  %7715 = vmatpush3.bf16.msra.mxu1 %v8629_v29  ;;  %v8676_v27 = vld [vmem:[%s10951_s1 + $0x438] sm:$0xff]  }
  0xa4   :  { %7696 = vmatprep.subr.bf16.mxu0 %v8968_v0  ;;  %7716 = vmatprep.subr.bf16.mxu1 %v8968_v0  ;;  %v8677_v29 = vld [vmem:[%s10951_s1 + $0x478] sm:$0xff]  }
  0xa5   :  { %7710 = vmatprep.mubr.msk.bf16.mxu0 %vm8969_vm0, %v8968_v0  ;;  %7730 = vmatprep.mubr.msk.bf16.mxu1 %vm8969_vm0, %v8968_v0 }
  0xa7   :  { %7697 = vmatpush3.bf16.msra.mxu0 %v8630_v30  ;;  %7717 = vmatpush3.bf16.msra.mxu1 %v8631_v31  ;;  %v8678_v31 = vld [vmem:[%s10951_s1 + $0x430] sm:$0xff]  }
  0xa8   :  { %7698 = vmatprep.subr.bf16.mxu0 %v8968_v0  ;;  %7718 = vmatprep.subr.bf16.mxu1 %v8968_v0 }
  0xab   :  { %7699 = vmatpush3.bf16.msra.mxu0 %v8632_v32  ;;  %7719 = vmatpush3.bf16.msra.mxu1 %v8633_v33 }
  0xac   :  { %7700 = vmatprep.subr.bf16.mxu0 %v8968_v0  ;;  %7720 = vmatprep.subr.bf16.mxu1 %v8968_v0 }
  0xaf   :  { %7701 = vmatpush3.bf16.msra.mxu0 %v8634_v34  ;;  %7721 = vmatpush3.bf16.msra.mxu1 %v8635_v35  ;;  %v8679_v34 = vld [vmem:[%s10951_s1 + $0x470] sm:$0xff]  }
  0xb0   :  { %7702 = vmatprep.subr.bf16.mxu0 %v8968_v0  ;;  %7722 = vmatprep.subr.bf16.mxu1 %v8968_v0 }
  0xb3   :  { %7703 = vmatpush3.bf16.msra.mxu0 %v8636_v36  ;;  %7723 = vmatpush3.bf16.msra.mxu1 %v8637_v37 }
  0xb4   :  { %7704 = vmatprep.subr.bf16.mxu0 %v8968_v0  ;;  %7724 = vmatprep.subr.bf16.mxu1 %v8968_v0 }
  0xb7   :  { %7705 = vmatpush3.bf16.msra.mxu0 %v8638_v38  ;;  %7725 = vmatpush3.bf16.msra.mxu1 %v8639_v39  ;;  %v8680_v39 = vld [vmem:[%s10951_s1 + $0x428] sm:$0xff]  }
  0xb8   :  { %7706 = vmatprep.subr.bf16.mxu0 %v8968_v0  ;;  %7726 = vmatprep.subr.bf16.mxu1 %v8968_v0 }
  0xbb   :  { %7707 = vmatpush3.bf16.msra.mxu0 %v8640_v40  ;;  %7727 = vmatpush3.bf16.msra.mxu1 %v8641_v41  ;;  %v8681_v40 = vld [vmem:[%s10951_s1 + $0x468] sm:$0xff]  }
  0xbc   :  { %7708 = vmatprep.subr.bf16.mxu0 %v8968_v0  ;;  %7728 = vmatprep.subr.bf16.mxu1 %v8968_v0 }
  0xbf   :  { %7709 = vmatpush3.bf16.msra.mxu0 %v8642_v42  ;;  %7729 = vmatpush3.bf16.msra.mxu1 %v8643_v43 }
  0xc0   :  { %7734 = vmatprep.subr.bf16.mxu0 %v8968_v0  ;;  %7754 = vmatprep.subr.bf16.mxu1 %v8968_v0 }
  0xc2   :  { %7711 = vmatmul.mubr.bf16.vlgmr.msra.gmra.mxu0 %v5964_v44  ;;  %7731 = vmatmul.mubr.bf16.vlgmr.msra.gmra.mxu1 %v5989_v46  ;;  %v8682_v44 = vld [vmem:[%s10951_s1 + $0x420] sm:$0xff]   ;;  %v8684_v46 = vld [vmem:[%s10951_s1 + $0x418] sm:$0xff]  }
  0xc3   :  { %7735 = vmatpush3.bf16.msra.mxu0 %v8644_v45  ;;  %7755 = vmatpush3.bf16.msra.mxu1 %v8645_v47  ;;  %v8683_v45 = vld [vmem:[%s10951_s1 + $0x460] sm:$0xff]   ;;  %v8685_v47 = vld [vmem:[%s10951_s1 + $0x458] sm:$0xff]  }
  0xc4   :  { %7736 = vmatprep.subr.bf16.mxu0 %v8968_v0  ;;  %7756 = vmatprep.subr.bf16.mxu1 %v8968_v0 }
  0xc5   :  { %7750 = vmatprep.mubr.msk.bf16.mxu0 %vm8969_vm0, %v8968_v0  ;;  %7770 = vmatprep.mubr.msk.bf16.mxu1 %vm8969_vm0, %v8968_v0 }
  0xc7   :  { %7737 = vmatpush3.bf16.msra.mxu0 %v8646_v48  ;;  %7757 = vmatpush3.bf16.msra.mxu1 %v8647_v49  ;;  %v8686_v48 = vld [vmem:[%s10951_s1 + $0x410] sm:$0xff]  }
  0xc8   :  { %7738 = vmatprep.subr.bf16.mxu0 %v8968_v0  ;;  %7758 = vmatprep.subr.bf16.mxu1 %v8968_v0  ;;  %v8687_v49 = vld [vmem:[%s10951_s1 + $0x450] sm:$0xff]  }
  0xcb   :  { %7739 = vmatpush3.bf16.msra.mxu0 %v8648_v50  ;;  %7759 = vmatpush3.bf16.msra.mxu1 %v8649_v51  ;;  %v8688_v50 = vld [vmem:[%s10951_s1 + $0x408] sm:$0xff]  }
  0xcc   :  { %7740 = vmatprep.subr.bf16.mxu0 %v8968_v0  ;;  %7760 = vmatprep.subr.bf16.mxu1 %v8968_v0  ;;  %v8689_v51 = vld [vmem:[%s10951_s1 + $0x448] sm:$0xff]  }
  0xcf   :  { %7741 = vmatpush3.bf16.msra.mxu0 %v8650_v52  ;;  %7761 = vmatpush3.bf16.msra.mxu1 %v8651_v53  ;;  %v8690_v52 = vld [vmem:[%s10951_s1 + $0x400] sm:$0xff]  }
  0xd0   :  { %7742 = vmatprep.subr.bf16.mxu0 %v8968_v0  ;;  %7762 = vmatprep.subr.bf16.mxu1 %v8968_v0  ;;  %v8691_v53 = vld [vmem:[%s10951_s1 + $0x440] sm:$0xff]  }
  0xd3   :  { %7743 = vmatpush3.bf16.msra.mxu0 %v8652_v54  ;;  %7763 = vmatpush3.bf16.msra.mxu1 %v8653_v55  ;;  %v6114_v54 = vld [vmem:[%s10952_s0 + $0x40] sm:$0xf]  ;;  %v8692_v55 = vld [vmem:[%s10951_s1 + $0x4b8] sm:$0xff]  }
  0xd4   :  { %7744 = vmatprep.subr.bf16.mxu0 %v8968_v0  ;;  %7764 = vmatprep.subr.bf16.mxu1 %v8968_v0 }
  0xd7   :  { %7745 = vmatpush3.bf16.msra.mxu0 %v8654_v56  ;;  %7765 = vmatpush3.bf16.msra.mxu1 %v8655_v57  ;;  %v6139_v56 = vld [vmem:[%s10952_s0 + $0x44] sm:$0xf]  ;;  %v8693_v57 = vld [vmem:[%s10951_s1 + $0x4f8] sm:$0xff]  }
  0xd8   :  { %7746 = vmatprep.subr.bf16.mxu0 %v8968_v0  ;;  %7766 = vmatprep.subr.bf16.mxu1 %v8968_v0 }
  0xdb   :  { %7747 = vmatpush3.bf16.msra.mxu0 %v8656_v58  ;;  %7767 = vmatpush3.bf16.msra.mxu1 %v8657_v59  ;;  %v8694_v59 = vld [vmem:[%s10951_s1 + $0x4b0] sm:$0xff]  }
  0xdc   :  { %7748 = vmatprep.subr.bf16.mxu0 %v8968_v0  ;;  %7768 = vmatprep.subr.bf16.mxu1 %v8968_v0 }
  0xdf   :  { %7749 = vmatpush3.bf16.msra.mxu0 %v8658_v60  ;;  %7769 = vmatpush3.bf16.msra.mxu1 %v8659_v61 }
  0xe0   :  { %7774 = vmatprep.subr.bf16.mxu0 %v8968_v0  ;;  %7794 = vmatprep.subr.bf16.mxu1 %v8968_v0 }
  0xe2   :  { %v139_v3 = vpop.f32.mrf.mxu0  ;;  %7751 = vmatmul.mubr.bf16.vlgmr.msra.gmra.mxu0 %v6014_v62  ;;  %v227_v5 = vpop.f32.mrf.mxu1  ;;  %7771 = vmatmul.mubr.bf16.vlgmr.msra.gmra.mxu1 %v6039_v1  ;;  %v8695_v62 = vld [vmem:[%s10951_s1 + $0x4f0] sm:$0xff]  }
  0xe3   :  { %7775 = vmatpush3.bf16.msra.mxu0 %v8660_v63  ;;  %v228_v7 = vadd.f32 %v227_v5, %v139_v3  ;;  %7795 = vmatpush3.bf16.msra.mxu1 %v8661_v2  ;;  %v8697_v5 = vld [vmem:[%s10951_s1 + $0x4e8] sm:$0xff]  }
  0xe4   :  { %v7512_v8 = vpop.f32.mrf.mxu0  ;;  %7776 = vmatprep.subr.bf16.mxu0 %v8968_v0  ;;  %v7532_v9 = vpop.f32.mrf.mxu1  ;;  %7796 = vmatprep.subr.bf16.mxu1 %v8968_v0 }
  0xe5   :  { %7790 = vmatprep.mubr.msk.bf16.mxu0 %vm8969_vm0, %v8968_v0  ;;  %7810 = vmatprep.mubr.msk.bf16.mxu1 %vm8969_vm0, %v8968_v0  ;;  %v8698_v9 = vld [vmem:[%s10951_s1 + $0x4a0] sm:$0xff]  }
  0xe6   :  { %v142_v10 = vpop.f32.mrf.mxu0  ;;  %v230_v13 = vpop.f32.mrf.mxu1 }
  0xe7   :  { %7777 = vmatpush3.bf16.msra.mxu0 %v8662_v4  ;;  %7797 = vmatpush3.bf16.msra.mxu1 %v8663_v6  ;;  %v8696_v4 = vld [vmem:[%s10951_s1 + $0x4a8] sm:$0xff]   ;;  %v8699_v10 = vld [vmem:[%s10951_s1 + $0x4e0] sm:$0xff]   ;;  %v8702_v13 = vld [vmem:[%s10951_s1 + $0x490] sm:$0xff]  }
  0xe8   :  { %v7513_v14 = vpop.f32.mrf.mxu0  ;;  %7778 = vmatprep.subr.bf16.mxu0 %v8968_v0  ;;  %v7533_v15 = vpop.f32.mrf.mxu1  ;;  %7798 = vmatprep.subr.bf16.mxu1 %v8968_v0 }
  0xe9   :  { %v8703_v14 = vld [vmem:[%s10951_s1 + $0x4d0] sm:$0xff]   ;;  %v8704_v15 = vld [vmem:[%s10951_s1 + $0x488] sm:$0xff]  }
  0xeb   :  { %7779 = vmatpush3.bf16.msra.mxu0 %v8664_v11  ;;  %7799 = vmatpush3.bf16.msra.mxu1 %v8665_v12  ;;  %v8700_v11 = vld [vmem:[%s10951_s1 + $0x498] sm:$0xff]  }
  0xec   :  { %7780 = vmatprep.subr.bf16.mxu0 %v8968_v0  ;;  %7800 = vmatprep.subr.bf16.mxu1 %v8968_v0  ;;  %v8701_v12 = vld [vmem:[%s10951_s1 + $0x4d8] sm:$0xff]  }
  0xef   :  { %7781 = vmatpush3.bf16.msra.mxu0 %v8666_v16  ;;  %7801 = vmatpush3.bf16.msra.mxu1 %v8667_v17  ;;  %v8705_v16 = vld [vmem:[%s10951_s1 + $0x4c8] sm:$0xff]   ;;  %v8706_v17 = vld [vmem:[%s10951_s1 + $0x480] sm:$0xff]  }
  0xf0   :  { %7782 = vmatprep.subr.bf16.mxu0 %v8968_v0  ;;  %7802 = vmatprep.subr.bf16.mxu1 %v8968_v0 }
  0xf3   :  { %7783 = vmatpush3.bf16.msra.mxu0 %v8668_v18  ;;  %7803 = vmatpush3.bf16.msra.mxu1 %v8669_v19  ;;  %v8707_v18 = vld [vmem:[%s10951_s1 + $0x4c0] sm:$0xff]   ;;  %v6164_v19 = vld [vmem:[%s10952_s0 + $0x48] sm:$0xf] }
  0xf4   :  { %7784 = vmatprep.subr.bf16.mxu0 %v8968_v0  ;;  %7804 = vmatprep.subr.bf16.mxu1 %v8968_v0 }
  0xf7   :  { %7785 = vmatpush3.bf16.msra.mxu0 %v8670_v20  ;;  %7805 = vmatpush3.bf16.msra.mxu1 %v8671_v21  ;;  %v8708_v20 = vld [vmem:[%s10951_s1 + $0x538] sm:$0xff]   ;;  %v6189_v21 = vld [vmem:[%s10952_s0 + $0x4c] sm:$0xf] }
  0xf8   :  { %7786 = vmatprep.subr.bf16.mxu0 %v8968_v0  ;;  %7806 = vmatprep.subr.bf16.mxu1 %v8968_v0 }
  0xfb   :  { %7787 = vmatpush3.bf16.msra.mxu0 %v8672_v22  ;;  %7807 = vmatpush3.bf16.msra.mxu1 %v8673_v23  ;;  %v8709_v22 = vld [vmem:[%s10951_s1 + $0x578] sm:$0xff]  }
  0xfc   :  { %7788 = vmatprep.subr.bf16.mxu0 %v8968_v0  ;;  %7808 = vmatprep.subr.bf16.mxu1 %v8968_v0 }
  0xff   :  { %7789 = vmatpush3.bf16.msra.mxu0 %v8674_v24  ;;  %7809 = vmatpush3.bf16.msra.mxu1 %v8675_v25  ;;  %v8710_v24 = vld [vmem:[%s10951_s1 + $0x530] sm:$0xff]  }
 0x100   :  { %7814 = vmatprep.subr.bf16.mxu0 %v8968_v0  ;;  %7834 = vmatprep.subr.bf16.mxu1 %v8968_v0 }
 0x102   :  { %v334_v30 = vpop.f32.mrf.mxu0  ;;  %7791 = vmatmul.mubr.bf16.vlgmr.msra.gmra.mxu0 %v6064_v26  ;;  %v442_v33 = vpop.f32.mrf.mxu1  ;;  %7811 = vmatmul.mubr.bf16.vlgmr.msra.gmra.mxu1 %v6089_v28 }
 0x103   :  { %v340_v32 = vadd.f32 %v334_v30, %v228_v7  ;;  %7815 = vmatpush3.bf16.msra.mxu0 %v8676_v27  ;;  %7835 = vmatpush3.bf16.msra.mxu1 %v8677_v29  ;;  %v8711_v27 = vld [vmem:[%s10951_s1 + $0x570] sm:$0xff]  }
 0x104   :  { %v7552_v35 = vpop.f32.mrf.mxu0  ;;  %7816 = vmatprep.subr.bf16.mxu0 %v8968_v0  ;;  %v7572_v37 = vpop.f32.mrf.mxu1  ;;  %7836 = vmatprep.subr.bf16.mxu1 %v8968_v0 }
 0x105   :  { %v448_v36 = vadd.f32 %v442_v33, %v340_v32  ;;  %7830 = vmatprep.mubr.msk.bf16.mxu0 %vm8969_vm0, %v8968_v0  ;;  %7850 = vmatprep.mubr.msk.bf16.mxu1 %vm8969_vm0, %v8968_v0  ;;  %v8712_v32 = vld [vmem:[%s10951_s1 + $0x528] sm:$0xff]   ;;  %v8714_v37 = vld [vmem:[%s10951_s1 + $0x520] sm:$0xff]  }
 0x106   :  { %v337_v38 = vpop.f32.mrf.mxu0  ;;  %v445_v41 = vpop.f32.mrf.mxu1  ;;  %v8713_v33 = vld [vmem:[%s10951_s1 + $0x568] sm:$0xff]  }
 0x107   :  { %7817 = vmatpush3.bf16.msra.mxu0 %v8678_v31  ;;  %7837 = vmatpush3.bf16.msra.mxu1 %v8679_v34  ;;  %v8715_v38 = vld [vmem:[%s10951_s1 + $0x560] sm:$0xff]   ;;  %v8718_v41 = vld [vmem:[%s10951_s1 + $0x510] sm:$0xff]  }
 0x108   :  { %v7553_v42 = vpop.f32.mrf.mxu0  ;;  %7818 = vmatprep.subr.bf16.mxu0 %v8968_v0  ;;  %v7573_v43 = vpop.f32.mrf.mxu1  ;;  %7838 = vmatprep.subr.bf16.mxu1 %v8968_v0 }
 0x109   :  { %v8719_v42 = vld [vmem:[%s10951_s1 + $0x550] sm:$0xff]   ;;  %v8720_v43 = vld [vmem:[%s10951_s1 + $0x508] sm:$0xff]  }
 0x10b   :  { %7819 = vmatpush3.bf16.msra.mxu0 %v8680_v39  ;;  %7839 = vmatpush3.bf16.msra.mxu1 %v8681_v40  ;;  %v8716_v39 = vld [vmem:[%s10951_s1 + $0x518] sm:$0xff]  }
 0x10c   :  { %7820 = vmatprep.subr.bf16.mxu0 %v8968_v0  ;;  %7840 = vmatprep.subr.bf16.mxu1 %v8968_v0  ;;  %v8717_v40 = vld [vmem:[%s10951_s1 + $0x558] sm:$0xff]  }
 0x10f   :  { %7821 = vmatpush3.bf16.msra.mxu0 %v8682_v44  ;;  %7841 = vmatpush3.bf16.msra.mxu1 %v8683_v45  ;;  %v8721_v44 = vld [vmem:[%s10951_s1 + $0x548] sm:$0xff]   ;;  %v8722_v45 = vld [vmem:[%s10951_s1 + $0x500] sm:$0xff]  }
 0x110   :  { %7822 = vmatprep.subr.bf16.mxu0 %v8968_v0  ;;  %7842 = vmatprep.subr.bf16.mxu1 %v8968_v0 }
 0x113   :  { %7823 = vmatpush3.bf16.msra.mxu0 %v8684_v46  ;;  %7843 = vmatpush3.bf16.msra.mxu1 %v8685_v47  ;;  %v8723_v46 = vld [vmem:[%s10951_s1 + $0x540] sm:$0xff]   ;;  %v6214_v47 = vld [vmem:[%s10952_s0 + $0x50] sm:$0xf] }
 0x114   :  { %7824 = vmatprep.subr.bf16.mxu0 %v8968_v0  ;;  %7844 = vmatprep.subr.bf16.mxu1 %v8968_v0 }
 0x117   :  { %7825 = vmatpush3.bf16.msra.mxu0 %v8686_v48  ;;  %7845 = vmatpush3.bf16.msra.mxu1 %v8687_v49  ;;  %v8724_v48 = vld [vmem:[%s10951_s1 + $0x5b8] sm:$0xff]   ;;  %v6239_v49 = vld [vmem:[%s10952_s0 + $0x54] sm:$0xf] }
 0x118   :  { %7826 = vmatprep.subr.bf16.mxu0 %v8968_v0  ;;  %7846 = vmatprep.subr.bf16.mxu1 %v8968_v0 }
 0x11b   :  { %7827 = vmatpush3.bf16.msra.mxu0 %v8688_v50  ;;  %7847 = vmatpush3.bf16.msra.mxu1 %v8689_v51  ;;  %v8725_v50 = vld [vmem:[%s10951_s1 + $0x5f8] sm:$0xff]  }
 0x11c   :  { %7828 = vmatprep.subr.bf16.mxu0 %v8968_v0  ;;  %7848 = vmatprep.subr.bf16.mxu1 %v8968_v0 }
 0x11f   :  { %7829 = vmatpush3.bf16.msra.mxu0 %v8690_v52  ;;  %7849 = vmatpush3.bf16.msra.mxu1 %v8691_v53  ;;  %v8726_v52 = vld [vmem:[%s10951_s1 + $0x5b0] sm:$0xff]  }
 0x120   :  { %7854 = vmatprep.subr.bf16.mxu0 %v8968_v0  ;;  %7874 = vmatprep.subr.bf16.mxu1 %v8968_v0 }
 0x122   :  { %v550_v58 = vpop.f32.mrf.mxu0  ;;  %7831 = vmatmul.mubr.bf16.vlgmr.msra.gmra.mxu0 %v6114_v54  ;;  %v658_v61 = vpop.f32.mrf.mxu1  ;;  %7851 = vmatmul.mubr.bf16.vlgmr.msra.gmra.mxu1 %v6139_v56 }
 0x123   :  { %v556_v60 = vadd.f32 %v550_v58, %v448_v36  ;;  %7855 = vmatpush3.bf16.msra.mxu0 %v8692_v55  ;;  %7875 = vmatpush3.bf16.msra.mxu1 %v8693_v57  ;;  %v8727_v55 = vld [vmem:[%s10951_s1 + $0x5f0] sm:$0xff]  }
 0x124   :  { %v7592_v63 = vpop.f32.mrf.mxu0  ;;  %7856 = vmatprep.subr.bf16.mxu0 %v8968_v0  ;;  %v7612_v2 = vpop.f32.mrf.mxu1  ;;  %7876 = vmatprep.subr.bf16.mxu1 %v8968_v0 }
 0x125   :  { %v664_v1 = vadd.f32 %v658_v61, %v556_v60  ;;  %7870 = vmatprep.mubr.msk.bf16.mxu0 %vm8969_vm0, %v8968_v0  ;;  %7890 = vmatprep.mubr.msk.bf16.mxu1 %vm8969_vm0, %v8968_v0  ;;  %v8728_v60 = vld [vmem:[%s10951_s1 + $0x5a8] sm:$0xff]   ;;  %v8730_v2 = vld [vmem:[%s10951_s1 + $0x5a0] sm:$0xff]  }
 0x126   :  { %v553_v3 = vpop.f32.mrf.mxu0  ;;  %v661_v6 = vpop.f32.mrf.mxu1  ;;  %v8729_v61 = vld [vmem:[%s10951_s1 + $0x5e8] sm:$0xff]  }
 0x127   :  { %7857 = vmatpush3.bf16.msra.mxu0 %v8694_v59  ;;  %7877 = vmatpush3.bf16.msra.mxu1 %v8695_v62  ;;  %v8731_v3 = vld [vmem:[%s10951_s1 + $0x5e0] sm:$0xff]   ;;  %v8734_v6 = vld [vmem:[%s10951_s1 + $0x590] sm:$0xff]  }
 0x128   :  { %v7593_v7 = vpop.f32.mrf.mxu0  ;;  %7858 = vmatprep.subr.bf16.mxu0 %v8968_v0  ;;  %v7613_v8 = vpop.f32.mrf.mxu1  ;;  %7878 = vmatprep.subr.bf16.mxu1 %v8968_v0 }
 0x129   :  { %v8735_v7 = vld [vmem:[%s10951_s1 + $0x5d0] sm:$0xff]   ;;  %v8736_v8 = vld [vmem:[%s10951_s1 + $0x588] sm:$0xff]  }
 0x12b   :  { %7859 = vmatpush3.bf16.msra.mxu0 %v8696_v4  ;;  %7879 = vmatpush3.bf16.msra.mxu1 %v8697_v5  ;;  %v8732_v4 = vld [vmem:[%s10951_s1 + $0x598] sm:$0xff]  }
 0x12c   :  { %7860 = vmatprep.subr.bf16.mxu0 %v8968_v0  ;;  %7880 = vmatprep.subr.bf16.mxu1 %v8968_v0  ;;  %v8733_v5 = vld [vmem:[%s10951_s1 + $0x5d8] sm:$0xff]  }
 0x12f   :  { %7861 = vmatpush3.bf16.msra.mxu0 %v8698_v9  ;;  %7881 = vmatpush3.bf16.msra.mxu1 %v8699_v10  ;;  %v8737_v9 = vld [vmem:[%s10951_s1 + $0x5c8] sm:$0xff]   ;;  %v8738_v10 = vld [vmem:[%s10951_s1 + $0x580] sm:$0xff]  }
 0x130   :  { %7862 = vmatprep.subr.bf16.mxu0 %v8968_v0  ;;  %7882 = vmatprep.subr.bf16.mxu1 %v8968_v0 }
 0x133   :  { %7863 = vmatpush3.bf16.msra.mxu0 %v8700_v11  ;;  %7883 = vmatpush3.bf16.msra.mxu1 %v8701_v12  ;;  %v8739_v11 = vld [vmem:[%s10951_s1 + $0x5c0] sm:$0xff]   ;;  %v6264_v12 = vld [vmem:[%s10952_s0 + $0x58] sm:$0xf] }
 0x134   :  { %7864 = vmatprep.subr.bf16.mxu0 %v8968_v0  ;;  %7884 = vmatprep.subr.bf16.mxu1 %v8968_v0 }
 0x137   :  { %7865 = vmatpush3.bf16.msra.mxu0 %v8702_v13  ;;  %7885 = vmatpush3.bf16.msra.mxu1 %v8703_v14  ;;  %v8740_v13 = vld [vmem:[%s10951_s1 + $0x638] sm:$0xff]  }
 0x138   :  { %7866 = vmatprep.subr.bf16.mxu0 %v8968_v0  ;;  %7886 = vmatprep.subr.bf16.mxu1 %v8968_v0  ;;  %v6289_v14 = vld [vmem:[%s10952_s0 + $0x5c] sm:$0xf] }
 0x13b   :  { %7867 = vmatpush3.bf16.msra.mxu0 %v8704_v15  ;;  %7887 = vmatpush3.bf16.msra.mxu1 %v8705_v16  ;;  %v8741_v15 = vld [vmem:[%s10951_s1 + $0x678] sm:$0xff]  }
 0x13c   :  { %7868 = vmatprep.subr.bf16.mxu0 %v8968_v0  ;;  %7888 = vmatprep.subr.bf16.mxu1 %v8968_v0 }
 0x13f   :  { %7869 = vmatpush3.bf16.msra.mxu0 %v8706_v17  ;;  %7889 = vmatpush3.bf16.msra.mxu1 %v8707_v18 }
 0x140   :  { %7894 = vmatprep.subr.bf16.mxu0 %v8968_v0  ;;  %7914 = vmatprep.subr.bf16.mxu1 %v8968_v0 }
 0x142   :  { %v766_v23 = vpop.f32.mrf.mxu0  ;;  %7871 = vmatmul.mubr.bf16.vlgmr.msra.gmra.mxu0 %v6164_v19  ;;  %v874_v26 = vpop.f32.mrf.mxu1  ;;  %7891 = vmatmul.mubr.bf16.vlgmr.msra.gmra.mxu1 %v6189_v21  ;;  %v8742_v19 = vld [vmem:[%s10951_s1 + $0x630] sm:$0xff]  }
 0x143   :  { %v772_v25 = vadd.f32 %v766_v23, %v664_v1  ;;  %7895 = vmatpush3.bf16.msra.mxu0 %v8708_v20  ;;  %7915 = vmatpush3.bf16.msra.mxu1 %v8709_v22  ;;  %v8743_v21 = vld [vmem:[%s10951_s1 + $0x670] sm:$0xff]  }
 0x144   :  { %v7632_v28 = vpop.f32.mrf.mxu0  ;;  %7896 = vmatprep.subr.bf16.mxu0 %v8968_v0  ;;  %v7652_v30 = vpop.f32.mrf.mxu1  ;;  %7916 = vmatprep.subr.bf16.mxu1 %v8968_v0 }
 0x145   :  { %v880_v29 = vadd.f32 %v874_v26, %v772_v25  ;;  %7910 = vmatprep.mubr.msk.bf16.mxu0 %vm8969_vm0, %v8968_v0  ;;  %7930 = vmatprep.mubr.msk.bf16.mxu1 %vm8969_vm0, %v8968_v0  ;;  %v8744_v26 = vld [vmem:[%s10951_s1 + $0x628] sm:$0xff]   ;;  %v8746_v30 = vld [vmem:[%s10951_s1 + $0x620] sm:$0xff]  }
 0x146   :  { %v769_v31 = vpop.f32.mrf.mxu0  ;;  %v877_v34 = vpop.f32.mrf.mxu1  ;;  %v8745_v28 = vld [vmem:[%s10951_s1 + $0x668] sm:$0xff]  }
 0x147   :  { %7897 = vmatpush3.bf16.msra.mxu0 %v8710_v24  ;;  %7917 = vmatpush3.bf16.msra.mxu1 %v8711_v27  ;;  %v8747_v31 = vld [vmem:[%s10951_s1 + $0x660] sm:$0xff]   ;;  %v8750_v34 = vld [vmem:[%s10951_s1 + $0x610] sm:$0xff]  }
 0x148   :  { %v7633_v35 = vpop.f32.mrf.mxu0  ;;  %7898 = vmatprep.subr.bf16.mxu0 %v8968_v0  ;;  %v7653_v36 = vpop.f32.mrf.mxu1  ;;  %7918 = vmatprep.subr.bf16.mxu1 %v8968_v0 }
 0x149   :  { %v8751_v35 = vld [vmem:[%s10951_s1 + $0x650] sm:$0xff]   ;;  %v8752_v36 = vld [vmem:[%s10951_s1 + $0x608] sm:$0xff]  }
 0x14b   :  { %7899 = vmatpush3.bf16.msra.mxu0 %v8712_v32  ;;  %7919 = vmatpush3.bf16.msra.mxu1 %v8713_v33  ;;  %v8748_v32 = vld [vmem:[%s10951_s1 + $0x618] sm:$0xff]  }
 0x14c   :  { %7900 = vmatprep.subr.bf16.mxu0 %v8968_v0  ;;  %7920 = vmatprep.subr.bf16.mxu1 %v8968_v0  ;;  %v8749_v33 = vld [vmem:[%s10951_s1 + $0x658] sm:$0xff]  }
 0x14f   :  { %7901 = vmatpush3.bf16.msra.mxu0 %v8714_v37  ;;  %7921 = vmatpush3.bf16.msra.mxu1 %v8715_v38  ;;  %v8753_v37 = vld [vmem:[%s10951_s1 + $0x648] sm:$0xff]   ;;  %v8754_v38 = vld [vmem:[%s10951_s1 + $0x600] sm:$0xff]  }
 0x150   :  { %7902 = vmatprep.subr.bf16.mxu0 %v8968_v0  ;;  %7922 = vmatprep.subr.bf16.mxu1 %v8968_v0 }
 0x153   :  { %7903 = vmatpush3.bf16.msra.mxu0 %v8716_v39  ;;  %7923 = vmatpush3.bf16.msra.mxu1 %v8717_v40  ;;  %v8755_v39 = vld [vmem:[%s10951_s1 + $0x640] sm:$0xff]  }
 0x154   :  { %7904 = vmatprep.subr.bf16.mxu0 %v8968_v0  ;;  %7924 = vmatprep.subr.bf16.mxu1 %v8968_v0  ;;  %v6314_v40 = vld [vmem:[%s10952_s0 + $0x60] sm:$0xf] }
 0x157   :  { %7905 = vmatpush3.bf16.msra.mxu0 %v8718_v41  ;;  %7925 = vmatpush3.bf16.msra.mxu1 %v8719_v42  ;;  %v8756_v41 = vld [vmem:[%s10951_s1 + $0x6b8] sm:$0xff]   ;;  %v6339_v42 = vld [vmem:[%s10952_s0 + $0x64] sm:$0xf] }
 0x158   :  { %7906 = vmatprep.subr.bf16.mxu0 %v8968_v0  ;;  %7926 = vmatprep.subr.bf16.mxu1 %v8968_v0 }
 0x15b   :  { %7907 = vmatpush3.bf16.msra.mxu0 %v8720_v43  ;;  %7927 = vmatpush3.bf16.msra.mxu1 %v8721_v44  ;;  %v8757_v43 = vld [vmem:[%s10951_s1 + $0x6f8] sm:$0xff]  }
 0x15c   :  { %7908 = vmatprep.subr.bf16.mxu0 %v8968_v0  ;;  %7928 = vmatprep.subr.bf16.mxu1 %v8968_v0 }
 0x15f   :  { %7909 = vmatpush3.bf16.msra.mxu0 %v8722_v45  ;;  %7929 = vmatpush3.bf16.msra.mxu1 %v8723_v46 }
 0x160   :  { %7934 = vmatprep.subr.bf16.mxu0 %v8968_v0  ;;  %7954 = vmatprep.subr.bf16.mxu1 %v8968_v0 }
 0x162   :  { %v982_v51 = vpop.f32.mrf.mxu0  ;;  %7911 = vmatmul.mubr.bf16.vlgmr.msra.gmra.mxu0 %v6214_v47  ;;  %v1090_v54 = vpop.f32.mrf.mxu1  ;;  %7931 = vmatmul.mubr.bf16.vlgmr.msra.gmra.mxu1 %v6239_v49  ;;  %v8758_v47 = vld [vmem:[%s10951_s1 + $0x6b0] sm:$0xff]  }
 0x163   :  { %v988_v53 = vadd.f32 %v982_v51, %v880_v29  ;;  %7935 = vmatpush3.bf16.msra.mxu0 %v8724_v48  ;;  %7955 = vmatpush3.bf16.msra.mxu1 %v8725_v50  ;;  %v8759_v49 = vld [vmem:[%s10951_s1 + $0x6f0] sm:$0xff]  }
 0x164   :  { %v7672_v56 = vpop.f32.mrf.mxu0  ;;  %7936 = vmatprep.subr.bf16.mxu0 %v8968_v0  ;;  %v7692_v58 = vpop.f32.mrf.mxu1  ;;  %7956 = vmatprep.subr.bf16.mxu1 %v8968_v0 }
 0x165   :  { %v1096_v57 = vadd.f32 %v1090_v54, %v988_v53  ;;  %7950 = vmatprep.mubr.msk.bf16.mxu0 %vm8969_vm0, %v8968_v0  ;;  %7970 = vmatprep.mubr.msk.bf16.mxu1 %vm8969_vm0, %v8968_v0  ;;  %v8760_v54 = vld [vmem:[%s10951_s1 + $0x6a8] sm:$0xff]   ;;  %v8762_v58 = vld [vmem:[%s10951_s1 + $0x6a0] sm:$0xff]  }
 0x166   :  { %v985_v59 = vpop.f32.mrf.mxu0  ;;  %v1093_v62 = vpop.f32.mrf.mxu1  ;;  %v8761_v56 = vld [vmem:[%s10951_s1 + $0x6e8] sm:$0xff]  }
 0x167   :  { %7937 = vmatpush3.bf16.msra.mxu0 %v8726_v52  ;;  %7957 = vmatpush3.bf16.msra.mxu1 %v8727_v55  ;;  %v8763_v59 = vld [vmem:[%s10951_s1 + $0x6e0] sm:$0xff]   ;;  %v8766_v62 = vld [vmem:[%s10951_s1 + $0x690] sm:$0xff]  }
 0x168   :  { %v7673_v63 = vpop.f32.mrf.mxu0  ;;  %7938 = vmatprep.subr.bf16.mxu0 %v8968_v0  ;;  %v7693_v1 = vpop.f32.mrf.mxu1  ;;  %7958 = vmatprep.subr.bf16.mxu1 %v8968_v0 }
 0x169   :  { %v8767_v63 = vld [vmem:[%s10951_s1 + $0x6d0] sm:$0xff]   ;;  %v8768_v1 = vld [vmem:[%s10951_s1 + $0x688] sm:$0xff]  }
 0x16b   :  { %7939 = vmatpush3.bf16.msra.mxu0 %v8728_v60  ;;  %7959 = vmatpush3.bf16.msra.mxu1 %v8729_v61  ;;  %v8764_v60 = vld [vmem:[%s10951_s1 + $0x698] sm:$0xff]  }
 0x16c   :  { %7940 = vmatprep.subr.bf16.mxu0 %v8968_v0  ;;  %7960 = vmatprep.subr.bf16.mxu1 %v8968_v0  ;;  %v8765_v61 = vld [vmem:[%s10951_s1 + $0x6d8] sm:$0xff]  }
 0x16f   :  { %7941 = vmatpush3.bf16.msra.mxu0 %v8730_v2  ;;  %7961 = vmatpush3.bf16.msra.mxu1 %v8731_v3  ;;  %v8769_v2 = vld [vmem:[%s10951_s1 + $0x6c8] sm:$0xff]   ;;  %v8770_v3 = vld [vmem:[%s10951_s1 + $0x680] sm:$0xff]  }
 0x170   :  { %7942 = vmatprep.subr.bf16.mxu0 %v8968_v0  ;;  %7962 = vmatprep.subr.bf16.mxu1 %v8968_v0 }
 0x173   :  { %7943 = vmatpush3.bf16.msra.mxu0 %v8732_v4  ;;  %7963 = vmatpush3.bf16.msra.mxu1 %v8733_v5  ;;  %v8771_v4 = vld [vmem:[%s10951_s1 + $0x6c0] sm:$0xff]   ;;  %v6364_v5 = vld [vmem:[%s10952_s0 + $0x68] sm:$0xf] }
 0x174   :  { %7944 = vmatprep.subr.bf16.mxu0 %v8968_v0  ;;  %7964 = vmatprep.subr.bf16.mxu1 %v8968_v0 }
 0x177   :  { %7945 = vmatpush3.bf16.msra.mxu0 %v8734_v6  ;;  %7965 = vmatpush3.bf16.msra.mxu1 %v8735_v7  ;;  %v8772_v6 = vld [vmem:[%s10951_s1 + $0x738] sm:$0xff]   ;;  %v6389_v7 = vld [vmem:[%s10952_s0 + $0x6c] sm:$0xf] }
 0x178   :  { %7946 = vmatprep.subr.bf16.mxu0 %v8968_v0  ;;  %7966 = vmatprep.subr.bf16.mxu1 %v8968_v0 }
 0x17b   :  { %7947 = vmatpush3.bf16.msra.mxu0 %v8736_v8  ;;  %7967 = vmatpush3.bf16.msra.mxu1 %v8737_v9  ;;  %v8773_v8 = vld [vmem:[%s10951_s1 + $0x778] sm:$0xff]  }
 0x17c   :  { %7948 = vmatprep.subr.bf16.mxu0 %v8968_v0  ;;  %7968 = vmatprep.subr.bf16.mxu1 %v8968_v0 }
 0x17f   :  { %7949 = vmatpush3.bf16.msra.mxu0 %v8738_v10  ;;  %7969 = vmatpush3.bf16.msra.mxu1 %v8739_v11 }
 0x180   :  { %7974 = vmatprep.subr.bf16.mxu0 %v8968_v0  ;;  %7994 = vmatprep.subr.bf16.mxu1 %v8968_v0 }
 0x182   :  { %v1198_v16 = vpop.f32.mrf.mxu0  ;;  %7951 = vmatmul.mubr.bf16.vlgmr.msra.gmra.mxu0 %v6264_v12  ;;  %v1306_v18 = vpop.f32.mrf.mxu1  ;;  %7971 = vmatmul.mubr.bf16.vlgmr.msra.gmra.mxu1 %v6289_v14  ;;  %v8774_v12 = vld [vmem:[%s10951_s1 + $0x730] sm:$0xff]  }
 0x183   :  { %v1204_v17 = vadd.f32 %v1198_v16, %v1096_v57  ;;  %7975 = vmatpush3.bf16.msra.mxu0 %v8740_v13  ;;  %7995 = vmatpush3.bf16.msra.mxu1 %v8741_v15  ;;  %v8775_v14 = vld [vmem:[%s10951_s1 + $0x770] sm:$0xff]  }
 0x184   :  { %v7712_v20 = vpop.f32.mrf.mxu0  ;;  %7976 = vmatprep.subr.bf16.mxu0 %v8968_v0  ;;  %v7732_v23 = vpop.f32.mrf.mxu1  ;;  %7996 = vmatprep.subr.bf16.mxu1 %v8968_v0 }
 0x185   :  { %v1312_v22 = vadd.f32 %v1306_v18, %v1204_v17  ;;  %7990 = vmatprep.mubr.msk.bf16.mxu0 %vm8969_vm0, %v8968_v0  ;;  %8010 = vmatprep.mubr.msk.bf16.mxu1 %vm8969_vm0, %v8968_v0  ;;  %v8778_v23 = vld [vmem:[%s10951_s1 + $0x720] sm:$0xff]  }
 0x186   :  { %v1201_v24 = vpop.f32.mrf.mxu0  ;;  %v1309_v25 = vpop.f32.mrf.mxu1 }
 0x187   :  { %7977 = vmatpush3.bf16.msra.mxu0 %v8742_v19  ;;  %7997 = vmatpush3.bf16.msra.mxu1 %v8743_v21  ;;  %v8776_v19 = vld [vmem:[%s10951_s1 + $0x728] sm:$0xff]   ;;  %v8779_v24 = vld [vmem:[%s10951_s1 + $0x760] sm:$0xff]   ;;  %v8780_v25 = vld [vmem:[%s10951_s1 + $0x718] sm:$0xff]  }
 0x188   :  { %v7713_v27 = vpop.f32.mrf.mxu0  ;;  %7978 = vmatprep.subr.bf16.mxu0 %v8968_v0  ;;  %v7733_v29 = vpop.f32.mrf.mxu1  ;;  %7998 = vmatprep.subr.bf16.mxu1 %v8968_v0  ;;  %v8777_v21 = vld [vmem:[%s10951_s1 + $0x768] sm:$0xff]  }
 0x189   :  { %v8782_v27 = vld [vmem:[%s10951_s1 + $0x710] sm:$0xff]   ;;  %v8784_v29 = vld [vmem:[%s10951_s1 + $0x708] sm:$0xff]  }
 0x18b   :  { %7979 = vmatpush3.bf16.msra.mxu0 %v8744_v26  ;;  %7999 = vmatpush3.bf16.msra.mxu1 %v8745_v28  ;;  %v8781_v26 = vld [vmem:[%s10951_s1 + $0x758] sm:$0xff]   ;;  %v8783_v28 = vld [vmem:[%s10951_s1 + $0x750] sm:$0xff]  }
 0x18c   :  { %7980 = vmatprep.subr.bf16.mxu0 %v8968_v0  ;;  %8000 = vmatprep.subr.bf16.mxu1 %v8968_v0 }
 0x18f   :  { %7981 = vmatpush3.bf16.msra.mxu0 %v8746_v30  ;;  %8001 = vmatpush3.bf16.msra.mxu1 %v8747_v31  ;;  %v8785_v30 = vld [vmem:[%s10951_s1 + $0x748] sm:$0xff]   ;;  %v8786_v31 = vld [vmem:[%s10951_s1 + $0x700] sm:$0xff]  }
 0x190   :  { %7982 = vmatprep.subr.bf16.mxu0 %v8968_v0  ;;  %8002 = vmatprep.subr.bf16.mxu1 %v8968_v0 }
 0x193   :  { %7983 = vmatpush3.bf16.msra.mxu0 %v8748_v32  ;;  %8003 = vmatpush3.bf16.msra.mxu1 %v8749_v33  ;;  %v8787_v32 = vld [vmem:[%s10951_s1 + $0x740] sm:$0xff]   ;;  %v6414_v33 = vld [vmem:[%s10952_s0 + $0x70] sm:$0xf] }
 0x194   :  { %7984 = vmatprep.subr.bf16.mxu0 %v8968_v0  ;;  %8004 = vmatprep.subr.bf16.mxu1 %v8968_v0 }
 0x197   :  { %7985 = vmatpush3.bf16.msra.mxu0 %v8750_v34  ;;  %8005 = vmatpush3.bf16.msra.mxu1 %v8751_v35  ;;  %v8788_v34 = vld [vmem:[%s10951_s1 + $0x7b8] sm:$0xff]   ;;  %v6439_v35 = vld [vmem:[%s10952_s0 + $0x74] sm:$0xf] }
 0x198   :  { %7986 = vmatprep.subr.bf16.mxu0 %v8968_v0  ;;  %8006 = vmatprep.subr.bf16.mxu1 %v8968_v0 }
 0x19b   :  { %7987 = vmatpush3.bf16.msra.mxu0 %v8752_v36  ;;  %8007 = vmatpush3.bf16.msra.mxu1 %v8753_v37  ;;  %v8789_v36 = vld [vmem:[%s10951_s1 + $0x7f8] sm:$0xff]  }
 0x19c   :  { %7988 = vmatprep.subr.bf16.mxu0 %v8968_v0  ;;  %8008 = vmatprep.subr.bf16.mxu1 %v8968_v0 }
 0x19f   :  { %7989 = vmatpush3.bf16.msra.mxu0 %v8754_v38  ;;  %8009 = vmatpush3.bf16.msra.mxu1 %v8755_v39 }
 0x1a0   :  { %8014 = vmatprep.subr.bf16.mxu0 %v8968_v0  ;;  %8034 = vmatprep.subr.bf16.mxu1 %v8968_v0 }
 0x1a2   :  { %v1414_v44 = vpop.f32.mrf.mxu0  ;;  %7991 = vmatmul.mubr.bf16.vlgmr.msra.gmra.mxu0 %v6314_v40  ;;  %v1522_v46 = vpop.f32.mrf.mxu1  ;;  %8011 = vmatmul.mubr.bf16.vlgmr.msra.gmra.mxu1 %v6339_v42  ;;  %v8790_v40 = vld [vmem:[%s10951_s1 + $0x7b0] sm:$0xff]  }
 0x1a3   :  { %v1420_v45 = vadd.f32 %v1414_v44, %v1312_v22  ;;  %8015 = vmatpush3.bf16.msra.mxu0 %v8756_v41  ;;  %8035 = vmatpush3.bf16.msra.mxu1 %v8757_v43  ;;  %v8791_v42 = vld [vmem:[%s10951_s1 + $0x7f0] sm:$0xff]  }
 0x1a4   :  { %v7752_v48 = vpop.f32.mrf.mxu0  ;;  %8016 = vmatprep.subr.bf16.mxu0 %v8968_v0  ;;  %v7772_v51 = vpop.f32.mrf.mxu1  ;;  %8036 = vmatprep.subr.bf16.mxu1 %v8968_v0 }
 0x1a5   :  { %v1528_v50 = vadd.f32 %v1522_v46, %v1420_v45  ;;  %8030 = vmatprep.mubr.msk.bf16.mxu0 %vm8969_vm0, %v8968_v0  ;;  %8050 = vmatprep.mubr.msk.bf16.mxu1 %vm8969_vm0, %v8968_v0  ;;  %v8794_v51 = vld [vmem:[%s10951_s1 + $0x7a0] sm:$0xff]  }
 0x1a6   :  { %v1417_v52 = vpop.f32.mrf.mxu0  ;;  %v1525_v53 = vpop.f32.mrf.mxu1 }
 0x1a7   :  { %8017 = vmatpush3.bf16.msra.mxu0 %v8758_v47  ;;  %8037 = vmatpush3.bf16.msra.mxu1 %v8759_v49  ;;  %v8792_v47 = vld [vmem:[%s10951_s1 + $0x7a8] sm:$0xff]   ;;  %v8795_v52 = vld [vmem:[%s10951_s1 + $0x7e0] sm:$0xff]   ;;  %v8796_v53 = vld [vmem:[%s10951_s1 + $0x798] sm:$0xff]  }
 0x1a8   :  { %v7753_v55 = vpop.f32.mrf.mxu0  ;;  %8018 = vmatprep.subr.bf16.mxu0 %v8968_v0  ;;  %v7773_v57 = vpop.f32.mrf.mxu1  ;;  %8038 = vmatprep.subr.bf16.mxu1 %v8968_v0  ;;  %v8793_v49 = vld [vmem:[%s10951_s1 + $0x7e8] sm:$0xff]  }
 0x1a9   :  { %v8798_v55 = vld [vmem:[%s10951_s1 + $0x790] sm:$0xff]   ;;  %v8800_v57 = vld [vmem:[%s10951_s1 + $0x788] sm:$0xff]  }
 0x1ab   :  { %8019 = vmatpush3.bf16.msra.mxu0 %v8760_v54  ;;  %8039 = vmatpush3.bf16.msra.mxu1 %v8761_v56  ;;  %v8797_v54 = vld [vmem:[%s10951_s1 + $0x7d8] sm:$0xff]   ;;  %v8799_v56 = vld [vmem:[%s10951_s1 + $0x7d0] sm:$0xff]  }
 0x1ac   :  { %8020 = vmatprep.subr.bf16.mxu0 %v8968_v0  ;;  %8040 = vmatprep.subr.bf16.mxu1 %v8968_v0 }
 0x1af   :  { %8021 = vmatpush3.bf16.msra.mxu0 %v8762_v58  ;;  %8041 = vmatpush3.bf16.msra.mxu1 %v8763_v59  ;;  %v8801_v58 = vld [vmem:[%s10951_s1 + $0x7c8] sm:$0xff]   ;;  %v8802_v59 = vld [vmem:[%s10951_s1 + $0x780] sm:$0xff]  }
 0x1b0   :  { %8022 = vmatprep.subr.bf16.mxu0 %v8968_v0  ;;  %8042 = vmatprep.subr.bf16.mxu1 %v8968_v0 }
 0x1b3   :  { %8023 = vmatpush3.bf16.msra.mxu0 %v8764_v60  ;;  %8043 = vmatpush3.bf16.msra.mxu1 %v8765_v61  ;;  %v8803_v60 = vld [vmem:[%s10951_s1 + $0x7c0] sm:$0xff]   ;;  %v6464_v61 = vld [vmem:[%s10952_s0 + $0x78] sm:$0xf] }
 0x1b4   :  { %8024 = vmatprep.subr.bf16.mxu0 %v8968_v0  ;;  %8044 = vmatprep.subr.bf16.mxu1 %v8968_v0 }
 0x1b7   :  { %8025 = vmatpush3.bf16.msra.mxu0 %v8766_v62  ;;  %8045 = vmatpush3.bf16.msra.mxu1 %v8767_v63  ;;  %v8804_v62 = vld [vmem:[%s10951_s1 + $0x838] sm:$0xff]  }
 0x1b8   :  { %8026 = vmatprep.subr.bf16.mxu0 %v8968_v0  ;;  %8046 = vmatprep.subr.bf16.mxu1 %v8968_v0  ;;  %v6489_v63 = vld [vmem:[%s10952_s0 + $0x7c] sm:$0xf] }
 0x1bb   :  { %8027 = vmatpush3.bf16.msra.mxu0 %v8768_v1  ;;  %8047 = vmatpush3.bf16.msra.mxu1 %v8769_v2  ;;  %v8805_v1 = vld [vmem:[%s10951_s1 + $0x878] sm:$0xff]  }
 0x1bc   :  { %8028 = vmatprep.subr.bf16.mxu0 %v8968_v0  ;;  %8048 = vmatprep.subr.bf16.mxu1 %v8968_v0 }
 0x1bf   :  { %8029 = vmatpush3.bf16.msra.mxu0 %v8770_v3  ;;  %8049 = vmatpush3.bf16.msra.mxu1 %v8771_v4 }
 0x1c0   :  { %8054 = vmatprep.subr.bf16.mxu0 %v8968_v0  ;;  %8074 = vmatprep.subr.bf16.mxu1 %v8968_v0 }
 0x1c2   :  { %v1630_v9 = vpop.f32.mrf.mxu0  ;;  %8031 = vmatmul.mubr.bf16.vlgmr.msra.gmra.mxu0 %v6364_v5  ;;  %v1738_v11 = vpop.f32.mrf.mxu1  ;;  %8051 = vmatmul.mubr.bf16.vlgmr.msra.gmra.mxu1 %v6389_v7  ;;  %v8806_v5 = vld [vmem:[%s10951_s1 + $0x830] sm:$0xff]  }
 0x1c3   :  { %v1636_v10 = vadd.f32 %v1630_v9, %v1528_v50  ;;  %8055 = vmatpush3.bf16.msra.mxu0 %v8772_v6  ;;  %8075 = vmatpush3.bf16.msra.mxu1 %v8773_v8  ;;  %v8807_v7 = vld [vmem:[%s10951_s1 + $0x870] sm:$0xff]  }
 0x1c4   :  { %v7792_v13 = vpop.f32.mrf.mxu0  ;;  %8056 = vmatprep.subr.bf16.mxu0 %v8968_v0  ;;  %v7812_v16 = vpop.f32.mrf.mxu1  ;;  %8076 = vmatprep.subr.bf16.mxu1 %v8968_v0 }
 0x1c5   :  { %v1744_v15 = vadd.f32 %v1738_v11, %v1636_v10  ;;  %8070 = vmatprep.mubr.msk.bf16.mxu0 %vm8969_vm0, %v8968_v0  ;;  %8090 = vmatprep.mubr.msk.bf16.mxu1 %vm8969_vm0, %v8968_v0  ;;  %v8810_v16 = vld [vmem:[%s10951_s1 + $0x820] sm:$0xff]  }
 0x1c6   :  { %v1633_v17 = vpop.f32.mrf.mxu0  ;;  %v1741_v18 = vpop.f32.mrf.mxu1 }
 0x1c7   :  { %8057 = vmatpush3.bf16.msra.mxu0 %v8774_v12  ;;  %8077 = vmatpush3.bf16.msra.mxu1 %v8775_v14  ;;  %v8808_v12 = vld [vmem:[%s10951_s1 + $0x828] sm:$0xff]   ;;  %v8811_v17 = vld [vmem:[%s10951_s1 + $0x860] sm:$0xff]   ;;  %v8812_v18 = vld [vmem:[%s10951_s1 + $0x818] sm:$0xff]  }
 0x1c8   :  { %v7793_v20 = vpop.f32.mrf.mxu0  ;;  %8058 = vmatprep.subr.bf16.mxu0 %v8968_v0  ;;  %v7813_v22 = vpop.f32.mrf.mxu1  ;;  %8078 = vmatprep.subr.bf16.mxu1 %v8968_v0  ;;  %v8809_v14 = vld [vmem:[%s10951_s1 + $0x868] sm:$0xff]  }
 0x1c9   :  { %v8814_v20 = vld [vmem:[%s10951_s1 + $0x810] sm:$0xff]   ;;  %v8816_v22 = vld [vmem:[%s10951_s1 + $0x808] sm:$0xff]  }
 0x1cb   :  { %8059 = vmatpush3.bf16.msra.mxu0 %v8776_v19  ;;  %8079 = vmatpush3.bf16.msra.mxu1 %v8777_v21  ;;  %v8813_v19 = vld [vmem:[%s10951_s1 + $0x858] sm:$0xff]   ;;  %v8815_v21 = vld [vmem:[%s10951_s1 + $0x850] sm:$0xff]  }
 0x1cc   :  { %8060 = vmatprep.subr.bf16.mxu0 %v8968_v0  ;;  %8080 = vmatprep.subr.bf16.mxu1 %v8968_v0 }
 0x1cf   :  { %8061 = vmatpush3.bf16.msra.mxu0 %v8778_v23  ;;  %8081 = vmatpush3.bf16.msra.mxu1 %v8779_v24  ;;  %v8817_v23 = vld [vmem:[%s10951_s1 + $0x848] sm:$0xff]   ;;  %v8818_v24 = vld [vmem:[%s10951_s1 + $0x800] sm:$0xff]  }
 0x1d0   :  { %8062 = vmatprep.subr.bf16.mxu0 %v8968_v0  ;;  %8082 = vmatprep.subr.bf16.mxu1 %v8968_v0 }
 0x1d3   :  { %8063 = vmatpush3.bf16.msra.mxu0 %v8780_v25  ;;  %8083 = vmatpush3.bf16.msra.mxu1 %v8781_v26  ;;  %v8819_v25 = vld [vmem:[%s10951_s1 + $0x840] sm:$0xff]  }
 0x1d4   :  { %8064 = vmatprep.subr.bf16.mxu0 %v8968_v0  ;;  %8084 = vmatprep.subr.bf16.mxu1 %v8968_v0  ;;  %v6514_v26 = vld [vmem:[%s10952_s0 + $0x80] sm:$0xf] }
 0x1d7   :  { %8065 = vmatpush3.bf16.msra.mxu0 %v8782_v27  ;;  %8085 = vmatpush3.bf16.msra.mxu1 %v8783_v28  ;;  %v8820_v27 = vld [vmem:[%s10951_s1 + $0x8b8] sm:$0xff]   ;;  %v6539_v28 = vld [vmem:[%s10952_s0 + $0x84] sm:$0xf] }
 0x1d8   :  { %8066 = vmatprep.subr.bf16.mxu0 %v8968_v0  ;;  %8086 = vmatprep.subr.bf16.mxu1 %v8968_v0 }
 0x1db   :  { %8067 = vmatpush3.bf16.msra.mxu0 %v8784_v29  ;;  %8087 = vmatpush3.bf16.msra.mxu1 %v8785_v30  ;;  %v8821_v29 = vld [vmem:[%s10951_s1 + $0x8f8] sm:$0xff]  }
 0x1dc   :  { %8068 = vmatprep.subr.bf16.mxu0 %v8968_v0  ;;  %8088 = vmatprep.subr.bf16.mxu1 %v8968_v0 }
 0x1df   :  { %8069 = vmatpush3.bf16.msra.mxu0 %v8786_v31  ;;  %8089 = vmatpush3.bf16.msra.mxu1 %v8787_v32 }
 0x1e0   :  { %8094 = vmatprep.subr.bf16.mxu0 %v8968_v0  ;;  %8114 = vmatprep.subr.bf16.mxu1 %v8968_v0 }
 0x1e2   :  { %v1846_v37 = vpop.f32.mrf.mxu0  ;;  %8071 = vmatmul.mubr.bf16.vlgmr.msra.gmra.mxu0 %v6414_v33  ;;  %v1954_v39 = vpop.f32.mrf.mxu1  ;;  %8091 = vmatmul.mubr.bf16.vlgmr.msra.gmra.mxu1 %v6439_v35  ;;  %v8822_v33 = vld [vmem:[%s10951_s1 + $0x8b0] sm:$0xff]  }
 0x1e3   :  { %v1852_v38 = vadd.f32 %v1846_v37, %v1744_v15  ;;  %8095 = vmatpush3.bf16.msra.mxu0 %v8788_v34  ;;  %8115 = vmatpush3.bf16.msra.mxu1 %v8789_v36  ;;  %v8823_v35 = vld [vmem:[%s10951_s1 + $0x8f0] sm:$0xff]  }
 0x1e4   :  { %v7832_v41 = vpop.f32.mrf.mxu0  ;;  %8096 = vmatprep.subr.bf16.mxu0 %v8968_v0  ;;  %v7852_v44 = vpop.f32.mrf.mxu1  ;;  %8116 = vmatprep.subr.bf16.mxu1 %v8968_v0 }
 0x1e5   :  { %v1960_v43 = vadd.f32 %v1954_v39, %v1852_v38  ;;  %8110 = vmatprep.mubr.msk.bf16.mxu0 %vm8969_vm0, %v8968_v0  ;;  %8130 = vmatprep.mubr.msk.bf16.mxu1 %vm8969_vm0, %v8968_v0  ;;  %v8826_v44 = vld [vmem:[%s10951_s1 + $0x8a0] sm:$0xff]  }
 0x1e6   :  { %v1849_v45 = vpop.f32.mrf.mxu0  ;;  %v1957_v46 = vpop.f32.mrf.mxu1 }
 0x1e7   :  { %8097 = vmatpush3.bf16.msra.mxu0 %v8790_v40  ;;  %8117 = vmatpush3.bf16.msra.mxu1 %v8791_v42  ;;  %v8824_v40 = vld [vmem:[%s10951_s1 + $0x8a8] sm:$0xff]   ;;  %v8827_v45 = vld [vmem:[%s10951_s1 + $0x8e0] sm:$0xff]   ;;  %v8828_v46 = vld [vmem:[%s10951_s1 + $0x898] sm:$0xff]  }
 0x1e8   :  { %v7833_v48 = vpop.f32.mrf.mxu0  ;;  %8098 = vmatprep.subr.bf16.mxu0 %v8968_v0  ;;  %v7853_v50 = vpop.f32.mrf.mxu1  ;;  %8118 = vmatprep.subr.bf16.mxu1 %v8968_v0  ;;  %v8825_v42 = vld [vmem:[%s10951_s1 + $0x8e8] sm:$0xff]  }
 0x1e9   :  { %v8830_v48 = vld [vmem:[%s10951_s1 + $0x890] sm:$0xff]   ;;  %v8832_v50 = vld [vmem:[%s10951_s1 + $0x888] sm:$0xff]  }
 0x1eb   :  { %8099 = vmatpush3.bf16.msra.mxu0 %v8792_v47  ;;  %8119 = vmatpush3.bf16.msra.mxu1 %v8793_v49  ;;  %v8829_v47 = vld [vmem:[%s10951_s1 + $0x8d8] sm:$0xff]   ;;  %v8831_v49 = vld [vmem:[%s10951_s1 + $0x8d0] sm:$0xff]  }
 0x1ec   :  { %8100 = vmatprep.subr.bf16.mxu0 %v8968_v0  ;;  %8120 = vmatprep.subr.bf16.mxu1 %v8968_v0 }
 0x1ef   :  { %8101 = vmatpush3.bf16.msra.mxu0 %v8794_v51  ;;  %8121 = vmatpush3.bf16.msra.mxu1 %v8795_v52  ;;  %v8833_v51 = vld [vmem:[%s10951_s1 + $0x8c8] sm:$0xff]   ;;  %v8834_v52 = vld [vmem:[%s10951_s1 + $0x880] sm:$0xff]  }
 0x1f0   :  { %8102 = vmatprep.subr.bf16.mxu0 %v8968_v0  ;;  %8122 = vmatprep.subr.bf16.mxu1 %v8968_v0 }
 0x1f3   :  { %8103 = vmatpush3.bf16.msra.mxu0 %v8796_v53  ;;  %8123 = vmatpush3.bf16.msra.mxu1 %v8797_v54  ;;  %v8835_v53 = vld [vmem:[%s10951_s1 + $0x8c0] sm:$0xff]   ;;  %v6564_v54 = vld [vmem:[%s10952_s0 + $0x88] sm:$0xf] }
 0x1f4   :  { %8104 = vmatprep.subr.bf16.mxu0 %v8968_v0  ;;  %8124 = vmatprep.subr.bf16.mxu1 %v8968_v0 }
 0x1f7   :  { %8105 = vmatpush3.bf16.msra.mxu0 %v8798_v55  ;;  %8125 = vmatpush3.bf16.msra.mxu1 %v8799_v56  ;;  %v8836_v55 = vld [vmem:[%s10951_s1 + $0x938] sm:$0xff]   ;;  %v6589_v56 = vld [vmem:[%s10952_s0 + $0x8c] sm:$0xf] }
 0x1f8   :  { %8106 = vmatprep.subr.bf16.mxu0 %v8968_v0  ;;  %8126 = vmatprep.subr.bf16.mxu1 %v8968_v0 }
 0x1fb   :  { %8107 = vmatpush3.bf16.msra.mxu0 %v8800_v57  ;;  %8127 = vmatpush3.bf16.msra.mxu1 %v8801_v58  ;;  %v8837_v57 = vld [vmem:[%s10951_s1 + $0x978] sm:$0xff]  }
 0x1fc   :  { %8108 = vmatprep.subr.bf16.mxu0 %v8968_v0  ;;  %8128 = vmatprep.subr.bf16.mxu1 %v8968_v0 }
 0x1ff   :  { %8109 = vmatpush3.bf16.msra.mxu0 %v8802_v59  ;;  %8129 = vmatpush3.bf16.msra.mxu1 %v8803_v60 }
 0x200   :  { %8134 = vmatprep.subr.bf16.mxu0 %v8968_v0  ;;  %8154 = vmatprep.subr.bf16.mxu1 %v8968_v0 }
 0x202   :  { %v2062_v2 = vpop.f32.mrf.mxu0  ;;  %8111 = vmatmul.mubr.bf16.vlgmr.msra.gmra.mxu0 %v6464_v61  ;;  %v2170_v4 = vpop.f32.mrf.mxu1  ;;  %8131 = vmatmul.mubr.bf16.vlgmr.msra.gmra.mxu1 %v6489_v63  ;;  %v8838_v61 = vld [vmem:[%s10951_s1 + $0x930] sm:$0xff]  }
 0x203   :  { %v2068_v3 = vadd.f32 %v2062_v2, %v1960_v43  ;;  %8135 = vmatpush3.bf16.msra.mxu0 %v8804_v62  ;;  %8155 = vmatpush3.bf16.msra.mxu1 %v8805_v1  ;;  %v8839_v63 = vld [vmem:[%s10951_s1 + $0x970] sm:$0xff]  }
 0x204   :  { %v7872_v6 = vpop.f32.mrf.mxu0  ;;  %8136 = vmatprep.subr.bf16.mxu0 %v8968_v0  ;;  %v7892_v9 = vpop.f32.mrf.mxu1  ;;  %8156 = vmatprep.subr.bf16.mxu1 %v8968_v0 }
 0x205   :  { %v2176_v8 = vadd.f32 %v2170_v4, %v2068_v3  ;;  %8150 = vmatprep.mubr.msk.bf16.mxu0 %vm8969_vm0, %v8968_v0  ;;  %8170 = vmatprep.mubr.msk.bf16.mxu1 %vm8969_vm0, %v8968_v0  ;;  %v8842_v9 = vld [vmem:[%s10951_s1 + $0x920] sm:$0xff]  }
 0x206   :  { %v2065_v10 = vpop.f32.mrf.mxu0  ;;  %v2173_v11 = vpop.f32.mrf.mxu1 }
 0x207   :  { %8137 = vmatpush3.bf16.msra.mxu0 %v8806_v5  ;;  %8157 = vmatpush3.bf16.msra.mxu1 %v8807_v7  ;;  %v8840_v5 = vld [vmem:[%s10951_s1 + $0x928] sm:$0xff]   ;;  %v8843_v10 = vld [vmem:[%s10951_s1 + $0x960] sm:$0xff]   ;;  %v8844_v11 = vld [vmem:[%s10951_s1 + $0x918] sm:$0xff]  }
 0x208   :  { %v7873_v13 = vpop.f32.mrf.mxu0  ;;  %8138 = vmatprep.subr.bf16.mxu0 %v8968_v0  ;;  %v7893_v15 = vpop.f32.mrf.mxu1  ;;  %8158 = vmatprep.subr.bf16.mxu1 %v8968_v0  ;;  %v8841_v7 = vld [vmem:[%s10951_s1 + $0x968] sm:$0xff]  }
 0x209   :  { %v8846_v13 = vld [vmem:[%s10951_s1 + $0x910] sm:$0xff]   ;;  %v8848_v15 = vld [vmem:[%s10951_s1 + $0x908] sm:$0xff]  }
 0x20b   :  { %8139 = vmatpush3.bf16.msra.mxu0 %v8808_v12  ;;  %8159 = vmatpush3.bf16.msra.mxu1 %v8809_v14  ;;  %v8845_v12 = vld [vmem:[%s10951_s1 + $0x958] sm:$0xff]   ;;  %v8847_v14 = vld [vmem:[%s10951_s1 + $0x950] sm:$0xff]  }
 0x20c   :  { %8140 = vmatprep.subr.bf16.mxu0 %v8968_v0  ;;  %8160 = vmatprep.subr.bf16.mxu1 %v8968_v0 }
 0x20f   :  { %8141 = vmatpush3.bf16.msra.mxu0 %v8810_v16  ;;  %8161 = vmatpush3.bf16.msra.mxu1 %v8811_v17  ;;  %v8849_v16 = vld [vmem:[%s10951_s1 + $0x948] sm:$0xff]   ;;  %v8850_v17 = vld [vmem:[%s10951_s1 + $0x900] sm:$0xff]  }
 0x210   :  { %8142 = vmatprep.subr.bf16.mxu0 %v8968_v0  ;;  %8162 = vmatprep.subr.bf16.mxu1 %v8968_v0 }
 0x213   :  { %8143 = vmatpush3.bf16.msra.mxu0 %v8812_v18  ;;  %8163 = vmatpush3.bf16.msra.mxu1 %v8813_v19  ;;  %v8851_v18 = vld [vmem:[%s10951_s1 + $0x940] sm:$0xff]   ;;  %v6614_v19 = vld [vmem:[%s10952_s0 + $0x90] sm:$0xf] }
 0x214   :  { %8144 = vmatprep.subr.bf16.mxu0 %v8968_v0  ;;  %8164 = vmatprep.subr.bf16.mxu1 %v8968_v0 }
 0x217   :  { %8145 = vmatpush3.bf16.msra.mxu0 %v8814_v20  ;;  %8165 = vmatpush3.bf16.msra.mxu1 %v8815_v21  ;;  %v8852_v20 = vld [vmem:[%s10951_s1 + $0x9b8] sm:$0xff]   ;;  %v6639_v21 = vld [vmem:[%s10952_s0 + $0x94] sm:$0xf] }
 0x218   :  { %8146 = vmatprep.subr.bf16.mxu0 %v8968_v0  ;;  %8166 = vmatprep.subr.bf16.mxu1 %v8968_v0 }
 0x21b   :  { %8147 = vmatpush3.bf16.msra.mxu0 %v8816_v22  ;;  %8167 = vmatpush3.bf16.msra.mxu1 %v8817_v23  ;;  %v8853_v22 = vld [vmem:[%s10951_s1 + $0x9f8] sm:$0xff]  }
 0x21c   :  { %8148 = vmatprep.subr.bf16.mxu0 %v8968_v0  ;;  %8168 = vmatprep.subr.bf16.mxu1 %v8968_v0 }
 0x21f   :  { %8149 = vmatpush3.bf16.msra.mxu0 %v8818_v24  ;;  %8169 = vmatpush3.bf16.msra.mxu1 %v8819_v25 }
 0x220   :  { %8174 = vmatprep.subr.bf16.mxu0 %v8968_v0  ;;  %8194 = vmatprep.subr.bf16.mxu1 %v8968_v0 }
 0x222   :  { %v2278_v30 = vpop.f32.mrf.mxu0  ;;  %8151 = vmatmul.mubr.bf16.vlgmr.msra.gmra.mxu0 %v6514_v26  ;;  %v2386_v32 = vpop.f32.mrf.mxu1  ;;  %8171 = vmatmul.mubr.bf16.vlgmr.msra.gmra.mxu1 %v6539_v28  ;;  %v8854_v26 = vld [vmem:[%s10951_s1 + $0x9b0] sm:$0xff]  }
 0x223   :  { %v2284_v31 = vadd.f32 %v2278_v30, %v2176_v8  ;;  %8175 = vmatpush3.bf16.msra.mxu0 %v8820_v27  ;;  %8195 = vmatpush3.bf16.msra.mxu1 %v8821_v29  ;;  %v8855_v28 = vld [vmem:[%s10951_s1 + $0x9f0] sm:$0xff]  }
 0x224   :  { %v7912_v34 = vpop.f32.mrf.mxu0  ;;  %8176 = vmatprep.subr.bf16.mxu0 %v8968_v0  ;;  %v7932_v37 = vpop.f32.mrf.mxu1  ;;  %8196 = vmatprep.subr.bf16.mxu1 %v8968_v0 }
 0x225   :  { %v2392_v36 = vadd.f32 %v2386_v32, %v2284_v31  ;;  %8190 = vmatprep.mubr.msk.bf16.mxu0 %vm8969_vm0, %v8968_v0  ;;  %8210 = vmatprep.mubr.msk.bf16.mxu1 %vm8969_vm0, %v8968_v0  ;;  %v8858_v37 = vld [vmem:[%s10951_s1 + $0x9a0] sm:$0xff]  }
 0x226   :  { %v2281_v38 = vpop.f32.mrf.mxu0  ;;  %v2389_v39 = vpop.f32.mrf.mxu1 }
 0x227   :  { %8177 = vmatpush3.bf16.msra.mxu0 %v8822_v33  ;;  %8197 = vmatpush3.bf16.msra.mxu1 %v8823_v35  ;;  %v8856_v33 = vld [vmem:[%s10951_s1 + $0x9a8] sm:$0xff]   ;;  %v8859_v38 = vld [vmem:[%s10951_s1 + $0x9e0] sm:$0xff]   ;;  %v8860_v39 = vld [vmem:[%s10951_s1 + $0x998] sm:$0xff]  }
 0x228   :  { %v7913_v41 = vpop.f32.mrf.mxu0  ;;  %8178 = vmatprep.subr.bf16.mxu0 %v8968_v0  ;;  %v7933_v43 = vpop.f32.mrf.mxu1  ;;  %8198 = vmatprep.subr.bf16.mxu1 %v8968_v0  ;;  %v8857_v35 = vld [vmem:[%s10951_s1 + $0x9e8] sm:$0xff]  }
 0x229   :  { %v8862_v41 = vld [vmem:[%s10951_s1 + $0x990] sm:$0xff]   ;;  %v8864_v43 = vld [vmem:[%s10951_s1 + $0x988] sm:$0xff]  }
 0x22b   :  { %8179 = vmatpush3.bf16.msra.mxu0 %v8824_v40  ;;  %8199 = vmatpush3.bf16.msra.mxu1 %v8825_v42  ;;  %v8861_v40 = vld [vmem:[%s10951_s1 + $0x9d8] sm:$0xff]   ;;  %v8863_v42 = vld [vmem:[%s10951_s1 + $0x9d0] sm:$0xff]  }
 0x22c   :  { %8180 = vmatprep.subr.bf16.mxu0 %v8968_v0  ;;  %8200 = vmatprep.subr.bf16.mxu1 %v8968_v0 }
 0x22f   :  { %8181 = vmatpush3.bf16.msra.mxu0 %v8826_v44  ;;  %8201 = vmatpush3.bf16.msra.mxu1 %v8827_v45  ;;  %v8865_v44 = vld [vmem:[%s10951_s1 + $0x9c8] sm:$0xff]   ;;  %v8866_v45 = vld [vmem:[%s10951_s1 + $0x980] sm:$0xff]  }
 0x230   :  { %8182 = vmatprep.subr.bf16.mxu0 %v8968_v0  ;;  %8202 = vmatprep.subr.bf16.mxu1 %v8968_v0 }
 0x233   :  { %8183 = vmatpush3.bf16.msra.mxu0 %v8828_v46  ;;  %8203 = vmatpush3.bf16.msra.mxu1 %v8829_v47  ;;  %v8867_v46 = vld [vmem:[%s10951_s1 + $0x9c0] sm:$0xff]   ;;  %v6664_v47 = vld [vmem:[%s10952_s0 + $0x98] sm:$0xf] }
 0x234   :  { %8184 = vmatprep.subr.bf16.mxu0 %v8968_v0  ;;  %8204 = vmatprep.subr.bf16.mxu1 %v8968_v0 }
 0x237   :  { %8185 = vmatpush3.bf16.msra.mxu0 %v8830_v48  ;;  %8205 = vmatpush3.bf16.msra.mxu1 %v8831_v49  ;;  %v8868_v48 = vld [vmem:[%s10951_s1 + $0xa38] sm:$0xff]  }
 0x238   :  { %8186 = vmatprep.subr.bf16.mxu0 %v8968_v0  ;;  %8206 = vmatprep.subr.bf16.mxu1 %v8968_v0  ;;  %v6689_v49 = vld [vmem:[%s10952_s0 + $0x9c] sm:$0xf] }
 0x23b   :  { %8187 = vmatpush3.bf16.msra.mxu0 %v8832_v50  ;;  %8207 = vmatpush3.bf16.msra.mxu1 %v8833_v51  ;;  %v8869_v50 = vld [vmem:[%s10951_s1 + $0xa78] sm:$0xff]  }
 0x23c   :  { %8188 = vmatprep.subr.bf16.mxu0 %v8968_v0  ;;  %8208 = vmatprep.subr.bf16.mxu1 %v8968_v0 }
 0x23f   :  { %8189 = vmatpush3.bf16.msra.mxu0 %v8834_v52  ;;  %8209 = vmatpush3.bf16.msra.mxu1 %v8835_v53 }
 0x240   :  { %8214 = vmatprep.subr.bf16.mxu0 %v8968_v0  ;;  %8234 = vmatprep.subr.bf16.mxu1 %v8968_v0 }
 0x242   :  { %v2494_v58 = vpop.f32.mrf.mxu0  ;;  %8191 = vmatmul.mubr.bf16.vlgmr.msra.gmra.mxu0 %v6564_v54  ;;  %v2602_v60 = vpop.f32.mrf.mxu1  ;;  %8211 = vmatmul.mubr.bf16.vlgmr.msra.gmra.mxu1 %v6589_v56  ;;  %v8870_v54 = vld [vmem:[%s10951_s1 + $0xa30] sm:$0xff]  }
 0x243   :  { %v2500_v59 = vadd.f32 %v2494_v58, %v2392_v36  ;;  %8215 = vmatpush3.bf16.msra.mxu0 %v8836_v55  ;;  %8235 = vmatpush3.bf16.msra.mxu1 %v8837_v57  ;;  %v8871_v56 = vld [vmem:[%s10951_s1 + $0xa70] sm:$0xff]  }
 0x244   :  { %v7952_v62 = vpop.f32.mrf.mxu0  ;;  %8216 = vmatprep.subr.bf16.mxu0 %v8968_v0  ;;  %v7972_v2 = vpop.f32.mrf.mxu1  ;;  %8236 = vmatprep.subr.bf16.mxu1 %v8968_v0 }
 0x245   :  { %v2608_v1 = vadd.f32 %v2602_v60, %v2500_v59  ;;  %8230 = vmatprep.mubr.msk.bf16.mxu0 %vm8969_vm0, %v8968_v0  ;;  %8250 = vmatprep.mubr.msk.bf16.mxu1 %vm8969_vm0, %v8968_v0  ;;  %v8874_v2 = vld [vmem:[%s10951_s1 + $0xa20] sm:$0xff]  }
 0x246   :  { %v2497_v3 = vpop.f32.mrf.mxu0  ;;  %v2605_v4 = vpop.f32.mrf.mxu1 }
 0x247   :  { %8217 = vmatpush3.bf16.msra.mxu0 %v8838_v61  ;;  %8237 = vmatpush3.bf16.msra.mxu1 %v8839_v63  ;;  %v8872_v61 = vld [vmem:[%s10951_s1 + $0xa28] sm:$0xff]   ;;  %v8875_v3 = vld [vmem:[%s10951_s1 + $0xa60] sm:$0xff]   ;;  %v8876_v4 = vld [vmem:[%s10951_s1 + $0xa18] sm:$0xff]  }
 0x248   :  { %v7953_v6 = vpop.f32.mrf.mxu0  ;;  %8218 = vmatprep.subr.bf16.mxu0 %v8968_v0  ;;  %v7973_v8 = vpop.f32.mrf.mxu1  ;;  %8238 = vmatprep.subr.bf16.mxu1 %v8968_v0  ;;  %v8873_v63 = vld [vmem:[%s10951_s1 + $0xa68] sm:$0xff]  }
 0x249   :  { %v8878_v6 = vld [vmem:[%s10951_s1 + $0xa10] sm:$0xff]   ;;  %v8880_v8 = vld [vmem:[%s10951_s1 + $0xa08] sm:$0xff]  }
 0x24b   :  { %8219 = vmatpush3.bf16.msra.mxu0 %v8840_v5  ;;  %8239 = vmatpush3.bf16.msra.mxu1 %v8841_v7  ;;  %v8877_v5 = vld [vmem:[%s10951_s1 + $0xa58] sm:$0xff]   ;;  %v8879_v7 = vld [vmem:[%s10951_s1 + $0xa50] sm:$0xff]  }
 0x24c   :  { %8220 = vmatprep.subr.bf16.mxu0 %v8968_v0  ;;  %8240 = vmatprep.subr.bf16.mxu1 %v8968_v0 }
 0x24f   :  { %8221 = vmatpush3.bf16.msra.mxu0 %v8842_v9  ;;  %8241 = vmatpush3.bf16.msra.mxu1 %v8843_v10  ;;  %v8881_v9 = vld [vmem:[%s10951_s1 + $0xa48] sm:$0xff]   ;;  %v8882_v10 = vld [vmem:[%s10951_s1 + $0xa00] sm:$0xff]  }
 0x250   :  { %8222 = vmatprep.subr.bf16.mxu0 %v8968_v0  ;;  %8242 = vmatprep.subr.bf16.mxu1 %v8968_v0 }
 0x253   :  { %8223 = vmatpush3.bf16.msra.mxu0 %v8844_v11  ;;  %8243 = vmatpush3.bf16.msra.mxu1 %v8845_v12  ;;  %v8883_v11 = vld [vmem:[%s10951_s1 + $0xa40] sm:$0xff]  }
 0x254   :  { %8224 = vmatprep.subr.bf16.mxu0 %v8968_v0  ;;  %8244 = vmatprep.subr.bf16.mxu1 %v8968_v0  ;;  %v6714_v12 = vld [vmem:[%s10952_s0 + $0xa0] sm:$0xf] }
 0x257   :  { %8225 = vmatpush3.bf16.msra.mxu0 %v8846_v13  ;;  %8245 = vmatpush3.bf16.msra.mxu1 %v8847_v14  ;;  %v8884_v13 = vld [vmem:[%s10951_s1 + $0xab8] sm:$0xff]   ;;  %v6739_v14 = vld [vmem:[%s10952_s0 + $0xa4] sm:$0xf] }
 0x258   :  { %8226 = vmatprep.subr.bf16.mxu0 %v8968_v0  ;;  %8246 = vmatprep.subr.bf16.mxu1 %v8968_v0 }
 0x25b   :  { %8227 = vmatpush3.bf16.msra.mxu0 %v8848_v15  ;;  %8247 = vmatpush3.bf16.msra.mxu1 %v8849_v16  ;;  %v8885_v15 = vld [vmem:[%s10951_s1 + $0xaf8] sm:$0xff]  }
 0x25c   :  { %8228 = vmatprep.subr.bf16.mxu0 %v8968_v0  ;;  %8248 = vmatprep.subr.bf16.mxu1 %v8968_v0 }
 0x25f   :  { %8229 = vmatpush3.bf16.msra.mxu0 %v8850_v17  ;;  %8249 = vmatpush3.bf16.msra.mxu1 %v8851_v18 }
 0x260   :  { %8254 = vmatprep.subr.bf16.mxu0 %v8968_v0  ;;  %8274 = vmatprep.subr.bf16.mxu1 %v8968_v0 }
 0x262   :  { %v2710_v23 = vpop.f32.mrf.mxu0  ;;  %8231 = vmatmul.mubr.bf16.vlgmr.msra.gmra.mxu0 %v6614_v19  ;;  %v2818_v25 = vpop.f32.mrf.mxu1  ;;  %8251 = vmatmul.mubr.bf16.vlgmr.msra.gmra.mxu1 %v6639_v21  ;;  %v8886_v19 = vld [vmem:[%s10951_s1 + $0xab0] sm:$0xff]  }
 0x263   :  { %v2716_v24 = vadd.f32 %v2710_v23, %v2608_v1  ;;  %8255 = vmatpush3.bf16.msra.mxu0 %v8852_v20  ;;  %8275 = vmatpush3.bf16.msra.mxu1 %v8853_v22  ;;  %v8887_v21 = vld [vmem:[%s10951_s1 + $0xaf0] sm:$0xff]  }
 0x264   :  { %v7992_v27 = vpop.f32.mrf.mxu0  ;;  %8256 = vmatprep.subr.bf16.mxu0 %v8968_v0  ;;  %v8012_v30 = vpop.f32.mrf.mxu1  ;;  %8276 = vmatprep.subr.bf16.mxu1 %v8968_v0 }
 0x265   :  { %v2824_v29 = vadd.f32 %v2818_v25, %v2716_v24  ;;  %8270 = vmatprep.mubr.msk.bf16.mxu0 %vm8969_vm0, %v8968_v0  ;;  %8290 = vmatprep.mubr.msk.bf16.mxu1 %vm8969_vm0, %v8968_v0  ;;  %v8890_v30 = vld [vmem:[%s10951_s1 + $0xaa0] sm:$0xff]  }
 0x266   :  { %v2713_v31 = vpop.f32.mrf.mxu0  ;;  %v2821_v32 = vpop.f32.mrf.mxu1 }
 0x267   :  { %8257 = vmatpush3.bf16.msra.mxu0 %v8854_v26  ;;  %8277 = vmatpush3.bf16.msra.mxu1 %v8855_v28  ;;  %v8888_v26 = vld [vmem:[%s10951_s1 + $0xaa8] sm:$0xff]   ;;  %v8891_v31 = vld [vmem:[%s10951_s1 + $0xae0] sm:$0xff]   ;;  %v8892_v32 = vld [vmem:[%s10951_s1 + $0xa98] sm:$0xff]  }
 0x268   :  { %v7993_v34 = vpop.f32.mrf.mxu0  ;;  %8258 = vmatprep.subr.bf16.mxu0 %v8968_v0  ;;  %v8013_v36 = vpop.f32.mrf.mxu1  ;;  %8278 = vmatprep.subr.bf16.mxu1 %v8968_v0  ;;  %v8889_v28 = vld [vmem:[%s10951_s1 + $0xae8] sm:$0xff]  }
 0x269   :  { %v8894_v34 = vld [vmem:[%s10951_s1 + $0xa90] sm:$0xff]   ;;  %v8896_v36 = vld [vmem:[%s10951_s1 + $0xa88] sm:$0xff]  }
 0x26b   :  { %8259 = vmatpush3.bf16.msra.mxu0 %v8856_v33  ;;  %8279 = vmatpush3.bf16.msra.mxu1 %v8857_v35  ;;  %v8893_v33 = vld [vmem:[%s10951_s1 + $0xad8] sm:$0xff]   ;;  %v8895_v35 = vld [vmem:[%s10951_s1 + $0xad0] sm:$0xff]  }
 0x26c   :  { %8260 = vmatprep.subr.bf16.mxu0 %v8968_v0  ;;  %8280 = vmatprep.subr.bf16.mxu1 %v8968_v0 }
 0x26f   :  { %8261 = vmatpush3.bf16.msra.mxu0 %v8858_v37  ;;  %8281 = vmatpush3.bf16.msra.mxu1 %v8859_v38  ;;  %v8897_v37 = vld [vmem:[%s10951_s1 + $0xac8] sm:$0xff]   ;;  %v8898_v38 = vld [vmem:[%s10951_s1 + $0xa80] sm:$0xff]  }
 0x270   :  { %8262 = vmatprep.subr.bf16.mxu0 %v8968_v0  ;;  %8282 = vmatprep.subr.bf16.mxu1 %v8968_v0 }
 0x273   :  { %8263 = vmatpush3.bf16.msra.mxu0 %v8860_v39  ;;  %8283 = vmatpush3.bf16.msra.mxu1 %v8861_v40  ;;  %v8899_v39 = vld [vmem:[%s10951_s1 + $0xac0] sm:$0xff]   ;;  %v6764_v40 = vld [vmem:[%s10952_s0 + $0xa8] sm:$0xf] }
 0x274   :  { %8264 = vmatprep.subr.bf16.mxu0 %v8968_v0  ;;  %8284 = vmatprep.subr.bf16.mxu1 %v8968_v0 }
 0x277   :  { %8265 = vmatpush3.bf16.msra.mxu0 %v8862_v41  ;;  %8285 = vmatpush3.bf16.msra.mxu1 %v8863_v42  ;;  %v8900_v41 = vld [vmem:[%s10951_s1 + $0xb38] sm:$0xff]   ;;  %v6789_v42 = vld [vmem:[%s10952_s0 + $0xac] sm:$0xf] }
 0x278   :  { %8266 = vmatprep.subr.bf16.mxu0 %v8968_v0  ;;  %8286 = vmatprep.subr.bf16.mxu1 %v8968_v0 }
 0x27b   :  { %8267 = vmatpush3.bf16.msra.mxu0 %v8864_v43  ;;  %8287 = vmatpush3.bf16.msra.mxu1 %v8865_v44  ;;  %v8901_v43 = vld [vmem:[%s10951_s1 + $0xb78] sm:$0xff]  }
 0x27c   :  { %8268 = vmatprep.subr.bf16.mxu0 %v8968_v0  ;;  %8288 = vmatprep.subr.bf16.mxu1 %v8968_v0 }
 0x27f   :  { %8269 = vmatpush3.bf16.msra.mxu0 %v8866_v45  ;;  %8289 = vmatpush3.bf16.msra.mxu1 %v8867_v46 }
 0x280   :  { %8294 = vmatprep.subr.bf16.mxu0 %v8968_v0  ;;  %8314 = vmatprep.subr.bf16.mxu1 %v8968_v0 }
 0x282   :  { %v2926_v51 = vpop.f32.mrf.mxu0  ;;  %8271 = vmatmul.mubr.bf16.vlgmr.msra.gmra.mxu0 %v6664_v47  ;;  %v3034_v53 = vpop.f32.mrf.mxu1  ;;  %8291 = vmatmul.mubr.bf16.vlgmr.msra.gmra.mxu1 %v6689_v49  ;;  %v8902_v47 = vld [vmem:[%s10951_s1 + $0xb30] sm:$0xff]  }
 0x283   :  { %v2932_v52 = vadd.f32 %v2926_v51, %v2824_v29  ;;  %8295 = vmatpush3.bf16.msra.mxu0 %v8868_v48  ;;  %8315 = vmatpush3.bf16.msra.mxu1 %v8869_v50  ;;  %v8903_v49 = vld [vmem:[%s10951_s1 + $0xb70] sm:$0xff]  }
 0x284   :  { %v8032_v55 = vpop.f32.mrf.mxu0  ;;  %8296 = vmatprep.subr.bf16.mxu0 %v8968_v0  ;;  %v8052_v58 = vpop.f32.mrf.mxu1  ;;  %8316 = vmatprep.subr.bf16.mxu1 %v8968_v0 }
 0x285   :  { %v3040_v57 = vadd.f32 %v3034_v53, %v2932_v52  ;;  %8310 = vmatprep.mubr.msk.bf16.mxu0 %vm8969_vm0, %v8968_v0  ;;  %8330 = vmatprep.mubr.msk.bf16.mxu1 %vm8969_vm0, %v8968_v0  ;;  %v8906_v58 = vld [vmem:[%s10951_s1 + $0xb20] sm:$0xff]  }
 0x286   :  { %v2929_v59 = vpop.f32.mrf.mxu0  ;;  %v3037_v60 = vpop.f32.mrf.mxu1 }
 0x287   :  { %8297 = vmatpush3.bf16.msra.mxu0 %v8870_v54  ;;  %8317 = vmatpush3.bf16.msra.mxu1 %v8871_v56  ;;  %v8904_v54 = vld [vmem:[%s10951_s1 + $0xb28] sm:$0xff]   ;;  %v8907_v59 = vld [vmem:[%s10951_s1 + $0xb60] sm:$0xff]   ;;  %v8908_v60 = vld [vmem:[%s10951_s1 + $0xb18] sm:$0xff]  }
 0x288   :  { %v8033_v62 = vpop.f32.mrf.mxu0  ;;  %8298 = vmatprep.subr.bf16.mxu0 %v8968_v0  ;;  %v8053_v1 = vpop.f32.mrf.mxu1  ;;  %8318 = vmatprep.subr.bf16.mxu1 %v8968_v0  ;;  %v8905_v56 = vld [vmem:[%s10951_s1 + $0xb68] sm:$0xff]  }
 0x289   :  { %v8910_v62 = vld [vmem:[%s10951_s1 + $0xb10] sm:$0xff]   ;;  %v8912_v1 = vld [vmem:[%s10951_s1 + $0xb08] sm:$0xff]  }
 0x28b   :  { %8299 = vmatpush3.bf16.msra.mxu0 %v8872_v61  ;;  %8319 = vmatpush3.bf16.msra.mxu1 %v8873_v63  ;;  %v8909_v61 = vld [vmem:[%s10951_s1 + $0xb58] sm:$0xff]   ;;  %v8911_v63 = vld [vmem:[%s10951_s1 + $0xb50] sm:$0xff]  }
 0x28c   :  { %8300 = vmatprep.subr.bf16.mxu0 %v8968_v0  ;;  %8320 = vmatprep.subr.bf16.mxu1 %v8968_v0 }
 0x28f   :  { %8301 = vmatpush3.bf16.msra.mxu0 %v8874_v2  ;;  %8321 = vmatpush3.bf16.msra.mxu1 %v8875_v3  ;;  %v8913_v2 = vld [vmem:[%s10951_s1 + $0xb48] sm:$0xff]   ;;  %v8914_v3 = vld [vmem:[%s10951_s1 + $0xb00] sm:$0xff]  }
 0x290   :  { %8302 = vmatprep.subr.bf16.mxu0 %v8968_v0  ;;  %8322 = vmatprep.subr.bf16.mxu1 %v8968_v0 }
 0x293   :  { %8303 = vmatpush3.bf16.msra.mxu0 %v8876_v4  ;;  %8323 = vmatpush3.bf16.msra.mxu1 %v8877_v5  ;;  %v8915_v4 = vld [vmem:[%s10951_s1 + $0xb40] sm:$0xff]   ;;  %v6814_v5 = vld [vmem:[%s10952_s0 + $0xb0] sm:$0xf] }
 0x294   :  { %8304 = vmatprep.subr.bf16.mxu0 %v8968_v0  ;;  %8324 = vmatprep.subr.bf16.mxu1 %v8968_v0 }
 0x297   :  { %8305 = vmatpush3.bf16.msra.mxu0 %v8878_v6  ;;  %8325 = vmatpush3.bf16.msra.mxu1 %v8879_v7  ;;  %v8916_v6 = vld [vmem:[%s10951_s1 + $0xbb8] sm:$0xff]   ;;  %v6839_v7 = vld [vmem:[%s10952_s0 + $0xb4] sm:$0xf] }
 0x298   :  { %8306 = vmatprep.subr.bf16.mxu0 %v8968_v0  ;;  %8326 = vmatprep.subr.bf16.mxu1 %v8968_v0 }
 0x29b   :  { %8307 = vmatpush3.bf16.msra.mxu0 %v8880_v8  ;;  %8327 = vmatpush3.bf16.msra.mxu1 %v8881_v9  ;;  %v8917_v8 = vld [vmem:[%s10951_s1 + $0xbf8] sm:$0xff]  }
 0x29c   :  { %8308 = vmatprep.subr.bf16.mxu0 %v8968_v0  ;;  %8328 = vmatprep.subr.bf16.mxu1 %v8968_v0 }
 0x29f   :  { %8309 = vmatpush3.bf16.msra.mxu0 %v8882_v10  ;;  %8329 = vmatpush3.bf16.msra.mxu1 %v8883_v11 }
 0x2a0   :  { %8334 = vmatprep.subr.bf16.mxu0 %v8968_v0  ;;  %8354 = vmatprep.subr.bf16.mxu1 %v8968_v0 }
 0x2a2   :  { %v3142_v16 = vpop.f32.mrf.mxu0  ;;  %8311 = vmatmul.mubr.bf16.vlgmr.msra.gmra.mxu0 %v6714_v12  ;;  %v3250_v18 = vpop.f32.mrf.mxu1  ;;  %8331 = vmatmul.mubr.bf16.vlgmr.msra.gmra.mxu1 %v6739_v14  ;;  %v8918_v12 = vld [vmem:[%s10951_s1 + $0xbb0] sm:$0xff]  }
 0x2a3   :  { %v3148_v17 = vadd.f32 %v3142_v16, %v3040_v57  ;;  %8335 = vmatpush3.bf16.msra.mxu0 %v8884_v13  ;;  %8355 = vmatpush3.bf16.msra.mxu1 %v8885_v15  ;;  %v8919_v14 = vld [vmem:[%s10951_s1 + $0xbf0] sm:$0xff]  }
 0x2a4   :  { %v8072_v20 = vpop.f32.mrf.mxu0  ;;  %8336 = vmatprep.subr.bf16.mxu0 %v8968_v0  ;;  %v8092_v23 = vpop.f32.mrf.mxu1  ;;  %8356 = vmatprep.subr.bf16.mxu1 %v8968_v0 }
 0x2a5   :  { %v3256_v22 = vadd.f32 %v3250_v18, %v3148_v17  ;;  %8350 = vmatprep.mubr.msk.bf16.mxu0 %vm8969_vm0, %v8968_v0  ;;  %8370 = vmatprep.mubr.msk.bf16.mxu1 %vm8969_vm0, %v8968_v0  ;;  %v8922_v23 = vld [vmem:[%s10951_s1 + $0xba0] sm:$0xff]  }
 0x2a6   :  { %v3145_v24 = vpop.f32.mrf.mxu0  ;;  %v3253_v25 = vpop.f32.mrf.mxu1 }
 0x2a7   :  { %8337 = vmatpush3.bf16.msra.mxu0 %v8886_v19  ;;  %8357 = vmatpush3.bf16.msra.mxu1 %v8887_v21  ;;  %v8920_v19 = vld [vmem:[%s10951_s1 + $0xba8] sm:$0xff]   ;;  %v8923_v24 = vld [vmem:[%s10951_s1 + $0xbe0] sm:$0xff]   ;;  %v8924_v25 = vld [vmem:[%s10951_s1 + $0xb98] sm:$0xff]  }
 0x2a8   :  { %v8073_v27 = vpop.f32.mrf.mxu0  ;;  %8338 = vmatprep.subr.bf16.mxu0 %v8968_v0  ;;  %v8093_v29 = vpop.f32.mrf.mxu1  ;;  %8358 = vmatprep.subr.bf16.mxu1 %v8968_v0  ;;  %v8921_v21 = vld [vmem:[%s10951_s1 + $0xbe8] sm:$0xff]  }
 0x2a9   :  { %v8926_v27 = vld [vmem:[%s10951_s1 + $0xb90] sm:$0xff]   ;;  %v8928_v29 = vld [vmem:[%s10951_s1 + $0xb88] sm:$0xff]  }
 0x2ab   :  { %8339 = vmatpush3.bf16.msra.mxu0 %v8888_v26  ;;  %8359 = vmatpush3.bf16.msra.mxu1 %v8889_v28  ;;  %v8925_v26 = vld [vmem:[%s10951_s1 + $0xbd8] sm:$0xff]   ;;  %v8927_v28 = vld [vmem:[%s10951_s1 + $0xbd0] sm:$0xff]  }
 0x2ac   :  { %8340 = vmatprep.subr.bf16.mxu0 %v8968_v0  ;;  %8360 = vmatprep.subr.bf16.mxu1 %v8968_v0 }
 0x2af   :  { %8341 = vmatpush3.bf16.msra.mxu0 %v8890_v30  ;;  %8361 = vmatpush3.bf16.msra.mxu1 %v8891_v31  ;;  %v8929_v30 = vld [vmem:[%s10951_s1 + $0xbc8] sm:$0xff]   ;;  %v8930_v31 = vld [vmem:[%s10951_s1 + $0xb80] sm:$0xff]  }
 0x2b0   :  { %8342 = vmatprep.subr.bf16.mxu0 %v8968_v0  ;;  %8362 = vmatprep.subr.bf16.mxu1 %v8968_v0 }
 0x2b3   :  { %8343 = vmatpush3.bf16.msra.mxu0 %v8892_v32  ;;  %8363 = vmatpush3.bf16.msra.mxu1 %v8893_v33  ;;  %v8931_v32 = vld [vmem:[%s10951_s1 + $0xbc0] sm:$0xff]   ;;  %v6864_v33 = vld [vmem:[%s10952_s0 + $0xb8] sm:$0xf] }
 0x2b4   :  { %8344 = vmatprep.subr.bf16.mxu0 %v8968_v0  ;;  %8364 = vmatprep.subr.bf16.mxu1 %v8968_v0 }
 0x2b7   :  { %8345 = vmatpush3.bf16.msra.mxu0 %v8894_v34  ;;  %8365 = vmatpush3.bf16.msra.mxu1 %v8895_v35  ;;  %v8932_v34 = vld [vmem:[%s10951_s1 + $0xc38] sm:$0xff]  }
 0x2b8   :  { %8346 = vmatprep.subr.bf16.mxu0 %v8968_v0  ;;  %8366 = vmatprep.subr.bf16.mxu1 %v8968_v0  ;;  %v6889_v35 = vld [vmem:[%s10952_s0 + $0xbc] sm:$0xf] }
 0x2bb   :  { %8347 = vmatpush3.bf16.msra.mxu0 %v8896_v36  ;;  %8367 = vmatpush3.bf16.msra.mxu1 %v8897_v37  ;;  %v8933_v36 = vld [vmem:[%s10951_s1 + $0xc78] sm:$0xff]  }
 0x2bc   :  { %8348 = vmatprep.subr.bf16.mxu0 %v8968_v0  ;;  %8368 = vmatprep.subr.bf16.mxu1 %v8968_v0 }
 0x2bf   :  { %8349 = vmatpush3.bf16.msra.mxu0 %v8898_v38  ;;  %8369 = vmatpush3.bf16.msra.mxu1 %v8899_v39 }
 0x2c0   :  { %8374 = vmatprep.subr.bf16.mxu0 %v8968_v0  ;;  %8394 = vmatprep.subr.bf16.mxu1 %v8968_v0 }
 0x2c2   :  { %v3358_v44 = vpop.f32.mrf.mxu0  ;;  %8351 = vmatmul.mubr.bf16.vlgmr.msra.gmra.mxu0 %v6764_v40  ;;  %v3466_v46 = vpop.f32.mrf.mxu1  ;;  %8371 = vmatmul.mubr.bf16.vlgmr.msra.gmra.mxu1 %v6789_v42  ;;  %v8934_v40 = vld [vmem:[%s10951_s1 + $0xc30] sm:$0xff]  }
 0x2c3   :  { %v3364_v45 = vadd.f32 %v3358_v44, %v3256_v22  ;;  %8375 = vmatpush3.bf16.msra.mxu0 %v8900_v41  ;;  %8395 = vmatpush3.bf16.msra.mxu1 %v8901_v43  ;;  %v8935_v42 = vld [vmem:[%s10951_s1 + $0xc70] sm:$0xff]  }
 0x2c4   :  { %v8112_v48 = vpop.f32.mrf.mxu0  ;;  %8376 = vmatprep.subr.bf16.mxu0 %v8968_v0  ;;  %v8132_v51 = vpop.f32.mrf.mxu1  ;;  %8396 = vmatprep.subr.bf16.mxu1 %v8968_v0 }
 0x2c5   :  { %v3472_v50 = vadd.f32 %v3466_v46, %v3364_v45  ;;  %8390 = vmatprep.mubr.msk.bf16.mxu0 %vm8969_vm0, %v8968_v0  ;;  %8410 = vmatprep.mubr.msk.bf16.mxu1 %vm8969_vm0, %v8968_v0  ;;  %v8938_v51 = vld [vmem:[%s10951_s1 + $0xc20] sm:$0xff]  }
 0x2c6   :  { %v3361_v52 = vpop.f32.mrf.mxu0  ;;  %v3469_v53 = vpop.f32.mrf.mxu1 }
 0x2c7   :  { %8377 = vmatpush3.bf16.msra.mxu0 %v8902_v47  ;;  %8397 = vmatpush3.bf16.msra.mxu1 %v8903_v49  ;;  %v8936_v47 = vld [vmem:[%s10951_s1 + $0xc28] sm:$0xff]   ;;  %v8939_v52 = vld [vmem:[%s10951_s1 + $0xc60] sm:$0xff]   ;;  %v8940_v53 = vld [vmem:[%s10951_s1 + $0xc18] sm:$0xff]  }
 0x2c8   :  { %v8113_v55 = vpop.f32.mrf.mxu0  ;;  %8378 = vmatprep.subr.bf16.mxu0 %v8968_v0  ;;  %v8133_v57 = vpop.f32.mrf.mxu1  ;;  %8398 = vmatprep.subr.bf16.mxu1 %v8968_v0  ;;  %v8937_v49 = vld [vmem:[%s10951_s1 + $0xc68] sm:$0xff]  }
 0x2c9   :  { %v8942_v55 = vld [vmem:[%s10951_s1 + $0xc10] sm:$0xff]   ;;  %v8944_v57 = vld [vmem:[%s10951_s1 + $0xc08] sm:$0xff]  }
 0x2cb   :  { %8379 = vmatpush3.bf16.msra.mxu0 %v8904_v54  ;;  %8399 = vmatpush3.bf16.msra.mxu1 %v8905_v56  ;;  %v8941_v54 = vld [vmem:[%s10951_s1 + $0xc58] sm:$0xff]   ;;  %v8943_v56 = vld [vmem:[%s10951_s1 + $0xc50] sm:$0xff]  }
 0x2cc   :  { %8380 = vmatprep.subr.bf16.mxu0 %v8968_v0  ;;  %8400 = vmatprep.subr.bf16.mxu1 %v8968_v0 }
 0x2cf   :  { %8381 = vmatpush3.bf16.msra.mxu0 %v8906_v58  ;;  %8401 = vmatpush3.bf16.msra.mxu1 %v8907_v59  ;;  %v8945_v58 = vld [vmem:[%s10951_s1 + $0xc48] sm:$0xff]   ;;  %v8946_v59 = vld [vmem:[%s10951_s1 + $0xc00] sm:$0xff]  }
 0x2d0   :  { %8382 = vmatprep.subr.bf16.mxu0 %v8968_v0  ;;  %8402 = vmatprep.subr.bf16.mxu1 %v8968_v0 }
 0x2d3   :  { %8383 = vmatpush3.bf16.msra.mxu0 %v8908_v60  ;;  %8403 = vmatpush3.bf16.msra.mxu1 %v8909_v61  ;;  %v8947_v60 = vld [vmem:[%s10951_s1 + $0xc40] sm:$0xff]  }
 0x2d4   :  { %8384 = vmatprep.subr.bf16.mxu0 %v8968_v0  ;;  %8404 = vmatprep.subr.bf16.mxu1 %v8968_v0  ;;  %v6914_v61 = vld [vmem:[%s10952_s0 + $0xc0] sm:$0xf] }
 0x2d7   :  { %8385 = vmatpush3.bf16.msra.mxu0 %v8910_v62  ;;  %8405 = vmatpush3.bf16.msra.mxu1 %v8911_v63  ;;  %v8948_v62 = vld [vmem:[%s10951_s1 + $0xcb8] sm:$0xff]   ;;  %v6939_v63 = vld [vmem:[%s10952_s0 + $0xc4] sm:$0xf] }
 0x2d8   :  { %8386 = vmatprep.subr.bf16.mxu0 %v8968_v0  ;;  %8406 = vmatprep.subr.bf16.mxu1 %v8968_v0 }
 0x2db   :  { %8387 = vmatpush3.bf16.msra.mxu0 %v8912_v1  ;;  %8407 = vmatpush3.bf16.msra.mxu1 %v8913_v2  ;;  %v8949_v1 = vld [vmem:[%s10951_s1 + $0xcf8] sm:$0xff]  }
 0x2dc   :  { %8388 = vmatprep.subr.bf16.mxu0 %v8968_v0  ;;  %8408 = vmatprep.subr.bf16.mxu1 %v8968_v0 }
 0x2df   :  { %8389 = vmatpush3.bf16.msra.mxu0 %v8914_v3  ;;  %8409 = vmatpush3.bf16.msra.mxu1 %v8915_v4 }
 0x2e0   :  { %8414 = vmatprep.subr.bf16.mxu0 %v8968_v0  ;;  %8434 = vmatprep.subr.bf16.mxu1 %v8968_v0 }
 0x2e2   :  { %v3574_v9 = vpop.f32.mrf.mxu0  ;;  %8391 = vmatmul.mubr.bf16.vlgmr.msra.gmra.mxu0 %v6814_v5  ;;  %v3682_v11 = vpop.f32.mrf.mxu1  ;;  %8411 = vmatmul.mubr.bf16.vlgmr.msra.gmra.mxu1 %v6839_v7  ;;  %v8950_v5 = vld [vmem:[%s10951_s1 + $0xcb0] sm:$0xff]  }
 0x2e3   :  { %v3580_v10 = vadd.f32 %v3574_v9, %v3472_v50  ;;  %8415 = vmatpush3.bf16.msra.mxu0 %v8916_v6  ;;  %8435 = vmatpush3.bf16.msra.mxu1 %v8917_v8  ;;  %v8951_v7 = vld [vmem:[%s10951_s1 + $0xcf0] sm:$0xff]  }
 0x2e4   :  { %v8152_v13 = vpop.f32.mrf.mxu0  ;;  %8416 = vmatprep.subr.bf16.mxu0 %v8968_v0  ;;  %v8172_v16 = vpop.f32.mrf.mxu1  ;;  %8436 = vmatprep.subr.bf16.mxu1 %v8968_v0 }
 0x2e5   :  { %v3688_v15 = vadd.f32 %v3682_v11, %v3580_v10  ;;  %8430 = vmatprep.mubr.msk.bf16.mxu0 %vm8969_vm0, %v8968_v0  ;;  %8450 = vmatprep.mubr.msk.bf16.mxu1 %vm8969_vm0, %v8968_v0  ;;  %v8954_v16 = vld [vmem:[%s10951_s1 + $0xca0] sm:$0xff]  }
 0x2e6   :  { %v3577_v17 = vpop.f32.mrf.mxu0  ;;  %v3685_v18 = vpop.f32.mrf.mxu1 }
 0x2e7   :  { %8417 = vmatpush3.bf16.msra.mxu0 %v8918_v12  ;;  %8437 = vmatpush3.bf16.msra.mxu1 %v8919_v14  ;;  %v8952_v12 = vld [vmem:[%s10951_s1 + $0xca8] sm:$0xff]   ;;  %v8955_v17 = vld [vmem:[%s10951_s1 + $0xce0] sm:$0xff]   ;;  %v8956_v18 = vld [vmem:[%s10951_s1 + $0xc98] sm:$0xff]  }
 0x2e8   :  { %v8153_v20 = vpop.f32.mrf.mxu0  ;;  %8418 = vmatprep.subr.bf16.mxu0 %v8968_v0  ;;  %v8173_v22 = vpop.f32.mrf.mxu1  ;;  %8438 = vmatprep.subr.bf16.mxu1 %v8968_v0  ;;  %v8953_v14 = vld [vmem:[%s10951_s1 + $0xce8] sm:$0xff]  }
 0x2e9   :  { %v8958_v20 = vld [vmem:[%s10951_s1 + $0xc90] sm:$0xff]   ;;  %v8960_v22 = vld [vmem:[%s10951_s1 + $0xc88] sm:$0xff]  }
 0x2eb   :  { %8419 = vmatpush3.bf16.msra.mxu0 %v8920_v19  ;;  %8439 = vmatpush3.bf16.msra.mxu1 %v8921_v21  ;;  %v8957_v19 = vld [vmem:[%s10951_s1 + $0xcd8] sm:$0xff]   ;;  %v8959_v21 = vld [vmem:[%s10951_s1 + $0xcd0] sm:$0xff]  }
 0x2ec   :  { %8420 = vmatprep.subr.bf16.mxu0 %v8968_v0  ;;  %8440 = vmatprep.subr.bf16.mxu1 %v8968_v0 }
 0x2ef   :  { %8421 = vmatpush3.bf16.msra.mxu0 %v8922_v23  ;;  %8441 = vmatpush3.bf16.msra.mxu1 %v8923_v24  ;;  %v8961_v23 = vld [vmem:[%s10951_s1 + $0xcc8] sm:$0xff]   ;;  %v8962_v24 = vld [vmem:[%s10951_s1 + $0xc80] sm:$0xff]  }
 0x2f0   :  { %8422 = vmatprep.subr.bf16.mxu0 %v8968_v0  ;;  %8442 = vmatprep.subr.bf16.mxu1 %v8968_v0 }
 0x2f3   :  { %8423 = vmatpush3.bf16.msra.mxu0 %v8924_v25  ;;  %8443 = vmatpush3.bf16.msra.mxu1 %v8925_v26  ;;  %v8963_v25 = vld [vmem:[%s10951_s1 + $0xcc0] sm:$0xff]   ;;  %v6964_v26 = vld [vmem:[%s10952_s0 + $0xc8] sm:$0xf] }
 0x2f4   :  { %8424 = vmatprep.subr.bf16.mxu0 %v8968_v0  ;;  %8444 = vmatprep.subr.bf16.mxu1 %v8968_v0 }
 0x2f7   :  { %8425 = vmatpush3.bf16.msra.mxu0 %v8926_v27  ;;  %8445 = vmatpush3.bf16.msra.mxu1 %v8927_v28  ;;  %v6989_v27 = vld [vmem:[%s10952_s0 + $0xcc] sm:$0xf] }
 0x2f8   :  { %8426 = vmatprep.subr.bf16.mxu0 %v8968_v0  ;;  %8446 = vmatprep.subr.bf16.mxu1 %v8968_v0 }
 0x2fb   :  { %8427 = vmatpush3.bf16.msra.mxu0 %v8928_v29  ;;  %8447 = vmatpush3.bf16.msra.mxu1 %v8929_v30 }
 0x2fc   :  { %8428 = vmatprep.subr.bf16.mxu0 %v8968_v0  ;;  %8448 = vmatprep.subr.bf16.mxu1 %v8968_v0 }
 0x2ff   :  { %8429 = vmatpush3.bf16.msra.mxu0 %v8930_v31  ;;  %8449 = vmatpush3.bf16.msra.mxu1 %v8931_v32 }
 0x300   :  { %8454 = vmatprep.subr.bf16.mxu0 %v8968_v0  ;;  %8474 = vmatprep.subr.bf16.mxu1 %v8968_v0 }
 0x302   :  { %v3790_v37 = vpop.f32.mrf.mxu0  ;;  %8431 = vmatmul.mubr.bf16.vlgmr.msra.gmra.mxu0 %v6864_v33  ;;  %v3898_v39 = vpop.f32.mrf.mxu1  ;;  %8451 = vmatmul.mubr.bf16.vlgmr.msra.gmra.mxu1 %v6889_v35 }
 0x303   :  { %v3796_v38 = vadd.f32 %v3790_v37, %v3688_v15  ;;  %8455 = vmatpush3.bf16.msra.mxu0 %v8932_v34  ;;  %8475 = vmatpush3.bf16.msra.mxu1 %v8933_v36 }
 0x304   :  { %v8192_v41 = vpop.f32.mrf.mxu0  ;;  %8456 = vmatprep.subr.bf16.mxu0 %v8968_v0  ;;  %v8212_v44 = vpop.f32.mrf.mxu1  ;;  %8476 = vmatprep.subr.bf16.mxu1 %v8968_v0 }
 0x305   :  { %v3904_v43 = vadd.f32 %v3898_v39, %v3796_v38  ;;  %8470 = vmatprep.mubr.msk.bf16.mxu0 %vm8969_vm0, %v8968_v0  ;;  %8490 = vmatprep.mubr.msk.bf16.mxu1 %vm8969_vm0, %v8968_v0 }
 0x306   :  { %v3793_v45 = vpop.f32.mrf.mxu0  ;;  %v3901_v46 = vpop.f32.mrf.mxu1 }
 0x307   :  { %8457 = vmatpush3.bf16.msra.mxu0 %v8934_v40  ;;  %8477 = vmatpush3.bf16.msra.mxu1 %v8935_v42 }
 0x308   :  { %v8193_v48 = vpop.f32.mrf.mxu0  ;;  %8458 = vmatprep.subr.bf16.mxu0 %v8968_v0  ;;  %v8213_v50 = vpop.f32.mrf.mxu1  ;;  %8478 = vmatprep.subr.bf16.mxu1 %v8968_v0 }
 0x309   :  { %v8964_v48 = vld [vmem:[%s10953_s3 + $0x18] sm:$0xff]  }
 0x30b   :  { %8459 = vmatpush3.bf16.msra.mxu0 %v8936_v47  ;;  %8479 = vmatpush3.bf16.msra.mxu1 %v8937_v49  ;;  %v8965_v49 = vld [vmem:[%s10953_s3 + $0x10] sm:$0xff]  }
 0x30c   :  { %8460 = vmatprep.subr.bf16.mxu0 %v8968_v0  ;;  %8480 = vmatprep.subr.bf16.mxu1 %v8968_v0 }
 0x30f   :  { %8461 = vmatpush3.bf16.msra.mxu0 %v8938_v51  ;;  %8481 = vmatpush3.bf16.msra.mxu1 %v8939_v52 }
 0x310   :  { %8462 = vmatprep.subr.bf16.mxu0 %v8968_v0  ;;  %8482 = vmatprep.subr.bf16.mxu1 %v8968_v0 }
 0x313   :  { %8463 = vmatpush3.bf16.msra.mxu0 %v8940_v53  ;;  %8483 = vmatpush3.bf16.msra.mxu1 %v8941_v54 }
 0x314   :  { %8464 = vmatprep.subr.bf16.mxu0 %v8968_v0  ;;  %8484 = vmatprep.subr.bf16.mxu1 %v8968_v0 }
 0x317   :  { %8465 = vmatpush3.bf16.msra.mxu0 %v8942_v55  ;;  %8485 = vmatpush3.bf16.msra.mxu1 %v8943_v56  ;;  %v8966_v56 = vld [vmem:[%s10953_s3 + $0x8] sm:$0xff]  }
 0x318   :  { %8466 = vmatprep.subr.bf16.mxu0 %v8968_v0  ;;  %8486 = vmatprep.subr.bf16.mxu1 %v8968_v0 }
 0x31b   :  { %8467 = vmatpush3.bf16.msra.mxu0 %v8944_v57  ;;  %8487 = vmatpush3.bf16.msra.mxu1 %v8945_v58 }
 0x31c   :  { %8468 = vmatprep.subr.bf16.mxu0 %v8968_v0  ;;  %8488 = vmatprep.subr.bf16.mxu1 %v8968_v0 }
 0x31f   :  { %8469 = vmatpush3.bf16.msra.mxu0 %v8946_v59  ;;  %8489 = vmatpush3.bf16.msra.mxu1 %v8947_v60 }
 0x320   :  { %8494 = vmatprep.subr.bf16.mxu0 %v8968_v0  ;;  %8514 = vmatprep.subr.bf16.mxu1 %v8968_v0 }
 0x322   :  { %v4006_v2 = vpop.f32.mrf.mxu0  ;;  %8471 = vmatmul.mubr.bf16.vlgmr.msra.gmra.mxu0 %v6914_v61  ;;  %v4114_v4 = vpop.f32.mrf.mxu1  ;;  %8491 = vmatmul.mubr.bf16.vlgmr.msra.gmra.mxu1 %v6939_v63  ;;  %v8967_v61 = vld [vmem:[%s10953_s3] sm:$0xff]  }
 0x323   :  { %v4012_v3 = vadd.f32 %v4006_v2, %v3904_v43  ;;  %8495 = vmatpush3.bf16.msra.mxu0 %v8948_v62  ;;  %8515 = vmatpush3.bf16.msra.mxu1 %v8949_v1 }
 0x324   :  { %v8232_v6 = vpop.f32.mrf.mxu0  ;;  %8496 = vmatprep.subr.bf16.mxu0 %v8968_v0  ;;  %v8252_v9 = vpop.f32.mrf.mxu1  ;;  %8516 = vmatprep.subr.bf16.mxu1 %v8968_v0 }
 0x325   :  { %v4120_v8 = vadd.f32 %v4114_v4, %v4012_v3  ;;  %8510 = vmatprep.mubr.msk.bf16.mxu0 %vm8969_vm0, %v8968_v0  ;;  %8530 = vmatprep.mubr.msk.bf16.mxu1 %vm8969_vm0, %v8968_v0 }
 0x326   :  { %v4009_v10 = vpop.f32.mrf.mxu0  ;;  %v4117_v11 = vpop.f32.mrf.mxu1 }
 0x327   :  { %8497 = vmatpush3.bf16.msra.mxu0 %v8950_v5  ;;  %8517 = vmatpush3.bf16.msra.mxu1 %v8951_v7 }
 0x328   :  { %v8233_v13 = vpop.f32.mrf.mxu0  ;;  %8498 = vmatprep.subr.bf16.mxu0 %v8968_v0  ;;  %v8253_v15 = vpop.f32.mrf.mxu1  ;;  %8518 = vmatprep.subr.bf16.mxu1 %v8968_v0 }
 0x32b   :  { %8499 = vmatpush3.bf16.msra.mxu0 %v8952_v12  ;;  %8519 = vmatpush3.bf16.msra.mxu1 %v8953_v14 }
 0x32c   :  { %8500 = vmatprep.subr.bf16.mxu0 %v8968_v0  ;;  %8520 = vmatprep.subr.bf16.mxu1 %v8968_v0 }
 0x32f   :  { %8501 = vmatpush3.bf16.msra.mxu0 %v8954_v16  ;;  %8521 = vmatpush3.bf16.msra.mxu1 %v8955_v17 }
 0x330   :  { %8502 = vmatprep.subr.bf16.mxu0 %v8968_v0  ;;  %8522 = vmatprep.subr.bf16.mxu1 %v8968_v0 }
 0x333   :  { %8503 = vmatpush3.bf16.msra.mxu0 %v8956_v18  ;;  %8523 = vmatpush3.bf16.msra.mxu1 %v8957_v19 }
 0x334   :  { %8504 = vmatprep.subr.bf16.mxu0 %v8968_v0  ;;  %8524 = vmatprep.subr.bf16.mxu1 %v8968_v0 }
 0x337   :  { %8505 = vmatpush3.bf16.msra.mxu0 %v8958_v20  ;;  %8525 = vmatpush3.bf16.msra.mxu1 %v8959_v21 }
 0x338   :  { %8506 = vmatprep.subr.bf16.mxu0 %v8968_v0  ;;  %8526 = vmatprep.subr.bf16.mxu1 %v8968_v0 }
 0x33b   :  { %8507 = vmatpush3.bf16.msra.mxu0 %v8960_v22  ;;  %8527 = vmatpush3.bf16.msra.mxu1 %v8961_v23 }
 0x33c   :  { %8508 = vmatprep.subr.bf16.mxu0 %v8968_v0  ;;  %8528 = vmatprep.subr.bf16.mxu1 %v8968_v0 }
 0x33f   :  { %8509 = vmatpush3.bf16.msra.mxu0 %v8962_v24  ;;  %8529 = vmatpush3.bf16.msra.mxu1 %v8963_v25 }
 0x340   :  { %8534 = vmatprep.subr.bf16.mxu0 %v8968_v0 }
 0x342   :  { %v4222_v28 = vpop.f32.mrf.mxu0  ;;  %8511 = vmatmul.mubr.bf16.vlgmr.msra.gmra.mxu0 %v6964_v26  ;;  %v4330_v30 = vpop.f32.mrf.mxu1  ;;  %8531 = vmatmul.mubr.bf16.vlgmr.msra.gmra.mxu1 %v6989_v27 }
 0x343   :  { %v4228_v29 = vadd.f32 %v4222_v28, %v4120_v8  ;;  %8542 = vmatprep.mubr.msk.bf16.mxu0 %vm8969_vm0, %v8968_v0  ;;  %8535 = vmatpush3.bf16.msra.mxu0 %v8964_v48 }
 0x344   :  { %v8272_v31 = vpop.f32.mrf.mxu0  ;;  %v8292_v33 = vpop.f32.mrf.mxu1  ;;  %8536 = vmatprep.subr.bf16.mxu0 %v8968_v0 }
 0x345   :  { %v4336_v32 = vadd.f32 %v4330_v30, %v4228_v29  ;;  %v7014_v31 = vld [vmem:[%s10954_s2] ss:$0 sm:$0xff] }
 0x346   :  { %v4225_v34 = vpop.f32.mrf.mxu0  ;;  %v4333_v35 = vpop.f32.mrf.mxu1 }
 0x347   :  { %8537 = vmatpush3.bf16.msra.mxu0 %v8965_v49 }
 0x348   :  { %v8273_v36 = vpop.f32.mrf.mxu0  ;;  %v8293_v37 = vpop.f32.mrf.mxu1  ;;  %8538 = vmatprep.subr.bf16.mxu0 %v8968_v0 }
 0x34b   :  { %8539 = vmatpush3.bf16.msra.mxu0 %v8966_v56 }
 0x34c   :  { %8540 = vmatprep.subr.bf16.mxu0 %v8968_v0 }
 0x34f   :  { %8541 = vmatpush3.bf16.msra.mxu0 %v8967_v61 }
 0x362   :  { %v4438_v38 = vpop.f32.mrf.mxu0  ;;  %v4546_v40 = vpop.f32.mrf.mxu1 }
 0x363   :  { %v4444_v39 = vadd.f32 %v4438_v38, %v4336_v32 }
 0x364   :  { %v8312_v41 = vpop.f32.mrf.mxu0  ;;  %v8332_v43 = vpop.f32.mrf.mxu1 }
 0x365   :  { %v4552_v42 = vadd.f32 %v4546_v40, %v4444_v39 }
 0x366   :  { %v4441_v44 = vpop.f32.mrf.mxu0  ;;  %v4549_v45 = vpop.f32.mrf.mxu1 }
 0x368   :  { %v8313_v46 = vpop.f32.mrf.mxu0  ;;  %v8333_v47 = vpop.f32.mrf.mxu1 }
 0x382   :  { %v4654_v50 = vpop.f32.mrf.mxu0  ;;  %v4762_v52 = vpop.f32.mrf.mxu1 }
 0x383   :  { %v4660_v51 = vadd.f32 %v4654_v50, %v4552_v42  ;;  %v7015_v42 = vld [vmem:[%s10955_s4] ss:$0 sm:$0xff] }
 0x384   :  { %v8352_v53 = vpop.f32.mrf.mxu0  ;;  %v8372_v55 = vpop.f32.mrf.mxu1 }
 0x385   :  { %v4768_v54 = vadd.f32 %v4762_v52, %v4660_v51 }
 0x386   :  { %v4657_v57 = vpop.f32.mrf.mxu0  ;;  %v4765_v58 = vpop.f32.mrf.mxu1 }
 0x388   :  { %v8353_v59 = vpop.f32.mrf.mxu0  ;;  %v8373_v60 = vpop.f32.mrf.mxu1 }
 0x3a2   :  { %v4870_v62 = vpop.f32.mrf.mxu0  ;;  %v4978_v1 = vpop.f32.mrf.mxu1 }
 0x3a3   :  { %v4876_v63 = vadd.f32 %v4870_v62, %v4768_v54 }
 0x3a4   :  { %v8392_v2 = vpop.f32.mrf.mxu0  ;;  %v8412_v4 = vpop.f32.mrf.mxu1 }
 0x3a5   :  { %v4984_v3 = vadd.f32 %v4978_v1, %v4876_v63 }
 0x3a6   :  { %v4873_v5 = vpop.f32.mrf.mxu0  ;;  %v4981_v6 = vpop.f32.mrf.mxu1 }
 0x3a8   :  { %v8393_v7 = vpop.f32.mrf.mxu0  ;;  %v8413_v8 = vpop.f32.mrf.mxu1 }
 0x3c2   :  { %v5086_v9 = vpop.f32.mrf.mxu0  ;;  %v5194_v10 = vpop.f32.mrf.mxu1 }
 0x3c3   :  { %v5092_v24 = vadd.f32 %v5086_v9, %v4984_v3 }
 0x3c4   :  { %v8432_v11 = vpop.f32.mrf.mxu0  ;;  %v8452_v0 = vpop.f32.mrf.mxu1 }
 0x3c5   :  { %v5200_v25 = vadd.f32 %v5194_v10, %v5092_v24 }
 0x3c6   :  { %v5089_v12 = vpop.f32.mrf.mxu0  ;;  %v5197_v13 = vpop.f32.mrf.mxu1 }
 0x3c8   :  { %v8433_v14 = vpop.f32.mrf.mxu0  ;;  %v8453_v15 = vpop.f32.mrf.mxu1 }
 0x3e2   :  { %v5302_v16 = vpop.f32.mrf.mxu0  ;;  %v5410_v17 = vpop.f32.mrf.mxu1 }
 0x3e3   :  { %v5308_v26 = vadd.f32 %v5302_v16, %v5200_v25 }
 0x3e4   :  { %v8472_v18 = vpop.f32.mrf.mxu0  ;;  %v8492_v19 = vpop.f32.mrf.mxu1 }
 0x3e5   :  { %v5416_v27 = vadd.f32 %v5410_v17, %v5308_v26 }
 0x3e6   :  { %v5305_v20 = vpop.f32.mrf.mxu0  ;;  %v5413_v21 = vpop.f32.mrf.mxu1 }
 0x3e8   :  { %v8473_v22 = vpop.f32.mrf.mxu0  ;;  %v8493_v23 = vpop.f32.mrf.mxu1 }
 0x402   :  { %v5518_v28 = vpop.f32.mrf.mxu0  ;;  %v5626_v30 = vpop.f32.mrf.mxu1 }
 0x403   :  { %v5524_v29 = vadd.f32 %v5518_v28, %v5416_v27 }
 0x404   :  { %v8512_v32 = vpop.f32.mrf.mxu0  ;;  %v8532_v34 = vpop.f32.mrf.mxu1 }
 0x405   :  { %v5632_v33 = vadd.f32 %v5626_v30, %v5524_v29 }
 0x406   :  { %v5521_v35 = vpop.f32.mrf.mxu0  ;;  %v5629_v37 = vpop.f32.mrf.mxu1 }
 0x407   :  { %v5640_v36 = vadd.f32 %v7014_v31, %v5632_v33 }
 0x408   :  { %v8513_v38 = vpop.f32.mrf.mxu0  ;;  %v8533_v40 = vpop.f32.mrf.mxu1 }
 0x409   :  { %v5641_v39 = vmax.f32 %v5640_v36, 0.0 }
 0x40b   :  { %v5642_v41 = vpack.c.bf16 %v5641_v39, %v5641_v39 }
 0x40d   :  { %8543 = vmatmul.mubr.msk.bf16.vlgmr.msra.gmra.mxu0 %vm5682_vm1, %v5642_v41 }
 0x4cd   :  { %v5720_v43 = vpop.f32.mrf.mxu0 }
 0x4ce   :  { %v5721_v44 = vadd.f32 %v7015_v42, %v5720_v43 }
 0x4cf   :  { %v8544_v45 = vpop.f32.mrf.mxu0 }
 0x4d0   :  { %5726 = vst [vmem:[%s10956_s5] sm:$0xff] %v5721_v44 }
 0x4d1   :  { %v5723_v46 = vpop.f32.mrf.mxu0 }
 0x4d3   :  { %v8545_v47 = vpop.f32.mrf.mxu0 }

</bundles_post_ra>
